<compile_context>
chip_gen: v7x
topology: tpu7x:2x2x1
jax: 0.10.0
libtpu: 0.0.40
codegen_flags: <defaults>
</compile_context>

<pallas_src>
import jax
import jax.numpy as jnp
from jax import lax
from jax.experimental import pallas as pl
from jax.experimental.pallas import tpu as pltpu

E_LAMBDA = 1e-4  # SimAM epsilon


def tass_kernel(inp_ref, ins_ref, pool_ref, wcat_ref, fcw_ref, fcb_ref,
                tw_ref, out_ref):
    C, L = inp_ref.shape
    L2 = L // 2
    f32 = jnp.float32
    dims00 = (((0,), (0,)), ((), ()))   # contract dim 0 of both operands: A^T @ B

    inp = inp_ref[...]        # (C, L)
    ins = ins_ref[...]        # (C, L)
    pool = pool_ref[...]      # (L, L2)  avg-pool matrix (wrapper constant)
    w_cat = wcat_ref[...]     # (C, 3C)  [W0 | W1 | W2] conv1 taps, fused
    fcw = fcw_ref[...]        # (C, C)   1x1 conv weight
    fcb = fcb_ref[...]        # (C, 1)   1x1 conv bias
    mixw = tw_ref[...]        # (1, 1)   Tiss mixing parameter

    # --- AvgPool1d(kernel=2, stride=2) -------------------------------------
    x = jnp.dot(inp, pool, preferred_element_type=f32)        # (C, L2)
    x_mfcc = jnp.dot(ins, pool, preferred_element_type=f32)   # (C, L2)

    # --- SimAM attention (reductions over the whole (C, L) map) ------------
    inv_cl = 1.0 / float(C * L)
    inv_n = 1.0 / float(C * L - 1)

    def simam(v):
        mu = jnp.sum(v, axis=(0, 1), keepdims=True) * inv_cl              # (1, 1)
        d = (v - mu) ** 2
        denom = 4.0 * (jnp.sum(d, axis=(0, 1), keepdims=True) * inv_n + E_LAMBDA)
        inv_denom = 1.0 / denom   # exact reciprocal of one element; broadcast-mul below
        return v + v * jax.nn.sigmoid(d * inv_denom + 0.5)

    input_new = simam(inp)    # (C, L)
    insum_new = simam(ins)    # (C, L)

    # --- conv1 (k=3, pad=1): zero-padded shifts via XLU roll + lane mask ---
    lane = lax.broadcasted_iota(jnp.int32, (C, L2), 1)

    def stack3(v):            # [v[:, l-1]; v[:, l]; v[:, l+1]] with zero edges
        vprev = jnp.where(lane == 0, 0.0, pltpu.roll(v, shift=1, axis=1))
        vnext = jnp.where(lane == L2 - 1, 0.0, pltpu.roll(v, shift=L2 - 1, axis=1))
        return jnp.concatenate([vprev, v, vnext], axis=0)      # (3C, L2)

    stack_x = stack3(x)        # conv1(x)      == w_cat @ stack_x   (never materialized)
    stack_xm = stack3(x_mfcc)  # conv1(x_mfcc) == w_cat @ stack_xm  (never materialized)

    ones_c = jnp.ones((C, 1), f32)

    # out1 = sigmoid(rowsum(conv1(x) @ fc(conv1(x_mfcc)).T))
    #      = sigmoid(w_cat @ (stack_x @ (stack_xm^T @ (w_cat^T @ colsum(fcw)) + sum(fcb))))
    colsum_fcw = lax.dot_general(fcw, ones_c, dims00,
                                 preferred_element_type=f32)                   # (C, 1)
    fcb_sum = jnp.sum(fcb, axis=0, keepdims=True)                              # (1, 1)
    a = lax.dot_general(w_cat, colsum_fcw, dims00,
                        preferred_element_type=f32)                            # (3C, 1)
    s1 = lax.dot_general(stack_xm, a, dims00,
                         preferred_element_type=f32) + fcb_sum                 # (L2, 1)
    t1 = jnp.dot(stack_x, s1, preferred_element_type=f32)                      # (3C, 1)
    out1 = jax.nn.sigmoid(jnp.dot(w_cat, t1, preferred_element_type=f32))      # (C, 1)

    # out2 = sigmoid(rowsum(conv1(x_mfcc)^T @ fc(x)))
    #      = sigmoid(stack_xm^T @ (w_cat^T @ (fcw @ rowsum(x) + L2*fcb)))
    rowsum_x = jnp.sum(x, axis=1, keepdims=True)                               # (C, 1)
    s2 = jnp.dot(fcw, rowsum_x, preferred_element_type=f32) + float(L2) * fcb  # (C, 1)
    b = lax.dot_general(w_cat, s2, dims00, preferred_element_type=f32)         # (3C, 1)
    out2 = jax.nn.sigmoid(
        lax.dot_general(stack_xm, b, dims00, preferred_element_type=f32))      # (L2, 1)

    # --- Tiss mix (requires C == L2) and the final per-channel gate ---------
    mf = jax.nn.sigmoid(mixw)                                                  # (1, 1)
    mixed = out1 * mf + out2 * (1.0 - mf)                                      # (C, 1)

    # conv1 on a length-1 sequence: zero padding kills taps 0 and 2 -> centre tap
    # only, which is the middle C-column slice of w_cat (lane-aligned for C=128).
    w_mid = w_cat[:, C:2 * C]                                                  # (C, C)
    gate = jax.nn.sigmoid(jnp.dot(w_mid, mixed, preferred_element_type=f32))   # (C, 1)

    out_ref[...] = (input_new * 0.6 + insum_new * 0.4) * gate                  # (C, L)


def tass_forward(inp, ins, conv_w, fc_w, fc_b, tiss_w):
    """inp/ins: (C, L) f32; conv_w: (C, C, 3); fc_w: (C, C, 1); fc_b: (C,); tiss_w: (1,)."""
    C, L = inp.shape
    assert L == 2 * C, "TASS broadcasting requires L == 2 * C"
    L2 = L // 2
    f32 = jnp.float32

    # ---- one-time parameter / constant prep in the wrapper ----
    w_cat = jnp.concatenate(
        [conv_w[:, :, 0], conv_w[:, :, 1], conv_w[:, :, 2]], axis=1).astype(f32)  # (C, 3C)
    fcw = fc_w[:, :, 0].astype(f32)                                                # (C, C)
    fcb = fc_b[:, None].astype(f32)                                                # (C, 1)
    tw = jnp.reshape(tiss_w, (1, 1)).astype(f32)                                   # (1, 1)

    # AvgPool1d(k=2, s=2) as a small constant matrix built once here.
    r = jnp.arange(L)[:, None]
    c = jnp.arange(L2)[None, :]
    pool = jnp.where((r == 2 * c) | (r == 2 * c + 1), 0.5, 0.0).astype(f32)        # (L, L2)

    vmem = pltpu.MemorySpace.VMEM
    return pl.pallas_call(
        tass_kernel,
        out_shape=jax.ShapeDtypeStruct((C, L), f32),
        in_specs=[pl.BlockSpec(memory_space=vmem)] * 7,
        out_specs=pl.BlockSpec(memory_space=vmem),
        compiler_params=pltpu.CompilerParams(
            # above the 16/32 MiB scoped defaults, below v7x's 64 MiB physical VMEM
            vmem_limit_bytes=48 * 1024 * 1024),
    )(inp.astype(f32), ins.astype(f32), pool, w_cat, fcw, fcb, tw)


# ------------------- pure-JAX reference (mirrors the torch module) -------------------
def tass_ref(inp, ins, conv_w, fc_w, fc_b, tiss_w):
    C, L = inp.shape

    def avg_pool(v):
        return 0.5 * (v[:, 0::2] + v[:, 1::2])

    def simam(v):
        n = C * L - 1
        mu = jnp.mean(v)
        d = (v - mu) ** 2
        y = d / (4.0 * (jnp.sum(d) / n + E_LAMBDA)) + 0.5
        return v + v * jax.nn.sigmoid(y)

    def conv1(v):
        vp = jnp.pad(v, ((0, 0), (1, 1)))
        return (conv_w[:, :, 0] @ vp[:, :-2]
                + conv_w[:, :, 1] @ vp[:, 1:-1]
                + conv_w[:, :, 2] @ vp[:, 2:])

    def fc(v):
        return fc_w[:, :, 0] @ v + fc_b[:, None]

    x = avg_pool(inp)
    x_mfcc = avg_pool(ins)
    input_new = simam(inp)
    insum_new = simam(ins)
    x1 = conv1(x)
    x_mfcc1 = conv1(x_mfcc)
    x2 = fc(x).T
    x_mfcc2 = fc(x_mfcc1).T
    out1 = jax.nn.sigmoid(jnp.sum(x1 @ x_mfcc2, axis=1))
    out2 = jax.nn.sigmoid(jnp.sum(x_mfcc1.T @ x2.T, axis=1))
    mf = jax.nn.sigmoid(tiss_w[0])
    out = out1 * mf + out2 * (1.0 - mf)            # (C,)
    out = jax.nn.sigmoid(conv1(out[:, None]))      # (C, 1): only centre tap survives
    return (input_new * 0.6 + insum_new * 0.4) * out


if __name__ == "__main__":
    C = 128        # channel count; chosen so L2 = 128 (lane-aligned, lane-dense output)
    L = 2 * C      # sequence length (the torch code requires L // 2 == C)

    key = jax.random.PRNGKey(0)
    k1, k2, k3, k4, k5 = jax.random.split(key, 5)

    inp = jax.random.normal(k1, (C, L), dtype=jnp.float32)
    ins = jax.random.normal(k2, (C, L), dtype=jnp.float32)

    # Deterministic synthetic parameters matching the PyTorch shapes (scaled so the
    # attention logits stay in a numerically comparable range).
    conv_w = 0.02 * jax.random.normal(k3, (C, C, 3), dtype=jnp.float32)   # Conv1d(C,C,3,bias=False)
    fc_w = 0.01 * jax.random.normal(k4, (C, C, 1), dtype=jnp.float32)     # Conv1d(C,C,1)
    fc_b = 0.005 * jax.random.normal(k5, (C,), dtype=jnp.float32)
    tiss_w = jnp.array([-0.8], dtype=jnp.float32)                         # Tiss mixing param

    out = jax.block_until_ready(tass_forward(inp, ins, conv_w, fc_w, fc_b, tiss_w))
    ref = jax.block_until_ready(tass_ref(inp, ins, conv_w, fc_w, fc_b, tiss_w))

    assert out.shape == (C, L)
    err = jnp.max(jnp.abs(out - ref))
    assert jnp.allclose(out, ref, atol=1e-2, rtol=1e-2), f"max abs err {err}"

    print("KERNEL_OK")
</pallas_src>

<mosaic_0001>
module attributes {stable_mosaic.version = 11 : i64} {
  func.func @tass_kernel(%arg0: memref<128x256xf32, #tpu.memory_space<vmem>>, %arg1: memref<128x256xf32, #tpu.memory_space<vmem>>, %arg2: memref<256x128xf32, #tpu.memory_space<vmem>>, %arg3: memref<128x384xf32, #tpu.memory_space<vmem>>, %arg4: memref<128x128xf32, #tpu.memory_space<vmem>>, %arg5: memref<128x1xf32, #tpu.memory_space<vmem>>, %arg6: memref<1x1xf32, #tpu.memory_space<vmem>>, %arg7: memref<128x256xf32, #tpu.memory_space<vmem>>) attributes {dimension_semantics = [], scalar_prefetch = 0 : i64, scratch_operands = 0 : i64, tpu.core_type = #tpu.core_type<tc>} {
    %c0 = arith.constant 0 : index
    %c0_0 = arith.constant 0 : index
    %0 = vector.load %arg0[%c0, %c0_0] : memref<128x256xf32, #tpu.memory_space<vmem>>, vector<128x256xf32>
    %c0_1 = arith.constant 0 : index
    %c0_2 = arith.constant 0 : index
    %1 = vector.load %arg1[%c0_1, %c0_2] : memref<128x256xf32, #tpu.memory_space<vmem>>, vector<128x256xf32>
    %c0_3 = arith.constant 0 : index
    %c0_4 = arith.constant 0 : index
    %2 = vector.load %arg2[%c0_3, %c0_4] : memref<256x128xf32, #tpu.memory_space<vmem>>, vector<256x128xf32>
    %c0_5 = arith.constant 0 : index
    %c0_6 = arith.constant 0 : index
    %3 = vector.load %arg3[%c0_5, %c0_6] : memref<128x384xf32, #tpu.memory_space<vmem>>, vector<128x384xf32>
    %c0_7 = arith.constant 0 : index
    %c0_8 = arith.constant 0 : index
    %4 = vector.load %arg4[%c0_7, %c0_8] : memref<128x128xf32, #tpu.memory_space<vmem>>, vector<128x128xf32>
    %c0_9 = arith.constant 0 : index
    %c0_10 = arith.constant 0 : index
    %5 = vector.load %arg5[%c0_9, %c0_10] : memref<128x1xf32, #tpu.memory_space<vmem>>, vector<128x1xf32>
    %c0_11 = arith.constant 0 : index
    %c0_12 = arith.constant 0 : index
    %6 = vector.load %arg6[%c0_11, %c0_12] : memref<1x1xf32, #tpu.memory_space<vmem>>, vector<1x1xf32>
    %cst = arith.constant dense<0.000000e+00> : vector<128x128xf32>
    %7 = tpu.matmul %0, %2, %cst {dimension_numbers = #tpu.dot_dimension_numbers<[1], [0], [0], [1], [0, 0, 1, 1], [], []>} : vector<128x256xf32>, vector<256x128xf32>, vector<128x128xf32> -> vector<128x128xf32>
    %cst_13 = arith.constant dense<0.000000e+00> : vector<128x128xf32>
    %8 = tpu.matmul %1, %2, %cst_13 {dimension_numbers = #tpu.dot_dimension_numbers<[1], [0], [0], [1], [0, 0, 1, 1], [], []>} : vector<128x256xf32>, vector<256x128xf32>, vector<128x128xf32> -> vector<128x128xf32>
    %9 = vector.shape_cast %0 : vector<128x256xf32> to vector<1x128x256xf32>
    %cst_14 = arith.constant dense<0.000000e+00> : vector<1xf32>
    %10 = vector.multi_reduction <add>, %9, %cst_14 [1, 2] : vector<1x128x256xf32> to vector<1xf32>
    %11 = vector.shape_cast %10 : vector<1xf32> to vector<1x1x1xf32>
    %12 = vector.extract %11[0, 0, 0] : f32 from vector<1x1x1xf32>
    %13 = vector.broadcast %12 : f32 to vector<1x1xf32>
    %cst_15 = arith.constant 3.05175781E-5 : f32
    %14 = vector.broadcast %cst_15 : f32 to vector<1x1xf32>
    %15 = arith.mulf %13, %14 : vector<1x1xf32>
    %16 = vector.broadcast %15 : vector<1x1xf32> to vector<128x256xf32>
    %17 = arith.subf %0, %16 : vector<128x256xf32>
    %18 = arith.mulf %17, %17 : vector<128x256xf32>
    %19 = vector.shape_cast %18 : vector<128x256xf32> to vector<1x128x256xf32>
    %cst_16 = arith.constant dense<0.000000e+00> : vector<1xf32>
    %20 = vector.multi_reduction <add>, %19, %cst_16 [1, 2] : vector<1x128x256xf32> to vector<1xf32>
    %21 = vector.shape_cast %20 : vector<1xf32> to vector<1x1x1xf32>
    %22 = vector.extract %21[0, 0, 0] : f32 from vector<1x1x1xf32>
    %23 = vector.broadcast %22 : f32 to vector<1x1xf32>
    %cst_17 = arith.constant 3.05185094E-5 : f32
    %24 = vector.broadcast %cst_17 : f32 to vector<1x1xf32>
    %25 = arith.mulf %23, %24 : vector<1x1xf32>
    %cst_18 = arith.constant 9.99999974E-5 : f32
    %26 = vector.broadcast %cst_18 : f32 to vector<1x1xf32>
    %27 = arith.addf %25, %26 : vector<1x1xf32>
    %cst_19 = arith.constant 4.000000e+00 : f32
    %28 = vector.broadcast %cst_19 : f32 to vector<1x1xf32>
    %29 = arith.mulf %28, %27 : vector<1x1xf32>
    %cst_20 = arith.constant 1.000000e+00 : f32
    %30 = vector.broadcast %cst_20 : f32 to vector<1x1xf32>
    %31 = arith.divf %30, %29 : vector<1x1xf32>
    %32 = vector.broadcast %31 : vector<1x1xf32> to vector<128x256xf32>
    %33 = arith.mulf %18, %32 : vector<128x256xf32>
    %cst_21 = arith.constant 5.000000e-01 : f32
    %34 = vector.broadcast %cst_21 : f32 to vector<128x256xf32>
    %35 = arith.addf %33, %34 : vector<128x256xf32>
    %36 = arith.negf %35 : vector<128x256xf32>
    %37 = math.exp %36 : vector<128x256xf32>
    %cst_22 = arith.constant 1.000000e+00 : f32
    %38 = vector.broadcast %cst_22 : f32 to vector<128x256xf32>
    %39 = arith.addf %38, %37 : vector<128x256xf32>
    %40 = arith.divf %38, %39 : vector<128x256xf32>
    %41 = arith.mulf %0, %40 : vector<128x256xf32>
    %42 = arith.addf %0, %41 : vector<128x256xf32>
    %43 = vector.shape_cast %1 : vector<128x256xf32> to vector<1x128x256xf32>
    %cst_23 = arith.constant dense<0.000000e+00> : vector<1xf32>
    %44 = vector.multi_reduction <add>, %43, %cst_23 [1, 2] : vector<1x128x256xf32> to vector<1xf32>
    %45 = vector.shape_cast %44 : vector<1xf32> to vector<1x1x1xf32>
    %46 = vector.extract %45[0, 0, 0] : f32 from vector<1x1x1xf32>
    %47 = vector.broadcast %46 : f32 to vector<1x1xf32>
    %cst_24 = arith.constant 3.05175781E-5 : f32
    %48 = vector.broadcast %cst_24 : f32 to vector<1x1xf32>
    %49 = arith.mulf %47, %48 : vector<1x1xf32>
    %50 = vector.broadcast %49 : vector<1x1xf32> to vector<128x256xf32>
    %51 = arith.subf %1, %50 : vector<128x256xf32>
    %52 = arith.mulf %51, %51 : vector<128x256xf32>
    %53 = vector.shape_cast %52 : vector<128x256xf32> to vector<1x128x256xf32>
    %cst_25 = arith.constant dense<0.000000e+00> : vector<1xf32>
    %54 = vector.multi_reduction <add>, %53, %cst_25 [1, 2] : vector<1x128x256xf32> to vector<1xf32>
    %55 = vector.shape_cast %54 : vector<1xf32> to vector<1x1x1xf32>
    %56 = vector.extract %55[0, 0, 0] : f32 from vector<1x1x1xf32>
    %57 = vector.broadcast %56 : f32 to vector<1x1xf32>
    %cst_26 = arith.constant 3.05185094E-5 : f32
    %58 = vector.broadcast %cst_26 : f32 to vector<1x1xf32>
    %59 = arith.mulf %57, %58 : vector<1x1xf32>
    %cst_27 = arith.constant 9.99999974E-5 : f32
    %60 = vector.broadcast %cst_27 : f32 to vector<1x1xf32>
    %61 = arith.addf %59, %60 : vector<1x1xf32>
    %cst_28 = arith.constant 4.000000e+00 : f32
    %62 = vector.broadcast %cst_28 : f32 to vector<1x1xf32>
    %63 = arith.mulf %62, %61 : vector<1x1xf32>
    %cst_29 = arith.constant 1.000000e+00 : f32
    %64 = vector.broadcast %cst_29 : f32 to vector<1x1xf32>
    %65 = arith.divf %64, %63 : vector<1x1xf32>
    %66 = vector.broadcast %65 : vector<1x1xf32> to vector<128x256xf32>
    %67 = arith.mulf %52, %66 : vector<128x256xf32>
    %cst_30 = arith.constant 5.000000e-01 : f32
    %68 = vector.broadcast %cst_30 : f32 to vector<128x256xf32>
    %69 = arith.addf %67, %68 : vector<128x256xf32>
    %70 = arith.negf %69 : vector<128x256xf32>
    %71 = math.exp %70 : vector<128x256xf32>
    %cst_31 = arith.constant 1.000000e+00 : f32
    %72 = vector.broadcast %cst_31 : f32 to vector<128x256xf32>
    %73 = arith.addf %72, %71 : vector<128x256xf32>
    %74 = arith.divf %72, %73 : vector<128x256xf32>
    %75 = arith.mulf %1, %74 : vector<128x256xf32>
    %76 = arith.addf %1, %75 : vector<128x256xf32>
    %77 = tpu.iota {dimensions = array<i32: 1>} : vector<128x128xi32>
    %c0_i32 = arith.constant 0 : i32
    %78 = vector.broadcast %c0_i32 : i32 to vector<128x128xi32>
    %79 = arith.cmpi eq, %77, %78 : vector<128x128xi32>
    %c1_i32 = arith.constant 1 : i32
    %80 = tpu.dynamic_rotate %7 by %c1_i32 dim 1 : vector<128x128xf32>, i32 -> vector<128x128xf32>
    %cst_32 = arith.constant 0.000000e+00 : f32
    %81 = vector.broadcast %cst_32 : f32 to vector<128x128xf32>
    %82 = arith.select %79, %81, %80 : vector<128x128xi1>, vector<128x128xf32>
    %c127_i32 = arith.constant 127 : i32
    %83 = vector.broadcast %c127_i32 : i32 to vector<128x128xi32>
    %84 = arith.cmpi eq, %77, %83 : vector<128x128xi32>
    %c127_i32_33 = arith.constant 127 : i32
    %85 = tpu.dynamic_rotate %7 by %c127_i32_33 dim 1 : vector<128x128xf32>, i32 -> vector<128x128xf32>
    %cst_34 = arith.constant 0.000000e+00 : f32
    %86 = vector.broadcast %cst_34 : f32 to vector<128x128xf32>
    %87 = arith.select %84, %86, %85 : vector<128x128xi1>, vector<128x128xf32>
    %88 = tpu.concatenate %82, %7, %87 in 0 : vector<128x128xf32>, vector<128x128xf32>, vector<128x128xf32> -> vector<384x128xf32>
    %c0_i32_35 = arith.constant 0 : i32
    %89 = vector.broadcast %c0_i32_35 : i32 to vector<128x128xi32>
    %90 = arith.cmpi eq, %77, %89 : vector<128x128xi32>
    %c1_i32_36 = arith.constant 1 : i32
    %91 = tpu.dynamic_rotate %8 by %c1_i32_36 dim 1 : vector<128x128xf32>, i32 -> vector<128x128xf32>
    %cst_37 = arith.constant 0.000000e+00 : f32
    %92 = vector.broadcast %cst_37 : f32 to vector<128x128xf32>
    %93 = arith.select %90, %92, %91 : vector<128x128xi1>, vector<128x128xf32>
    %c127_i32_38 = arith.constant 127 : i32
    %94 = vector.broadcast %c127_i32_38 : i32 to vector<128x128xi32>
    %95 = arith.cmpi eq, %77, %94 : vector<128x128xi32>
    %c127_i32_39 = arith.constant 127 : i32
    %96 = tpu.dynamic_rotate %8 by %c127_i32_39 dim 1 : vector<128x128xf32>, i32 -> vector<128x128xf32>
    %cst_40 = arith.constant 0.000000e+00 : f32
    %97 = vector.broadcast %cst_40 : f32 to vector<128x128xf32>
    %98 = arith.select %95, %97, %96 : vector<128x128xi1>, vector<128x128xf32>
    %99 = tpu.concatenate %93, %8, %98 in 0 : vector<128x128xf32>, vector<128x128xf32>, vector<128x128xf32> -> vector<384x128xf32>
    %cst_41 = arith.constant 1.000000e+00 : f32
    %100 = vector.broadcast %cst_41 : f32 to vector<128x1xf32>
    %cst_42 = arith.constant dense<0.000000e+00> : vector<128x1xf32>
    %101 = tpu.matmul %4, %100, %cst_42 {dimension_numbers = #tpu.dot_dimension_numbers<[0], [0], [1], [1], [0, 1, 1, 1], [], []>} : vector<128x128xf32>, vector<128x1xf32>, vector<128x1xf32> -> vector<128x1xf32>
    %cst_43 = arith.constant dense<0.000000e+00> : vector<1xf32>
    %102 = vector.multi_reduction <add>, %5, %cst_43 [0] : vector<128x1xf32> to vector<1xf32>
    %103 = vector.shape_cast %102 : vector<1xf32> to vector<1x1xf32>
    %cst_44 = arith.constant dense<0.000000e+00> : vector<384x1xf32>
    %104 = tpu.matmul %3, %101, %cst_44 {dimension_numbers = #tpu.dot_dimension_numbers<[0], [0], [1], [1], [0, 1, 1, 1], [], []>} : vector<128x384xf32>, vector<128x1xf32>, vector<384x1xf32> -> vector<384x1xf32>
    %cst_45 = arith.constant dense<0.000000e+00> : vector<128x1xf32>
    %105 = tpu.matmul %99, %104, %cst_45 {dimension_numbers = #tpu.dot_dimension_numbers<[0], [0], [1], [1], [0, 1, 1, 1], [], []>} : vector<384x128xf32>, vector<384x1xf32>, vector<128x1xf32> -> vector<128x1xf32>
    %106 = vector.broadcast %103 : vector<1x1xf32> to vector<128x1xf32>
    %107 = arith.addf %105, %106 : vector<128x1xf32>
    %cst_46 = arith.constant dense<0.000000e+00> : vector<384x1xf32>
    %108 = tpu.matmul %88, %107, %cst_46 {dimension_numbers = #tpu.dot_dimension_numbers<[1], [0], [0], [1], [0, 0, 1, 1], [], []>} : vector<384x128xf32>, vector<128x1xf32>, vector<384x1xf32> -> vector<384x1xf32>
    %cst_47 = arith.constant dense<0.000000e+00> : vector<128x1xf32>
    %109 = tpu.matmul %3, %108, %cst_47 {dimension_numbers = #tpu.dot_dimension_numbers<[1], [0], [0], [1], [0, 0, 1, 1], [], []>} : vector<128x384xf32>, vector<384x1xf32>, vector<128x1xf32> -> vector<128x1xf32>
    %110 = arith.negf %109 : vector<128x1xf32>
    %111 = math.exp %110 : vector<128x1xf32>
    %cst_48 = arith.constant 1.000000e+00 : f32
    %112 = vector.broadcast %cst_48 : f32 to vector<128x1xf32>
    %113 = arith.addf %112, %111 : vector<128x1xf32>
    %114 = arith.divf %112, %113 : vector<128x1xf32>
    %cst_49 = arith.constant dense<0.000000e+00> : vector<128xf32>
    %115 = vector.multi_reduction <add>, %7, %cst_49 [1] : vector<128x128xf32> to vector<128xf32>
    %116 = vector.shape_cast %115 : vector<128xf32> to vector<128x1xf32>
    %cst_50 = arith.constant dense<0.000000e+00> : vector<128x1xf32>
    %117 = tpu.matmul %4, %116, %cst_50 {dimension_numbers = #tpu.dot_dimension_numbers<[1], [0], [0], [1], [0, 0, 1, 1], [], []>} : vector<128x128xf32>, vector<128x1xf32>, vector<128x1xf32> -> vector<128x1xf32>
    %cst_51 = arith.constant 1.280000e+02 : f32
    %118 = vector.broadcast %cst_51 : f32 to vector<128x1xf32>
    %119 = arith.mulf %118, %5 : vector<128x1xf32>
    %120 = arith.addf %117, %119 : vector<128x1xf32>
    %cst_52 = arith.constant dense<0.000000e+00> : vector<384x1xf32>
    %121 = tpu.matmul %3, %120, %cst_52 {dimension_numbers = #tpu.dot_dimension_numbers<[0], [0], [1], [1], [0, 1, 1, 1], [], []>} : vector<128x384xf32>, vector<128x1xf32>, vector<384x1xf32> -> vector<384x1xf32>
    %cst_53 = arith.constant dense<0.000000e+00> : vector<128x1xf32>
    %122 = tpu.matmul %99, %121, %cst_53 {dimension_numbers = #tpu.dot_dimension_numbers<[0], [0], [1], [1], [0, 1, 1, 1], [], []>} : vector<384x128xf32>, vector<384x1xf32>, vector<128x1xf32> -> vector<128x1xf32>
    %123 = arith.negf %122 : vector<128x1xf32>
    %124 = math.exp %123 : vector<128x1xf32>
    %cst_54 = arith.constant 1.000000e+00 : f32
    %125 = vector.broadcast %cst_54 : f32 to vector<128x1xf32>
    %126 = arith.addf %125, %124 : vector<128x1xf32>
    %127 = arith.divf %125, %126 : vector<128x1xf32>
    %128 = arith.negf %6 : vector<1x1xf32>
    %129 = math.exp %128 : vector<1x1xf32>
    %cst_55 = arith.constant 1.000000e+00 : f32
    %130 = vector.broadcast %cst_55 : f32 to vector<1x1xf32>
    %131 = arith.addf %130, %129 : vector<1x1xf32>
    %132 = arith.divf %130, %131 : vector<1x1xf32>
    %133 = vector.broadcast %132 : vector<1x1xf32> to vector<128x1xf32>
    %134 = arith.mulf %114, %133 : vector<128x1xf32>
    %cst_56 = arith.constant 1.000000e+00 : f32
    %135 = vector.broadcast %cst_56 : f32 to vector<1x1xf32>
    %136 = arith.subf %135, %132 : vector<1x1xf32>
    %137 = vector.broadcast %136 : vector<1x1xf32> to vector<128x1xf32>
    %138 = arith.mulf %127, %137 : vector<128x1xf32>
    %139 = arith.addf %134, %138 : vector<128x1xf32>
    %140 = vector.extract_strided_slice %3 {offsets = [0, 128], sizes = [128, 128], strides = [1, 1]} : vector<128x384xf32> to vector<128x128xf32>
    %cst_57 = arith.constant dense<0.000000e+00> : vector<128x1xf32>
    %141 = tpu.matmul %140, %139, %cst_57 {dimension_numbers = #tpu.dot_dimension_numbers<[1], [0], [0], [1], [0, 0, 1, 1], [], []>} : vector<128x128xf32>, vector<128x1xf32>, vector<128x1xf32> -> vector<128x1xf32>
    %142 = arith.negf %141 : vector<128x1xf32>
    %143 = math.exp %142 : vector<128x1xf32>
    %cst_58 = arith.constant 1.000000e+00 : f32
    %144 = vector.broadcast %cst_58 : f32 to vector<128x1xf32>
    %145 = arith.addf %144, %143 : vector<128x1xf32>
    %146 = arith.divf %144, %145 : vector<128x1xf32>
    %cst_59 = arith.constant 6.000000e-01 : f32
    %147 = vector.broadcast %cst_59 : f32 to vector<128x256xf32>
    %148 = arith.mulf %42, %147 : vector<128x256xf32>
    %cst_60 = arith.constant 4.000000e-01 : f32
    %149 = vector.broadcast %cst_60 : f32 to vector<128x256xf32>
    %150 = arith.mulf %76, %149 : vector<128x256xf32>
    %151 = arith.addf %148, %150 : vector<128x256xf32>
    %152 = vector.broadcast %146 : vector<128x1xf32> to vector<128x256xf32>
    %153 = arith.mulf %151, %152 : vector<128x256xf32>
    %c0_61 = arith.constant 0 : index
    %c0_62 = arith.constant 0 : index
    %154 = vector.load %arg7[%c0_61, %c0_62] : memref<128x256xf32, #tpu.memory_space<vmem>>, vector<128x256xf32>
    tpu.vector_store %arg7[%c0_61, %c0_62], %153 {strides = array<i32>} : memref<128x256xf32, #tpu.memory_space<vmem>>, vector<128x256xf32>,
    return
  }
}

</mosaic_0001>

<bundles_post_ra>
// kernel: tpu_custom_call.1
= control target key start
LH: loop header
LB: loop body
LE: loop exit
PB: predicated region body
PF: predicated region fallthrough
CT: control target
= control target key end

     0   :  { %s10443_s0 = inlined_call_operand.hbm [shape: f32[128,256], index: 0, kind: input, shape index: {}]   ;;  %s10444_s1 = inlined_call_operand.hbm [shape: f32[128,256], index: 1, kind: input, shape index: {}]   ;;  %s10445_s2 = inlined_call_operand.hbm [shape: f32[256,128], index: 2, kind: input, shape index: {}]   ;;  %s10446_s3 = inlined_call_operand.hbm [shape: f32[128,384], index: 3, kind: input, shape index: {}]   ;;  %s10447_s4 = inlined_call_operand.vmem [shape: f32[128,128], index: 4, kind: input, shape index: {}]   ;;  %s10448_s5 = inlined_call_operand.vmem [shape: f32[128,1], index: 5, kind: input, shape index: {}]   ;;  %s10449_s6 = inlined_call_operand.<no memory space> [shape: f32[1,1], index: 6, kind: input, shape index: {}]   ;;  %s10450_s7 = inlined_call_operand.hbm [shape: f32[128,256], index: 7, kind: output, shape index: {}]  }
   0x1   :  { %v12_v0 = vstv %s10449_s6 }
   0x2   :  { %13 = vst [vmem:[#allocation2] sm:$0x1] %v12_v0 }
   0x3   :  { %14 = vsyncpa [#allocation4], 0 }
   0x4   :  { %15 = vsyncpa [#allocation7], 0 }
   0x5   :  { %16 = vsyncpa [#allocation10], 0 }
   0x6   :  { %17 = vsyncpa [#allocation5], 0  ;;  %s7902_s26 = smov [#allocation6]   ;;  %s7903_s28 = smov [#allocation3]  }
   0x7   :  { %s35_s27 = sshll.u32 %s7902_s26, 4  ;;  %s23_s29 = sshll.u32 %s7903_s28, 4  ;;  %s36_s27 = int_to_ptr.vmem [resolvable:$true] %s35_s27  ;;  %s7960_s29 = int_to_ptr.vmem [resolvable:$true] %s23_s29 }
   0x8   :  { %s7784_s9 = scalar_lea.hbm %s10444_s1, 4096 }
   0x9   :  { %p7785_p0 = scmp.ne.s32.totalorder %s10444_s1, %s7784_s9  ;;  %p7788_p1 = scmp.lt.u32.totalorder %s7784_s9, %s10444_s1 }
   0xb   :  { %p7790_p2 = pnand %p7788_p1, %p7785_p0 }
   0xd   :  { %7793 = shalt.err (!%p7790_p2)
}
   0xe   :  { %s7794_s13 = scalar_lea.vmem %s36_s27, 4096  ;;  %p7799_p4 = scmp.lt.s32.totalorder %s36_s27, %s36_s27 }
   0xf   :  { %p7795_p3 = scmp.ne.s32.totalorder %s36_s27, %s7794_s13  ;;  %p7800_p5 = scmp.lt.s32.totalorder %s7794_s13, %s7794_s13 }
  0x11   :  { %p7801_p6 = por %p7800_p5, %p7799_p4 }
  0x13   :  { %p7802_p7 = pnand %p7801_p6, %p7795_p3 }
  0x15   :  { %7805 = shalt.err (!%p7802_p7)
}
  0x16   :  { %s7904_s14 = smov 256   ;;  %s7905_s15 = smov 16  }
  0x17   :  { %41 = dma.hbm_to_vmem [thread:$0]  %s10444_s1, 4096, %s36_s27, [#allocation7], %s7904_s14, %s7904_s14, %s7905_s15  }
  0x18   :  { %s7806_s20 = scalar_lea.hbm %s10443_s0, 4096 }
  0x19   :  { %p7807_p8 = scmp.ne.s32.totalorder %s10443_s0, %s7806_s20  ;;  %p7810_p9 = scmp.lt.u32.totalorder %s7806_s20, %s10443_s0 }
  0x1b   :  { %p7812_p10 = pnand %p7810_p9, %p7807_p8 }
  0x1d   :  { %7815 = shalt.err (!%p7812_p10)
}
  0x1e   :  { %s7816_s25 = scalar_lea.vmem %s7960_s29, 4096  ;;  %p7821_p12 = scmp.lt.s32.totalorder %s7960_s29, %s7960_s29 }
  0x1f   :  { %p7817_p11 = scmp.ne.s32.totalorder %s7960_s29, %s7816_s25  ;;  %p7822_p13 = scmp.lt.s32.totalorder %s7816_s25, %s7816_s25 }
  0x21   :  { %p7823_p0 = por %p7822_p13, %p7821_p12 }
  0x23   :  { %p7824_p1 = pnand %p7823_p0, %p7817_p11 }
  0x25   :  { %7827 = shalt.err (!%p7824_p1)
}
  0x26   :  { %29 = dma.hbm_to_vmem [thread:$0]  %s10443_s0, 4096, %s7960_s29, [#allocation4], %s7904_s14, %s7904_s14, %s7905_s15  }
  0x27   :  { %s7906_s27 = smov [#allocation8]   ;;  %s7828_s9 = scalar_lea.hbm %s10445_s2, 4096 }
  0x28   :  { %s47_s28 = sshll.u32 %s7906_s27, 4  ;;  %p7829_p2 = scmp.ne.s32.totalorder %s10445_s2, %s7828_s9  ;;  %s48_s28 = int_to_ptr.vmem [resolvable:$true] %s47_s28 }
  0x29   :  { %p7832_p3 = scmp.lt.u32.totalorder %s7828_s9, %s10445_s2 }
  0x2b   :  { %p7834_p4 = pnand %p7832_p3, %p7829_p2 }
  0x2d   :  { %7837 = shalt.err (!%p7834_p4)
}
  0x2e   :  { %s7838_s13 = scalar_lea.vmem %s48_s28, 4096  ;;  %p7843_p6 = scmp.lt.s32.totalorder %s48_s28, %s48_s28 }
  0x2f   :  { %p7839_p5 = scmp.ne.s32.totalorder %s48_s28, %s7838_s13  ;;  %p7844_p7 = scmp.lt.s32.totalorder %s7838_s13, %s7838_s13 }
  0x31   :  { %p7845_p8 = por %p7844_p7, %p7843_p6 }
  0x33   :  { %p7846_p9 = pnand %p7845_p8, %p7839_p5 }
  0x35   :  { %7849 = shalt.err (!%p7846_p9)
}
  0x36   :  { %s7907_s0 = smov 128   ;;  %s7908_s29 = smov 8  }
  0x37   :  { %53 = dma.hbm_to_vmem [thread:$0]  %s10445_s2, 4096, %s48_s28, [#allocation7], %s7907_s0, %s7907_s0, %s7908_s29  }
  0x38   :  { %s7909_s18 = smov [#allocation9]   ;;  %s7850_s22 = scalar_lea.hbm %s10446_s3, 6144 }
  0x39   :  { %s59_s19 = sshll.u32 %s7909_s18, 4  ;;  %p7851_p10 = scmp.ne.s32.totalorder %s10446_s3, %s7850_s22  ;;  %s60_s19 = int_to_ptr.vmem [resolvable:$true] %s59_s19 }
  0x3a   :  { %p7854_p11 = scmp.lt.u32.totalorder %s7850_s22, %s10446_s3 }
  0x3c   :  { %p7856_p12 = pnand %p7854_p11, %p7851_p10 }
  0x3e   :  { %7859 = shalt.err (!%p7856_p12)
}
  0x3f   :  { %s7860_s26 = scalar_lea.vmem %s60_s19, 6144  ;;  %p7865_p0 = scmp.lt.s32.totalorder %s60_s19, %s60_s19 }
  0x40   :  { %p7861_p13 = scmp.ne.s32.totalorder %s60_s19, %s7860_s26  ;;  %p7866_p1 = scmp.lt.s32.totalorder %s7860_s26, %s7860_s26 }
  0x42   :  { %p7867_p2 = por %p7866_p1, %p7865_p0 }
  0x44   :  { %p7868_p3 = pnand %p7867_p2, %p7861_p13 }
  0x46   :  { %7871 = shalt.err (!%p7868_p3)
}
  0x47   :  { %s7910_s2 = smov 384   ;;  %s7911_s27 = smov 24  }
  0x48   :  { %65 = dma.hbm_to_vmem [thread:$0]  %s10446_s3, 6144, %s60_s19, [#allocation10], %s7910_s2, %s7910_s2, %s7911_s27  }
  0x49   :  { %7894 = dma.done.wait [#allocation4], 4096  }
  0x4a   :  { %7895 = vsyncadd [#allocation4], 4294963200 }
  0x4b   :  { %7896 = dma.done.wait [#allocation7], 8192  }
  0x4c   :  { %7897 = vsyncadd [#allocation7], 4294959104 }
  0x4d   :  { %7898 = dma.done.wait [#allocation10], 6144  }
  0x4e   :  { %7899 = vsyncadd [#allocation10], 4294961152  ;;  %v228_v1 = vld [vmem:[%s10447_s4] sm:$0xff]  ;;  %v165_v3 = vld [vmem:[#allocation8 + $0x88] sm:$0xff]  ;;  %v7912_v0 = vmov 1.0|1.0  }
  0x4f   :  { %v164_v2 = vld [vmem:[#allocation8 + $0x80] sm:$0xff]  ;;  %1691 = vxpose.xlu0.b32.start [1/16] %v228_v1, 128  ;;  %v149_v6 = vld [vmem:[#allocation8 + $0x8] sm:$0xff]  ;;  %v166_v9 = vld [vmem:[#allocation8 + $0x90] sm:$0xff]  ;;  %s7913_s12 = smov 1   ;;  %s7914_s13 = smov 127   ;;  %vm1868_vm3 = vcmask 7168  }
  0x50   :  { %v6444_v4 = vpack.c.bf16 %v165_v3, %v164_v2  ;;  %v148_v5 = vld [vmem:[#allocation8] sm:$0xff]  ;;  %v167_v10 = vld [vmem:[#allocation8 + $0x98] sm:$0xff]  ;;  %v150_v11 = vld [vmem:[#allocation8 + $0x10] sm:$0xff]  ;;  %s7916_s9 = smov [#allocation11]  }
  0x51   :  { %v229_v7 = vld [vmem:[%s10447_s4 + $0x8] sm:$0xff]  ;;  %v6446_v8 = vpack.c.bf16 %v149_v6, %v148_v5  ;;  %v6448_v12 = vpack.c.bf16 %v167_v10, %v166_v9  ;;  %v151_v13 = vld [vmem:[#allocation8 + $0x18] sm:$0xff]  ;;  %v230_v20 = vld [vmem:[%s10447_s4 + $0x10] sm:$0xff]  ;;  %s4821_s10 = sshll.u32 %s7916_s9, 4  ;;  %s4822_s10 = int_to_ptr.vmem [resolvable:$true] %s4821_s10 }
  0x52   :  { %6477 = vmatprep.subr.bf16.mxu1 %v6444_v4  ;;  %v168_v14 = vld [vmem:[#allocation8 + $0xa0] sm:$0xff]  ;;  %6445 = vmatprep.subr.bf16.mxu0 %v6444_v4  ;;  %v6450_v15 = vpack.c.bf16 %v151_v13, %v150_v11  ;;  %v169_v16 = vld [vmem:[#allocation8 + $0xa8] sm:$0xff]  ;;  %v170_v21 = vld [vmem:[#allocation8 + $0xb0] sm:$0xff]  ;;  %s7872_s11 = scalar_lea.vmem %s4822_s10, 4096  ;;  %p7877_p5 = scmp.lt.s32.totalorder %s4822_s10, %s4822_s10 }
  0x53   :  { %6479 = vmatpush3.bf16.msra.mxu1 %v6446_v8  ;;  %6447 = vmatpush3.bf16.msra.mxu0 %v6446_v8  ;;  %v6452_v17 = vpack.c.bf16 %v169_v16, %v168_v14  ;;  %v152_v18 = vld [vmem:[#allocation8 + $0x20] sm:$0xff]  ;;  %v153_v19 = vld [vmem:[#allocation8 + $0x28] sm:$0xff]  ;;  %v171_v22 = vld [vmem:[#allocation8 + $0xb8] sm:$0xff]  ;;  %p7873_p4 = scmp.ne.s32.totalorder %s4822_s10, %s7872_s11  ;;  %p7878_p6 = scmp.lt.s32.totalorder %s7872_s11, %s7872_s11 }
  0x54   :  { %1692 = vxpose.xlu0.b32.cont [2/16] %v229_v7, 128  ;;  %6481 = vmatprep.subr.bf16.mxu1 %v6448_v12  ;;  %v6454_v23 = vpack.c.bf16 %v153_v19, %v152_v18  ;;  %v6456_v24 = vpack.c.bf16 %v171_v22, %v170_v21  ;;  %v154_v25 = vld [vmem:[#allocation8 + $0x30] sm:$0xff]  ;;  %v155_v26 = vld [vmem:[#allocation8 + $0x38] sm:$0xff]  ;;  %v172_v28 = vld [vmem:[#allocation8 + $0xc0] sm:$0xff] }
  0x55   :  { %6449 = vmatprep.subr.bf16.mxu0 %v6448_v12  ;;  %v231_v27 = vld [vmem:[%s10447_s4 + $0x18] sm:$0xff]  ;;  %v173_v29 = vld [vmem:[#allocation8 + $0xc8] sm:$0xff]  ;;  %v6458_v30 = vpack.c.bf16 %v155_v26, %v154_v25  ;;  %v156_v32 = vld [vmem:[#allocation8 + $0x40] sm:$0xff]  ;;  %p7879_p7 = por %p7878_p6, %p7877_p5 }
  0x56   :  { %v6460_v31 = vpack.c.bf16 %v173_v29, %v172_v28  ;;  %v157_v33 = vld [vmem:[#allocation8 + $0x48] sm:$0xff]  ;;  %v232_v35 = vld [vmem:[%s10447_s4 + $0x20] sm:$0xff]  ;;  %v174_v36 = vld [vmem:[#allocation8 + $0xd0] sm:$0xff] }
  0x57   :  { %6483 = vmatpush3.bf16.msra.mxu1 %v6450_v15  ;;  %6451 = vmatpush3.bf16.msra.mxu0 %v6450_v15  ;;  %v117_v34 = vld [vmem:[#allocation6 + $0x8] sm:$0xff]  ;;  %v175_v37 = vld [vmem:[#allocation8 + $0xd8] sm:$0xff]  ;;  %v6462_v38 = vpack.c.bf16 %v157_v33, %v156_v32  ;;  %v158_v40 = vld [vmem:[#allocation8 + $0x50] sm:$0xff]  ;;  %p7880_p8 = pnand %p7879_p7, %p7873_p4 }
  0x58   :  { %1693 = vxpose.xlu0.b32.cont [3/16] %v230_v20, 128  ;;  %6485 = vmatprep.subr.bf16.mxu1 %v6452_v17  ;;  %v6464_v39 = vpack.c.bf16 %v175_v37, %v174_v36  ;;  %v159_v41 = vld [vmem:[#allocation8 + $0x58] sm:$0xff]  ;;  %v233_v42 = vld [vmem:[%s10447_s4 + $0x28] sm:$0xff]  ;;  %v234_v46 = vld [vmem:[%s10447_s4 + $0x30] sm:$0xff] }
  0x59   :  { %6453 = vmatprep.subr.bf16.mxu0 %v6452_v17  ;;  %470 = vmatprep.mubr.f32.mxu1 %v117_v34  ;;  %v176_v43 = vld [vmem:[#allocation8 + $0xe0] sm:$0xff]  ;;  %v177_v44 = vld [vmem:[#allocation8 + $0xe8] sm:$0xff]  ;;  %v6466_v45 = vpack.c.bf16 %v159_v41, %v158_v40  ;;  %v178_v50 = vld [vmem:[#allocation8 + $0xf0] sm:$0xff] }
  0x5a   :  { %v6468_v47 = vpack.c.bf16 %v177_v44, %v176_v43  ;;  %v160_v48 = vld [vmem:[#allocation8 + $0x60] sm:$0xff]  ;;  %v161_v49 = vld [vmem:[#allocation8 + $0x68] sm:$0xff]  ;;  %v179_v51 = vld [vmem:[#allocation8 + $0xf8] sm:$0xff] }
  0x5b   :  { %6487 = vmatpush3.bf16.msra.mxu1 %v6454_v23  ;;  %6455 = vmatpush3.bf16.msra.mxu0 %v6454_v23  ;;  %v85_v52 = vld [vmem:[#allocation3 + $0x8] sm:$0xff]  ;;  %v6470_v53 = vpack.c.bf16 %v161_v49, %v160_v48  ;;  %v6472_v54 = vpack.c.bf16 %v179_v51, %v178_v50  ;;  %v162_v55 = vld [vmem:[#allocation8 + $0x70] sm:$0xff]  ;;  %v163_v56 = vld [vmem:[#allocation8 + $0x78] sm:$0xff] }
  0x5c   :  { %1694 = vxpose.xlu0.b32.cont [4/16] %v231_v27, 128  ;;  %6489 = vmatprep.subr.bf16.mxu1 %v6456_v24  ;;  %v235_v57 = vld [vmem:[%s10447_s4 + $0x38] sm:$0xff]  ;;  %v6474_v58 = vpack.c.bf16 %v163_v56, %v162_v55  ;;  %v236_v59 = vld [vmem:[%s10447_s4 + $0x40] sm:$0xff]  ;;  %v237_v1 = vld [vmem:[%s10447_s4 + $0x48] sm:$0xff] }
  0x5d   :  { %6457 = vmatprep.subr.bf16.mxu0 %v6456_v24  ;;  %325 = vmatprep.mubr.f32.mxu0 %v85_v52  ;;  %v116_v60 = vld [vmem:[#allocation6] sm:$0xff]  ;;  %v119_v62 = vld [vmem:[#allocation6 + $0x18] sm:$0xff]  ;;  %v118_v3 = vld [vmem:[#allocation6 + $0x10] sm:$0xff] }
  0x5e   :  { %v84_v61 = vld [vmem:[#allocation3] sm:$0xff]  ;;  %v87_v63 = vld [vmem:[#allocation3 + $0x18] sm:$0xff]  ;;  %v86_v4 = vld [vmem:[#allocation3 + $0x10] sm:$0xff] }
  0x5f   :  { %6491 = vmatpush3.bf16.msra.mxu1 %v6458_v30  ;;  %6459 = vmatpush3.bf16.msra.mxu0 %v6458_v30  ;;  %v180_v2 = vld [vmem:[#allocation9] sm:$0xff]  ;;  %v121_v5 = vld [vmem:[#allocation6 + $0x28] sm:$0xff]  ;;  %v183_v8 = vld [vmem:[#allocation9 + $0x18] sm:$0xff] }
  0x60   :  { %1695 = vxpose.xlu0.b32.cont [5/16] %v232_v35, 128  ;;  %6493 = vmatprep.subr.bf16.mxu1 %v6460_v31  ;;  %v89_v6 = vld [vmem:[#allocation3 + $0x28] sm:$0xff]  ;;  %v120_v9 = vld [vmem:[#allocation6 + $0x20] sm:$0xff]  ;;  %v123_v11 = vld [vmem:[#allocation6 + $0x38] sm:$0xff] }
  0x61   :  { %6461 = vmatprep.subr.bf16.mxu0 %v6460_v31  ;;  %v238_v7 = vld [vmem:[%s10447_s4 + $0x50] sm:$0xff]  ;;  %1906 = vxpose.xlu1.b32.start [1/16] %v180_v2, 128  ;;  %v88_v10 = vld [vmem:[#allocation3 + $0x20] sm:$0xff]  ;;  %v91_v12 = vld [vmem:[#allocation3 + $0x38] sm:$0xff] }
  0x62   :  { %v239_v13 = vld [vmem:[%s10447_s4 + $0x58] sm:$0xff]  ;;  %v125_v17 = vld [vmem:[#allocation6 + $0x48] sm:$0xff]  ;;  %v240_v19 = vld [vmem:[%s10447_s4 + $0x60] sm:$0xff] }
  0x63   :  { %6495 = vmatpush3.bf16.msra.mxu1 %v6462_v38  ;;  %6463 = vmatpush3.bf16.msra.mxu0 %v6462_v38  ;;  %v186_v14 = vld [vmem:[#allocation9 + $0x30] sm:$0xff]  ;;  %v93_v18 = vld [vmem:[#allocation3 + $0x48] sm:$0xff]  ;;  %v124_v21 = vld [vmem:[#allocation6 + $0x40] sm:$0xff] }
  0x64   :  { %1696 = vxpose.xlu0.b32.cont [6/16] %v233_v42, 128  ;;  %6497 = vmatprep.subr.bf16.mxu1 %v6464_v39  ;;  %v122_v15 = vld [vmem:[#allocation6 + $0x30] sm:$0xff]  ;;  %v189_v20 = vld [vmem:[#allocation9 + $0x48] sm:$0xff]  ;;  %v92_v22 = vld [vmem:[#allocation3 + $0x40] sm:$0xff] }
  0x65   :  { %6465 = vmatprep.subr.bf16.mxu0 %v6464_v39  ;;  %1907 = vxpose.xlu1.b32.cont [2/16] %v183_v8, 128  ;;  %v90_v16 = vld [vmem:[#allocation3 + $0x30] sm:$0xff]  ;;  %v127_v23 = vld [vmem:[#allocation6 + $0x58] sm:$0xff]  ;;  %v241_v25 = vld [vmem:[%s10447_s4 + $0x68] sm:$0xff] }
  0x66   :  { %v95_v24 = vld [vmem:[#allocation3 + $0x58] sm:$0xff]  ;;  %v192_v26 = vld [vmem:[#allocation9 + $0x60] sm:$0xff]  ;;  %v126_v27 = vld [vmem:[#allocation6 + $0x50] sm:$0xff] }
  0x67   :  { %6499 = vmatpush3.bf16.msra.mxu1 %v6466_v45  ;;  %6467 = vmatpush3.bf16.msra.mxu0 %v6466_v45  ;;  %v94_v28 = vld [vmem:[#allocation3 + $0x50] sm:$0xff]  ;;  %v129_v29 = vld [vmem:[#allocation6 + $0x68] sm:$0xff]  ;;  %v195_v32 = vld [vmem:[#allocation9 + $0x78] sm:$0xff] }
  0x68   :  { %1697 = vxpose.xlu0.b32.cont [7/16] %v234_v46, 128  ;;  %6501 = vmatprep.subr.bf16.mxu1 %v6468_v47  ;;  %v97_v30 = vld [vmem:[#allocation3 + $0x68] sm:$0xff]  ;;  %v128_v33 = vld [vmem:[#allocation6 + $0x60] sm:$0xff]  ;;  %v131_v35 = vld [vmem:[#allocation6 + $0x78] sm:$0xff] }
  0x69   :  { %6469 = vmatprep.subr.bf16.mxu0 %v6468_v47  ;;  %1908 = vxpose.xlu1.b32.cont [3/16] %v186_v14, 128  ;;  %v242_v31 = vld [vmem:[%s10447_s4 + $0x70] sm:$0xff]  ;;  %v96_v34 = vld [vmem:[#allocation3 + $0x60] sm:$0xff]  ;;  %v99_v36 = vld [vmem:[#allocation3 + $0x78] sm:$0xff] }
  0x6a   :  { %v243_v37 = vld [vmem:[%s10447_s4 + $0x78] sm:$0xff]  ;;  %v133_v41 = vld [vmem:[#allocation6 + $0x88] sm:$0xff]  ;;  %v132_v45 = vld [vmem:[#allocation6 + $0x80] sm:$0xff] }
  0x6b   :  { %6503 = vmatpush3.bf16.msra.mxu1 %v6470_v53  ;;  %6471 = vmatpush3.bf16.msra.mxu0 %v6470_v53  ;;  %v198_v38 = vld [vmem:[#allocation9 + $0x90] sm:$0xff]  ;;  %v101_v42 = vld [vmem:[#allocation3 + $0x88] sm:$0xff]  ;;  %v100_v46 = vld [vmem:[#allocation3 + $0x80] sm:$0xff] }
  0x6c   :  { %1698 = vxpose.xlu0.b32.cont [8/16] %v235_v57, 128  ;;  %6505 = vmatprep.subr.bf16.mxu1 %v6472_v54  ;;  %v130_v39 = vld [vmem:[#allocation6 + $0x70] sm:$0xff]  ;;  %v181_v43 = vld [vmem:[#allocation9 + $0x8] sm:$0xff]  ;;  %v135_v47 = vld [vmem:[#allocation6 + $0x98] sm:$0xff] }
  0x6d   :  { %6473 = vmatprep.subr.bf16.mxu0 %v6472_v54  ;;  %1909 = vxpose.xlu1.b32.cont [4/16] %v189_v20, 128  ;;  %v98_v40 = vld [vmem:[#allocation3 + $0x70] sm:$0xff]  ;;  %v201_v44 = vld [vmem:[#allocation9 + $0xa8] sm:$0xff]  ;;  %v103_v48 = vld [vmem:[#allocation3 + $0x98] sm:$0xff] }
  0x6e   :  { %v184_v49 = vld [vmem:[#allocation9 + $0x20] sm:$0xff]  ;;  %v134_v51 = vld [vmem:[#allocation6 + $0x90] sm:$0xff]  ;;  %v137_v53 = vld [vmem:[#allocation6 + $0xa8] sm:$0xff] }
  0x6f   :  { %6507 = vmatpush3.bf16.msra.mxu1 %v6474_v58  ;;  %6475 = vmatpush3.bf16.msra.mxu0 %v6474_v58  ;;  %v204_v50 = vld [vmem:[#allocation9 + $0xc0] sm:$0xff]  ;;  %v102_v52 = vld [vmem:[#allocation3 + $0x90] sm:$0xff]  ;;  %v105_v54 = vld [vmem:[#allocation3 + $0xa8] sm:$0xff] }
  0x70   :  { %1699 = vxpose.xlu0.b32.cont [9/16] %v236_v59, 128  ;;  %6508 = vmatprep.subr.bf16.mxu0 %v7912_v0  ;;  %v187_v55 = vld [vmem:[#allocation9 + $0x38] sm:$0xff]  ;;  %v136_v57 = vld [vmem:[#allocation6 + $0xa0] sm:$0xff]  ;;  %v109_v2 = vld [vmem:[#allocation3 + $0xc8] sm:$0xff] }
  0x71   :  { %1910 = vxpose.xlu1.b32.cont [5/16] %v192_v26, 128  ;;  %v207_v56 = vld [vmem:[#allocation9 + $0xd8] sm:$0xff]  ;;  %v104_v58 = vld [vmem:[#allocation3 + $0xa0] sm:$0xff]  ;;  %v113_v14 = vld [vmem:[#allocation3 + $0xe8] sm:$0xff] }
  0x72   :  { %471 = vmatmul.mubr.f32.vlgmr.msra.gmra.mrb[0].mxu1 %v116_v60  ;;  %326 = vmatmul.mubr.f32.vlgmr.msra.gmra.mrb[0].mxu0 %v84_v61  ;;  %v139_v59 = vld [vmem:[#allocation6 + $0xb8] sm:$0xff]  ;;  %v190_v61 = vld [vmem:[#allocation9 + $0x50] sm:$0xff]  ;;  %v225_v26 = vld [vmem:[#allocation9 + $0x168] sm:$0xff] }
  0x73   :  { %475 = vmatprep.mubr.f32.mxu1 %v119_v62  ;;  %330 = vmatprep.mubr.f32.mxu0 %v87_v63  ;;  %v107_v60 = vld [vmem:[#allocation3 + $0xb8] sm:$0xff]  ;;  %v210_v62 = vld [vmem:[#allocation9 + $0xf0] sm:$0xff] }
  0x74   :  { %1700 = vxpose.xlu0.b32.cont [10/16] %v237_v1, 128  ;;  %6509 = vmatpush3.bf16.msra.mxu0 %v7912_v0  ;;  %v138_v63 = vld [vmem:[#allocation6 + $0xb0] sm:$0xff]  ;;  %v141_v1 = vld [vmem:[#allocation6 + $0xc8] sm:$0xff]  ;;  %v111_v8 = vld [vmem:[#allocation3 + $0xd8] sm:$0xff] }
  0x75   :  { %6510 = vmatprep.subr.bf16.mxu0 %v7912_v0  ;;  %1911 = vxpose.xlu1.b32.cont [6/16] %v195_v32, 128  ;;  %v115_v20 = vld [vmem:[#allocation3 + $0xf8] sm:$0xff]  ;;  %v188_v32 = vld [vmem:[#allocation9 + $0x40] sm:$0xff] }
  0x76   :  { %476 = vmatmul.mubr.f32.gmra.mrb[2].mxu1 %v118_v3  ;;  %331 = vmatmul.mubr.f32.gmra.mrb[2].mxu0 %v86_v4  ;;  %v193_v3 = vld [vmem:[#allocation9 + $0x68] sm:$0xff] }
  0x77   :  { %480 = vmatprep.mubr.f32.mxu1 %v121_v5  ;;  %335 = vmatprep.mubr.f32.mxu0 %v89_v6  ;;  %v213_v4 = vld [vmem:[#allocation9 + $0x108] sm:$0xff]  ;;  %v140_v5 = vld [vmem:[#allocation6 + $0xc0] sm:$0xff] }
  0x78   :  { %1701 = vxpose.xlu0.b32.cont [11/16] %v238_v7, 128  ;;  %6511 = vmatpush3.bf16.msra.mxu0 %v7912_v0  ;;  %v108_v6 = vld [vmem:[#allocation3 + $0xc0] sm:$0xff]  ;;  %v143_v7 = vld [vmem:[#allocation6 + $0xd8] sm:$0xff] }
  0x79   :  { %6512 = vmatprep.subr.bf16.mxu0 %v7912_v0  ;;  %1912 = vxpose.xlu1.b32.cont [7/16] %v198_v38, 128  ;;  %v197_v38 = vld [vmem:[#allocation9 + $0x88] sm:$0xff] }
  0x7a   :  { %481 = vmatmul.mubr.f32.gmra.mrb[4].mxu1 %v120_v9  ;;  %336 = vmatmul.mubr.f32.gmra.mrb[4].mxu0 %v88_v10  ;;  %v196_v9 = vld [vmem:[#allocation9 + $0x80] sm:$0xff] }
  0x7b   :  { %485 = vmatprep.mubr.f32.mxu1 %v123_v11  ;;  %340 = vmatprep.mubr.f32.mxu0 %v91_v12  ;;  %v216_v10 = vld [vmem:[#allocation9 + $0x120] sm:$0xff]  ;;  %v142_v11 = vld [vmem:[#allocation6 + $0xd0] sm:$0xff] }
  0x7c   :  { %1702 = vxpose.xlu0.b32.cont [12/16] %v239_v13, 128  ;;  %6513 = vmatpush3.bf16.msra.mxu0 %v7912_v0  ;;  %v110_v12 = vld [vmem:[#allocation3 + $0xd0] sm:$0xff]  ;;  %v145_v13 = vld [vmem:[#allocation6 + $0xe8] sm:$0xff] }
  0x7d   :  { %6514 = vmatprep.subr.bf16.mxu0 %v7912_v0  ;;  %1913 = vxpose.xlu1.b32.cont [8/16] %v201_v44, 128 }
  0x7e   :  { %486 = vmatmul.mubr.f32.gmra.mrb[6].mxu1 %v122_v15  ;;  %341 = vmatmul.mubr.f32.gmra.mrb[6].mxu0 %v90_v16  ;;  %v199_v15 = vld [vmem:[#allocation9 + $0x98] sm:$0xff] }
  0x7f   :  { %490 = vmatprep.mubr.f32.mxu1 %v125_v17  ;;  %345 = vmatprep.mubr.f32.mxu0 %v93_v18  ;;  %v219_v16 = vld [vmem:[#allocation9 + $0x138] sm:$0xff]  ;;  %v144_v17 = vld [vmem:[#allocation6 + $0xe0] sm:$0xff] }
  0x80   :  { %1703 = vxpose.xlu0.b32.cont [13/16] %v240_v19, 128  ;;  %6515 = vmatpush3.bf16.msra.mxu0 %v7912_v0  ;;  %v112_v18 = vld [vmem:[#allocation3 + $0xe0] sm:$0xff]  ;;  %v147_v19 = vld [vmem:[#allocation6 + $0xf8] sm:$0xff] }
  0x81   :  { %6516 = vmatprep.subr.bf16.mxu0 %v7912_v0  ;;  %1914 = vxpose.xlu1.b32.cont [9/16] %v204_v50, 128 }
  0x82   :  { %491 = vmatmul.mubr.f32.gmra.mrb[8].mxu1 %v124_v21  ;;  %346 = vmatmul.mubr.f32.gmra.mrb[8].mxu0 %v92_v22  ;;  %v202_v21 = vld [vmem:[#allocation9 + $0xb0] sm:$0xff] }
  0x83   :  { %495 = vmatprep.mubr.f32.mxu1 %v127_v23  ;;  %350 = vmatprep.mubr.f32.mxu0 %v95_v24  ;;  %v222_v22 = vld [vmem:[#allocation9 + $0x150] sm:$0xff] }
  0x84   :  { %1704 = vxpose.xlu0.b32.cont [14/16] %v241_v25, 128  ;;  %6517 = vmatpush3.bf16.msra.mxu0 %v7912_v0  ;;  %v146_v23 = vld [vmem:[#allocation6 + $0xf0] sm:$0xff]  ;;  %v205_v25 = vld [vmem:[#allocation9 + $0xc8] sm:$0xff] }
  0x85   :  { %6518 = vmatprep.subr.bf16.mxu0 %v7912_v0  ;;  %1915 = vxpose.xlu1.b32.cont [10/16] %v207_v56, 128  ;;  %v114_v24 = vld [vmem:[#allocation3 + $0xf0] sm:$0xff] }
  0x86   :  { %496 = vmatmul.mubr.f32.gmra.mrb[10].mxu1 %v126_v27  ;;  %351 = vmatmul.mubr.f32.gmra.mrb[10].mxu0 %v94_v28  ;;  %v208_v27 = vld [vmem:[#allocation9 + $0xe0] sm:$0xff]  ;;  %v182_v28 = vld [vmem:[#allocation9 + $0x10] sm:$0xff] }
  0x87   :  { %500 = vmatprep.mubr.f32.mxu1 %v129_v29  ;;  %355 = vmatprep.mubr.f32.mxu0 %v97_v30  ;;  %v211_v29 = vld [vmem:[#allocation9 + $0xf8] sm:$0xff]  ;;  %v185_v30 = vld [vmem:[#allocation9 + $0x28] sm:$0xff] }
  0x88   :  { %1705 = vxpose.xlu0.b32.cont [15/16] %v242_v31, 128  ;;  %6519 = vmatpush3.bf16.msra.mxu0 %v7912_v0  ;;  %v214_v31 = vld [vmem:[#allocation9 + $0x110] sm:$0xff] }
  0x89   :  { %6520 = vmatprep.subr.bf16.mxu0 %v7912_v0  ;;  %1916 = vxpose.xlu1.b32.cont [11/16] %v210_v62, 128 }
  0x8a   :  { %501 = vmatmul.mubr.f32.gmra.mrb[12].mxu1 %v128_v33  ;;  %356 = vmatmul.mubr.f32.gmra.mrb[12].mxu0 %v96_v34  ;;  %v217_v33 = vld [vmem:[#allocation9 + $0x128] sm:$0xff]  ;;  %v191_v34 = vld [vmem:[#allocation9 + $0x58] sm:$0xff] }
  0x8b   :  { %505 = vmatprep.mubr.f32.mxu1 %v131_v35  ;;  %360 = vmatprep.mubr.f32.mxu0 %v99_v36  ;;  %v220_v35 = vld [vmem:[#allocation9 + $0x140] sm:$0xff]  ;;  %v194_v36 = vld [vmem:[#allocation9 + $0x70] sm:$0xff] }
  0x8c   :  { %1706 = vxpose.xlu0.b32.end [16/16] %v243_v37, 128  ;;  %6521 = vmatpush3.bf16.msra.mxu0 %v7912_v0  ;;  %v223_v37 = vld [vmem:[#allocation9 + $0x158] sm:$0xff] }
  0x8d   :  { %6522 = vmatprep.subr.bf16.mxu0 %v7912_v0  ;;  %1917 = vxpose.xlu1.b32.cont [12/16] %v213_v4, 128 }
  0x8e   :  { %506 = vmatmul.mubr.f32.gmra.mrb[14].mxu1 %v130_v39  ;;  %361 = vmatmul.mubr.f32.gmra.mrb[14].mxu0 %v98_v40  ;;  %v226_v39 = vld [vmem:[#allocation9 + $0x170] sm:$0xff]  ;;  %v200_v40 = vld [vmem:[#allocation9 + $0xa0] sm:$0xff] }
  0x8f   :  { %510 = vmatprep.mubr.f32.mxu1 %v133_v41  ;;  %365 = vmatprep.mubr.f32.mxu0 %v101_v42  ;;  %v203_v41 = vld [vmem:[#allocation9 + $0xb8] sm:$0xff] }
  0x90   :  { %6523 = vmatpush3.bf16.msra.mxu0 %v7912_v0  ;;  %1938 = vxpose.xlu0.b32.start [1/16] %v181_v43, 128  ;;  %v106_v0 = vld [vmem:[#allocation3 + $0xb0] sm:$0xff] }
  0x91   :  { %1918 = vxpose.xlu1.b32.cont [13/16] %v216_v10, 128  ;;  %v206_v43 = vld [vmem:[#allocation9 + $0xd0] sm:$0xff] }
  0x92   :  { %511 = vmatmul.mubr.f32.gmra.mrb[16].mxu1 %v132_v45  ;;  %366 = vmatmul.mubr.f32.gmra.mrb[16].mxu0 %v100_v46  ;;  %v209_v45 = vld [vmem:[#allocation9 + $0xe8] sm:$0xff] }
  0x93   :  { %515 = vmatprep.mubr.f32.mxu1 %v135_v47  ;;  %370 = vmatprep.mubr.f32.mxu0 %v103_v48  ;;  %v212_v47 = vld [vmem:[#allocation9 + $0x100] sm:$0xff] }
  0x94   :  { %1939 = vxpose.xlu0.b32.cont [2/16] %v184_v49, 128  ;;  %v215_v49 = vld [vmem:[#allocation9 + $0x118] sm:$0xff] }
  0x95   :  { %1919 = vxpose.xlu1.b32.cont [14/16] %v219_v16, 128 }
  0x96   :  { %516 = vmatmul.mubr.f32.gmra.mrb[18].mxu1 %v134_v51  ;;  %371 = vmatmul.mubr.f32.gmra.mrb[18].mxu0 %v102_v52  ;;  %v218_v51 = vld [vmem:[#allocation9 + $0x130] sm:$0xff] }
  0x97   :  { %520 = vmatprep.mubr.f32.mxu1 %v137_v53  ;;  %375 = vmatprep.mubr.f32.mxu0 %v105_v54  ;;  %v221_v53 = vld [vmem:[#allocation9 + $0x148] sm:$0xff] }
  0x98   :  { %1940 = vxpose.xlu0.b32.cont [3/16] %v187_v55, 128  ;;  %v224_v55 = vld [vmem:[#allocation9 + $0x160] sm:$0xff] }
  0x99   :  { %1920 = vxpose.xlu1.b32.cont [15/16] %v222_v22, 128 }
  0x9a   :  { %521 = vmatmul.mubr.f32.gmra.mrb[20].mxu1 %v136_v57  ;;  %376 = vmatmul.mubr.f32.gmra.mrb[20].mxu0 %v104_v58  ;;  %v227_v57 = vld [vmem:[#allocation9 + $0x178] sm:$0xff] }
  0x9b   :  { %525 = vmatprep.mubr.f32.mxu1 %v139_v59  ;;  %380 = vmatprep.mubr.f32.mxu0 %v107_v60 }
  0x9c   :  { %1941 = vxpose.xlu0.b32.cont [4/16] %v190_v61, 128 }
  0x9d   :  { %1921 = vxpose.xlu1.b32.end [16/16] %v225_v26, 128 }
  0x9e   :  { %526 = vmatmul.mubr.f32.gmra.mrb[22].mxu1 %v138_v63  ;;  %381 = vmatmul.mubr.f32.gmra.mrb[22].mxu0 %v106_v0 }
  0x9f   :  { %530 = vmatprep.mubr.f32.mxu1 %v141_v1  ;;  %385 = vmatprep.mubr.f32.mxu0 %v109_v2 }
  0xa0   :  { %1942 = vxpose.xlu0.b32.cont [5/16] %v193_v3, 128 }
  0xa1   :  { %1970 = vxpose.xlu1.b32.start [1/16] %v182_v28, 128 }
  0xa2   :  { %531 = vmatmul.mubr.f32.gmra.mrb[24].mxu1 %v140_v5  ;;  %386 = vmatmul.mubr.f32.gmra.mrb[24].mxu0 %v108_v6 }
  0xa3   :  { %535 = vmatprep.mubr.f32.mxu1 %v143_v7  ;;  %390 = vmatprep.mubr.f32.mxu0 %v111_v8 }
  0xa4   :  { %1943 = vxpose.xlu0.b32.cont [6/16] %v196_v9, 128 }
  0xa5   :  { %1971 = vxpose.xlu1.b32.cont [2/16] %v185_v30, 128 }
  0xa6   :  { %536 = vmatmul.mubr.f32.gmra.mrb[26].mxu1 %v142_v11  ;;  %391 = vmatmul.mubr.f32.gmra.mrb[26].mxu0 %v110_v12 }
  0xa7   :  { %540 = vmatprep.mubr.f32.mxu1 %v145_v13  ;;  %395 = vmatprep.mubr.f32.mxu0 %v113_v14 }
  0xa8   :  { %1944 = vxpose.xlu0.b32.cont [7/16] %v199_v15, 128 }
  0xa9   :  { %1972 = vxpose.xlu1.b32.cont [3/16] %v188_v32, 128 }
  0xaa   :  { %541 = vmatmul.mubr.f32.gmra.mrb[28].mxu1 %v144_v17  ;;  %396 = vmatmul.mubr.f32.gmra.mrb[28].mxu0 %v112_v18 }
  0xab   :  { %545 = vmatprep.mubr.f32.mxu1 %v147_v19  ;;  %400 = vmatprep.mubr.f32.mxu0 %v115_v20 }
  0xac   :  { %1945 = vxpose.xlu0.b32.cont [8/16] %v202_v21, 128 }
  0xad   :  { %1973 = vxpose.xlu1.b32.cont [4/16] %v191_v34, 128 }
  0xae   :  { %546 = vmatmul.mubr.f32.gmra.mrb[30].mxu1 %v146_v23  ;;  %401 = vmatmul.mubr.f32.gmra.mrb[30].mxu0 %v114_v24 }
  0xb0   :  { %1946 = vxpose.xlu0.b32.cont [9/16] %v205_v25, 128 }
  0xb1   :  { %1974 = vxpose.xlu1.b32.cont [5/16] %v194_v36, 128 }
  0xb4   :  { %1947 = vxpose.xlu0.b32.cont [10/16] %v208_v27, 128 }
  0xb5   :  { %1975 = vxpose.xlu1.b32.cont [6/16] %v197_v38, 128 }
  0xb8   :  { %1948 = vxpose.xlu0.b32.cont [11/16] %v211_v29, 128 }
  0xb9   :  { %1976 = vxpose.xlu1.b32.cont [7/16] %v200_v40, 128 }
  0xbc   :  { %1949 = vxpose.xlu0.b32.cont [12/16] %v214_v31, 128 }
  0xbd   :  { %1977 = vxpose.xlu1.b32.cont [8/16] %v203_v41, 128 }
  0xc0   :  { %1950 = vxpose.xlu0.b32.cont [13/16] %v217_v33, 128 }
  0xc1   :  { %1978 = vxpose.xlu1.b32.cont [9/16] %v206_v43, 128 }
  0xc4   :  { %1951 = vxpose.xlu0.b32.cont [14/16] %v220_v35, 128 }
  0xc5   :  { %1979 = vxpose.xlu1.b32.cont [10/16] %v209_v45, 128 }
  0xc8   :  { %1952 = vxpose.xlu0.b32.cont [15/16] %v223_v37, 128 }
  0xc9   :  { %1980 = vxpose.xlu1.b32.cont [11/16] %v212_v47, 128 }
  0xcc   :  { %1953 = vxpose.xlu0.b32.end [16/16] %v226_v39, 128 }
  0xcd   :  { %1981 = vxpose.xlu1.b32.cont [12/16] %v215_v49, 128 }
  0xd0   :  { %v1707_v42 = vpop.trf.xlu0 }
  0xd1   :  { %5828 = vmatprep.mubr.f32.mxu0 %v1707_v42  ;;  %1982 = vxpose.xlu1.b32.cont [13/16] %v218_v51, 128 }
  0xd4   :  { %v1708_v44 = vpop.trf.xlu0 }
  0xd5   :  { %5829 = vmatmul.mubr.f32.vlgmr.msra.gmra.mrb[32].mxu0 %v1708_v44  ;;  %1983 = vxpose.xlu1.b32.cont [14/16] %v221_v53, 128 }
  0xd8   :  { %v1709_v46 = vpop.trf.xlu0 }
  0xd9   :  { %5831 = vmatprep.mubr.f32.mxu0 %v1709_v46  ;;  %1984 = vxpose.xlu1.b32.cont [15/16] %v224_v55, 128 }
  0xdc   :  { %v1710_v48 = vpop.trf.xlu0 }
  0xdd   :  { %5832 = vmatmul.mubr.f32.gmra.mrb[34].mxu0 %v1710_v48  ;;  %1985 = vxpose.xlu1.b32.end [16/16] %v227_v57, 128 }
  0xe0   :  { %v1711_v50 = vpop.trf.xlu0 }
  0xe1   :  { %5834 = vmatprep.mubr.f32.mxu0 %v1711_v50  ;;  %v8085_v60 = vpop.trf.xlu1 }
  0xe2   :  { %10680 = vst [vmem:[#allocation16_spill] sm:$0xff] %v8085_v60  ;;  %5884 = vmatprep.mubr.f32.mxu1 %v8085_v60 }
  0xe4   :  { %v1712_v52 = vpop.trf.xlu0 }
  0xe5   :  { %5835 = vmatmul.mubr.f32.gmra.mrb[36].mxu0 %v1712_v52  ;;  %v8088_v0 = vpop.trf.xlu1 }
  0xe6   :  { %10681 = vst [vmem:[#allocation17_spill] sm:$0xff] %v8088_v0 }
  0xe8   :  { %v1713_v54 = vpop.trf.xlu0 }
  0xe9   :  { %5837 = vmatprep.mubr.f32.mxu0 %v1713_v54  ;;  %v8090_v2 = vpop.trf.xlu1 }
  0xea   :  { %10682 = vst [vmem:[#allocation18_spill] sm:$0xff] %v8090_v2 }
  0xec   :  { %v1714_v56 = vpop.trf.xlu0 }
  0xed   :  { %5838 = vmatmul.mubr.f32.gmra.mrb[38].mxu0 %v1714_v56  ;;  %v8092_v5 = vpop.trf.xlu1 }
  0xee   :  { %10683 = vst [vmem:[#allocation19_spill] sm:$0xff] %v8092_v5 }
  0xf0   :  { %v1715_v58 = vpop.trf.xlu0 }
  0xf1   :  { %5840 = vmatprep.mubr.f32.mxu0 %v1715_v58  ;;  %v8094_v6 = vpop.trf.xlu1 }
  0xf2   :  { %10684 = vst [vmem:[#allocation20_spill] sm:$0xff] %v8094_v6 }
  0xf4   :  { %v1716_v59 = vpop.trf.xlu0 }
  0xf5   :  { %5841 = vmatmul.mubr.f32.gmra.mrb[40].mxu0 %v1716_v59  ;;  %v8096_v7 = vpop.trf.xlu1 }
  0xf6   :  { %10685 = vst [vmem:[#allocation21_spill] sm:$0xff] %v8096_v7 }
  0xf8   :  { %v1717_v61 = vpop.trf.xlu0 }
  0xf9   :  { %5843 = vmatprep.mubr.f32.mxu0 %v1717_v61  ;;  %v8098_v8 = vpop.trf.xlu1 }
  0xfa   :  { %10686 = vst [vmem:[#allocation22_spill] sm:$0xff] %v8098_v8 }
  0xfc   :  { %v1718_v62 = vpop.trf.xlu0 }
  0xfd   :  { %5844 = vmatmul.mubr.f32.gmra.mrb[42].mxu0 %v1718_v62  ;;  %v8100_v9 = vpop.trf.xlu1 }
  0xfe   :  { %10687 = vst [vmem:[#allocation23_spill] sm:$0xff] %v8100_v9 }
 0x100   :  { %v1719_v63 = vpop.trf.xlu0 }
 0x101   :  { %5846 = vmatprep.mubr.f32.mxu0 %v1719_v63  ;;  %v8102_v10 = vpop.trf.xlu1 }
 0x102   :  { %10688 = vst [vmem:[#allocation24_spill] sm:$0xff] %v8102_v10 }
 0x104   :  { %v1720_v1 = vpop.trf.xlu0 }
 0x105   :  { %5847 = vmatmul.mubr.f32.gmra.mrb[44].mxu0 %v1720_v1  ;;  %v8104_v11 = vpop.trf.xlu1 }
 0x106   :  { %10689 = vst [vmem:[#allocation25_spill] sm:$0xff] %v8104_v11 }
 0x108   :  { %v1721_v3 = vpop.trf.xlu0 }
 0x109   :  { %5849 = vmatprep.mubr.f32.mxu0 %v1721_v3  ;;  %v8106_v12 = vpop.trf.xlu1 }
 0x10a   :  { %10690 = vst [vmem:[#allocation26_spill] sm:$0xff] %v8106_v12 }
 0x10c   :  { %v1722_v4 = vpop.trf.xlu0 }
 0x10d   :  { %5850 = vmatmul.mubr.f32.gmra.mrb[46].mxu0 %v1722_v4  ;;  %v8108_v13 = vpop.trf.xlu1 }
 0x10e   :  { %10691 = vst [vmem:[#allocation27_spill] sm:$0xff] %v8108_v13 }
 0x110   :  { %v8148_v49 = vpop.trf.xlu0 }
 0x111   :  { %v8110_v14 = vpop.trf.xlu1  ;;  %10700 = vst [vmem:[#allocation36_spill] sm:$0xff] %v8148_v49 }
 0x112   :  { %10692 = vst [vmem:[#allocation28_spill] sm:$0xff] %v8110_v14 }
 0x114   :  { %v8166_v3 = vpop.trf.xlu0 }
 0x115   :  { %v8116_v21 = vpop.trf.xlu1  ;;  %10704 = vst [vmem:[#allocation40_spill] sm:$0xff] %v8166_v3 }
 0x116   :  { %10694 = vst [vmem:[#allocation30_spill] sm:$0xff] %v8116_v21 }
 0x119   :  { %v8132_v35 = vpop.trf.xlu1 }
 0x11a   :  { %10697 = vst [vmem:[#allocation33_spill] sm:$0xff] %v8132_v35 }
 0x11d   :  { %v8150_v50 = vpop.trf.xlu1 }
 0x11e   :  { %10701 = vst [vmem:[#allocation37_spill] sm:$0xff] %v8150_v50 }
 0x121   :  { %v8168_v4 = vpop.trf.xlu1 }
 0x122   :  { %10705 = vst [vmem:[#allocation41_spill] sm:$0xff] %v8168_v4 }
 0x145   :  { %v5124_v15 = vpop.f32.mrb[0].mxu1  ;;  %v5044_v16 = vpop.f32.mrb[0].mxu0 }
 0x146   :  { %v5125_v17 = vpop.f32.mrb[1].mxu1  ;;  %v5045_v18 = vpop.f32.mrb[1].mxu0 }
 0x147   :  { %v8112_v19 = vadd.f32 %v5125_v17, %v5124_v15  ;;  %v8114_v20 = vadd.f32 %v5045_v18, %v5044_v16 }
 0x149   :  { %10693 = vst [vmem:[#allocation29_spill] sm:$0xff] %v8114_v20  ;;  %v5127_v22 = vpop.f32.mrb[2].mxu1  ;;  %v5047_v23 = vpop.f32.mrb[2].mxu0 }
 0x14a   :  { %v5128_v24 = vpop.f32.mrb[3].mxu1  ;;  %v5048_v25 = vpop.f32.mrb[3].mxu0 }
 0x14b   :  { %v8118_v26 = vadd.f32 %v5128_v24, %v5127_v22  ;;  %v8120_v27 = vadd.f32 %v5048_v25, %v5047_v23 }
 0x14d   :  { %10695 = vst [vmem:[#allocation31_spill] sm:$0xff] %v8120_v27  ;;  %v5130_v28 = vpop.f32.mrb[4].mxu1  ;;  %v8124_v29 = vpack.i.bf16 %v8118_v26, %v8112_v19  ;;  %v5050_v30 = vpop.f32.mrb[4].mxu0 }
 0x14e   :  { %v5131_v31 = vpop.f32.mrb[5].mxu1  ;;  %v5051_v32 = vpop.f32.mrb[5].mxu0 }
 0x14f   :  { %6916 = vrot.lane.b32.xlu0 %v8124_v29, %s7913_s12  ;;  %v8128_v33 = vadd.f32 %v5131_v31, %v5130_v28  ;;  %v8130_v34 = vadd.f32 %v5051_v32, %v5050_v30 }
 0x151   :  { %10696 = vst [vmem:[#allocation32_spill] sm:$0xff] %v8130_v34  ;;  %v5133_v36 = vpop.f32.mrb[6].mxu1  ;;  %v5053_v37 = vpop.f32.mrb[6].mxu0 }
 0x152   :  { %v5134_v38 = vpop.f32.mrb[7].mxu1  ;;  %v5054_v39 = vpop.f32.mrb[7].mxu0 }
 0x153   :  { %v8134_v40 = vadd.f32 %v5134_v38, %v5133_v36  ;;  %v8136_v41 = vadd.f32 %v5054_v39, %v5053_v37  ;;  %v8181_v37 = vpop.trf.xlu0  ;;  %v8183_v38 = vpop.trf.xlu1 }
 0x154   :  { %10708 = vst [vmem:[#allocation44_spill] sm:$0xff] %v8181_v37  ;;  %10709 = vst [vmem:[#allocation45_spill] sm:$0xff] %v8183_v38 }
 0x155   :  { %10698 = vst [vmem:[#allocation34_spill] sm:$0xff] %v8136_v41  ;;  %v5136_v42 = vpop.f32.mrb[8].mxu1  ;;  %v8140_v43 = vpack.i.bf16 %v8134_v40, %v8128_v33  ;;  %v5056_v44 = vpop.f32.mrb[8].mxu0 }
 0x156   :  { %v5137_v45 = vpop.f32.mrb[9].mxu1  ;;  %v5057_v46 = vpop.f32.mrb[9].mxu0 }
 0x157   :  { %6921 = vrot.lane.b32.xlu1 %v8140_v43, %s7913_s12  ;;  %v8144_v47 = vadd.f32 %v5137_v45, %v5136_v42  ;;  %v8146_v48 = vadd.f32 %v5057_v46, %v5056_v44 }
 0x159   :  { %10699 = vst [vmem:[#allocation35_spill] sm:$0xff] %v8146_v48  ;;  %v5139_v51 = vpop.f32.mrb[10].mxu1  ;;  %v5059_v52 = vpop.f32.mrb[10].mxu0 }
 0x15a   :  { %v5140_v53 = vpop.f32.mrb[11].mxu1  ;;  %v5060_v54 = vpop.f32.mrb[11].mxu0 }
 0x15b   :  { %v8152_v55 = vadd.f32 %v5140_v53, %v5139_v51  ;;  %v8154_v56 = vadd.f32 %v5060_v54, %v5059_v52 }
 0x15d   :  { %10702 = vst [vmem:[#allocation38_spill] sm:$0xff] %v8154_v56  ;;  %v5142_v57 = vpop.f32.mrb[12].mxu1  ;;  %v8158_v58 = vpack.i.bf16 %v8152_v55, %v8144_v47  ;;  %v5062_v59 = vpop.f32.mrb[12].mxu0 }
 0x15e   :  { %v5143_v61 = vpop.f32.mrb[13].mxu1  ;;  %v5063_v62 = vpop.f32.mrb[13].mxu0 }
 0x15f   :  { %6926 = vrot.lane.b32.xlu1 %v8158_v58, %s7913_s12  ;;  %v8162_v63 = vadd.f32 %v5143_v61, %v5142_v57  ;;  %v8164_v1 = vadd.f32 %v5063_v62, %v5062_v59 }
 0x161   :  { %10703 = vst [vmem:[#allocation39_spill] sm:$0xff] %v8164_v1  ;;  %v5145_v15 = vpop.f32.mrb[14].mxu1  ;;  %v5065_v16 = vpop.f32.mrb[14].mxu0 }
 0x162   :  { %v5146_v17 = vpop.f32.mrb[15].mxu1  ;;  %v5066_v18 = vpop.f32.mrb[15].mxu0 }
 0x163   :  { %v8170_v22 = vadd.f32 %v5146_v17, %v5145_v15  ;;  %v8172_v23 = vadd.f32 %v5066_v18, %v5065_v16  ;;  %v8196_v15 = vpop.trf.xlu0  ;;  %v8198_v16 = vpop.trf.xlu1 }
 0x164   :  { %10712 = vst [vmem:[#allocation48_spill] sm:$0xff] %v8196_v15  ;;  %10713 = vst [vmem:[#allocation49_spill] sm:$0xff] %v8198_v16 }
 0x165   :  { %10706 = vst [vmem:[#allocation42_spill] sm:$0xff] %v8172_v23  ;;  %v5148_v24 = vpop.f32.mrb[16].mxu1  ;;  %v6930_v25 = vpack.i.bf16 %v8170_v22, %v8162_v63  ;;  %v5068_v28 = vpop.f32.mrb[16].mxu0 }
 0x166   :  { %v5149_v30 = vpop.f32.mrb[17].mxu1  ;;  %v5069_v31 = vpop.f32.mrb[17].mxu0 }
 0x167   :  { %6931 = vrot.lane.b32.xlu1 %v6930_v25, %s7913_s12  ;;  %v8177_v32 = vadd.f32 %v5149_v30, %v5148_v24  ;;  %v8179_v36 = vadd.f32 %v5069_v31, %v5068_v28  ;;  %v8213_v60 = vpop.trf.xlu1 }
 0x168   :  { %10717 = vst [vmem:[#allocation53_spill] sm:$0xff] %v8213_v60 }
 0x169   :  { %10707 = vst [vmem:[#allocation43_spill] sm:$0xff] %v8179_v36  ;;  %v5151_v39 = vpop.f32.mrb[18].mxu1  ;;  %v5071_v42 = vpop.f32.mrb[18].mxu0 }
 0x16a   :  { %v5152_v44 = vpop.f32.mrb[19].mxu1  ;;  %v5072_v45 = vpop.f32.mrb[19].mxu0 }
 0x16b   :  { %v8185_v46 = vadd.f32 %v5152_v44, %v5151_v39  ;;  %v8187_v51 = vadd.f32 %v5072_v45, %v5071_v42 }
 0x16d   :  { %10710 = vst [vmem:[#allocation46_spill] sm:$0xff] %v8187_v51  ;;  %v5154_v52 = vpop.f32.mrb[20].mxu1  ;;  %v6935_v53 = vpack.i.bf16 %v8185_v46, %v8177_v32  ;;  %v5074_v54 = vpop.f32.mrb[20].mxu0 }
 0x16e   :  { %v5155_v57 = vpop.f32.mrb[21].mxu1  ;;  %v5075_v59 = vpop.f32.mrb[21].mxu0 }
 0x16f   :  { %6936 = vrot.lane.b32.xlu1 %v6935_v53, %s7913_s12  ;;  %v8192_v61 = vadd.f32 %v5155_v57, %v5154_v52  ;;  %v8194_v62 = vadd.f32 %v5075_v59, %v5074_v54  ;;  %v8211_v59 = vpop.trf.xlu0 }
 0x170   :  { %10716 = vst [vmem:[#allocation52_spill] sm:$0xff] %v8211_v59 }
 0x171   :  { %10711 = vst [vmem:[#allocation47_spill] sm:$0xff] %v8194_v62  ;;  %v5157_v17 = vpop.f32.mrb[22].mxu1  ;;  %v5077_v18 = vpop.f32.mrb[22].mxu0 }
 0x172   :  { %v5158_v24 = vpop.f32.mrb[23].mxu1  ;;  %v5078_v28 = vpop.f32.mrb[23].mxu0 }
 0x173   :  { %v8200_v30 = vadd.f32 %v5158_v24, %v5157_v17  ;;  %v8202_v31 = vadd.f32 %v5078_v28, %v5077_v18 }
 0x175   :  { %10714 = vst [vmem:[#allocation50_spill] sm:$0xff] %v8202_v31  ;;  %v5160_v39 = vpop.f32.mrb[24].mxu1  ;;  %v6940_v42 = vpack.i.bf16 %v8200_v30, %v8192_v61  ;;  %v5080_v44 = vpop.f32.mrb[24].mxu0 }
 0x176   :  { %v5161_v45 = vpop.f32.mrb[25].mxu1  ;;  %v5081_v52 = vpop.f32.mrb[25].mxu0 }
 0x177   :  { %6941 = vrot.lane.b32.xlu0 %v6940_v42, %s7913_s12  ;;  %v8207_v54 = vadd.f32 %v5161_v45, %v5160_v39  ;;  %v8209_v57 = vadd.f32 %v5081_v52, %v5080_v44 }
 0x179   :  { %10715 = vst [vmem:[#allocation51_spill] sm:$0xff] %v8209_v57  ;;  %v5163_v17 = vpop.f32.mrb[26].mxu1  ;;  %v5083_v18 = vpop.f32.mrb[26].mxu0 }
 0x17a   :  { %v5164_v24 = vpop.f32.mrb[27].mxu1  ;;  %v5084_v28 = vpop.f32.mrb[27].mxu0 }
 0x17b   :  { %v8215_v31 = vadd.f32 %v5164_v24, %v5163_v17  ;;  %6956 = vrot.lane.b32.xlu0 %v8140_v43, %s7914_s13  ;;  %v8219_v51 = vadd.f32 %v5084_v28, %v5083_v18  ;;  %v8227_v17 = vpop.trf.xlu0  ;;  %v8231_v43 = vpop.trf.xlu1 }
 0x17c   :  { %10719 = vst [vmem:[#allocation55_spill] sm:$0xff] %v8227_v17  ;;  %10721 = vst [vmem:[#allocation57_spill] sm:$0xff] %v8231_v43 }
 0x17d   :  { %10718 = vst [vmem:[#allocation54_spill] sm:$0xff] %v8219_v51  ;;  %v5166_v39 = vpop.f32.mrb[28].mxu1  ;;  %v6945_v44 = vpack.i.bf16 %v8215_v31, %v8207_v54  ;;  %v5086_v45 = vpop.f32.mrb[28].mxu0 }
 0x17e   :  { %v5167_v52 = vpop.f32.mrb[29].mxu1  ;;  %v5087_v23 = vpop.f32.mrb[29].mxu0 }
 0x17f   :  { %6946 = vrot.lane.b32.xlu1 %v6945_v44, %s7913_s12  ;;  %6966 = vrot.lane.b32.xlu0 %v6930_v25, %s7914_s13  ;;  %v8225_v56 = vadd.f32 %v5167_v52, %v5166_v39  ;;  %v8229_v24 = vadd.f32 %v5087_v23, %v5086_v45  ;;  %v8242_v23 = vpop.trf.xlu0  ;;  %v8247_v45 = vpop.trf.xlu1 }
 0x180   :  { %10723 = vst [vmem:[#allocation59_spill] sm:$0xff] %v8242_v23  ;;  %10724 = vst [vmem:[#allocation60_spill] sm:$0xff] %v8247_v45 }
 0x181   :  { %10720 = vst [vmem:[#allocation56_spill] sm:$0xff] %v8229_v24  ;;  %v5169_v18 = vpop.f32.mrb[30].mxu1  ;;  %v5089_v28 = vpop.f32.mrb[30].mxu0 }
 0x182   :  { %v5170_v51 = vpop.f32.mrb[31].mxu1  ;;  %v5090_v27 = vpop.f32.mrb[31].mxu0 }
 0x183   :  { %v8233_v57 = vadd.f32 %v5170_v51, %v5169_v18  ;;  %6951 = vrot.lane.b32.xlu1 %v8124_v29, %s7914_s13  ;;  %6976 = vrot.lane.b32.xlu0 %v6940_v42, %s7914_s13  ;;  %v8238_v25 = vadd.f32 %v5090_v27, %v5089_v28  ;;  %v8249_v51 = vpop.trf.xlu0  ;;  %v8252_v29 = vpop.trf.xlu1 }
 0x184   :  { %10725 = vst [vmem:[#allocation61_spill] sm:$0xff] %v8249_v51  ;;  %10726 = vst [vmem:[#allocation62_spill] sm:$0xff] %v8252_v29 }
 0x185   :  { %10722 = vst [vmem:[#allocation58_spill] sm:$0xff] %v8238_v25  ;;  %v6985_v39 = vpack.i.bf16 %v8233_v57, %v8225_v56 }
 0x187   :  { %6986 = vrot.lane.b32.xlu0 %v6985_v39, %s7913_s12  ;;  %6961 = vrot.lane.b32.xlu1 %v8158_v58, %s7914_s13  ;;  %v8255_v27 = vpop.trf.xlu0  ;;  %v8257_v42 = vpop.trf.xlu1 }
 0x188   :  { %10727 = vst [vmem:[#allocation63_spill] sm:$0xff] %v8255_v27  ;;  %10728 = vst [vmem:[#allocation64_spill] sm:$0xff] %v8257_v42 }
 0x18b   :  { %6971 = vrot.lane.b32.xlu1 %v6935_v53, %s7914_s13  ;;  %v8261_v52 = vpop.trf.xlu0  ;;  %v8265_v58 = vpop.trf.xlu1 }
 0x18c   :  { %10729 = vst [vmem:[#allocation65_spill] sm:$0xff] %v8261_v52  ;;  %10730 = vst [vmem:[#allocation66_spill] sm:$0xff] %v8265_v58 }
 0x18f   :  { %6981 = vrot.lane.b32.xlu1 %v6945_v44, %s7914_s13  ;;  %v8267_v18 = vpop.trf.xlu0  ;;  %v8269_v53 = vpop.trf.xlu1 }
 0x190   :  { %10731 = vst [vmem:[#allocation67_spill] sm:$0xff] %v8267_v18  ;;  %10732 = vst [vmem:[#allocation68_spill] sm:$0xff] %v8269_v53 }
 0x193   :  { %1671 = vrot.lane.b32.xlu1 %v8225_v56, %s7914_s13  ;;  %v8271_v28 = vpop.trf.xlu0  ;;  %v8273_v44 = vpop.trf.xlu1 }
 0x194   :  { %10733 = vst [vmem:[#allocation69_spill] sm:$0xff] %v8271_v28  ;;  %10734 = vst [vmem:[#allocation70_spill] sm:$0xff] %v8273_v44 }
 0x197   :  { %1673 = vrot.lane.b32.xlu1 %v8233_v57, %s7914_s13  ;;  %v8275_v24 = vpop.trf.xlu0  ;;  %v8277_v36 = vpop.trf.xlu1 }
 0x198   :  { %10735 = vst [vmem:[#allocation71_spill] sm:$0xff] %v8275_v24  ;;  %10736 = vst [vmem:[#allocation72_spill] sm:$0xff] %v8277_v36 }
 0x19b   :  { %v8279_v1 = vpop.trf.xlu0  ;;  %v8281_v42 = vpop.trf.xlu1 }
 0x19c   :  { %10737 = vst [vmem:[#allocation73_spill] sm:$0xff] %v8279_v1  ;;  %10738 = vst [vmem:[#allocation74_spill] sm:$0xff] %v8281_v42 }
 0x19f   :  { %v8283_v41 = vpop.trf.xlu0  ;;  %v8285_v44 = vpop.trf.xlu1 }
 0x1a0   :  { %10739 = vst [vmem:[#allocation75_spill] sm:$0xff] %v8283_v41  ;;  %10740 = vst [vmem:[#allocation76_spill] sm:$0xff] %v8285_v44 }
 0x1a3   :  { %v8287_v36 = vpop.trf.xlu0 }
 0x1a4   :  { %10741 = vst [vmem:[#allocation77_spill] sm:$0xff] %v8287_v36 }
 0x1a8   :  { %v5830_v39 = vpop.f32.mrb[32].mxu0 }
 0x1a9   :  { %v1789_v25 = vpop.f32.mrb[33].mxu0 }
 0x1aa   :  { %v6524_v62 = vpack.c.bf16 %v5830_v39, %v1789_v25  ;;  %v10478_v25 = vlaneseq }
 0x1ac   :  { %6525 = vmatprep.subr.bf16.mxu1 %v6524_v62  ;;  %v8292_v34 = vand.u32 127, %v10478_v25 }
 0x1ad   :  { %6527 = vmatpush3.bf16.msra.mxu1 %v6524_v62  ;;  %v8289_v62 = vpop.trf.xlu1 }
 0x1ae   :  { %10742 = vst [vmem:[#allocation78_spill] sm:$0xff] %v8289_v62  ;;  %vm1497_vm0 = vcmp.eq.s32.totalorder %v8292_v34, 0  ;;  %vm1546_vm1 = vcmp.eq.s32.totalorder %v8292_v34, 127 }
 0x1af   :  { %vm8512_vm2 = vmneg %vm1497_vm0 }
 0x1b0   :  { %v5833_v48 = vpop.f32.mrb[34].mxu0  ;;  %vm9042_vm4 = vmneg %vm1546_vm1 }
 0x1b1   :  { %v1799_v58 = vpop.f32.mrb[35].mxu0  ;;  %v8295_v60 = vpop.trf.xlu1 }
 0x1b2   :  { %v6528_v53 = vpack.c.bf16 %v5833_v48, %v1799_v58  ;;  %10743 = vst [vmem:[#allocation79_spill] sm:$0xff] %v8295_v60 }
 0x1b4   :  { %6529 = vmatprep.subr.bf16.mxu1 %v6528_v53 }
 0x1b5   :  { %6531 = vmatpush3.bf16.msra.mxu1 %v6528_v53 }
 0x1b8   :  { %v5836_v29 = vpop.f32.mrb[36].mxu0 }
 0x1b9   :  { %v1809_v45 = vpop.f32.mrb[37].mxu0 }
 0x1ba   :  { %v6532_v39 = vpack.c.bf16 %v5836_v29, %v1809_v45 }
 0x1bc   :  { %6533 = vmatprep.subr.bf16.mxu1 %v6532_v39 }
 0x1bd   :  { %6535 = vmatpush3.bf16.msra.mxu1 %v6532_v39 }
 0x1c0   :  { %v5839_v48 = vpop.f32.mrb[38].mxu0 }
 0x1c1   :  { %v6917_v58 = vpop.permute.xlu0 %6916  ;;  %v1819_v53 = vpop.f32.mrb[39].mxu0 }
 0x1c2   :  { %v6919_v42 = vunpack.i.h.bf16 %v6917_v58  ;;  %v6918_v44 = vunpack.i.l.bf16 %v6917_v58  ;;  %v6536_v43 = vpack.c.bf16 %v5839_v48, %v1819_v53 }
 0x1c4   :  { %v1628_v45 = vsel %vm1497_vm0, 0.0, %v6919_v42  ;;  %v1627_v29 = vsel %vm1497_vm0, 0.0, %v6918_v44  ;;  %6537 = vmatprep.subr.bf16.mxu1 %v6536_v43 }
 0x1c5   :  { %v6990_v39 = vpack.i.bf16 %v1627_v29, %v8112_v19  ;;  %6539 = vmatpush3.bf16.msra.mxu1 %v6536_v43  ;;  %v6992_v25 = vpack.i.bf16 %v1628_v45, %v8118_v26 }
 0x1c7   :  { %6991 = vxpose.xlu0.b32.start [1/16] %v6990_v39, 128 }
 0x1c8   :  { %v5842_v62 = vpop.f32.mrb[40].mxu0 }
 0x1c9   :  { %v6922_v20 = vpop.permute.xlu1 %6921  ;;  %v1829_v16 = vpop.f32.mrb[41].mxu0 }
 0x1ca   :  { %v6924_v58 = vunpack.i.h.bf16 %v6922_v20  ;;  %v6923_v48 = vunpack.i.l.bf16 %v6922_v20  ;;  %v6540_v53 = vpack.c.bf16 %v5842_v62, %v1829_v16 }
 0x1cb   :  { %6993 = vxpose.xlu0.b32.cont [2/16] %v6992_v25, 128 }
 0x1cc   :  { %v1630_v42 = vsel %vm1497_vm0, 0.0, %v6924_v58  ;;  %v1629_v44 = vsel %vm1497_vm0, 0.0, %v6923_v48  ;;  %6541 = vmatprep.subr.bf16.mxu1 %v6540_v53 }
 0x1cd   :  { %v6994_v19 = vpack.i.bf16 %v1629_v44, %v8128_v33  ;;  %6543 = vmatpush3.bf16.msra.mxu1 %v6540_v53  ;;  %v6996_v26 = vpack.i.bf16 %v1630_v42, %v8134_v40 }
 0x1cf   :  { %6995 = vxpose.xlu0.b32.cont [3/16] %v6994_v19, 128 }
 0x1d0   :  { %v5845_v43 = vpop.f32.mrb[42].mxu0 }
 0x1d1   :  { %v6927_v45 = vpop.permute.xlu1 %6926  ;;  %v1839_v29 = vpop.f32.mrb[43].mxu0 }
 0x1d2   :  { %v6929_v39 = vunpack.i.h.bf16 %v6927_v45  ;;  %v6928_v20 = vunpack.i.l.bf16 %v6927_v45  ;;  %v6544_v16 = vpack.c.bf16 %v5845_v43, %v1839_v29 }
 0x1d3   :  { %6997 = vxpose.xlu0.b32.cont [4/16] %v6996_v26, 128 }
 0x1d4   :  { %v1632_v25 = vsel %vm1497_vm0, 0.0, %v6929_v39  ;;  %v1631_v62 = vsel %vm1497_vm0, 0.0, %v6928_v20  ;;  %6545 = vmatprep.subr.bf16.mxu1 %v6544_v16 }
 0x1d5   :  { %v6998_v33 = vpack.i.bf16 %v1631_v62, %v8144_v47  ;;  %6547 = vmatpush3.bf16.msra.mxu1 %v6544_v16  ;;  %v7000_v40 = vpack.i.bf16 %v1632_v25, %v8152_v55 }
 0x1d7   :  { %6999 = vxpose.xlu0.b32.cont [5/16] %v6998_v33, 128 }
 0x1d8   :  { %v5848_v58 = vpop.f32.mrb[44].mxu0 }
 0x1d9   :  { %v6932_v48 = vpop.permute.xlu1 %6931  ;;  %v1849_v53 = vpop.f32.mrb[45].mxu0 }
 0x1da   :  { %v6934_v42 = vunpack.i.h.bf16 %v6932_v48  ;;  %v6933_v44 = vunpack.i.l.bf16 %v6932_v48  ;;  %v6548_v19 = vpack.c.bf16 %v5848_v58, %v1849_v53 }
 0x1db   :  { %7001 = vxpose.xlu0.b32.cont [6/16] %v7000_v40, 128 }
 0x1dc   :  { %v1634_v26 = vsel %vm1497_vm0, 0.0, %v6934_v42  ;;  %v1633_v43 = vsel %vm1497_vm0, 0.0, %v6933_v44  ;;  %6549 = vmatprep.subr.bf16.mxu1 %v6548_v19 }
 0x1dd   :  { %v7002_v47 = vpack.i.bf16 %v1633_v43, %v8162_v63  ;;  %6551 = vmatpush3.bf16.msra.mxu1 %v6548_v19  ;;  %v7004_v55 = vpack.i.bf16 %v1634_v26, %v8170_v22 }
 0x1df   :  { %7003 = vxpose.xlu0.b32.cont [7/16] %v7002_v47, 128 }
 0x1e0   :  { %v5851_v45 = vpop.f32.mrb[46].mxu0 }
 0x1e1   :  { %v6937_v29 = vpop.permute.xlu1 %6936  ;;  %v1859_v39 = vpop.f32.mrb[47].mxu0 }
 0x1e2   :  { %v6939_v20 = vunpack.i.h.bf16 %v6937_v29  ;;  %v6938_v16 = vunpack.i.l.bf16 %v6937_v29  ;;  %v6552_v25 = vpack.c.bf16 %v5851_v45, %v1859_v39 }
 0x1e3   :  { %7005 = vxpose.xlu0.b32.cont [8/16] %v7004_v55, 128 }
 0x1e4   :  { %v1636_v62 = vsel %vm1497_vm0, 0.0, %v6939_v20  ;;  %v1635_v33 = vsel %vm1497_vm0, 0.0, %v6938_v16  ;;  %6553 = vmatprep.subr.bf16.mxu1 %v6552_v25 }
 0x1e5   :  { %v7006_v63 = vpack.i.bf16 %v1635_v33, %v8177_v32  ;;  %6555 = vmatpush3.bf16.msra.mxu1 %v6552_v25  ;;  %v7008_v22 = vpack.i.bf16 %v1636_v62, %v8185_v46 }
 0x1e7   :  { %7007 = vxpose.xlu0.b32.cont [9/16] %v7006_v63, 128 }
 0x1e8   :  { %5885 = vmatmul.mubr.f32.vlgmr.msra.gmra.mrb[32].mxu1 %v8088_v0 }
 0x1e9   :  { %v6942_v40 = vpop.permute.xlu0 %6941  ;;  %5887 = vmatprep.mubr.f32.mxu1 %v8090_v2 }
 0x1ea   :  { %v6944_v58 = vunpack.i.h.bf16 %v6942_v40  ;;  %v6943_v48 = vunpack.i.l.bf16 %v6942_v40 }
 0x1eb   :  { %7009 = vxpose.xlu0.b32.cont [10/16] %v7008_v22, 128 }
 0x1ec   :  { %v1638_v53 = vsel %vm1497_vm0, 0.0, %v6944_v58  ;;  %v1637_v42 = vsel %vm1497_vm0, 0.0, %v6943_v48  ;;  %5888 = vmatmul.mubr.f32.gmra.mrb[34].mxu1 %v8092_v5 }
 0x1ed   :  { %v7010_v32 = vpack.i.bf16 %v1637_v42, %v8192_v61  ;;  %v6957_v46 = vpop.permute.xlu0 %6956  ;;  %5890 = vmatprep.mubr.f32.mxu1 %v8094_v6  ;;  %v7012_v44 = vpack.i.bf16 %v1638_v53, %v8200_v30  ;;  %v8818_v6 = vld [vmem:[#allocation3 + $0xe0] sm:$0xff] }
 0x1ee   :  { %v6959_v48 = vunpack.i.h.bf16 %v6957_v46  ;;  %10835 = vst [vmem:[#allocation124_spill] sm:$0xff] %v8818_v6 }
 0x1ef   :  { %7011 = vxpose.xlu0.b32.cont [11/16] %v7010_v32, 128 }
 0x1f0   :  { %5891 = vmatmul.mubr.f32.gmra.mrb[36].mxu1 %v8096_v7 }
 0x1f1   :  { %v6947_v19 = vpop.permute.xlu1 %6946  ;;  %v8338_v26 = vpop.permute.xlu0 %6966  ;;  %5893 = vmatprep.mubr.f32.mxu1 %v8098_v8 }
 0x1f2   :  { %v6949_v43 = vunpack.i.h.bf16 %v6947_v19  ;;  %v6948_v47 = vunpack.i.l.bf16 %v6947_v19  ;;  %v6968_v19 = vunpack.i.l.bf16 %v8338_v26 }
 0x1f3   :  { %7013 = vxpose.xlu0.b32.cont [12/16] %v7012_v44, 128 }
 0x1f4   :  { %v1640_v55 = vsel %vm1497_vm0, 0.0, %v6949_v43  ;;  %v1639_v61 = vsel %vm1497_vm0, 0.0, %v6948_v47  ;;  %5894 = vmatmul.mubr.f32.gmra.mrb[38].mxu1 %v8100_v9  ;;  %v6969_v47 = vunpack.i.h.bf16 %v8338_v26 }
 0x1f5   :  { %v7014_v30 = vpack.i.bf16 %v1639_v61, %v8207_v54  ;;  %v6952_v45 = vpop.permute.xlu1 %6951  ;;  %v8347_v29 = vpop.permute.xlu0 %6976  ;;  %5896 = vmatprep.mubr.f32.mxu1 %v8102_v10  ;;  %v7016_v16 = vpack.i.bf16 %v1640_v55, %v8215_v31  ;;  %v6958_v54 = vunpack.i.l.bf16 %v6957_v46  ;;  %v1681_v55 = vsel %vm1546_vm1, 0.0, %v6968_v19  ;;  %v8803_v10 = vld [vmem:[#allocation3 + $0xd0] sm:$0xff] }
 0x1f6   :  { %v6954_v39 = vunpack.i.h.bf16 %v6952_v45  ;;  %v6953_v20 = vunpack.i.l.bf16 %v6952_v45  ;;  %v1682_v45 = vsel %vm1546_vm1, 0.0, %v6969_v47  ;;  %v10752_v47 = vld [vmem:[#allocation64_spill] sm:$0xff]  ;;  %10833 = vst [vmem:[#allocation122_spill] sm:$0xff] %v8803_v10 }
 0x1f7   :  { %7015 = vxpose.xlu0.b32.cont [13/16] %v7014_v30, 128  ;;  %v1677_v53 = vsel %vm1546_vm1, 0.0, %v6958_v54 }
 0x1f8   :  { %5897 = vmatmul.mubr.f32.gmra.mrb[40].mxu1 %v8104_v11  ;;  %v1675_v25 = vsel %vm1546_vm1, 0.0, %v6953_v20  ;;  %v1676_v22 = vsel %vm1546_vm1, 0.0, %v6954_v39  ;;  %v6978_v20 = vunpack.i.l.bf16 %v8347_v29  ;;  %v8796_v11 = vld [vmem:[#allocation3 + $0xc8] sm:$0xff] }
 0x1f9   :  { %2371 = vxpose.xlu1.b32.start [1/16] %v1675_v25, 128  ;;  %v6987_v62 = vpop.permute.xlu0 %6986  ;;  %5899 = vmatprep.mubr.f32.mxu1 %v8106_v12  ;;  %v6962_v32 = vpop.permute.xlu1 %6961  ;;  %v6979_v25 = vunpack.i.h.bf16 %v8347_v29  ;;  %10832 = vst [vmem:[#allocation121_spill] sm:$0xff] %v8796_v11 }
 0x1fa   :  { %v6989_v33 = vunpack.i.h.bf16 %v6987_v62  ;;  %v6988_v63 = vunpack.i.l.bf16 %v6987_v62  ;;  %v6963_v44 = vunpack.i.l.bf16 %v6962_v32  ;;  %v6964_v46 = vunpack.i.h.bf16 %v6962_v32 }
 0x1fb   :  { %7017 = vxpose.xlu0.b32.cont [14/16] %v7016_v16, 128  ;;  %v1685_v62 = vsel %vm1546_vm1, 0.0, %v6978_v20  ;;  %v10759_v20 = vld [vmem:[#allocation74_spill] sm:$0xff] }
 0x1fc   :  { %v1642_v31 = vsel %vm1497_vm0, 0.0, %v6989_v33  ;;  %v1641_v40 = vsel %vm1497_vm0, 0.0, %v6988_v63  ;;  %5900 = vmatmul.mubr.f32.gmra.mrb[42].mxu1 %v8108_v13  ;;  %v1680_v43 = vsel %vm1546_vm1, 0.0, %v6964_v46  ;;  %v1686_v63 = vsel %vm1546_vm1, 0.0, %v6979_v25  ;;  %v10749_v46 = vld [vmem:[#allocation60_spill] sm:$0xff] }
 0x1fd   :  { %v7018_v58 = vpack.i.bf16 %v1641_v40, %v8225_v56  ;;  %2372 = vxpose.xlu1.b32.cont [2/16] %v1676_v22, 128  ;;  %5902 = vmatprep.mubr.f32.mxu1 %v8110_v14  ;;  %v7020_v42 = vpack.i.bf16 %v1642_v31, %v8233_v57  ;;  %v1678_v56 = vsel %vm1546_vm1, 0.0, %v6959_v48  ;;  %v1679_v57 = vsel %vm1546_vm1, 0.0, %v6963_v44  ;;  %v6972_v61 = vpop.permute.xlu1 %6971  ;;  %v10744_v40 = vld [vmem:[#allocation49_spill] sm:$0xff]  ;;  %v10761_v25 = vld [vmem:[#allocation76_spill] sm:$0xff] }
 0x1fe   :  { %v6973_v30 = vunpack.i.l.bf16 %v6972_v61  ;;  %v6974_v39 = vunpack.i.h.bf16 %v6972_v61  ;;  %v10745_v48 = vld [vmem:[#allocation29_spill] sm:$0xff]  ;;  %v10754_v61 = vld [vmem:[#allocation35_spill] sm:$0xff] }
 0x1ff   :  { %7019 = vxpose.xlu0.b32.cont [15/16] %v7018_v58, 128 }
 0x200   :  { %5903 = vmatmul.mubr.f32.gmra.mrb[44].mxu1 %v8116_v21  ;;  %v1683_v26 = vsel %vm1546_vm1, 0.0, %v6973_v30  ;;  %v1684_v16 = vsel %vm1546_vm1, 0.0, %v6974_v39  ;;  %v10755_v30 = vld [vmem:[#allocation68_spill] sm:$0xff]  ;;  %v10757_v39 = vld [vmem:[#allocation39_spill] sm:$0xff] }
 0x201   :  { %2373 = vxpose.xlu1.b32.cont [3/16] %v1677_v53, 128  ;;  %5905 = vmatprep.mubr.f32.mxu1 %v8132_v35  ;;  %v6982_v54 = vpop.permute.xlu1 %6981  ;;  %v10746_v53 = vld [vmem:[#allocation53_spill] sm:$0xff] }
 0x202   :  { %v6983_v33 = vunpack.i.l.bf16 %v6982_v54  ;;  %v6984_v22 = vunpack.i.h.bf16 %v6982_v54  ;;  %v10763_v54 = vld [vmem:[#allocation47_spill] sm:$0xff] }
 0x203   :  { %7021 = vxpose.xlu0.b32.end [16/16] %v7020_v42, 128  ;;  %v10747_v42 = vld [vmem:[#allocation57_spill] sm:$0xff] }
 0x204   :  { %5906 = vmatmul.mubr.f32.gmra.mrb[46].mxu1 %v8150_v50  ;;  %v1687_v29 = vsel %vm1546_vm1, 0.0, %v6983_v33  ;;  %v1688_v58 = vsel %vm1546_vm1, 0.0, %v6984_v22 }
 0x205   :  { %2374 = vxpose.xlu1.b32.cont [4/16] %v1678_v56, 128  ;;  %5908 = vmatprep.mubr.f32.mxu1 %v8148_v49  ;;  %v1672_v31 = vpop.permute.xlu1 %1671  ;;  %v10748_v56 = vld [vmem:[#allocation32_spill] sm:$0xff] }
 0x206   :  { %v1689_v32 = vsel %vm1546_vm1, 0.0, %v1672_v31 }
 0x208   :  { %5909 = vmatmul.mubr.f32.gmra.mrb[48].mxu1 %v8166_v3 }
 0x209   :  { %2375 = vxpose.xlu1.b32.cont [5/16] %v1679_v57, 128  ;;  %5911 = vmatprep.mubr.f32.mxu1 %v8181_v37  ;;  %v1674_v44 = vpop.permute.xlu1 %1673  ;;  %v10750_v57 = vld [vmem:[#allocation62_spill] sm:$0xff] }
 0x20a   :  { %v1690_v19 = vsel %vm1546_vm1, 0.0, %v1674_v44  ;;  %v10771_v44 = vld [vmem:[#allocation38_spill] sm:$0xff] }
 0x20c   :  { %5912 = vmatmul.mubr.f32.gmra.mrb[50].mxu1 %v8196_v15 }
 0x20d   :  { %2376 = vxpose.xlu1.b32.cont [6/16] %v1680_v43, 128  ;;  %5914 = vmatprep.mubr.f32.mxu1 %v8211_v59  ;;  %v10751_v43 = vld [vmem:[#allocation34_spill] sm:$0xff] }
 0x210   :  { %5915 = vmatmul.mubr.f32.gmra.mrb[52].mxu1 %v8227_v17 }
 0x211   :  { %2377 = vxpose.xlu1.b32.cont [7/16] %v1681_v55, 128  ;;  %5917 = vmatprep.mubr.f32.mxu1 %v8242_v23  ;;  %v10753_v55 = vld [vmem:[#allocation66_spill] sm:$0xff] }
 0x214   :  { %5918 = vmatmul.mubr.f32.gmra.mrb[54].mxu1 %v8249_v51 }
 0x215   :  { %2378 = vxpose.xlu1.b32.cont [8/16] %v1682_v45, 128  ;;  %5920 = vmatprep.mubr.f32.mxu1 %v8255_v27  ;;  %v10756_v45 = vld [vmem:[#allocation70_spill] sm:$0xff] }
 0x218   :  { %5921 = vmatmul.mubr.f32.gmra.mrb[56].mxu1 %v8261_v52 }
 0x219   :  { %2379 = vxpose.xlu1.b32.cont [9/16] %v1683_v26, 128  ;;  %5923 = vmatprep.mubr.f32.mxu1 %v8267_v18  ;;  %v10758_v26 = vld [vmem:[#allocation72_spill] sm:$0xff] }
 0x21c   :  { %5924 = vmatmul.mubr.f32.gmra.mrb[58].mxu1 %v8271_v28 }
 0x21d   :  { %2380 = vxpose.xlu1.b32.cont [10/16] %v1684_v16, 128  ;;  %5926 = vmatprep.mubr.f32.mxu1 %v8275_v24  ;;  %v10760_v16 = vld [vmem:[#allocation43_spill] sm:$0xff] }
 0x220   :  { %5927 = vmatmul.mubr.f32.gmra.mrb[60].mxu1 %v8279_v1 }
 0x221   :  { %2381 = vxpose.xlu1.b32.cont [11/16] %v1685_v62, 128  ;;  %5929 = vmatprep.mubr.f32.mxu1 %v8283_v41  ;;  %v10762_v62 = vld [vmem:[#allocation78_spill] sm:$0xff] }
 0x224   :  { %5930 = vmatmul.mubr.f32.gmra.mrb[62].mxu1 %v8287_v36 }
 0x225   :  { %2382 = vxpose.xlu1.b32.cont [12/16] %v1686_v63, 128  ;;  %5932 = vmatprep.mubr.f32.mxu1 %v8168_v4  ;;  %v10765_v63 = vld [vmem:[#allocation51_spill] sm:$0xff] }
 0x228   :  { %5933 = vmatmul.mubr.f32.gmra.mrb[64].mxu1 %v8183_v38 }
 0x229   :  { %2383 = vxpose.xlu1.b32.cont [13/16] %v1687_v29, 128  ;;  %5935 = vmatprep.mubr.f32.mxu1 %v10744_v40  ;;  %v10767_v29 = vld [vmem:[#allocation56_spill] sm:$0xff] }
 0x22c   :  { %1498 = vrot.lane.b32.xlu0 %v10745_v48, %s7913_s12  ;;  %5936 = vmatmul.mubr.f32.gmra.mrb[66].mxu1 %v10746_v53 }
 0x22d   :  { %2384 = vxpose.xlu1.b32.cont [14/16] %v1688_v58, 128  ;;  %5938 = vmatprep.mubr.f32.mxu1 %v10747_v42  ;;  %v10769_v58 = vld [vmem:[#allocation31_spill] sm:$0xff] }
 0x230   :  { %1502 = vrot.lane.b32.xlu0 %v10748_v56, %s7913_s12  ;;  %5939 = vmatmul.mubr.f32.gmra.mrb[68].mxu1 %v10749_v46 }
 0x231   :  { %2385 = vxpose.xlu1.b32.cont [15/16] %v1689_v32, 128  ;;  %5941 = vmatprep.mubr.f32.mxu1 %v10750_v57 }
 0x234   :  { %1504 = vrot.lane.b32.xlu0 %v10751_v43, %s7913_s12  ;;  %5942 = vmatmul.mubr.f32.gmra.mrb[70].mxu1 %v10752_v47  ;;  %v10781_v47 = vld [vmem:[#allocation58_spill] sm:$0xff] }
 0x235   :  { %2386 = vxpose.xlu1.b32.end [16/16] %v1690_v19, 128  ;;  %5944 = vmatprep.mubr.f32.mxu1 %v10753_v55 }
 0x238   :  { %1506 = vrot.lane.b32.xlu0 %v10754_v61, %s7913_s12  ;;  %5945 = vmatmul.mubr.f32.gmra.mrb[72].mxu1 %v10755_v30  ;;  %v10779_v30 = vld [vmem:[#allocation54_spill] sm:$0xff] }
 0x239   :  { %5947 = vmatprep.mubr.f32.mxu1 %v10756_v45 }
 0x23c   :  { %1510 = vrot.lane.b32.xlu0 %v10757_v39, %s7913_s12  ;;  %5948 = vmatmul.mubr.f32.gmra.mrb[74].mxu1 %v10758_v26  ;;  %v10777_v26 = vld [vmem:[#allocation50_spill] sm:$0xff] }
 0x23d   :  { %5950 = vmatprep.mubr.f32.mxu1 %v10759_v20 }
 0x240   :  { %1514 = vrot.lane.b32.xlu0 %v10760_v16, %s7913_s12  ;;  %5951 = vmatmul.mubr.f32.gmra.mrb[76].mxu1 %v10761_v25  ;;  %v10775_v25 = vld [vmem:[#allocation46_spill] sm:$0xff] }
 0x241   :  { %5953 = vmatprep.mubr.f32.mxu1 %v10762_v62 }
 0x244   :  { %1518 = vrot.lane.b32.xlu0 %v10763_v54, %s7913_s12  ;;  %5954 = vmatmul.mubr.f32.gmra.mrb[78].mxu1 %v8295_v60  ;;  %v10773_v60 = vld [vmem:[#allocation42_spill] sm:$0xff] }
 0x247   :  { %v8447_v33 = vpop.trf.xlu0 }
 0x248   :  { %10764 = vst [vmem:[#allocation29_spill] sm:$0xff] %v8447_v33  ;;  %1522 = vrot.lane.b32.xlu0 %v10765_v63, %s7913_s12  ;;  %v10487_v38 = vunpack.i.l.bf16 %v8447_v33 }
 0x24a   :  { %2467 = vmatprep.mubr.f32.mxu0 %v10487_v38 }
 0x24b   :  { %v8451_v22 = vpop.trf.xlu0 }
 0x24c   :  { %10766 = vst [vmem:[#allocation32_spill] sm:$0xff] %v8451_v22  ;;  %1526 = vrot.lane.b32.xlu0 %v10767_v29, %s7913_s12 }
 0x24f   :  { %v8455_v31 = vpop.trf.xlu0 }
 0x250   :  { %10768 = vst [vmem:[#allocation34_spill] sm:$0xff] %v8455_v31 }
 0x253   :  { %1500 = vrot.lane.b32.xlu1 %v10769_v58, %s7913_s12  ;;  %v8459_v32 = vpop.trf.xlu0 }
 0x254   :  { %10770 = vst [vmem:[#allocation35_spill] sm:$0xff] %v8459_v32 }
 0x257   :  { %1508 = vrot.lane.b32.xlu1 %v10771_v44, %s7913_s12  ;;  %v8463_v19 = vpop.trf.xlu0 }
 0x258   :  { %10772 = vst [vmem:[#allocation39_spill] sm:$0xff] %v8463_v19 }
 0x25b   :  { %1512 = vrot.lane.b32.xlu1 %v10773_v60, %s7913_s12  ;;  %v8467_v62 = vpop.trf.xlu0 }
 0x25c   :  { %10774 = vst [vmem:[#allocation43_spill] sm:$0xff] %v8467_v62 }
 0x25f   :  { %1516 = vrot.lane.b32.xlu1 %v10775_v25, %s7913_s12  ;;  %v8471_v20 = vpop.trf.xlu0 }
 0x260   :  { %10776 = vst [vmem:[#allocation47_spill] sm:$0xff] %v8471_v20 }
 0x263   :  { %1520 = vrot.lane.b32.xlu1 %v10777_v26, %s7913_s12  ;;  %v8475_v45 = vpop.trf.xlu0 }
 0x264   :  { %10778 = vst [vmem:[#allocation51_spill] sm:$0xff] %v8475_v45 }
 0x267   :  { %1524 = vrot.lane.b32.xlu1 %v10779_v30, %s7913_s12  ;;  %v8479_v55 = vpop.trf.xlu0 }
 0x268   :  { %10780 = vst [vmem:[#allocation56_spill] sm:$0xff] %v8479_v55 }
 0x26b   :  { %1528 = vrot.lane.b32.xlu1 %v10781_v47, %s7913_s12  ;;  %3384 = vadd.xlane.f32.xlu0 %v10745_v48  ;;  %v8484_v57 = vpop.trf.xlu0 }
 0x26c   :  { %10782 = vst [vmem:[#allocation31_spill] sm:$0xff] %v8484_v57 }
 0x26f   :  { %3388 = vadd.xlane.f32.xlu0 %v10748_v56  ;;  %v8487_v46 = vpop.trf.xlu0 }
 0x270   :  { %10783 = vst [vmem:[#allocation38_spill] sm:$0xff] %v8487_v46 }
 0x273   :  { %3390 = vadd.xlane.f32.xlu0 %v10751_v43  ;;  %v8490_v42 = vpop.trf.xlu0 }
 0x274   :  { %10784 = vst [vmem:[#allocation42_spill] sm:$0xff] %v8490_v42 }
 0x277   :  { %3394 = vadd.xlane.f32.xlu0 %v10771_v44  ;;  %v8493_v53 = vpop.trf.xlu0 }
 0x278   :  { %10785 = vst [vmem:[#allocation46_spill] sm:$0xff] %v8493_v53 }
 0x27b   :  { %3398 = vadd.xlane.f32.xlu0 %v10773_v60  ;;  %v8496_v40 = vpop.trf.xlu0 }
 0x27c   :  { %10786 = vst [vmem:[#allocation50_spill] sm:$0xff] %v8496_v40 }
 0x27f   :  { %v8501_v4 = vpop.trf.xlu0 }
 0x280   :  { %10787 = vst [vmem:[#allocation54_spill] sm:$0xff] %v8501_v4 }
 0x283   :  { %v8503_v36 = vpop.trf.xlu0 }
 0x284   :  { %10788 = vst [vmem:[#allocation58_spill] sm:$0xff] %v8503_v36 }
 0x28f   :  { %3386 = vadd.xlane.f32.xlu1 %v10769_v58 }
 0x291   :  { %1549 = vrot.lane.b32.xlu0 %v10769_v58, %s7914_s13 }
 0x293   :  { %3392 = vadd.xlane.f32.xlu1 %v10754_v61 }
 0x297   :  { %3396 = vadd.xlane.f32.xlu1 %v10757_v39 }
 0x29e   :  { %v1499_v38 = vpop.permute.xlu0 %1498 }
 0x29f   :  { %6044 = vmatprep.mubr.msk.f32.mxu1 %vm8512_vm2, %v1499_v38 }
 0x2a8   :  { %1547 = vrot.lane.b32.xlu1 %v10745_v48, %s7914_s13 }
 0x2b0   :  { %3402 = vadd.xlane.f32.xlu0 %v10775_v25 }
 0x2bb   :  { %v5886_v1 = vpop.f32.mrb[32].mxu1 }
 0x2bc   :  { %v2068_v24 = vpop.f32.mrb[33].mxu1 }
 0x2bd   :  { %v6558_v28 = vpack.c.bf16 %v5886_v1, %v2068_v24 }
 0x2bf   :  { %v5889_v18 = vpop.f32.mrb[34].mxu1 }
 0x2c0   :  { %v2078_v52 = vpop.f32.mrb[35].mxu1 }
 0x2c1   :  { %v6562_v27 = vpack.c.bf16 %v5889_v18, %v2078_v52 }
 0x2c3   :  { %v5892_v51 = vpop.f32.mrb[36].mxu1 }
 0x2c4   :  { %v2088_v23 = vpop.f32.mrb[37].mxu1 }
 0x2c5   :  { %v6566_v17 = vpack.c.bf16 %v5892_v51, %v2088_v23 }
 0x2c6   :  { %1553 = vrot.lane.b32.xlu0 %v10751_v43, %s7914_s13 }
 0x2c7   :  { %v5895_v59 = vpop.f32.mrb[38].mxu1 }
 0x2c8   :  { %v2098_v15 = vpop.f32.mrb[39].mxu1 }
 0x2c9   :  { %v6570_v38 = vpack.c.bf16 %v5895_v59, %v2098_v15 }
 0x2cb   :  { %v5898_v37 = vpop.f32.mrb[40].mxu1 }
 0x2cc   :  { %v2108_v3 = vpop.f32.mrb[41].mxu1  ;;  %3400 = vadd.xlane.f32.xlu1 %v10760_v16 }
 0x2cd   :  { %v6574_v49 = vpack.c.bf16 %v5898_v37, %v2108_v3 }
 0x2cf   :  { %v5901_v50 = vpop.f32.mrb[42].mxu1 }
 0x2d0   :  { %v2118_v35 = vpop.f32.mrb[43].mxu1 }
 0x2d1   :  { %v6578_v1 = vpack.c.bf16 %v5901_v50, %v2118_v35 }
 0x2d3   :  { %v5904_v24 = vpop.f32.mrb[44].mxu1 }
 0x2d4   :  { %v2128_v21 = vpop.f32.mrb[45].mxu1 }
 0x2d5   :  { %v6582_v52 = vpack.c.bf16 %v5904_v24, %v2128_v21 }
 0x2d7   :  { %v5907_v18 = vpop.f32.mrb[46].mxu1 }
 0x2d8   :  { %v2138_v14 = vpop.f32.mrb[47].mxu1 }
 0x2d9   :  { %v6586_v23 = vpack.c.bf16 %v5907_v18, %v2138_v14 }
 0x2db   :  { %v5910_v51 = vpop.f32.mrb[48].mxu1 }
 0x2dc   :  { %v2148_v13 = vpop.f32.mrb[49].mxu1 }
 0x2dd   :  { %v6556_v12 = vpack.c.bf16 %v5910_v51, %v2148_v13  ;;  %1551 = vrot.lane.b32.xlu1 %v10748_v56, %s7914_s13 }
 0x2df   :  { %v5913_v15 = vpop.f32.mrb[50].mxu1  ;;  %6557 = vmatprep.subr.bf16.mxu0 %v6556_v12 }
 0x2e0   :  { %v2158_v59 = vpop.f32.mrb[51].mxu1  ;;  %6559 = vmatpush3.bf16.msra.mxu0 %v6558_v28 }
 0x2e1   :  { %v6560_v3 = vpack.c.bf16 %v5913_v15, %v2158_v59 }
 0x2e3   :  { %v5916_v37 = vpop.f32.mrb[52].mxu1  ;;  %6561 = vmatprep.subr.bf16.mxu0 %v6560_v3 }
 0x2e4   :  { %v2168_v35 = vpop.f32.mrb[53].mxu1  ;;  %6563 = vmatpush3.bf16.msra.mxu0 %v6562_v27 }
 0x2e5   :  { %v6564_v50 = vpack.c.bf16 %v5916_v37, %v2168_v35  ;;  %3406 = vadd.xlane.f32.xlu0 %v10777_v26 }
 0x2e7   :  { %v5919_v21 = vpop.f32.mrb[54].mxu1  ;;  %6565 = vmatprep.subr.bf16.mxu0 %v6564_v50  ;;  %v10538_v50 = vunpack.i.h.bf16 %v8447_v33 }
 0x2e8   :  { %v2178_v14 = vpop.f32.mrb[55].mxu1  ;;  %6567 = vmatpush3.bf16.msra.mxu0 %v6566_v17 }
 0x2e9   :  { %v6568_v13 = vpack.c.bf16 %v5919_v21, %v2178_v14  ;;  %v10537_v21 = vunpack.i.l.bf16 %v8451_v22 }
 0x2eb   :  { %v5922_v24 = vpop.f32.mrb[56].mxu1  ;;  %6569 = vmatprep.subr.bf16.mxu0 %v6568_v13  ;;  %v8534_v13 = vpop.trf.xlu1 }
 0x2ec   :  { %v2188_v18 = vpop.f32.mrb[57].mxu1  ;;  %6571 = vmatpush3.bf16.msra.mxu0 %v6570_v38  ;;  %10791 = vst [vmem:[#allocation80_spill] sm:$0xff] %v8534_v13 }
 0x2ed   :  { %v6572_v12 = vpack.c.bf16 %v5922_v24, %v2188_v18 }
 0x2ef   :  { %v5925_v51 = vpop.f32.mrb[58].mxu1  ;;  %6573 = vmatprep.subr.bf16.mxu0 %v6572_v12  ;;  %v10534_v12 = vunpack.i.h.bf16 %v8455_v31 }
 0x2f0   :  { %v2198_v28 = vpop.f32.mrb[59].mxu1  ;;  %6575 = vmatpush3.bf16.msra.mxu0 %v6574_v49 }
 0x2f1   :  { %v6576_v15 = vpack.c.bf16 %v5925_v51, %v2198_v28  ;;  %v10514_v28 = vunpack.i.l.bf16 %v8459_v32 }
 0x2f3   :  { %v5928_v59 = vpop.f32.mrb[60].mxu1  ;;  %6577 = vmatprep.subr.bf16.mxu0 %v6576_v15 }
 0x2f4   :  { %v2208_v27 = vpop.f32.mrb[61].mxu1  ;;  %6579 = vmatpush3.bf16.msra.mxu0 %v6578_v1  ;;  %v10536_v1 = vunpack.i.h.bf16 %v8451_v22  ;;  %v8789_v22 = vld [vmem:[#allocation3 + $0xc0] sm:$0xff] }
 0x2f5   :  { %v6580_v3 = vpack.c.bf16 %v5928_v59, %v2208_v27  ;;  %v8546_v27 = vpop.trf.xlu1  ;;  %10831 = vst [vmem:[#allocation120_spill] sm:$0xff] %v8789_v22 }
 0x2f6   :  { %10792 = vst [vmem:[#allocation81_spill] sm:$0xff] %v8546_v27 }
 0x2f7   :  { %v5931_v37 = vpop.f32.mrb[62].mxu1  ;;  %6581 = vmatprep.subr.bf16.mxu0 %v6580_v3  ;;  %v10509_v3 = vunpack.i.h.bf16 %v8459_v32 }
 0x2f8   :  { %v2218_v35 = vpop.f32.mrb[63].mxu1  ;;  %6583 = vmatpush3.bf16.msra.mxu0 %v6582_v52 }
 0x2f9   :  { %v6584_v17 = vpack.c.bf16 %v5931_v37, %v2218_v35  ;;  %v10508_v35 = vunpack.i.l.bf16 %v8463_v19 }
 0x2fb   :  { %6585 = vmatprep.subr.bf16.mxu0 %v6584_v17  ;;  %1557 = vrot.lane.b32.xlu0 %v10771_v44, %s7914_s13  ;;  %v5934_v38 = vpop.f32.mrb[64].mxu1 }
 0x2fc   :  { %6587 = vmatpush3.bf16.msra.mxu0 %v6586_v23  ;;  %v2228_v49 = vpop.f32.mrb[65].mxu1  ;;  %v10535_v23 = vunpack.i.l.bf16 %v8455_v31  ;;  %v8782_v31 = vld [vmem:[#allocation3 + $0xb8] sm:$0xff] }
 0x2fd   :  { %v6588_v14 = vpack.c.bf16 %v5934_v38, %v2228_v49  ;;  %v10512_v49 = vunpack.i.h.bf16 %v8463_v19  ;;  %10830 = vst [vmem:[#allocation119_spill] sm:$0xff] %v8782_v31 }
 0x2ff   :  { %2468 = vmatmul.mubr.f32.vlgmr.msra.gmra.mrb[48].mxu0 %v10538_v50  ;;  %6589 = vmatprep.subr.bf16.mxu0 %v6588_v14  ;;  %v5937_v52 = vpop.f32.mrb[66].mxu1  ;;  %v8693_v50 = vld [vmem:[#allocation3 + $0x10] sm:$0xff] }
 0x300   :  { %2472 = vmatprep.mubr.f32.mxu0 %v10537_v21  ;;  %6591 = vmatpush3.bf16.msra.mxu0 %v6588_v14  ;;  %v2238_v24 = vpop.f32.mrb[67].mxu1  ;;  %10809 = vst [vmem:[#allocation98_spill] sm:$0xff] %v8693_v50 }
 0x301   :  { %3404 = vadd.xlane.f32.xlu1 %v10763_v54  ;;  %v6592_v18 = vpack.c.bf16 %v5937_v52, %v2238_v24  ;;  %v8557_v52 = vpop.trf.xlu1  ;;  %v10510_v24 = vunpack.i.l.bf16 %v8467_v62 }
 0x302   :  { %10793 = vst [vmem:[#allocation82_spill] sm:$0xff] %v8557_v52 }
 0x303   :  { %2473 = vmatmul.mubr.f32.gmra.mrb[50].mxu0 %v10536_v1  ;;  %6593 = vmatprep.subr.bf16.mxu0 %v6592_v18  ;;  %v5940_v51 = vpop.f32.mrb[68].mxu1  ;;  %v8687_v1 = vld [vmem:[#allocation3] sm:$0xff] }
 0x304   :  { %2477 = vmatprep.mubr.f32.mxu0 %v10535_v23  ;;  %6595 = vmatpush3.bf16.msra.mxu0 %v6592_v18  ;;  %v2248_v15 = vpop.f32.mrb[69].mxu1  ;;  %v8685_v23 = vld [vmem:[#allocation3 + $0x8] sm:$0xff]  ;;  %10808 = vst [vmem:[#allocation97_spill] sm:$0xff] %v8687_v1 }
 0x305   :  { %v6596_v59 = vpack.c.bf16 %v5940_v51, %v2248_v15  ;;  %v10511_v15 = vunpack.i.h.bf16 %v8467_v62  ;;  %10807 = vst [vmem:[#allocation96_spill] sm:$0xff] %v8685_v23  ;;  %v551_v21 = vadd.f32 %v8687_v1, %v8685_v23  ;;  %v8775_v62 = vld [vmem:[#allocation3 + $0xb0] sm:$0xff] }
 0x306   :  { %10829 = vst [vmem:[#allocation118_spill] sm:$0xff] %v8775_v62 }
 0x307   :  { %2478 = vmatmul.mubr.f32.gmra.mrb[52].mxu0 %v10534_v12  ;;  %6597 = vmatprep.subr.bf16.mxu0 %v6596_v59  ;;  %v5943_v37 = vpop.f32.mrb[70].mxu1  ;;  %v7560_v12 = vld [vmem:[#allocation9 + $0x8] sm:$0xff] }
 0x308   :  { %2482 = vmatprep.mubr.f32.mxu0 %v10514_v28  ;;  %6599 = vmatpush3.bf16.msra.mxu0 %v6596_v59  ;;  %v2258_v17 = vpop.f32.mrb[71].mxu1 }
 0x309   :  { %v6600_v38 = vpack.c.bf16 %v5943_v37, %v2258_v17  ;;  %v10513_v37 = vunpack.i.l.bf16 %v8471_v20 }
 0x30b   :  { %2483 = vmatmul.mubr.f32.gmra.mrb[54].mxu0 %v10509_v3  ;;  %6601 = vmatprep.subr.bf16.mxu0 %v6600_v38  ;;  %v5946_v14 = vpop.f32.mrb[72].mxu1  ;;  %v8568_v3 = vpop.trf.xlu1 }
 0x30c   :  { %2487 = vmatprep.mubr.f32.mxu0 %v10508_v35  ;;  %6603 = vmatpush3.bf16.msra.mxu0 %v6600_v38  ;;  %v2268_v18 = vpop.f32.mrb[73].mxu1  ;;  %10794 = vst [vmem:[#allocation83_spill] sm:$0xff] %v8568_v3  ;;  %v10533_v38 = vunpack.i.h.bf16 %v8471_v20 }
 0x30d   :  { %v6604_v51 = vpack.c.bf16 %v5946_v14, %v2268_v18  ;;  %v10526_v18 = vunpack.i.l.bf16 %v8475_v45 }
 0x30f   :  { %2488 = vmatmul.mubr.f32.gmra.mrb[56].mxu0 %v10512_v49  ;;  %6605 = vmatprep.subr.bf16.mxu0 %v6604_v51  ;;  %v5949_v59 = vpop.f32.mrb[74].mxu1  ;;  %v10515_v49 = vunpack.i.l.bf16 %v8479_v55 }
 0x310   :  { %2492 = vmatprep.mubr.f32.mxu0 %v10510_v24  ;;  %6607 = vmatpush3.bf16.msra.mxu0 %v6604_v51  ;;  %v2278_v17 = vpop.f32.mrb[75].mxu1 }
 0x311   :  { %v6608_v35 = vpack.c.bf16 %v5949_v59, %v2278_v17  ;;  %v10519_v17 = vunpack.i.h.bf16 %v8475_v45 }
 0x312   :  { %1555 = vrot.lane.b32.xlu1 %v10754_v61, %s7914_s13 }
 0x313   :  { %2493 = vmatmul.mubr.f32.gmra.mrb[58].mxu0 %v10511_v15  ;;  %6609 = vmatprep.subr.bf16.mxu0 %v6608_v35  ;;  %v5952_v14 = vpop.f32.mrb[76].mxu1  ;;  %v8581_v15 = vpop.trf.xlu1 }
 0x314   :  { %2497 = vmatprep.mubr.f32.mxu0 %v10513_v37  ;;  %6611 = vmatpush3.bf16.msra.mxu0 %v6608_v35  ;;  %v2288_v51 = vpop.f32.mrb[77].mxu1  ;;  %10795 = vst [vmem:[#allocation84_spill] sm:$0xff] %v8581_v15  ;;  %v10516_v35 = vunpack.i.h.bf16 %v8479_v55  ;;  %v8768_v55 = vld [vmem:[#allocation3 + $0xa8] sm:$0xff] }
 0x315   :  { %v6612_v59 = vpack.c.bf16 %v5952_v14, %v2288_v51  ;;  %v10517_v14 = vunpack.i.l.bf16 %v8484_v57  ;;  %10828 = vst [vmem:[#allocation117_spill] sm:$0xff] %v8768_v55 }
 0x317   :  { %2498 = vmatmul.mubr.f32.gmra.mrb[60].mxu0 %v10533_v38  ;;  %6613 = vmatprep.subr.bf16.mxu0 %v6612_v59  ;;  %v5955_v24 = vpop.f32.mrb[78].mxu1  ;;  %v8593_v51 = vpop.trf.xlu1 }
 0x318   :  { %2502 = vmatprep.mubr.f32.mxu0 %v10526_v18  ;;  %6615 = vmatpush3.bf16.msra.mxu0 %v6612_v59  ;;  %v2298_v37 = vpop.f32.mrb[79].mxu1  ;;  %10796 = vst [vmem:[#allocation85_spill] sm:$0xff] %v8593_v51  ;;  %v10521_v59 = vunpack.i.h.bf16 %v8487_v46 }
 0x319   :  { %v6616_v28 = vpack.c.bf16 %v5955_v24, %v2298_v37  ;;  %v10518_v24 = vunpack.i.h.bf16 %v8484_v57  ;;  %v10520_v37 = vunpack.i.l.bf16 %v8487_v46  ;;  %v8757_v46 = vld [vmem:[#allocation3 + $0xa0] sm:$0xff] }
 0x31a   :  { %3410 = vadd.xlane.f32.xlu0 %v10779_v30  ;;  %10827 = vst [vmem:[#allocation116_spill] sm:$0xff] %v8757_v46 }
 0x31b   :  { %2503 = vmatmul.mubr.f32.gmra.mrb[62].mxu0 %v10519_v17  ;;  %6617 = vmatprep.subr.bf16.mxu0 %v6616_v28  ;;  %v10525_v17 = vunpack.i.h.bf16 %v8493_v53 }
 0x31c   :  { %2507 = vmatprep.mubr.f32.mxu0 %v10515_v49  ;;  %6619 = vmatpush3.bf16.msra.mxu0 %v6616_v28  ;;  %v8604_v49 = vpop.trf.xlu1  ;;  %v10522_v28 = vunpack.i.l.bf16 %v8490_v42 }
 0x31d   :  { %10797 = vst [vmem:[#allocation86_spill] sm:$0xff] %v8604_v49 }
 0x31f   :  { %2508 = vmatmul.mubr.f32.gmra.mrb[64].mxu0 %v10516_v35  ;;  %v10523_v35 = vunpack.i.h.bf16 %v8490_v42  ;;  %v8754_v42 = vld [vmem:[#allocation3 + $0x98] sm:$0xff] }
 0x320   :  { %2512 = vmatprep.mubr.f32.mxu0 %v10517_v14  ;;  %v10524_v14 = vunpack.i.l.bf16 %v8493_v53  ;;  %v8751_v53 = vld [vmem:[#allocation3 + $0x90] sm:$0xff]  ;;  %10826 = vst [vmem:[#allocation115_spill] sm:$0xff] %v8754_v42 }
 0x321   :  { %10825 = vst [vmem:[#allocation114_spill] sm:$0xff] %v8751_v53 }
 0x323   :  { %2513 = vmatmul.mubr.f32.gmra.mrb[66].mxu0 %v10518_v24  ;;  %v8615_v24 = vpop.trf.xlu1 }
 0x324   :  { %2517 = vmatprep.mubr.f32.mxu0 %v10520_v37  ;;  %10798 = vst [vmem:[#allocation87_spill] sm:$0xff] %v8615_v24  ;;  %v10527_v37 = vunpack.i.l.bf16 %v8496_v40 }
 0x327   :  { %2518 = vmatmul.mubr.f32.gmra.mrb[68].mxu0 %v10521_v59  ;;  %v10528_v59 = vunpack.i.h.bf16 %v8496_v40  ;;  %v8748_v40 = vld [vmem:[#allocation3 + $0x88] sm:$0xff] }
 0x328   :  { %2522 = vmatprep.mubr.f32.mxu0 %v10522_v28  ;;  %v8626_v28 = vpop.trf.xlu1  ;;  %10824 = vst [vmem:[#allocation113_spill] sm:$0xff] %v8748_v40 }
 0x329   :  { %10799 = vst [vmem:[#allocation88_spill] sm:$0xff] %v8626_v28 }
 0x32b   :  { %2523 = vmatmul.mubr.f32.gmra.mrb[70].mxu0 %v10523_v35  ;;  %v10529_v35 = vunpack.i.l.bf16 %v8501_v4 }
 0x32c   :  { %2527 = vmatprep.mubr.f32.mxu0 %v10524_v14  ;;  %v10532_v14 = vunpack.i.h.bf16 %v8501_v4  ;;  %v8639_v18 = vpop.trf.xlu1  ;;  %v8745_v4 = vld [vmem:[#allocation3 + $0x80] sm:$0xff] }
 0x32d   :  { %10800 = vst [vmem:[#allocation89_spill] sm:$0xff] %v8639_v18  ;;  %10823 = vst [vmem:[#allocation112_spill] sm:$0xff] %v8745_v4 }
 0x32f   :  { %2528 = vmatmul.mubr.f32.gmra.mrb[72].mxu0 %v10525_v17  ;;  %v10531_v17 = vunpack.i.l.bf16 %v8503_v36 }
 0x330   :  { %1561 = vrot.lane.b32.xlu0 %v10773_v60, %s7914_s13  ;;  %2532 = vmatprep.mubr.f32.mxu0 %v10527_v37  ;;  %v10530_v37 = vunpack.i.h.bf16 %v8503_v36  ;;  %v8742_v36 = vld [vmem:[#allocation3 + $0x78] sm:$0xff] }
 0x331   :  { %10822 = vst [vmem:[#allocation111_spill] sm:$0xff] %v8742_v36 }
 0x333   :  { %2533 = vmatmul.mubr.f32.gmra.mrb[74].mxu0 %v10528_v59  ;;  %v8649_v59 = vpop.trf.xlu1 }
 0x334   :  { %2537 = vmatprep.mubr.f32.mxu0 %v10529_v35  ;;  %10801 = vst [vmem:[#allocation90_spill] sm:$0xff] %v8649_v59 }
 0x336   :  { %3408 = vadd.xlane.f32.xlu1 %v10765_v63 }
 0x337   :  { %2538 = vmatmul.mubr.f32.gmra.mrb[76].mxu0 %v10532_v14  ;;  %v8654_v35 = vpop.trf.xlu1 }
 0x338   :  { %2542 = vmatprep.mubr.f32.mxu0 %v10531_v17  ;;  %10802 = vst [vmem:[#allocation91_spill] sm:$0xff] %v8654_v35 }
 0x33b   :  { %2543 = vmatmul.mubr.f32.gmra.mrb[78].mxu0 %v10530_v37  ;;  %v8661_v37 = vpop.trf.xlu1 }
 0x33c   :  { %5988 = vmatprep.mubr.f32.mxu0 %v8534_v13  ;;  %10803 = vst [vmem:[#allocation92_spill] sm:$0xff] %v8661_v37 }
 0x33f   :  { %5989 = vmatmul.mubr.f32.vlgmr.msra.gmra.mrb[80].mxu0 %v8546_v27  ;;  %v8666_v17 = vpop.trf.xlu1 }
 0x340   :  { %5991 = vmatprep.mubr.f32.mxu0 %v8557_v52  ;;  %10804 = vst [vmem:[#allocation93_spill] sm:$0xff] %v8666_v17  ;;  %v8736_v52 = vld [vmem:[#allocation3 + $0x68] sm:$0xff] }
 0x341   :  { %10820 = vst [vmem:[#allocation109_spill] sm:$0xff] %v8736_v52 }
 0x343   :  { %5992 = vmatmul.mubr.f32.gmra.mrb[82].mxu0 %v8568_v3  ;;  %v8672_v14 = vpop.trf.xlu1  ;;  %v8733_v3 = vld [vmem:[#allocation3 + $0x60] sm:$0xff] }
 0x344   :  { %5994 = vmatprep.mubr.f32.mxu0 %v8581_v15  ;;  %10805 = vst [vmem:[#allocation94_spill] sm:$0xff] %v8672_v14  ;;  %10819 = vst [vmem:[#allocation108_spill] sm:$0xff] %v8733_v3 }
 0x347   :  { %5995 = vmatmul.mubr.f32.gmra.mrb[84].mxu0 %v8593_v51  ;;  %1559 = vrot.lane.b32.xlu1 %v10757_v39, %s7914_s13  ;;  %v8677_v38 = vpop.trf.xlu1  ;;  %v8730_v51 = vld [vmem:[#allocation3 + $0x58] sm:$0xff] }
 0x348   :  { %5997 = vmatprep.mubr.f32.mxu0 %v8604_v49  ;;  %10806 = vst [vmem:[#allocation95_spill] sm:$0xff] %v8677_v38  ;;  %v8727_v49 = vld [vmem:[#allocation3 + $0x50] sm:$0xff]  ;;  %10818 = vst [vmem:[#allocation107_spill] sm:$0xff] %v8730_v51 }
 0x349   :  { %10817 = vst [vmem:[#allocation106_spill] sm:$0xff] %v8727_v49 }
 0x34b   :  { %5998 = vmatmul.mubr.f32.gmra.mrb[86].mxu0 %v8615_v24  ;;  %v8722_v24 = vld [vmem:[#allocation3 + $0x48] sm:$0xff] }
 0x34c   :  { %6000 = vmatprep.mubr.f32.mxu0 %v8626_v28  ;;  %10816 = vst [vmem:[#allocation105_spill] sm:$0xff] %v8722_v24 }
 0x34f   :  { %6001 = vmatmul.mubr.f32.gmra.mrb[88].mxu0 %v8639_v18  ;;  %3414 = vadd.xlane.f32.xlu0 %v10781_v47  ;;  %v8707_v18 = vld [vmem:[#allocation3 + $0x30] sm:$0xff] }
 0x350   :  { %6003 = vmatprep.mubr.f32.mxu0 %v8649_v59  ;;  %10813 = vst [vmem:[#allocation102_spill] sm:$0xff] %v8707_v18 }
 0x353   :  { %6004 = vmatmul.mubr.f32.gmra.mrb[90].mxu0 %v8654_v35  ;;  %v8702_v35 = vld [vmem:[#allocation3 + $0x28] sm:$0xff] }
 0x354   :  { %6006 = vmatprep.mubr.f32.mxu0 %v8661_v37  ;;  %10812 = vst [vmem:[#allocation101_spill] sm:$0xff] %v8702_v35 }
 0x357   :  { %6007 = vmatmul.mubr.f32.gmra.mrb[92].mxu0 %v8666_v17  ;;  %v8699_v17 = vld [vmem:[#allocation3 + $0x20] sm:$0xff] }
 0x358   :  { %6009 = vmatprep.mubr.f32.mxu0 %v8672_v14  ;;  %10811 = vst [vmem:[#allocation100_spill] sm:$0xff] %v8699_v17 }
 0x35b   :  { %6010 = vmatmul.mubr.f32.gmra.mrb[94].mxu0 %v8677_v38  ;;  %v8696_v38 = vld [vmem:[#allocation3 + $0x18] sm:$0xff] }
 0x35c   :  { %3062 = vmatprep.mubr.f32.mxu0 %v7560_v12  ;;  %v552_v12 = vadd.f32 %v8693_v50, %v551_v21  ;;  %10810 = vst [vmem:[#allocation99_spill] sm:$0xff] %v8696_v38  ;;  %v8712_v21 = vld [vmem:[#allocation3 + $0x38] sm:$0xff] }
 0x35d   :  { %10814 = vst [vmem:[#allocation103_spill] sm:$0xff] %v8712_v21 }
 0x35e   :  { %v553_v14 = vadd.f32 %v8696_v38, %v552_v12 }
 0x360   :  { %v554_v37 = vadd.f32 %v8699_v17, %v553_v14  ;;  %v8717_v14 = vld [vmem:[#allocation3 + $0x40] sm:$0xff] }
 0x361   :  { %10815 = vst [vmem:[#allocation104_spill] sm:$0xff] %v8717_v14 }
 0x362   :  { %v555_v59 = vadd.f32 %v8702_v35, %v554_v37 }
 0x364   :  { %v556_v28 = vadd.f32 %v8707_v18, %v555_v59 }
 0x365   :  { %1565 = vrot.lane.b32.xlu0 %v10775_v25, %s7914_s13 }
 0x366   :  { %v557_v12 = vadd.f32 %v8712_v21, %v556_v28 }
 0x368   :  { %v558_v37 = vadd.f32 %v8717_v14, %v557_v12 }
 0x369   :  { %1571 = vrot.lane.b32.xlu0 %v10765_v63, %s7914_s13 }
 0x36a   :  { %v559_v59 = vadd.f32 %v8722_v24, %v558_v37  ;;  %v8739_v37 = vld [vmem:[#allocation3 + $0x70] sm:$0xff] }
 0x36b   :  { %3412 = vadd.xlane.f32.xlu1 %v10767_v29  ;;  %10821 = vst [vmem:[#allocation110_spill] sm:$0xff] %v8739_v37 }
 0x36c   :  { %v560_v28 = vadd.f32 %v8727_v49, %v559_v59 }
 0x36d   :  { %1575 = vrot.lane.b32.xlu0 %v10767_v29, %s7914_s13 }
 0x36e   :  { %v561_v15 = vadd.f32 %v8730_v51, %v560_v28 }
 0x370   :  { %v562_v12 = vadd.f32 %v8733_v3, %v561_v15 }
 0x372   :  { %v563_v27 = vadd.f32 %v8736_v52, %v562_v12 }
 0x374   :  { %v564_v13 = vadd.f32 %v8739_v37, %v563_v27 }
 0x376   :  { %v565_v59 = vadd.f32 %v8742_v36, %v564_v13 }
 0x378   :  { %v566_v28 = vadd.f32 %v8745_v4, %v565_v59  ;;  %v244_v59 = vld [vmem:[%s10448_s5] sm:$0xff] }
 0x379   :  { %v1869_v57 = vsel %vm1868_vm3, %v244_v59, 0.0  ;;  %v247_v59 = vld [vmem:[%s10448_s5 + $0x18] sm:$0xff] }
 0x37a   :  { %v567_v15 = vadd.f32 %v8748_v40, %v566_v28  ;;  %v245_v28 = vld [vmem:[%s10448_s5 + $0x8] sm:$0xff]  ;;  %v1874_v32 = vsel %vm1868_vm3, %v247_v59, 0.0 }
 0x37c   :  { %1563 = vrot.lane.b32.xlu1 %v10760_v16, %s7914_s13  ;;  %v568_v12 = vadd.f32 %v8751_v53, %v567_v15  ;;  %v1870_v15 = vsel %vm1868_vm3, %v245_v28, 0.0 }
 0x37d   :  { %v1871_v45 = vadd.f32 %v1870_v15, %v1869_v57  ;;  %v248_v57 = vld [vmem:[%s10448_s5 + $0x20] sm:$0xff] }
 0x37e   :  { %v569_v27 = vadd.f32 %v8754_v42, %v568_v12 }
 0x380   :  { %1567 = vrot.lane.b32.xlu1 %v10763_v54, %s7914_s13  ;;  %v570_v13 = vadd.f32 %v8757_v46, %v569_v27  ;;  %v246_v27 = vld [vmem:[%s10448_s5 + $0x10] sm:$0xff] }
 0x381   :  { %v1872_v20 = vsel %vm1868_vm3, %v246_v27, 0.0  ;;  %v1876_v27 = vsel %vm1868_vm3, %v248_v57, 0.0 }
 0x382   :  { %v571_v12 = vadd.f32 %v8768_v55, %v570_v13  ;;  %v1873_v28 = vadd.f32 %v1872_v20, %v1871_v45  ;;  %v249_v45 = vld [vmem:[%s10448_s5 + $0x28] sm:$0xff] }
 0x383   :  { %v1878_v59 = vsel %vm1868_vm3, %v249_v45, 0.0 }
 0x384   :  { %1569 = vrot.lane.b32.xlu1 %v10777_v26, %s7914_s13  ;;  %v572_v19 = vadd.f32 %v8775_v62, %v571_v12  ;;  %v1875_v15 = vadd.f32 %v1874_v32, %v1873_v28  ;;  %v250_v32 = vld [vmem:[%s10448_s5 + $0x30] sm:$0xff]  ;;  %v8873_v62 = vpop.permute.xlu1 %1500 }
 0x385   :  { %v1880_v57 = vsel %vm1868_vm3, %v250_v32, 0.0 }
 0x386   :  { %v573_v13 = vadd.f32 %v8782_v31, %v572_v19  ;;  %v1877_v20 = vadd.f32 %v1876_v27, %v1875_v15  ;;  %v251_v15 = vld [vmem:[%s10448_s5 + $0x38] sm:$0xff] }
 0x388   :  { %1573 = vrot.lane.b32.xlu1 %v10779_v30, %s7914_s13  ;;  %v574_v12 = vadd.f32 %v8789_v22, %v573_v13  ;;  %v1879_v28 = vadd.f32 %v1878_v59, %v1877_v20  ;;  %v252_v20 = vld [vmem:[%s10448_s5 + $0x40] sm:$0xff] }
 0x389   :  { %v8815_v59 = vld [vmem:[#allocation3 + $0xd8] sm:$0xff] }
 0x38a   :  { %v575_v19 = vadd.f32 %v8796_v11, %v574_v12  ;;  %v1881_v45 = vadd.f32 %v1880_v57, %v1879_v28  ;;  %v1882_v12 = vsel %vm1868_vm3, %v251_v15, 0.0  ;;  %10834 = vst [vmem:[#allocation123_spill] sm:$0xff] %v8815_v59  ;;  %v1884_v57 = vsel %vm1868_vm3, %v252_v20, 0.0 }
 0x38c   :  { %1577 = vrot.lane.b32.xlu1 %v10781_v47, %s7914_s13  ;;  %v576_v13 = vadd.f32 %v8803_v10, %v575_v19  ;;  %v1883_v7 = vadd.f32 %v1882_v12, %v1881_v45  ;;  %v8830_v45 = vld [vmem:[#allocation3 + $0xf0] sm:$0xff] }
 0x38d   :  { %10837 = vst [vmem:[#allocation126_spill] sm:$0xff] %v8830_v45 }
 0x38e   :  { %v577_v32 = vadd.f32 %v8815_v59, %v576_v13  ;;  %v1885_v0 = vadd.f32 %v1884_v57, %v1883_v7 }
 0x390   :  { %v578_v5 = vadd.f32 %v8818_v6, %v577_v32 }
 0x3d2   :  { %v5300_v27 = vpop.f32.mrb[48].mxu0 }
 0x3d3   :  { %v5301_v9 = vpop.f32.mrb[49].mxu0 }
 0x3d4   :  { %v8810_v8 = vadd.f32 %v5301_v9, %v5300_v27  ;;  %v253_v9 = vld [vmem:[%s10448_s5 + $0x48] sm:$0xff] }
 0x3d5   :  { %v8827_v27 = vld [vmem:[#allocation3 + $0xe8] sm:$0xff]  ;;  %v1886_v6 = vsel %vm1868_vm3, %v253_v9, 0.0  ;;  %v255_v9 = vld [vmem:[%s10448_s5 + $0x58] sm:$0xff] }
 0x3d6   :  { %v5303_v19 = vpop.f32.mrb[50].mxu0  ;;  %10836 = vst [vmem:[#allocation125_spill] sm:$0xff] %v8827_v27  ;;  %v579_v2 = vadd.f32 %v8827_v27, %v578_v5  ;;  %v1887_v27 = vadd.f32 %v1886_v6, %v1885_v0  ;;  %v1890_v11 = vsel %vm1868_vm3, %v255_v9, 0.0  ;;  %v256_v0 = vld [vmem:[%s10448_s5 + $0x60] sm:$0xff] }
 0x3d7   :  { %v5304_v28 = vpop.f32.mrb[51].mxu0 }
 0x3d8   :  { %v8822_v15 = vadd.f32 %v5304_v28, %v5303_v19  ;;  %v580_v12 = vadd.f32 %v8830_v45, %v579_v2  ;;  %v254_v19 = vld [vmem:[%s10448_s5 + $0x50] sm:$0xff]  ;;  %v8839_v28 = vld [vmem:[#allocation3 + $0xf8] sm:$0xff] }
 0x3d9   :  { %10838 = vst [vmem:[#allocation127_spill] sm:$0xff] %v8839_v28  ;;  %v1888_v57 = vsel %vm1868_vm3, %v254_v19, 0.0 }
 0x3da   :  { %v5306_v13 = vpop.f32.mrb[52].mxu0  ;;  %v581_v59 = vadd.f32 %v8839_v28, %v580_v12  ;;  %v1889_v45 = vadd.f32 %v1888_v57, %v1887_v27  ;;  %v257_v27 = vld [vmem:[%s10448_s5 + $0x68] sm:$0xff] }
 0x3db   :  { %v5307_v32 = vpop.f32.mrb[53].mxu0 }
 0x3dc   :  { %v8834_v20 = vadd.f32 %v5307_v32, %v5306_v13  ;;  %582 = vadd.xlane.f32.xlu0 %v581_v59  ;;  %v8848_v13 = vpop.permute.xlu0 %1502  ;;  %v1891_v59 = vadd.f32 %v1890_v11, %v1889_v45  ;;  %v258_v11 = vld [vmem:[%s10448_s5 + $0x70] sm:$0xff] }
 0x3dd   :  { %v1896_v31 = vsel %vm1868_vm3, %v258_v11, 0.0 }
 0x3de   :  { %v5309_v5 = vpop.f32.mrb[54].mxu0 }
 0x3df   :  { %v5310_v7 = vpop.f32.mrb[55].mxu0 }
 0x3e0   :  { %v8843_v2 = vadd.f32 %v5310_v7, %v5309_v5  ;;  %v8856_v19 = vpop.permute.xlu0 %1504  ;;  %v1892_v7 = vsel %vm1868_vm3, %v256_v0, 0.0 }
 0x3e2   :  { %v5312_v32 = vpop.f32.mrb[56].mxu0 }
 0x3e3   :  { %v5313_v10 = vpop.f32.mrb[57].mxu0 }
 0x3e4   :  { %v8851_v12 = vadd.f32 %v5313_v10, %v5312_v32  ;;  %v1893_v10 = vadd.f32 %v1892_v7, %v1891_v59  ;;  %v1894_v32 = vsel %vm1868_vm3, %v257_v27, 0.0  ;;  %v8870_v45 = vpop.permute.xlu0 %1506  ;;  %v259_v59 = vld [vmem:[%s10448_s5 + $0x78] sm:$0xff] }
 0x3e5   :  { %v1898_v46 = vsel %vm1868_vm3, %v259_v59, 0.0 }
 0x3e6   :  { %v5315_v6 = vpop.f32.mrb[58].mxu0 }
 0x3e7   :  { %v5316_v5 = vpop.f32.mrb[59].mxu0 }
 0x3e8   :  { %v8859_v28 = vadd.f32 %v5316_v5, %v5315_v6  ;;  %v1895_v6 = vadd.f32 %v1894_v32, %v1893_v10  ;;  %v8885_v10 = vpop.permute.xlu1 %1508 }
 0x3ea   :  { %v5318_v57 = vpop.f32.mrb[60].mxu0  ;;  %v1897_v27 = vadd.f32 %v1896_v31, %v1895_v6 }
 0x3eb   :  { %v5319_v9 = vpop.f32.mrb[61].mxu0 }
 0x3ec   :  { %v8865_v22 = vadd.f32 %v5319_v9, %v5318_v57  ;;  %v8880_v57 = vpop.permute.xlu0 %1510  ;;  %v1899_v11 = vadd.f32 %v1898_v46, %v1897_v27  ;;  %v8891_v31 = vpop.permute.xlu1 %1512 }
 0x3ee   :  { %v5321_v0 = vpop.f32.mrb[62].mxu0  ;;  %v1900_v4 = vrot.slane %v1899_v11, 4 }
 0x3ef   :  { %v5322_v5 = vpop.f32.mrb[63].mxu0 }
 0x3f0   :  { %v8875_v55 = vadd.f32 %v5322_v5, %v5321_v0  ;;  %v8889_v5 = vpop.permute.xlu0 %1514  ;;  %v1901_v59 = vadd.f32 %v1900_v4, %v1899_v11  ;;  %v8899_v46 = vpop.permute.xlu1 %1516 }
 0x3f2   :  { %v5324_v7 = vpop.f32.mrb[64].mxu0  ;;  %v1902_v27 = vrot.slane %v1901_v59, 2 }
 0x3f3   :  { %v5325_v9 = vpop.f32.mrb[65].mxu0 }
 0x3f4   :  { %v8883_v42 = vadd.f32 %v5325_v9, %v5324_v7  ;;  %v8895_v7 = vpop.permute.xlu0 %1518  ;;  %v1903_v24 = vadd.f32 %v1902_v27, %v1901_v59 }
 0x3f6   :  { %v5327_v32 = vpop.f32.mrb[66].mxu0  ;;  %v1904_v14 = vrot.slane %v1903_v24, 1 }
 0x3f7   :  { %v5328_v53 = vpop.f32.mrb[67].mxu0 }
 0x3f8   :  { %v8887_v0 = vadd.f32 %v5328_v53, %v5327_v32  ;;  %v8903_v51 = vpop.permute.xlu0 %1522 }
 0x3fa   :  { %v5330_v40 = vpop.f32.mrb[68].mxu0 }
 0x3fb   :  { %v5331_v36 = vpop.f32.mrb[69].mxu0 }
 0x3fc   :  { %v8893_v6 = vadd.f32 %v5331_v36, %v5330_v40  ;;  %v8905_v40 = vpop.permute.xlu1 %1520 }
 0x3fe   :  { %v5333_v37 = vpop.f32.mrb[70].mxu0 }
 0x3ff   :  { %v5334_v9 = vpop.f32.mrb[71].mxu0 }
 0x400   :  { %v8897_v52 = vadd.f32 %v5334_v9, %v5333_v37  ;;  %v8909_v37 = vpop.permute.xlu0 %1526  ;;  %v8913_v18 = vpop.permute.xlu1 %1524 }
 0x402   :  { %v5336_v53 = vpop.f32.mrb[72].mxu0 }
 0x403   :  { %v5337_v32 = vpop.f32.mrb[73].mxu0 }
 0x404   :  { %v8901_v3 = vadd.f32 %v5337_v32, %v5336_v53  ;;  %v8915_v32 = vadd.f32 %v1904_v14, %v1903_v24  ;;  %v8917_v35 = vpop.xlane.xlu0 %3384  ;;  %v8925_v38 = vpop.permute.xlu1 %1528 }
 0x406   :  { %v5339_v49 = vpop.f32.mrb[74].mxu0  ;;  %v2470_v33 = vadd.f32 %v8810_v8, %v8915_v32  ;;  %v2485_v24 = vadd.f32 %v8843_v2, %v8915_v32  ;;  %v2490_v2 = vadd.f32 %v8851_v12, %v8915_v32 }
 0x407   :  { %v5340_v36 = vpop.f32.mrb[75].mxu0 }
 0x408   :  { %v8907_v4 = vadd.f32 %v5340_v36, %v5339_v49  ;;  %v2475_v49 = vadd.f32 %v8822_v15, %v8915_v32  ;;  %v8927_v50 = vpop.xlane.xlu0 %3388  ;;  %v8933_v8 = vpop.xlane.xlu1 %3386 }
 0x40a   :  { %v5342_v11 = vpop.f32.mrb[76].mxu0 }
 0x40b   :  { %v5343_v9 = vpop.f32.mrb[77].mxu0 }
 0x40c   :  { %v8911_v21 = vadd.f32 %v5343_v9, %v5342_v11 }
 0x40e   :  { %v5345_v53 = vpop.f32.mrb[78].mxu0 }
 0x40f   :  { %v5346_v59 = vpop.f32.mrb[79].mxu0 }
 0x410   :  { %v8919_v27 = vadd.f32 %v5346_v59, %v5345_v53  ;;  %v2480_v59 = vadd.f32 %v8834_v20, %v8915_v32 }
 0x412   :  { %v5990_v36 = vpop.f32.mrb[80].mxu0 }
 0x413   :  { %v2620_v17 = vadd.f32 %v5990_v36, %v2475_v49  ;;  %v2614_v11 = vpop.f32.mrb[81].mxu0 }
 0x414   :  { %v2615_v9 = vadd.f32 %v2614_v11, %v2470_v33  ;;  %v2495_v33 = vadd.f32 %v8859_v28, %v8915_v32  ;;  %v2500_v28 = vadd.f32 %v8865_v22, %v8915_v32 }
 0x416   :  { %v6620_v14 = vpack.c.bf16 %v2620_v17, %v2615_v9  ;;  %v5993_v53 = vpop.f32.mrb[82].mxu0  ;;  %v8939_v17 = vpop.xlane.xlu0 %3390 }
 0x417   :  { %v2630_v15 = vadd.f32 %v5993_v53, %v2485_v24  ;;  %v2624_v23 = vpop.f32.mrb[83].mxu0 }
 0x418   :  { %v2625_v1 = vadd.f32 %v2624_v23, %v2480_v59  ;;  %6621 = vmatprep.subr.bf16.mxu1 %v6620_v14  ;;  %v2505_v23 = vadd.f32 %v8875_v55, %v8915_v32  ;;  %v2510_v55 = vadd.f32 %v8883_v42, %v8915_v32  ;;  %v2535_v42 = vadd.f32 %v8907_v4, %v8915_v32 }
 0x419   :  { %6623 = vmatpush3.bf16.msra.mxu1 %v6620_v14  ;;  %v2540_v4 = vadd.f32 %v8911_v21, %v8915_v32  ;;  %v6720_v21 = vpack.c.bf16 %v8939_v17, %v8927_v50 }
 0x41a   :  { %v6624_v49 = vpack.c.bf16 %v2630_v15, %v2625_v1  ;;  %v5996_v36 = vpop.f32.mrb[84].mxu0  ;;  %v8945_v1 = vpop.xlane.xlu1 %3392 }
 0x41b   :  { %v2640_v11 = vadd.f32 %v5996_v36, %v2495_v33  ;;  %v2634_v9 = vpop.f32.mrb[85].mxu0  ;;  %v3395_v15 = vpop.xlane.xlu0 %3394  ;;  %v2515_v33 = vadd.f32 %v8887_v0, %v8915_v32 }
 0x41c   :  { %v2635_v20 = vadd.f32 %v2634_v9, %v2490_v2  ;;  %6625 = vmatprep.subr.bf16.mxu1 %v6624_v49 }
 0x41d   :  { %6627 = vmatpush3.bf16.msra.mxu1 %v6624_v49 }
 0x41e   :  { %v6628_v24 = vpack.c.bf16 %v2640_v11, %v2635_v20  ;;  %v5999_v14 = vpop.f32.mrb[86].mxu0  ;;  %v3397_v22 = vpop.xlane.xlu1 %3396  ;;  %v2525_v20 = vadd.f32 %v8897_v52, %v8915_v32 }
 0x41f   :  { %v2650_v53 = vadd.f32 %v5999_v14, %v2505_v23  ;;  %v2644_v59 = vpop.f32.mrb[87].mxu0  ;;  %v3399_v0 = vpop.xlane.xlu0 %3398 }
 0x420   :  { %v2645_v12 = vadd.f32 %v2644_v59, %v2500_v28  ;;  %6629 = vmatprep.subr.bf16.mxu1 %v6628_v24  ;;  %v6728_v50 = vpack.c.bf16 %v3399_v0, %v3397_v22  ;;  %v9094_v22 = vld [vmem:[#allocation6 + $0x28] sm:$0xff] }
 0x421   :  { %6631 = vmatpush3.bf16.msra.mxu1 %v6628_v24  ;;  %v2520_v24 = vadd.f32 %v8893_v6, %v8915_v32 }
 0x422   :  { %v6632_v49 = vpack.c.bf16 %v2650_v53, %v2645_v12  ;;  %v6002_v36 = vpop.f32.mrb[88].mxu0  ;;  %v8959_v52 = vpop.permute.xlu1 %1547 }
 0x423   :  { %v2660_v2 = vadd.f32 %v6002_v36, %v2515_v33  ;;  %v2654_v11 = vpop.f32.mrb[89].mxu0  ;;  %v8961_v6 = vpop.permute.xlu0 %1549 }
 0x424   :  { %v2655_v9 = vadd.f32 %v2654_v11, %v2510_v55  ;;  %6633 = vmatprep.subr.bf16.mxu1 %v6632_v49  ;;  %v2545_v11 = vadd.f32 %v8919_v27, %v8915_v32 }
 0x425   :  { %6635 = vmatpush3.bf16.msra.mxu1 %v6632_v49  ;;  %v2530_v49 = vadd.f32 %v8901_v3, %v8915_v32 }
 0x426   :  { %v6636_v23 = vpack.c.bf16 %v2660_v2, %v2655_v9  ;;  %v6005_v14 = vpop.f32.mrb[90].mxu0 }
 0x427   :  { %v2670_v28 = vadd.f32 %v6005_v14, %v2525_v20  ;;  %v2664_v53 = vpop.f32.mrb[91].mxu0 }
 0x428   :  { %v2665_v59 = vadd.f32 %v2664_v53, %v2520_v24  ;;  %6637 = vmatprep.subr.bf16.mxu1 %v6636_v23 }
 0x429   :  { %6639 = vmatpush3.bf16.msra.mxu1 %v6636_v23  ;;  %v3401_v23 = vpop.xlane.xlu1 %3400 }
 0x42a   :  { %v6640_v12 = vpack.c.bf16 %v2670_v28, %v2665_v59  ;;  %v6008_v33 = vpop.f32.mrb[92].mxu0  ;;  %v3403_v28 = vpop.xlane.xlu0 %3402  ;;  %v6716_v59 = vpack.c.bf16 %v8933_v8, %v8917_v35  ;;  %v6724_v8 = vpack.c.bf16 %v3395_v15, %v8945_v1 }
 0x42b   :  { %v2680_v36 = vadd.f32 %v6008_v33, %v2535_v42  ;;  %v2674_v55 = vpop.f32.mrb[93].mxu0  ;;  %v6732_v17 = vpack.c.bf16 %v3403_v28, %v3401_v23  ;;  %v9127_v23 = vld [vmem:[#allocation6 + $0x48] sm:$0xff]  ;;  %v9136_v28 = vld [vmem:[#allocation6 + $0x50] sm:$0xff] }
 0x42c   :  { %v2675_v2 = vadd.f32 %v2674_v55, %v2530_v49  ;;  %6641 = vmatprep.subr.bf16.mxu1 %v6640_v12 }
 0x42d   :  { %6643 = vmatpush3.bf16.msra.mxu1 %v6640_v12  ;;  %v8969_v42 = vpop.permute.xlu1 %1551  ;;  %v9101_v12 = vld [vmem:[#allocation6 + $0x30] sm:$0xff] }
 0x42e   :  { %v6644_v9 = vpack.c.bf16 %v2680_v36, %v2675_v2  ;;  %v6011_v20 = vpop.f32.mrb[94].mxu0  ;;  %v8971_v27 = vpop.permute.xlu0 %1553  ;;  %v9109_v36 = vld [vmem:[#allocation6 + $0x38] sm:$0xff]  ;;  %v7602_v2 = vld [vmem:[%s10447_s4 + $0x8] sm:$0xff] }
 0x42f   :  { %v2690_v14 = vadd.f32 %v6011_v20, %v2545_v11  ;;  %v2684_v3 = vpop.f32.mrb[95].mxu0  ;;  %v9118_v11 = vld [vmem:[#allocation6 + $0x40] sm:$0xff]  ;;  %v7605_v20 = vld [vmem:[%s10447_s4 + $0x18] sm:$0xff] }
 0x430   :  { %v2685_v24 = vadd.f32 %v2684_v3, %v2540_v4  ;;  %6645 = vmatprep.subr.bf16.mxu1 %v6644_v9  ;;  %v7606_v4 = vld [vmem:[%s10447_s4 + $0x20] sm:$0xff]  ;;  %v7608_v3 = vld [vmem:[%s10447_s4 + $0x28] sm:$0xff] }
 0x431   :  { %6647 = vmatpush3.bf16.msra.mxu1 %v6644_v9  ;;  %v3405_v32 = vpop.xlane.xlu1 %3404 }
 0x432   :  { %v6648_v53 = vpack.c.bf16 %v2690_v14, %v2685_v24  ;;  %v3407_v35 = vpop.xlane.xlu0 %3406  ;;  %v7609_v24 = vld [vmem:[%s10447_s4 + $0x30] sm:$0xff] }
 0x434   :  { %6649 = vmatprep.subr.bf16.mxu1 %v6648_v53 }
 0x435   :  { %6651 = vmatpush3.bf16.msra.mxu1 %v6648_v53 }
 0x436   :  { %6717 = vmatprep.subr.bf16.mxu1 %v6716_v59 }
 0x438   :  { %6045 = vmatmul.mubr.msk.f32.vlgmr.msra.gmra.mrb[80].mxu1 %vm8512_vm2, %v8873_v62  ;;  %v8988_v62 = vpop.permute.xlu1 %1555 }
 0x439   :  { %6047 = vmatprep.mubr.msk.f32.mxu1 %vm8512_vm2, %v8848_v13  ;;  %6719 = vmatpush3.bf16.msra.mxu1 %v6716_v59  ;;  %v8993_v13 = vpop.permute.xlu0 %1557  ;;  %v7611_v59 = vld [vmem:[%s10447_s4 + $0x38] sm:$0xff] }
 0x43a   :  { %6721 = vmatprep.subr.bf16.mxu1 %v6720_v21 }
 0x43c   :  { %6048 = vmatmul.mubr.msk.f32.gmra.mrb[82].mxu1 %vm8512_vm2, %v8856_v19  ;;  %v3409_v19 = vpop.xlane.xlu1 %3408 }
 0x43d   :  { %6050 = vmatprep.mubr.msk.f32.mxu1 %vm8512_vm2, %v8870_v45  ;;  %6723 = vmatpush3.bf16.msra.mxu1 %v6720_v21  ;;  %v3411_v45 = vpop.xlane.xlu0 %3410 }
 0x43e   :  { %6725 = vmatprep.subr.bf16.mxu1 %v6724_v8  ;;  %v6740_v1 = vpack.c.bf16 %v3411_v45, %v3409_v19  ;;  %v7617_v19 = vld [vmem:[%s10447_s4 + $0x58] sm:$0xff]  ;;  %v10841_v45 = vld [vmem:[#allocation97_spill] sm:$0xff] }
 0x440   :  { %6051 = vmatmul.mubr.msk.f32.gmra.mrb[84].mxu1 %vm8512_vm2, %v8885_v10  ;;  %v6736_v10 = vpack.c.bf16 %v3407_v35, %v3405_v32  ;;  %v7614_v32 = vld [vmem:[%s10447_s4 + $0x48] sm:$0xff]  ;;  %v7615_v35 = vld [vmem:[%s10447_s4 + $0x50] sm:$0xff] }
 0x441   :  { %6053 = vmatprep.mubr.msk.f32.mxu1 %vm8512_vm2, %v8880_v57  ;;  %6727 = vmatpush3.bf16.msra.mxu1 %v6724_v8  ;;  %v1560_v57 = vpop.permute.xlu1 %1559  ;;  %v9154_v8 = vld [vmem:[#allocation6 + $0x60] sm:$0xff] }
 0x442   :  { %6729 = vmatprep.subr.bf16.mxu1 %v6728_v50 }
 0x444   :  { %6054 = vmatmul.mubr.msk.f32.gmra.mrb[86].mxu1 %vm8512_vm2, %v8891_v31  ;;  %v1562_v31 = vpop.permute.xlu0 %1561 }
 0x445   :  { %6056 = vmatprep.mubr.msk.f32.mxu1 %vm8512_vm2, %v8889_v5  ;;  %6731 = vmatpush3.bf16.msra.mxu1 %v6728_v50  ;;  %v3413_v5 = vpop.xlane.xlu1 %3412 }
 0x446   :  { %6733 = vmatprep.subr.bf16.mxu1 %v6732_v17 }
 0x448   :  { %6057 = vmatmul.mubr.msk.f32.gmra.mrb[88].mxu1 %vm8512_vm2, %v8899_v46  ;;  %v3415_v46 = vpop.xlane.xlu0 %3414 }
 0x449   :  { %6059 = vmatprep.mubr.msk.f32.mxu1 %vm8512_vm2, %v8895_v7  ;;  %6735 = vmatpush3.bf16.msra.mxu1 %v6732_v17  ;;  %v6744_v15 = vpack.c.bf16 %v3415_v46, %v3413_v5  ;;  %v1564_v34 = vpop.permute.xlu1 %1563  ;;  %v9087_v7 = vld [vmem:[#allocation6 + $0x20] sm:$0xff]  ;;  %v10843_v46 = vld [vmem:[#allocation98_spill] sm:$0xff] }
 0x44a   :  { %6737 = vmatprep.subr.bf16.mxu1 %v6736_v10  ;;  %v7618_v17 = vld [vmem:[%s10447_s4 + $0x60] sm:$0xff] }
 0x44c   :  { %6060 = vmatmul.mubr.msk.f32.gmra.mrb[90].mxu1 %vm8512_vm2, %v8905_v40 }
 0x44d   :  { %6062 = vmatprep.mubr.msk.f32.mxu1 %vm8512_vm2, %v8903_v51  ;;  %6739 = vmatpush3.bf16.msra.mxu1 %v6736_v10  ;;  %v1566_v51 = vpop.permute.xlu0 %1565 }
 0x44e   :  { %6741 = vmatprep.subr.bf16.mxu1 %v6740_v1 }
 0x450   :  { %6063 = vmatmul.mubr.msk.f32.gmra.mrb[92].mxu1 %vm8512_vm2, %v8913_v18 }
 0x451   :  { %6065 = vmatprep.mubr.msk.f32.mxu1 %vm8512_vm2, %v8909_v37  ;;  %6743 = vmatpush3.bf16.msra.mxu1 %v6740_v1  ;;  %v1572_v18 = vpop.permute.xlu0 %1571  ;;  %v9169_v1 = vld [vmem:[#allocation6 + $0x68] sm:$0xff] }
 0x452   :  { %6745 = vmatprep.subr.bf16.mxu1 %v6744_v15 }
 0x454   :  { %6066 = vmatmul.mubr.msk.f32.gmra.mrb[94].mxu1 %vm8512_vm2, %v8925_v38 }
 0x455   :  { %6068 = vmatprep.mubr.f32.mxu1 %v10745_v48  ;;  %6747 = vmatpush3.bf16.msra.mxu1 %v6744_v15  ;;  %v1576_v41 = vpop.permute.xlu0 %1575 }
 0x458   :  { %6069 = vmatmul.mubr.f32.gmra.mrb[96].mxu1 %v10769_v58  ;;  %v9080_v58 = vld [vmem:[#allocation6 + $0x18] sm:$0xff] }
 0x459   :  { %6071 = vmatprep.mubr.f32.mxu1 %v10748_v56 }
 0x45c   :  { %6072 = vmatmul.mubr.f32.gmra.mrb[98].mxu1 %v10751_v43 }
 0x45d   :  { %6074 = vmatprep.mubr.f32.mxu1 %v10754_v61 }
 0x460   :  { %6075 = vmatmul.mubr.f32.gmra.mrb[100].mxu1 %v10771_v44 }
 0x461   :  { %6077 = vmatprep.mubr.f32.mxu1 %v10757_v39 }
 0x464   :  { %6078 = vmatmul.mubr.f32.gmra.mrb[102].mxu1 %v10773_v60 }
 0x465   :  { %6080 = vmatprep.mubr.f32.mxu1 %v10760_v16 }
 0x468   :  { %6081 = vmatmul.mubr.f32.gmra.mrb[104].mxu1 %v10775_v25 }
 0x469   :  { %6083 = vmatprep.mubr.f32.mxu1 %v10763_v54  ;;  %v583_v48 = vpop.xlane.xlu0 %582  ;;  %v1568_v54 = vpop.permute.xlu1 %1567 }
 0x46a   :  { %v584_v56 = vrot.slane %v583_v48, 4 }
 0x46c   :  { %6084 = vmatmul.mubr.f32.gmra.mrb[106].mxu1 %v10777_v26  ;;  %v585_v43 = vadd.f32 %v584_v56, %v583_v48  ;;  %v7621_v48 = vld [vmem:[%s10447_s4 + $0x70] sm:$0xff]  ;;  %v10844_v56 = vld [vmem:[#allocation99_spill] sm:$0xff] }
 0x46d   :  { %6086 = vmatprep.mubr.f32.mxu1 %v10765_v63  ;;  %v9073_v63 = vld [vmem:[#allocation6 + $0x10] sm:$0xff]  ;;  %v1570_v38 = vpop.permute.xlu1 %1569 }
 0x46e   :  { %v586_v61 = vrot.slane %v585_v43, 2 }
 0x470   :  { %6087 = vmatmul.mubr.f32.gmra.mrb[108].mxu1 %v10779_v30  ;;  %v587_v39 = vadd.f32 %v586_v61, %v585_v43  ;;  %v9064_v30 = vld [vmem:[#allocation6] sm:$0xff] }
 0x471   :  { %6089 = vmatprep.mubr.f32.mxu1 %v10767_v29  ;;  %v1574_v37 = vpop.permute.xlu1 %1573 }
 0x472   :  { %v588_v16 = vrot.slane %v587_v39, 1 }
 0x474   :  { %6090 = vmatmul.mubr.f32.gmra.mrb[110].mxu1 %v10781_v47  ;;  %v589_v26 = vadd.f32 %v588_v16, %v587_v39  ;;  %v9062_v47 = vld [vmem:[#allocation6 + $0x8] sm:$0xff]  ;;  %v9190_v39 = vld [vmem:[#allocation6 + $0x70] sm:$0xff] }
 0x475   :  { %6092 = vmatprep.mubr.msk.f32.mxu1 %vm9042_vm4, %v8959_v52  ;;  %v1023_v25 = vadd.f32 %v9064_v30, %v9062_v47  ;;  %v1578_v49 = vpop.permute.xlu1 %1577  ;;  %v7600_v52 = vld [vmem:[%s10447_s4] sm:$0xff] }
 0x476   :  { %6892 = vpush %v589_v26  ;;  %v10846_v26 = vld [vmem:[#allocation100_spill] sm:$0xff] }
 0x477   :  { %v1024_v29 = vadd.f32 %v9073_v63, %v1023_v25 }
 0x478   :  { %6093 = vmatmul.mubr.msk.f32.gmra.mrb[112].mxu1 %vm9042_vm4, %v8961_v6  ;;  %v7603_v6 = vld [vmem:[%s10447_s4 + $0x10] sm:$0xff] }
 0x479   :  { %6095 = vmatprep.mubr.msk.f32.mxu1 %vm9042_vm4, %v8969_v42  ;;  %v1025_v44 = vadd.f32 %v9080_v58, %v1024_v29  ;;  %v7612_v42 = vld [vmem:[%s10447_s4 + $0x40] sm:$0xff]  ;;  %v7623_v29 = vld [vmem:[%s10447_s4 + $0x78] sm:$0xff] }
 0x47b   :  { %v1026_v40 = vadd.f32 %v9087_v7, %v1025_v44  ;;  %v10848_v44 = vld [vmem:[#allocation29_spill] sm:$0xff] }
 0x47c   :  { %6096 = vmatmul.mubr.msk.f32.gmra.mrb[114].mxu1 %vm9042_vm4, %v8971_v27  ;;  %v9145_v27 = vld [vmem:[#allocation6 + $0x58] sm:$0xff] }
 0x47d   :  { %6098 = vmatprep.mubr.msk.f32.mxu1 %vm9042_vm4, %v8988_v62  ;;  %v1027_v0 = vadd.f32 %v9094_v22, %v1026_v40  ;;  %v10850_v40 = vld [vmem:[#allocation101_spill] sm:$0xff] }
 0x47f   :  { %v1028_v33 = vadd.f32 %v9101_v12, %v1027_v0 }
 0x480   :  { %6099 = vmatmul.mubr.msk.f32.gmra.mrb[116].mxu1 %vm9042_vm4, %v8993_v13 }
 0x481   :  { %6101 = vmatprep.mubr.msk.f32.mxu1 %vm9042_vm4, %v1560_v57  ;;  %v1029_v55 = vadd.f32 %v9109_v36, %v1028_v33  ;;  %v10842_v57 = vld [vmem:[#allocation96_spill] sm:$0xff] }
 0x483   :  { %v1030_v9 = vadd.f32 %v9118_v11, %v1029_v55  ;;  %v10852_v55 = vld [vmem:[#allocation102_spill] sm:$0xff] }
 0x484   :  { %6102 = vmatmul.mubr.msk.f32.gmra.mrb[118].mxu1 %vm9042_vm4, %v1562_v31 }
 0x485   :  { %6104 = vmatprep.mubr.msk.f32.mxu1 %vm9042_vm4, %v1564_v34  ;;  %v1031_v14 = vadd.f32 %v9127_v23, %v1030_v9 }
 0x487   :  { %v1032_v53 = vadd.f32 %v9136_v28, %v1031_v14 }
 0x488   :  { %6105 = vmatmul.mubr.msk.f32.gmra.mrb[120].mxu1 %vm9042_vm4, %v1566_v51 }
 0x489   :  { %6107 = vmatprep.mubr.msk.f32.mxu1 %vm9042_vm4, %v1568_v54  ;;  %v1033_v21 = vadd.f32 %v9145_v27, %v1032_v53 }
 0x48b   :  { %v1034_v62 = vadd.f32 %v9154_v8, %v1033_v21 }
 0x48c   :  { %6108 = vmatmul.mubr.msk.f32.gmra.mrb[122].mxu1 %vm9042_vm4, %v1570_v38  ;;  %v10849_v38 = vunpack.i.l.bf16 %v10848_v44 }
 0x48d   :  { %6110 = vmatprep.mubr.msk.f32.mxu1 %vm9042_vm4, %v1572_v18  ;;  %v1035_v5 = vadd.f32 %v9169_v1, %v1034_v62 }
 0x48f   :  { %v1036_v16 = vadd.f32 %v9190_v39, %v1035_v5 }
 0x490   :  { %6111 = vmatmul.mubr.msk.f32.gmra.mrb[124].mxu1 %vm9042_vm4, %v1574_v37 }
 0x491   :  { %6113 = vmatprep.mubr.msk.f32.mxu1 %vm9042_vm4, %v1576_v41  ;;  %v7620_v41 = vld [vmem:[%s10447_s4 + $0x68] sm:$0xff] }
 0x494   :  { %6114 = vmatmul.mubr.msk.f32.gmra.mrb[126].mxu1 %vm9042_vm4, %v1578_v49  ;;  %v9208_v49 = vld [vmem:[#allocation6 + $0x78] sm:$0xff] }
 0x495   :  { %6204 = vmatprep.mubr.f32.mxu1 %v7600_v52  ;;  %v1037_v52 = vadd.f32 %v9208_v49, %v1036_v16 }
 0x498   :  { %6205 = vmatmul.mubr.f32.vlgmr.msra.gmra.mrb[128].mxu1 %v7602_v2 }
 0x499   :  { %6207 = vmatprep.mubr.f32.mxu1 %v7603_v6 }
 0x49c   :  { %6208 = vmatmul.mubr.f32.gmra.mrb[130].mxu1 %v7605_v20  ;;  %v10854_v20 = vld [vmem:[#allocation103_spill] sm:$0xff] }
 0x49d   :  { %6210 = vmatprep.mubr.f32.mxu1 %v7606_v4 }
 0x4a0   :  { %6211 = vmatmul.mubr.f32.gmra.mrb[132].mxu1 %v7608_v3 }
 0x4a1   :  { %6213 = vmatprep.mubr.f32.mxu1 %v7609_v24  ;;  %v9221_v24 = vld [vmem:[#allocation6 + $0x80] sm:$0xff] }
 0x4a2   :  { %v1038_v53 = vadd.f32 %v9221_v24, %v1037_v52  ;;  %v10868_v52 = vld [vmem:[#allocation110_spill] sm:$0xff] }
 0x4a4   :  { %6214 = vmatmul.mubr.f32.gmra.mrb[134].mxu1 %v7611_v59  ;;  %v10856_v59 = vld [vmem:[#allocation104_spill] sm:$0xff] }
 0x4a5   :  { %6216 = vmatprep.mubr.f32.mxu1 %v7612_v42 }
 0x4a7   :  { %s6893_s16 = spop %6892 }
 0x4a8   :  { %6217 = vmatmul.mubr.f32.gmra.mrb[136].mxu1 %v7614_v32  ;;  %v591_v50 = vstv %s6893_s16 }
 0x4a9   :  { %6219 = vmatprep.mubr.f32.mxu1 %v7615_v35  ;;  %v9157_v13 = vmul.f32 3.0517578e-05, %v591_v50  ;;  %v10858_v35 = vld [vmem:[#allocation105_spill] sm:$0xff] }
 0x4ab   :  { %v593_v10 = vsub.f32 %v10841_v45, %v9157_v13  ;;  %v594_v31 = vsub.f32 %v10842_v57, %v9157_v13  ;;  %v595_v15 = vsub.f32 %v10843_v46, %v9157_v13  ;;  %v596_v43 = vsub.f32 %v10844_v56, %v9157_v13  ;;  %v10862_v46 = vld [vmem:[#allocation107_spill] sm:$0xff]  ;;  %v9247_v56 = vld [vmem:[#allocation6 + $0x90] sm:$0xff] }
 0x4ac   :  { %6220 = vmatmul.mubr.f32.gmra.mrb[138].mxu1 %v7617_v19  ;;  %v597_v34 = vsub.f32 %v10846_v26, %v9157_v13  ;;  %v598_v37 = vsub.f32 %v10850_v40, %v9157_v13  ;;  %v599_v2 = vsub.f32 %v10852_v55, %v9157_v13  ;;  %v600_v4 = vsub.f32 %v10854_v20, %v9157_v13  ;;  %v10870_v20 = vld [vmem:[#allocation111_spill] sm:$0xff] }
 0x4ad   :  { %6222 = vmatprep.mubr.f32.mxu1 %v7618_v17  ;;  %v9174_v51 = vmul.f32 %v593_v10, %v593_v10  ;;  %v9176_v18 = vmul.f32 %v594_v31, %v594_v31  ;;  %v9186_v61 = vmul.f32 %v595_v15, %v595_v15  ;;  %v9195_v25 = vmul.f32 %v596_v43, %v596_v43  ;;  %v9234_v17 = vld [vmem:[#allocation6 + $0x88] sm:$0xff]  ;;  %v10860_v10 = vld [vmem:[#allocation106_spill] sm:$0xff] }
 0x4ae   :  { %v9205_v0 = vmul.f32 %v597_v34, %v597_v34  ;;  %v9213_v6 = vmul.f32 %v598_v37, %v598_v37  ;;  %v9218_v14 = vmul.f32 %v599_v2, %v599_v2  ;;  %v601_v42 = vsub.f32 %v10856_v59, %v9157_v13  ;;  %v9260_v37 = vld [vmem:[#allocation6 + $0x98] sm:$0xff]  ;;  %v9273_v59 = vld [vmem:[#allocation6 + $0xa0] sm:$0xff] }
 0x4af   :  { %10845 = vst [vmem:[#allocation97_spill] sm:$0xff] %v9186_v61  ;;  %v657_v60 = vadd.f32 %v9176_v18, %v9174_v51  ;;  %10847 = vst [vmem:[#allocation96_spill] sm:$0xff] %v9195_v25  ;;  %v9226_v21 = vmul.f32 %v600_v4, %v600_v4  ;;  %v602_v62 = vsub.f32 %v10858_v35, %v9157_v13 }
 0x4b0   :  { %6223 = vmatmul.mubr.f32.gmra.mrb[140].mxu1 %v7620_v41  ;;  %10851 = vst [vmem:[#allocation98_spill] sm:$0xff] %v9205_v0  ;;  %10853 = vst [vmem:[#allocation99_spill] sm:$0xff] %v9213_v6  ;;  %v9231_v50 = vmul.f32 %v601_v42, %v601_v42  ;;  %v1039_v45 = vadd.f32 %v9234_v17, %v1038_v53  ;;  %v603_v57 = vsub.f32 %v10860_v10, %v9157_v13 }
 0x4b1   :  { %6225 = vmatprep.mubr.f32.mxu1 %v7621_v48  ;;  %v658_v54 = vadd.f32 %v657_v60, %v9186_v61  ;;  %10855 = vst [vmem:[#allocation100_spill] sm:$0xff] %v9218_v14  ;;  %10857 = vst [vmem:[#allocation29_spill] sm:$0xff] %v9226_v21  ;;  %v9239_v31 = vmul.f32 %v602_v62, %v602_v62  ;;  %v604_v15 = vsub.f32 %v10862_v46, %v9157_v13  ;;  %v10864_v60 = vld [vmem:[#allocation108_spill] sm:$0xff]  ;;  %v9286_v46 = vld [vmem:[#allocation6 + $0xa8] sm:$0xff] }
 0x4b2   :  { %10859 = vst [vmem:[#allocation101_spill] sm:$0xff] %v9231_v50  ;;  %v9244_v41 = vmul.f32 %v603_v57, %v603_v57  ;;  %v1040_v43 = vadd.f32 %v9247_v56, %v1039_v45  ;;  %v605_v16 = vsub.f32 %v10864_v60, %v9157_v13  ;;  %v607_v55 = vsub.f32 %v10868_v52, %v9157_v13  ;;  %v10874_v45 = vld [vmem:[#allocation113_spill] sm:$0xff] }
 0x4b3   :  { %v659_v33 = vadd.f32 %v658_v54, %v9195_v25  ;;  %10861 = vst [vmem:[#allocation102_spill] sm:$0xff] %v9239_v31  ;;  %v9252_v26 = vmul.f32 %v604_v15, %v604_v15  ;;  %v10866_v54 = vld [vmem:[#allocation109_spill] sm:$0xff]  ;;  %v608_v4 = vsub.f32 %v10870_v20, %v9157_v13  ;;  %v610_v10 = vsub.f32 %v10874_v45, %v9157_v13 }
 0x4b4   :  { %6226 = vmatmul.mubr.f32.gmra.mrb[142].mxu1 %v7623_v29  ;;  %10863 = vst [vmem:[#allocation103_spill] sm:$0xff] %v9244_v41  ;;  %v606_v29 = vsub.f32 %v10866_v54, %v9157_v13 }
 0x4b5   :  { %3946 = vmatprep.mubr.f32.mxu1 %v10849_v38  ;;  %v660_v9 = vadd.f32 %v659_v33, %v9205_v0  ;;  %10865 = vst [vmem:[#allocation104_spill] sm:$0xff] %v9252_v26  ;;  %v9257_v38 = vmul.f32 %v605_v16, %v605_v16  ;;  %v1041_v33 = vadd.f32 %v9260_v37, %v1040_v43 }
 0x4b6   :  { %v9265_v2 = vmul.f32 %v606_v29, %v606_v29  ;;  %v9278_v62 = vmul.f32 %v608_v4, %v608_v4  ;;  %v9291_v60 = vmul.f32 %v610_v10, %v610_v10  ;;  %v10884_v10 = vld [vmem:[#allocation118_spill] sm:$0xff] }
 0x4b7   :  { %v661_v3 = vadd.f32 %v660_v9, %v9213_v6  ;;  %10867 = vst [vmem:[#allocation105_spill] sm:$0xff] %v9257_v38  ;;  %v1042_v42 = vadd.f32 %v9273_v59, %v1041_v33  ;;  %v9299_v33 = vld [vmem:[#allocation6 + $0xb0] sm:$0xff] }
 0x4b8   :  { %10869 = vst [vmem:[#allocation106_spill] sm:$0xff] %v9265_v2  ;;  %10873 = vst [vmem:[#allocation108_spill] sm:$0xff] %v9278_v62 }
 0x4b9   :  { %v662_v32 = vadd.f32 %v661_v3, %v9218_v14  ;;  %v9270_v3 = vmul.f32 %v607_v55, %v607_v55  ;;  %v1043_v15 = vadd.f32 %v9286_v46, %v1042_v42  ;;  %10877 = vst [vmem:[#allocation110_spill] sm:$0xff] %v9291_v60  ;;  %v10880_v55 = vld [vmem:[#allocation116_spill] sm:$0xff]  ;;  %v7681_v14 = vld [vmem:[#allocation9 + $0x138] sm:$0xff] }
 0x4bb   :  { %v663_v19 = vadd.f32 %v662_v32, %v9226_v21  ;;  %10871 = vst [vmem:[#allocation107_spill] sm:$0xff] %v9270_v3  ;;  %v10872_v32 = vld [vmem:[#allocation112_spill] sm:$0xff]  ;;  %v1044_v52 = vadd.f32 %v9299_v33, %v1043_v15 }
 0x4bc   :  { %v609_v35 = vsub.f32 %v10872_v32, %v9157_v13 }
 0x4bd   :  { %v664_v5 = vadd.f32 %v663_v19, %v9231_v50 }
 0x4be   :  { %v9283_v57 = vmul.f32 %v609_v35, %v609_v35 }
 0x4bf   :  { %v665_v48 = vadd.f32 %v664_v5, %v9239_v31 }
 0x4c0   :  { %10875 = vst [vmem:[#allocation109_spill] sm:$0xff] %v9283_v57 }
 0x4c1   :  { %v666_v34 = vadd.f32 %v665_v48, %v9244_v41  ;;  %v10876_v48 = vld [vmem:[#allocation114_spill] sm:$0xff] }
 0x4c2   :  { %v611_v43 = vsub.f32 %v10876_v48, %v9157_v13 }
 0x4c3   :  { %v667_v40 = vadd.f32 %v666_v34, %v9252_v26  ;;  %v10878_v34 = vld [vmem:[#allocation115_spill] sm:$0xff] }
 0x4c4   :  { %v612_v54 = vsub.f32 %v10878_v34, %v9157_v13  ;;  %v9296_v29 = vmul.f32 %v611_v43, %v611_v43  ;;  %v10886_v43 = vld [vmem:[#allocation119_spill] sm:$0xff] }
 0x4c5   :  { %v668_v9 = vadd.f32 %v667_v40, %v9257_v38 }
 0x4c6   :  { %10879 = vst [vmem:[#allocation111_spill] sm:$0xff] %v9296_v29  ;;  %v9304_v20 = vmul.f32 %v612_v54, %v612_v54 }
 0x4c7   :  { %v669_v53 = vadd.f32 %v668_v9, %v9265_v2  ;;  %v613_v9 = vsub.f32 %v10880_v55, %v9157_v13 }
 0x4c8   :  { %10881 = vst [vmem:[#allocation112_spill] sm:$0xff] %v9304_v20 }
 0x4c9   :  { %v670_v19 = vadd.f32 %v669_v53, %v9270_v3  ;;  %v10882_v53 = vld [vmem:[#allocation117_spill] sm:$0xff]  ;;  %v9309_v32 = vmul.f32 %v613_v9, %v613_v9 }
 0x4ca   :  { %v614_v42 = vsub.f32 %v10882_v53, %v9157_v13 }
 0x4cb   :  { %v671_v5 = vadd.f32 %v670_v19, %v9278_v62  ;;  %10883 = vst [vmem:[#allocation113_spill] sm:$0xff] %v9309_v32  ;;  %v9312_v19 = vld [vmem:[#allocation6 + $0xb8] sm:$0xff] }
 0x4cc   :  { %v1045_v45 = vadd.f32 %v9312_v19, %v1044_v52  ;;  %v9317_v15 = vmul.f32 %v614_v42, %v614_v42  ;;  %v10888_v52 = vld [vmem:[#allocation120_spill] sm:$0xff]  ;;  %v10890_v42 = vld [vmem:[#allocation121_spill] sm:$0xff] }
 0x4cd   :  { %v672_v16 = vadd.f32 %v671_v5, %v9283_v57  ;;  %v615_v5 = vsub.f32 %v10884_v10, %v9157_v13  ;;  %v617_v9 = vsub.f32 %v10888_v52, %v9157_v13 }
 0x4ce   :  { %10885 = vst [vmem:[#allocation114_spill] sm:$0xff] %v9317_v15 }
 0x4cf   :  { %v673_v40 = vadd.f32 %v672_v16, %v9291_v60  ;;  %v616_v16 = vsub.f32 %v10886_v43, %v9157_v13  ;;  %v9322_v34 = vmul.f32 %v615_v5, %v615_v5  ;;  %v9335_v10 = vmul.f32 %v617_v9, %v617_v9  ;;  %v9338_v43 = vld [vmem:[#allocation6 + $0xc8] sm:$0xff]  ;;  %v9350_v9 = vld [vmem:[#allocation6 + $0xd0] sm:$0xff] }
 0x4d1   :  { %v674_v4 = vadd.f32 %v673_v40, %v9296_v29  ;;  %10887 = vst [vmem:[#allocation115_spill] sm:$0xff] %v9322_v34  ;;  %v9325_v40 = vld [vmem:[#allocation6 + $0xc0] sm:$0xff]  ;;  %10891 = vst [vmem:[#allocation117_spill] sm:$0xff] %v9335_v10 }
 0x4d2   :  { %v1046_v55 = vadd.f32 %v9325_v40, %v1045_v45  ;;  %v10892_v45 = vld [vmem:[#allocation122_spill] sm:$0xff]  ;;  %v9367_v29 = vld [vmem:[#allocation6 + $0xe0] sm:$0xff] }
 0x4d3   :  { %v675_v35 = vadd.f32 %v674_v4, %v9304_v20  ;;  %v9330_v4 = vmul.f32 %v616_v16, %v616_v16 }
 0x4d5   :  { %v676_v48 = vadd.f32 %v675_v35, %v9309_v32  ;;  %10889 = vst [vmem:[#allocation116_spill] sm:$0xff] %v9330_v4  ;;  %v618_v35 = vsub.f32 %v10890_v42, %v9157_v13 }
 0x4d7   :  { %v677_v54 = vadd.f32 %v676_v48, %v9317_v15  ;;  %v1047_v48 = vadd.f32 %v9338_v43, %v1046_v55  ;;  %v619_v15 = vsub.f32 %v10892_v45, %v9157_v13  ;;  %v9343_v32 = vmul.f32 %v618_v35, %v618_v35  ;;  %v10896_v55 = vld [vmem:[#allocation124_spill] sm:$0xff]  ;;  %v9359_v45 = vld [vmem:[#allocation6 + $0xd8] sm:$0xff] }
 0x4d9   :  { %v678_v53 = vadd.f32 %v677_v54, %v9322_v34  ;;  %10893 = vst [vmem:[#allocation118_spill] sm:$0xff] %v9343_v32  ;;  %v10894_v54 = vld [vmem:[#allocation123_spill] sm:$0xff]  ;;  %v9348_v34 = vmul.f32 %v619_v15, %v619_v15  ;;  %v10898_v15 = vld [vmem:[#allocation125_spill] sm:$0xff] }
 0x4da   :  { %v620_v52 = vsub.f32 %v10894_v54, %v9157_v13  ;;  %v622_v54 = vsub.f32 %v10898_v15, %v9157_v13 }
 0x4db   :  { %v679_v5 = vadd.f32 %v678_v53, %v9330_v4  ;;  %10895 = vst [vmem:[#allocation119_spill] sm:$0xff] %v9348_v34  ;;  %v1048_v53 = vadd.f32 %v9350_v9, %v1047_v48  ;;  %v621_v4 = vsub.f32 %v10896_v55, %v9157_v13 }
 0x4dc   :  { %v9356_v20 = vmul.f32 %v620_v52, %v620_v52  ;;  %v10900_v52 = vld [vmem:[#allocation126_spill] sm:$0xff] }
 0x4dd   :  { %v680_v16 = vadd.f32 %v679_v5, %v9335_v10  ;;  %v1049_v5 = vadd.f32 %v9359_v45, %v1048_v53  ;;  %v9364_v10 = vmul.f32 %v621_v4, %v621_v4  ;;  %v623_v55 = vsub.f32 %v10900_v52, %v9157_v13  ;;  %v10902_v4 = vld [vmem:[#allocation127_spill] sm:$0xff] }
 0x4de   :  { %10897 = vst [vmem:[#allocation120_spill] sm:$0xff] %v9356_v20  ;;  %v624_v15 = vsub.f32 %v10902_v4, %v9157_v13 }
 0x4df   :  { %v681_v42 = vadd.f32 %v680_v16, %v9343_v32  ;;  %10899 = vst [vmem:[#allocation121_spill] sm:$0xff] %v9364_v10  ;;  %v1050_v16 = vadd.f32 %v9367_v29, %v1049_v5  ;;  %v9372_v32 = vmul.f32 %v622_v54, %v622_v54  ;;  %v9380_v60 = vmul.f32 %v623_v55, %v623_v55 }
 0x4e0   :  { %v9386_v52 = vmul.f32 %v624_v15, %v624_v15 }
 0x4e1   :  { %v682_v35 = vadd.f32 %v681_v42, %v9348_v34  ;;  %10901 = vst [vmem:[#allocation122_spill] sm:$0xff] %v9372_v32  ;;  %v9375_v34 = vld [vmem:[#allocation6 + $0xe8] sm:$0xff]  ;;  %10903 = vst [vmem:[#allocation123_spill] sm:$0xff] %v9380_v60 }
 0x4e2   :  { %v1051_v53 = vadd.f32 %v9375_v34, %v1050_v16  ;;  %10904 = vst [vmem:[#allocation124_spill] sm:$0xff] %v9386_v52 }
 0x4e3   :  { %v683_v48 = vadd.f32 %v682_v35, %v9356_v20  ;;  %v9383_v20 = vld [vmem:[#allocation6 + $0xf0] sm:$0xff] }
 0x4e4   :  { %v1052_v5 = vadd.f32 %v9383_v20, %v1051_v53 }
 0x4e5   :  { %v684_v42 = vadd.f32 %v683_v48, %v9364_v10  ;;  %v9389_v48 = vld [vmem:[#allocation6 + $0xf8] sm:$0xff] }
 0x4e6   :  { %v1053_v10 = vadd.f32 %v9389_v48, %v1052_v5 }
 0x4e7   :  { %v685_v35 = vadd.f32 %v684_v42, %v9372_v32 }
 0x4e8   :  { %1054 = vadd.xlane.f32.xlu0 %v1053_v10 }
 0x4e9   :  { %v686_v54 = vadd.f32 %v685_v35, %v9380_v60 }
 0x4eb   :  { %v687_v16 = vadd.f32 %v686_v54, %v9386_v52 }
 0x4ed   :  { %688 = vadd.xlane.f32.xlu1 %v687_v16 }
 0x50b   :  { %v6046_v13 = vpop.f32.mrb[80].mxu1 }
 0x50c   :  { %v2759_v55 = vpop.f32.mrb[81].mxu1 }
 0x50d   :  { %v6654_v4 = vpack.c.bf16 %v6046_v13, %v2759_v55 }
 0x50f   :  { %v6049_v42 = vpop.f32.mrb[82].mxu1 }
 0x510   :  { %v2769_v32 = vpop.f32.mrb[83].mxu1 }
 0x511   :  { %v6658_v57 = vpack.c.bf16 %v6049_v42, %v2769_v32 }
 0x513   :  { %v6052_v62 = vpop.f32.mrb[84].mxu1 }
 0x514   :  { %v2779_v53 = vpop.f32.mrb[85].mxu1 }
 0x515   :  { %v6662_v15 = vpack.c.bf16 %v6052_v62, %v2779_v53 }
 0x517   :  { %v6055_v3 = vpop.f32.mrb[86].mxu1 }
 0x518   :  { %v2789_v2 = vpop.f32.mrb[87].mxu1 }
 0x519   :  { %v6666_v35 = vpack.c.bf16 %v6055_v3, %v2789_v2 }
 0x51b   :  { %v6058_v60 = vpop.f32.mrb[88].mxu1 }
 0x51c   :  { %v2799_v38 = vpop.f32.mrb[89].mxu1 }
 0x51d   :  { %v6670_v26 = vpack.c.bf16 %v6058_v60, %v2799_v38 }
 0x51f   :  { %v6061_v5 = vpop.f32.mrb[90].mxu1 }
 0x520   :  { %v2809_v41 = vpop.f32.mrb[91].mxu1 }
 0x521   :  { %v6674_v54 = vpack.c.bf16 %v6061_v5, %v2809_v41 }
 0x523   :  { %v6064_v10 = vpop.f32.mrb[92].mxu1 }
 0x524   :  { %v2819_v16 = vpop.f32.mrb[93].mxu1 }
 0x525   :  { %v6678_v52 = vpack.c.bf16 %v6064_v10, %v2819_v16 }
 0x527   :  { %v6067_v31 = vpop.f32.mrb[94].mxu1 }
 0x528   :  { %v2829_v13 = vpop.f32.mrb[95].mxu1 }
 0x529   :  { %v6682_v55 = vpack.c.bf16 %v6067_v31, %v2829_v13 }
 0x52b   :  { %v6070_v50 = vpop.f32.mrb[96].mxu1 }
 0x52c   :  { %v2839_v32 = vpop.f32.mrb[97].mxu1 }
 0x52d   :  { %v6652_v42 = vpack.c.bf16 %v6070_v50, %v2839_v32 }
 0x52f   :  { %v6073_v21 = vpop.f32.mrb[98].mxu1  ;;  %6653 = vmatprep.subr.bf16.mxu0 %v6652_v42 }
 0x530   :  { %v2849_v62 = vpop.f32.mrb[99].mxu1  ;;  %6655 = vmatpush3.bf16.msra.mxu0 %v6654_v4 }
 0x531   :  { %v6656_v2 = vpack.c.bf16 %v6073_v21, %v2849_v62 }
 0x533   :  { %v6076_v3 = vpop.f32.mrb[100].mxu1  ;;  %6657 = vmatprep.subr.bf16.mxu0 %v6656_v2 }
 0x534   :  { %v2859_v38 = vpop.f32.mrb[101].mxu1  ;;  %6659 = vmatpush3.bf16.msra.mxu0 %v6658_v57 }
 0x535   :  { %v6660_v60 = vpack.c.bf16 %v6076_v3, %v2859_v38 }
 0x537   :  { %v6079_v41 = vpop.f32.mrb[102].mxu1  ;;  %6661 = vmatprep.subr.bf16.mxu0 %v6660_v60  ;;  %v7641_v60 = vld [vmem:[#allocation9] sm:$0xff] }
 0x538   :  { %v2869_v53 = vpop.f32.mrb[103].mxu1  ;;  %6663 = vmatpush3.bf16.msra.mxu0 %v6662_v15 }
 0x539   :  { %v6664_v5 = vpack.c.bf16 %v6079_v41, %v2869_v53  ;;  %v7642_v41 = vld [vmem:[#allocation9 + $0x20] sm:$0xff] }
 0x53b   :  { %v6082_v10 = vpop.f32.mrb[104].mxu1  ;;  %6665 = vmatprep.subr.bf16.mxu0 %v6664_v5  ;;  %v7643_v5 = vld [vmem:[#allocation9 + $0x18] sm:$0xff] }
 0x53c   :  { %v2879_v31 = vpop.f32.mrb[105].mxu1  ;;  %6667 = vmatpush3.bf16.msra.mxu0 %v6666_v35 }
 0x53d   :  { %v6668_v50 = vpack.c.bf16 %v6082_v10, %v2879_v31  ;;  %v7644_v10 = vld [vmem:[#allocation9 + $0x38] sm:$0xff] }
 0x53f   :  { %v6085_v16 = vpop.f32.mrb[106].mxu1  ;;  %6669 = vmatprep.subr.bf16.mxu0 %v6668_v50  ;;  %v7645_v50 = vld [vmem:[#allocation9 + $0x30] sm:$0xff] }
 0x540   :  { %v2889_v13 = vpop.f32.mrb[107].mxu1  ;;  %6671 = vmatpush3.bf16.msra.mxu0 %v6670_v26 }
 0x541   :  { %v6672_v21 = vpack.c.bf16 %v6085_v16, %v2889_v13  ;;  %v7646_v13 = vld [vmem:[#allocation9 + $0x50] sm:$0xff] }
 0x543   :  { %v6088_v4 = vpop.f32.mrb[108].mxu1  ;;  %6673 = vmatprep.subr.bf16.mxu0 %v6672_v21 }
 0x544   :  { %v2899_v32 = vpop.f32.mrb[109].mxu1  ;;  %6675 = vmatpush3.bf16.msra.mxu0 %v6674_v54 }
 0x545   :  { %v6676_v57 = vpack.c.bf16 %v6088_v4, %v2899_v32  ;;  %v7647_v32 = vld [vmem:[#allocation9 + $0x48] sm:$0xff] }
 0x547   :  { %v6091_v42 = vpop.f32.mrb[110].mxu1  ;;  %6677 = vmatprep.subr.bf16.mxu0 %v6676_v57 }
 0x548   :  { %v2909_v62 = vpop.f32.mrb[111].mxu1  ;;  %6679 = vmatpush3.bf16.msra.mxu0 %v6678_v52 }
 0x549   :  { %v6680_v15 = vpack.c.bf16 %v6091_v42, %v2909_v62  ;;  %v7648_v42 = vld [vmem:[#allocation9 + $0x68] sm:$0xff] }
 0x54b   :  { %v6094_v2 = vpop.f32.mrb[112].mxu1  ;;  %6681 = vmatprep.subr.bf16.mxu0 %v6680_v15 }
 0x54c   :  { %v2919_v3 = vpop.f32.mrb[113].mxu1  ;;  %6683 = vmatpush3.bf16.msra.mxu0 %v6682_v55 }
 0x54d   :  { %v6684_v35 = vpack.c.bf16 %v6094_v2, %v2919_v3  ;;  %v7649_v2 = vld [vmem:[#allocation9 + $0x60] sm:$0xff] }
 0x54f   :  { %v6097_v38 = vpop.f32.mrb[114].mxu1  ;;  %3063 = vmatmul.mubr.f32.vlgmr.msra.gmra.mrb[96].mxu0 %v7641_v60  ;;  %6685 = vmatprep.subr.bf16.mxu0 %v6684_v35 }
 0x550   :  { %v2929_v26 = vpop.f32.mrb[115].mxu1  ;;  %6687 = vmatpush3.bf16.msra.mxu0 %v6684_v35  ;;  %3067 = vmatprep.mubr.f32.mxu0 %v7642_v41  ;;  %v7650_v35 = vld [vmem:[#allocation9 + $0x80] sm:$0xff] }
 0x551   :  { %v6688_v54 = vpack.c.bf16 %v6097_v38, %v2929_v26  ;;  %v7651_v26 = vld [vmem:[#allocation9 + $0x78] sm:$0xff] }
 0x553   :  { %v6100_v53 = vpop.f32.mrb[116].mxu1  ;;  %3068 = vmatmul.mubr.f32.gmra.mrb[98].mxu0 %v7643_v5  ;;  %6689 = vmatprep.subr.bf16.mxu0 %v6688_v54 }
 0x554   :  { %v2939_v52 = vpop.f32.mrb[117].mxu1  ;;  %6691 = vmatpush3.bf16.msra.mxu0 %v6688_v54  ;;  %3072 = vmatprep.mubr.f32.mxu0 %v7644_v10  ;;  %v7652_v54 = vld [vmem:[#allocation9 + $0x98] sm:$0xff] }
 0x555   :  { %v6692_v31 = vpack.c.bf16 %v6100_v53, %v2939_v52  ;;  %v7653_v52 = vld [vmem:[#allocation9 + $0x90] sm:$0xff] }
 0x557   :  { %v6103_v55 = vpop.f32.mrb[118].mxu1  ;;  %3073 = vmatmul.mubr.f32.gmra.mrb[100].mxu0 %v7645_v50  ;;  %6693 = vmatprep.subr.bf16.mxu0 %v6692_v31 }
 0x558   :  { %v2949_v16 = vpop.f32.mrb[119].mxu1  ;;  %6695 = vmatpush3.bf16.msra.mxu0 %v6692_v31  ;;  %3077 = vmatprep.mubr.f32.mxu0 %v7646_v13  ;;  %v7654_v31 = vld [vmem:[#allocation9 + $0xb0] sm:$0xff]  ;;  %v7656_v13 = vld [vmem:[%s10448_s5] sm:$0xff] }
 0x559   :  { %v6696_v21 = vpack.c.bf16 %v6103_v55, %v2949_v16  ;;  %v7655_v55 = vld [vmem:[%s10448_s5 + $0x8] sm:$0xff] }
 0x55a   :  { %v3417_v50 = vmul.f32 128.0, %v7655_v55  ;;  %v7664_v55 = vld [vmem:[%s10448_s5 + $0x20] sm:$0xff] }
 0x55b   :  { %v6106_v4 = vpop.f32.mrb[120].mxu1  ;;  %3078 = vmatmul.mubr.f32.gmra.mrb[102].mxu0 %v7647_v32  ;;  %6697 = vmatprep.subr.bf16.mxu0 %v6696_v21 }
 0x55c   :  { %v2959_v57 = vpop.f32.mrb[121].mxu1  ;;  %6699 = vmatpush3.bf16.msra.mxu0 %v6696_v21  ;;  %3082 = vmatprep.mubr.f32.mxu0 %v7648_v42  ;;  %v3416_v21 = vmul.f32 128.0, %v7656_v13 }
 0x55d   :  { %v6700_v62 = vpack.c.bf16 %v6106_v4, %v2959_v57  ;;  %v7657_v4 = vld [vmem:[#allocation9 + $0xa8] sm:$0xff] }
 0x55e   :  { %v7658_v57 = vld [vmem:[#allocation9 + $0xc8] sm:$0xff] }
 0x55f   :  { %v6109_v15 = vpop.f32.mrb[122].mxu1  ;;  %3083 = vmatmul.mubr.f32.gmra.mrb[104].mxu0 %v7649_v2  ;;  %6701 = vmatprep.subr.bf16.mxu0 %v6700_v62 }
 0x560   :  { %v2969_v3 = vpop.f32.mrb[123].mxu1  ;;  %6703 = vmatpush3.bf16.msra.mxu0 %v6700_v62  ;;  %3087 = vmatprep.mubr.f32.mxu0 %v7650_v35  ;;  %v7660_v35 = vld [vmem:[%s10448_s5 + $0x10] sm:$0xff] }
 0x561   :  { %v6704_v38 = vpack.c.bf16 %v6109_v15, %v2969_v3  ;;  %v7659_v15 = vld [vmem:[%s10448_s5 + $0x18] sm:$0xff] }
 0x562   :  { %v3419_v2 = vmul.f32 128.0, %v7659_v15 }
 0x563   :  { %v6112_v60 = vpop.f32.mrb[124].mxu1  ;;  %3088 = vmatmul.mubr.f32.gmra.mrb[106].mxu0 %v7651_v26  ;;  %6705 = vmatprep.subr.bf16.mxu0 %v6704_v38 }
 0x564   :  { %v2979_v41 = vpop.f32.mrb[125].mxu1  ;;  %6707 = vmatpush3.bf16.msra.mxu0 %v6704_v38  ;;  %3092 = vmatprep.mubr.f32.mxu0 %v7652_v54  ;;  %v3418_v38 = vmul.f32 128.0, %v7660_v35  ;;  %v7662_v54 = vld [vmem:[#allocation9 + $0xe0] sm:$0xff]  ;;  %v7669_v35 = vld [vmem:[#allocation9 + $0xf0] sm:$0xff] }
 0x565   :  { %v6708_v53 = vpack.c.bf16 %v6112_v60, %v2979_v41  ;;  %v7661_v60 = vld [vmem:[#allocation9 + $0xc0] sm:$0xff] }
 0x567   :  { %v6115_v5 = vpop.f32.mrb[126].mxu1  ;;  %3093 = vmatmul.mubr.f32.gmra.mrb[108].mxu0 %v7653_v52  ;;  %6709 = vmatprep.subr.bf16.mxu0 %v6708_v53  ;;  %v7663_v52 = vld [vmem:[%s10448_s5 + $0x28] sm:$0xff] }
 0x568   :  { %v2989_v10 = vpop.f32.mrb[127].mxu1  ;;  %6711 = vmatpush3.bf16.msra.mxu0 %v6708_v53  ;;  %3097 = vmatprep.mubr.f32.mxu0 %v7654_v31 }
 0x569   :  { %v6712_v16 = vpack.c.bf16 %v6115_v5, %v2989_v10  ;;  %v3421_v10 = vmul.f32 128.0, %v7663_v52 }
 0x56b   :  { %3098 = vmatmul.mubr.f32.gmra.mrb[110].mxu0 %v7657_v4  ;;  %6713 = vmatprep.subr.bf16.mxu0 %v6712_v16  ;;  %v6206_v32 = vpop.f32.mrb[128].mxu1  ;;  %v7666_v4 = vld [vmem:[#allocation9 + $0xf8] sm:$0xff] }
 0x56c   :  { %6715 = vmatpush3.bf16.msra.mxu0 %v6712_v16  ;;  %3102 = vmatprep.mubr.f32.mxu0 %v7658_v57  ;;  %v3504_v42 = vadd.f32 %v6206_v32, %v3417_v50  ;;  %v3498_v62 = vpop.f32.mrb[129].mxu1  ;;  %v3420_v50 = vmul.f32 128.0, %v7664_v55  ;;  %v7665_v16 = vld [vmem:[#allocation9 + $0xd8] sm:$0xff] }
 0x56d   :  { %v3499_v3 = vadd.f32 %v3498_v62, %v3416_v21 }
 0x56f   :  { %3103 = vmatmul.mubr.f32.gmra.mrb[112].mxu0 %v7661_v60  ;;  %v9405_v26 = vpack.c.bf16 %v3504_v42, %v3499_v3  ;;  %v6209_v41 = vpop.f32.mrb[130].mxu1  ;;  %v7667_v42 = vld [vmem:[%s10448_s5 + $0x38] sm:$0xff] }
 0x570   :  { %3107 = vmatprep.mubr.f32.mxu0 %v7662_v54  ;;  %v3514_v53 = vadd.f32 %v6209_v41, %v3419_v2  ;;  %v3508_v5 = vpop.f32.mrb[131].mxu1  ;;  %v3423_v62 = vmul.f32 128.0, %v7667_v42  ;;  %v7668_v2 = vld [vmem:[%s10448_s5 + $0x30] sm:$0xff]  ;;  %v7675_v42 = vld [vmem:[%s10448_s5 + $0x58] sm:$0xff] }
 0x571   :  { %v3509_v31 = vadd.f32 %v3508_v5, %v3418_v38  ;;  %6749 = vmatprep.subr.bf16.mxu0 %v9405_v26  ;;  %v3422_v3 = vmul.f32 128.0, %v7668_v2  ;;  %v7670_v41 = vld [vmem:[#allocation9 + $0x110] sm:$0xff]  ;;  %v7671_v5 = vld [vmem:[%s10448_s5 + $0x48] sm:$0xff] }
 0x572   :  { %v3425_v52 = vmul.f32 128.0, %v7671_v5  ;;  %v7676_v2 = vld [vmem:[%s10448_s5 + $0x50] sm:$0xff] }
 0x573   :  { %3108 = vmatmul.mubr.f32.gmra.mrb[114].mxu0 %v7665_v16  ;;  %v9414_v13 = vpack.c.bf16 %v3514_v53, %v3509_v31  ;;  %v6212_v21 = vpop.f32.mrb[132].mxu1  ;;  %v7672_v31 = vld [vmem:[%s10448_s5 + $0x40] sm:$0xff] }
 0x574   :  { %3112 = vmatprep.mubr.f32.mxu0 %v7666_v4  ;;  %v3524_v32 = vadd.f32 %v6212_v21, %v3421_v10  ;;  %v3518_v57 = vpop.f32.mrb[133].mxu1  ;;  %v3424_v55 = vmul.f32 128.0, %v7672_v31  ;;  %v7674_v4 = vld [vmem:[#allocation9 + $0x128] sm:$0xff] }
 0x575   :  { %v3519_v15 = vadd.f32 %v3518_v57, %v3420_v50  ;;  %v7673_v50 = vld [vmem:[#allocation9 + $0x108] sm:$0xff] }
 0x577   :  { %3113 = vmatmul.mubr.f32.gmra.mrb[116].mxu0 %v7669_v35  ;;  %v9422_v38 = vpack.c.bf16 %v3524_v32, %v3519_v15  ;;  %v6215_v60 = vpop.f32.mrb[134].mxu1 }
 0x578   :  { %3117 = vmatprep.mubr.f32.mxu0 %v7670_v41  ;;  %v3534_v54 = vadd.f32 %v6215_v60, %v3423_v62  ;;  %v3528_v53 = vpop.f32.mrb[135].mxu1  ;;  %v3427_v62 = vmul.f32 128.0, %v7675_v42  ;;  %v1055_v60 = vpop.xlane.xlu0 %1054 }
 0x579   :  { %v3529_v10 = vadd.f32 %v3528_v53, %v3422_v3  ;;  %v3426_v3 = vmul.f32 128.0, %v7676_v2  ;;  %v7677_v53 = vld [vmem:[#allocation9 + $0x120] sm:$0xff] }
 0x57a   :  { %v689_v35 = vpop.xlane.xlu1 %688  ;;  %v7680_v2 = vld [vmem:[%s10448_s5 + $0x60] sm:$0xff] }
 0x57b   :  { %3118 = vmatmul.mubr.f32.gmra.mrb[118].mxu0 %v7673_v50  ;;  %v9430_v16 = vpack.c.bf16 %v3534_v54, %v3529_v10  ;;  %v6218_v21 = vpop.f32.mrb[136].mxu1  ;;  %v690_v41 = vrot.slane %v689_v35, 4  ;;  %v1056_v54 = vrot.slane %v1055_v60, 4  ;;  %v7678_v10 = vld [vmem:[#allocation9 + $0x140] sm:$0xff] }
 0x57c   :  { %3122 = vmatprep.mubr.f32.mxu0 %v7674_v4  ;;  %v3544_v32 = vadd.f32 %v6218_v21, %v3425_v52  ;;  %v3538_v57 = vpop.f32.mrb[137].mxu1 }
 0x57d   :  { %v3539_v15 = vadd.f32 %v3538_v57, %v3424_v55  ;;  %v7679_v55 = vld [vmem:[%s10448_s5 + $0x68] sm:$0xff]  ;;  %v691_v4 = vadd.f32 %v690_v41, %v689_v35  ;;  %v1057_v57 = vadd.f32 %v1056_v54, %v1055_v60 }
 0x57e   :  { %v3429_v21 = vmul.f32 128.0, %v7679_v55 }
 0x57f   :  { %3123 = vmatmul.mubr.f32.gmra.mrb[120].mxu0 %v7677_v53  ;;  %v9438_v5 = vpack.c.bf16 %v3544_v32, %v3539_v15  ;;  %v6221_v52 = vpop.f32.mrb[138].mxu1  ;;  %v3428_v53 = vmul.f32 128.0, %v7680_v2  ;;  %v692_v32 = vrot.slane %v691_v4, 2  ;;  %v1058_v15 = vrot.slane %v1057_v57, 2 }
 0x580   :  { %3127 = vmatprep.mubr.f32.mxu0 %v7678_v10  ;;  %v3554_v31 = vadd.f32 %v6221_v52, %v3427_v62  ;;  %v3548_v50 = vpop.f32.mrb[139].mxu1  ;;  %v7682_v52 = vld [vmem:[#allocation9 + $0x158] sm:$0xff] }
 0x581   :  { %v3549_v42 = vadd.f32 %v3548_v50, %v3426_v3  ;;  %v7683_v3 = vld [vmem:[%s10448_s5 + $0x78] sm:$0xff]  ;;  %v693_v60 = vadd.f32 %v692_v32, %v691_v4  ;;  %v1059_v41 = vadd.f32 %v1058_v15, %v1057_v57  ;;  %v7684_v50 = vld [vmem:[%s10448_s5 + $0x70] sm:$0xff] }
 0x582   :  { %v3431_v35 = vmul.f32 128.0, %v7683_v3  ;;  %v7689_v32 = vld [vmem:[#allocation9 + $0x28] sm:$0xff]  ;;  %v7691_v15 = vld [vmem:[#allocation9 + $0x58] sm:$0xff] }
 0x583   :  { %3128 = vmatmul.mubr.f32.gmra.mrb[122].mxu0 %v7681_v14  ;;  %v9446_v10 = vpack.c.bf16 %v3554_v31, %v3549_v42  ;;  %v6224_v62 = vpop.f32.mrb[140].mxu1  ;;  %v3430_v14 = vmul.f32 128.0, %v7684_v50  ;;  %v694_v31 = vrot.slane %v693_v60, 1  ;;  %v1060_v55 = vrot.slane %v1059_v41, 1  ;;  %v7685_v42 = vld [vmem:[#allocation9 + $0x150] sm:$0xff]  ;;  %v7702_v50 = vld [vmem:[#allocation9 + $0x160] sm:$0xff] }
 0x584   :  { %3132 = vmatprep.mubr.f32.mxu0 %v7682_v52  ;;  %v3564_v6 = vadd.f32 %v6224_v62, %v3429_v21  ;;  %v3558_v0 = vpop.f32.mrb[141].mxu1  ;;  %v7686_v62 = vld [vmem:[#allocation9 + $0x170] sm:$0xff] }
 0x585   :  { %v3559_v54 = vadd.f32 %v3558_v0, %v3428_v53  ;;  %v695_v61 = vadd.f32 %v694_v31, %v693_v60  ;;  %v1061_v3 = vadd.f32 %v1060_v55, %v1059_v41  ;;  %v7687_v0 = vld [vmem:[#allocation9 + $0x168] sm:$0xff]  ;;  %v7688_v53 = vld [vmem:[#allocation9 + $0x10] sm:$0xff]  ;;  %v7698_v41 = vld [vmem:[#allocation9 + $0x100] sm:$0xff] }
 0x586   :  { %v7696_v60 = vld [vmem:[#allocation9 + $0xd0] sm:$0xff]  ;;  %v10906_v31 = vld [vmem:[#allocation17_spill] sm:$0xff] }
 0x587   :  { %3133 = vmatmul.mubr.f32.gmra.mrb[124].mxu0 %v7685_v42  ;;  %v6772_v2 = vpack.c.bf16 %v3564_v6, %v3559_v54  ;;  %v6227_v21 = vpop.f32.mrb[142].mxu1  ;;  %6894 = vpush %v695_v61  ;;  %v7690_v6 = vld [vmem:[#allocation9 + $0x40] sm:$0xff]  ;;  %v7693_v61 = vld [vmem:[#allocation9 + $0x88] sm:$0xff]  ;;  %v7700_v54 = vld [vmem:[#allocation9 + $0x130] sm:$0xff] }
 0x588   :  { %3137 = vmatprep.mubr.f32.mxu0 %v7686_v62  ;;  %v3574_v52 = vadd.f32 %v6227_v21, %v3431_v35  ;;  %v3568_v25 = vpop.f32.mrb[143].mxu1  ;;  %6896 = vpush %v1061_v3  ;;  %v7694_v35 = vld [vmem:[#allocation9 + $0xa0] sm:$0xff]  ;;  %v10907_v55 = vld [vmem:[#allocation18_spill] sm:$0xff]  ;;  %v10908_v42 = vld [vmem:[#allocation19_spill] sm:$0xff] }
 0x589   :  { %v3569_v4 = vadd.f32 %v3568_v25, %v3430_v14  ;;  %v7692_v25 = vld [vmem:[#allocation9 + $0x70] sm:$0xff]  ;;  %v7703_v14 = vld [vmem:[#allocation9 + $0x178] sm:$0xff]  ;;  %v10910_v21 = vld [vmem:[#allocation21_spill] sm:$0xff] }
 0x58a   :  { %v10911_v62 = vld [vmem:[#allocation22_spill] sm:$0xff] }
 0x58b   :  { %3138 = vmatmul.mubr.f32.gmra.mrb[126].mxu0 %v7687_v0  ;;  %v6776_v57 = vpack.c.bf16 %v3574_v52, %v3569_v4  ;;  %v10913_v52 = vld [vmem:[#allocation24_spill] sm:$0xff]  ;;  %v10914_v4 = vld [vmem:[#allocation25_spill] sm:$0xff] }
 0x58c   :  { %6148 = vmatprep.mubr.f32.mxu0 %v7688_v53 }
 0x58f   :  { %6149 = vmatmul.mubr.f32.vlgmr.msra.gmra.mrb[128].mxu0 %v7689_v32 }
 0x590   :  { %6751 = vmatpush3.bf16.msra.mxu0 %v9405_v26  ;;  %6151 = vmatprep.mubr.f32.mxu0 %v7690_v6  ;;  %v7695_v26 = vld [vmem:[#allocation9 + $0xb8] sm:$0xff] }
 0x591   :  { %6753 = vmatprep.subr.bf16.mxu0 %v9414_v13 }
 0x593   :  { %6152 = vmatmul.mubr.f32.gmra.mrb[130].mxu0 %v7691_v15  ;;  %v10916_v15 = vld [vmem:[#allocation27_spill] sm:$0xff] }
 0x594   :  { %6755 = vmatpush3.bf16.msra.mxu0 %v9414_v13  ;;  %6154 = vmatprep.mubr.f32.mxu0 %v7692_v25  ;;  %v7697_v13 = vld [vmem:[#allocation9 + $0xe8] sm:$0xff] }
 0x595   :  { %6757 = vmatprep.subr.bf16.mxu0 %v9422_v38 }
 0x597   :  { %6155 = vmatmul.mubr.f32.gmra.mrb[132].mxu0 %v7693_v61 }
 0x598   :  { %6759 = vmatpush3.bf16.msra.mxu0 %v9422_v38  ;;  %6157 = vmatprep.mubr.f32.mxu0 %v7694_v35  ;;  %v7699_v38 = vld [vmem:[#allocation9 + $0x118] sm:$0xff]  ;;  %v10917_v35 = vld [vmem:[#allocation28_spill] sm:$0xff] }
 0x599   :  { %6761 = vmatprep.subr.bf16.mxu0 %v9430_v16 }
 0x59b   :  { %6158 = vmatmul.mubr.f32.gmra.mrb[134].mxu0 %v7695_v26 }
 0x59c   :  { %6763 = vmatpush3.bf16.msra.mxu0 %v9430_v16  ;;  %6160 = vmatprep.mubr.f32.mxu0 %v7696_v60  ;;  %v7701_v16 = vld [vmem:[#allocation9 + $0x148] sm:$0xff] }
 0x59d   :  { %6765 = vmatprep.subr.bf16.mxu0 %v9438_v5 }
 0x59f   :  { %6161 = vmatmul.mubr.f32.gmra.mrb[136].mxu0 %v7697_v13  ;;  %v10918_v13 = vld [vmem:[#allocation30_spill] sm:$0xff] }
 0x5a0   :  { %6767 = vmatpush3.bf16.msra.mxu0 %v9438_v5  ;;  %6163 = vmatprep.mubr.f32.mxu0 %v7698_v41  ;;  %v10905_v5 = vld [vmem:[#allocation16_spill] sm:$0xff] }
 0x5a1   :  { %6769 = vmatprep.subr.bf16.mxu0 %v9446_v10 }
 0x5a3   :  { %6164 = vmatmul.mubr.f32.gmra.mrb[138].mxu0 %v7699_v38  ;;  %v10919_v38 = vld [vmem:[#allocation33_spill] sm:$0xff] }
 0x5a4   :  { %6771 = vmatpush3.bf16.msra.mxu0 %v9446_v10  ;;  %6166 = vmatprep.mubr.f32.mxu0 %v7700_v54  ;;  %v10909_v10 = vld [vmem:[#allocation20_spill] sm:$0xff] }
 0x5a5   :  { %6773 = vmatprep.subr.bf16.mxu0 %v6772_v2 }
 0x5a7   :  { %6167 = vmatmul.mubr.f32.gmra.mrb[140].mxu0 %v7701_v16 }
 0x5a8   :  { %6775 = vmatpush3.bf16.msra.mxu0 %v6772_v2  ;;  %6169 = vmatprep.mubr.f32.mxu0 %v7702_v50  ;;  %v10912_v2 = vld [vmem:[#allocation23_spill] sm:$0xff] }
 0x5a9   :  { %6777 = vmatprep.subr.bf16.mxu0 %v6776_v57 }
 0x5ab   :  { %6170 = vmatmul.mubr.f32.gmra.mrb[142].mxu0 %v7703_v14 }
 0x5ac   :  { %6779 = vmatpush3.bf16.msra.mxu0 %v6776_v57  ;;  %6260 = vmatprep.mubr.f32.mxu0 %v10905_v5  ;;  %v10915_v57 = vld [vmem:[#allocation26_spill] sm:$0xff] }
 0x5af   :  { %6261 = vmatmul.mubr.f32.vlgmr.msra.gmra.mrb[144].mxu0 %v10906_v31  ;;  %v10921_v31 = vld [vmem:[#allocation36_spill] sm:$0xff] }
 0x5b0   :  { %6263 = vmatprep.mubr.f32.mxu0 %v10907_v55 }
 0x5b3   :  { %6264 = vmatmul.mubr.f32.gmra.mrb[146].mxu0 %v10908_v42 }
 0x5b4   :  { %6266 = vmatprep.mubr.f32.mxu0 %v10909_v10 }
 0x5b7   :  { %6267 = vmatmul.mubr.f32.gmra.mrb[148].mxu0 %v10910_v21 }
 0x5b8   :  { %6269 = vmatprep.mubr.f32.mxu0 %v10911_v62  ;;  %s9474_s5 = spop %6894 }
 0x5b9   :  { %s6897_s30 = spop %6896 }
 0x5ba   :  { %v1063_v3 = vstv %s6897_s30 }
 0x5bb   :  { %6270 = vmatmul.mubr.f32.gmra.mrb[150].mxu0 %v10912_v2  ;;  %v9477_v0 = vmul.f32 3.0517578e-05, %v1063_v3  ;;  %v10923_v2 = vld [vmem:[#allocation44_spill] sm:$0xff] }
 0x5bc   :  { %6272 = vmatprep.mubr.f32.mxu0 %v10913_v52 }
 0x5bd   :  { %v1065_v53 = vsub.f32 %v9064_v30, %v9477_v0  ;;  %v1066_v32 = vsub.f32 %v9062_v47, %v9477_v0  ;;  %v1067_v6 = vsub.f32 %v9073_v63, %v9477_v0  ;;  %v1068_v26 = vsub.f32 %v9080_v58, %v9477_v0 }
 0x5be   :  { %v1069_v47 = vsub.f32 %v9087_v7, %v9477_v0  ;;  %v1070_v54 = vsub.f32 %v9094_v22, %v9477_v0  ;;  %v1071_v50 = vsub.f32 %v9101_v12, %v9477_v0  ;;  %v10920_v7 = vld [vmem:[#allocation37_spill] sm:$0xff]  ;;  %v1072_v55 = vsub.f32 %v9109_v36, %v9477_v0  ;;  %v10922_v12 = vld [vmem:[#allocation40_spill] sm:$0xff] }
 0x5bf   :  { %6273 = vmatmul.mubr.f32.gmra.mrb[152].mxu0 %v10914_v4  ;;  %v9487_v25 = vmul.f32 %v1065_v53, %v1065_v53  ;;  %v9489_v61 = vmul.f32 %v1066_v32, %v1066_v32  ;;  %v9494_v60 = vmul.f32 %v1067_v6, %v1067_v6  ;;  %v9500_v63 = vmul.f32 %v1068_v26, %v1068_v26  ;;  %v10925_v32 = vld [vmem:[#allocation52_spill] sm:$0xff] }
 0x5c0   :  { %6275 = vmatprep.mubr.f32.mxu0 %v10915_v57  ;;  %v9507_v58 = vmul.f32 %v1069_v47, %v1069_v47  ;;  %v9512_v14 = vmul.f32 %v1070_v54, %v1070_v54  ;;  %v9519_v42 = vmul.f32 %v1071_v50, %v1071_v50  ;;  %v1073_v10 = vsub.f32 %v9118_v11, %v9477_v0  ;;  %v10924_v11 = vld [vmem:[#allocation48_spill] sm:$0xff]  ;;  %v10928_v47 = vld [vmem:[#allocation59_spill] sm:$0xff] }
 0x5c1   :  { %v1129_v30 = vadd.f32 %v9489_v61, %v9487_v25  ;;  %v9524_v21 = vmul.f32 %v1072_v55, %v1072_v55  ;;  %v1074_v52 = vsub.f32 %v9127_v23, %v9477_v0  ;;  %v1075_v4 = vsub.f32 %v9136_v28, %v9477_v0  ;;  %v10927_v28 = vld [vmem:[#allocation55_spill] sm:$0xff] }
 0x5c2   :  { %v9531_v3 = vmul.f32 %v1073_v10, %v1073_v10  ;;  %v1076_v6 = vsub.f32 %v9145_v27, %v9477_v0  ;;  %v10932_v50 = vld [vmem:[#allocation63_spill] sm:$0xff] }
 0x5c3   :  { %6276 = vmatmul.mubr.f32.gmra.mrb[154].mxu0 %v10916_v15  ;;  %v1130_v41 = vadd.f32 %v1129_v30, %v9494_v60  ;;  %v9536_v57 = vmul.f32 %v1074_v52, %v1074_v52  ;;  %v9543_v15 = vmul.f32 %v1075_v4, %v1075_v4  ;;  %v10936_v10 = vld [vmem:[#allocation67_spill] sm:$0xff] }
 0x5c4   :  { %6278 = vmatprep.mubr.f32.mxu0 %v10917_v35  ;;  %v1077_v35 = vsub.f32 %v9154_v8, %v9477_v0  ;;  %v9548_v26 = vmul.f32 %v1076_v6, %v1076_v6  ;;  %v10931_v8 = vld [vmem:[#allocation61_spill] sm:$0xff]  ;;  %v10940_v4 = vld [vmem:[#allocation71_spill] sm:$0xff] }
 0x5c5   :  { %v1131_v16 = vadd.f32 %v1130_v41, %v9500_v63 }
 0x5c6   :  { %10926 = vst [vmem:[#allocation125_spill] sm:$0xff] %v9548_v26  ;;  %v9555_v41 = vmul.f32 %v1077_v35, %v1077_v35  ;;  %v10944_v35 = vld [vmem:[#allocation75_spill] sm:$0xff] }
 0x5c7   :  { %6279 = vmatmul.mubr.f32.gmra.mrb[156].mxu0 %v10918_v13  ;;  %v1132_v5 = vadd.f32 %v1131_v16, %v9507_v58  ;;  %v1078_v13 = vsub.f32 %v9169_v1, %v9477_v0 }
 0x5c8   :  { %6281 = vmatprep.mubr.f32.mxu0 %v10919_v38  ;;  %10929 = vst [vmem:[#allocation126_spill] sm:$0xff] %v9555_v41  ;;  %v1079_v38 = vsub.f32 %v9190_v39, %v9477_v0  ;;  %v10935_v39 = vld [vmem:[#allocation65_spill] sm:$0xff] }
 0x5c9   :  { %v1133_v22 = vadd.f32 %v1132_v5, %v9512_v14  ;;  %v9560_v54 = vmul.f32 %v1078_v13, %v1078_v13 }
 0x5ca   :  { %v9567_v5 = vmul.f32 %v1079_v38, %v1079_v38  ;;  %v10948_v38 = vld [vmem:[#allocation41_spill] sm:$0xff] }
 0x5cb   :  { %6282 = vmatmul.mubr.f32.gmra.mrb[158].mxu0 %v10920_v7  ;;  %v1134_v62 = vadd.f32 %v1133_v22, %v9519_v42  ;;  %10930 = vst [vmem:[#allocation127_spill] sm:$0xff] %v9560_v54  ;;  %v1080_v7 = vsub.f32 %v9208_v49, %v9477_v0 }
 0x5cc   :  { %6284 = vmatprep.mubr.f32.mxu0 %v10921_v31  ;;  %10933 = vst [vmem:[#allocation16_spill] sm:$0xff] %v9567_v5  ;;  %v1081_v31 = vsub.f32 %v9221_v24, %v9477_v0  ;;  %v10939_v24 = vld [vmem:[#allocation69_spill] sm:$0xff] }
 0x5cd   :  { %v1135_v36 = vadd.f32 %v1134_v62, %v9524_v21  ;;  %v9572_v55 = vmul.f32 %v1080_v7, %v1080_v7 }
 0x5ce   :  { %v9579_v62 = vmul.f32 %v1081_v31, %v1081_v31  ;;  %v10952_v31 = vld [vmem:[#allocation49_spill] sm:$0xff] }
 0x5cf   :  { %6285 = vmatmul.mubr.f32.gmra.mrb[160].mxu0 %v10922_v12  ;;  %v1136_v53 = vadd.f32 %v1135_v36, %v9531_v3  ;;  %10934 = vst [vmem:[#allocation17_spill] sm:$0xff] %v9572_v55  ;;  %v1082_v12 = vsub.f32 %v9234_v17, %v9477_v0 }
 0x5d0   :  { %6287 = vmatprep.mubr.f32.mxu0 %v10923_v2  ;;  %10937 = vst [vmem:[#allocation18_spill] sm:$0xff] %v9579_v62  ;;  %v1083_v2 = vsub.f32 %v9247_v56, %v9477_v0  ;;  %v10943_v56 = vld [vmem:[#allocation73_spill] sm:$0xff] }
 0x5d1   :  { %v1137_v23 = vadd.f32 %v1136_v53, %v9536_v57  ;;  %v9584_v52 = vmul.f32 %v1082_v12, %v1082_v12 }
 0x5d2   :  { %v9591_v53 = vmul.f32 %v1083_v2, %v1083_v2  ;;  %v10956_v2 = vld [vmem:[#allocation57_spill] sm:$0xff] }
 0x5d3   :  { %6288 = vmatmul.mubr.f32.gmra.mrb[162].mxu0 %v10924_v11  ;;  %v1138_v30 = vadd.f32 %v1137_v23, %v9543_v15  ;;  %10938 = vst [vmem:[#allocation19_spill] sm:$0xff] %v9584_v52  ;;  %v1084_v11 = vsub.f32 %v9260_v37, %v9477_v0 }
 0x5d4   :  { %6290 = vmatprep.mubr.f32.mxu0 %v10925_v32  ;;  %10941 = vst [vmem:[#allocation20_spill] sm:$0xff] %v9591_v53  ;;  %v1085_v32 = vsub.f32 %v9273_v59, %v9477_v0  ;;  %v10947_v59 = vld [vmem:[#allocation77_spill] sm:$0xff] }
 0x5d5   :  { %v1139_v27 = vadd.f32 %v1138_v30, %v9548_v26  ;;  %v9596_v6 = vmul.f32 %v1084_v11, %v1084_v11 }
 0x5d6   :  { %v9603_v30 = vmul.f32 %v1085_v32, %v1085_v32  ;;  %v10960_v32 = vld [vmem:[#allocation62_spill] sm:$0xff] }
 0x5d7   :  { %6291 = vmatmul.mubr.f32.gmra.mrb[164].mxu0 %v10927_v28  ;;  %v1140_v16 = vadd.f32 %v1139_v27, %v9555_v41  ;;  %10942 = vst [vmem:[#allocation21_spill] sm:$0xff] %v9596_v6  ;;  %v1086_v28 = vsub.f32 %v9286_v46, %v9477_v0 }
 0x5d8   :  { %6293 = vmatprep.mubr.f32.mxu0 %v10928_v47  ;;  %10945 = vst [vmem:[#allocation22_spill] sm:$0xff] %v9603_v30  ;;  %v1087_v47 = vsub.f32 %v9299_v33, %v9477_v0  ;;  %v10951_v33 = vld [vmem:[#allocation45_spill] sm:$0xff] }
 0x5d9   :  { %v1141_v1 = vadd.f32 %v1140_v16, %v9560_v54  ;;  %v9608_v13 = vmul.f32 %v1086_v28, %v1086_v28 }
 0x5da   :  { %v9615_v16 = vmul.f32 %v1087_v47, %v1087_v47  ;;  %v10964_v47 = vld [vmem:[#allocation66_spill] sm:$0xff] }
 0x5db   :  { %6294 = vmatmul.mubr.f32.gmra.mrb[166].mxu0 %v10931_v8  ;;  %v1142_v22 = vadd.f32 %v1141_v1, %v9567_v5  ;;  %10946 = vst [vmem:[#allocation23_spill] sm:$0xff] %v9608_v13  ;;  %v1088_v8 = vsub.f32 %v9312_v19, %v9477_v0 }
 0x5dc   :  { %6296 = vmatprep.mubr.f32.mxu0 %v10932_v50  ;;  %10949 = vst [vmem:[#allocation24_spill] sm:$0xff] %v9615_v16  ;;  %v1089_v50 = vsub.f32 %v9325_v40, %v9477_v0  ;;  %v10955_v40 = vld [vmem:[#allocation53_spill] sm:$0xff] }
 0x5dd   :  { %v1143_v49 = vadd.f32 %v1142_v22, %v9572_v55  ;;  %v9620_v7 = vmul.f32 %v1088_v8, %v1088_v8  ;;  %v10967_v8 = vld [vmem:[#allocation68_spill] sm:$0xff] }
 0x5de   :  { %v9627_v22 = vmul.f32 %v1089_v50, %v1089_v50 }
 0x5df   :  { %6297 = vmatmul.mubr.f32.gmra.mrb[168].mxu0 %v10935_v39  ;;  %v1144_v36 = vadd.f32 %v1143_v49, %v9579_v62  ;;  %10950 = vst [vmem:[#allocation25_spill] sm:$0xff] %v9620_v7  ;;  %v1090_v39 = vsub.f32 %v9338_v43, %v9477_v0 }
 0x5e0   :  { %6299 = vmatprep.mubr.f32.mxu0 %v10936_v10  ;;  %10953 = vst [vmem:[#allocation26_spill] sm:$0xff] %v9627_v22  ;;  %v1091_v10 = vsub.f32 %v9350_v9, %v9477_v0  ;;  %v10959_v9 = vld [vmem:[#allocation60_spill] sm:$0xff] }
 0x5e1   :  { %v1145_v17 = vadd.f32 %v1144_v36, %v9584_v52  ;;  %v9632_v12 = vmul.f32 %v1090_v39, %v1090_v39  ;;  %v7704_v39 = vld [vmem:[#allocation9 + $0x8] sm:$0xff] }
 0x5e2   :  { %v9639_v36 = vmul.f32 %v1091_v10, %v1091_v10 }
 0x5e3   :  { %6300 = vmatmul.mubr.f32.gmra.mrb[170].mxu0 %v10939_v24  ;;  %v1146_v23 = vadd.f32 %v1145_v17, %v9591_v53  ;;  %10954 = vst [vmem:[#allocation27_spill] sm:$0xff] %v9632_v12  ;;  %v1092_v24 = vsub.f32 %v9359_v45, %v9477_v0 }
 0x5e4   :  { %6302 = vmatprep.mubr.f32.mxu0 %v10940_v4  ;;  %10957 = vst [vmem:[#allocation28_spill] sm:$0xff] %v9639_v36  ;;  %v1093_v4 = vsub.f32 %v9367_v29, %v9477_v0  ;;  %v10963_v29 = vld [vmem:[#allocation64_spill] sm:$0xff] }
 0x5e5   :  { %v1147_v37 = vadd.f32 %v1146_v23, %v9596_v6  ;;  %v9644_v11 = vmul.f32 %v1092_v24, %v1092_v24 }
 0x5e6   :  { %v9651_v23 = vmul.f32 %v1093_v4, %v1093_v4 }
 0x5e7   :  { %6303 = vmatmul.mubr.f32.gmra.mrb[172].mxu0 %v10943_v56  ;;  %v1148_v27 = vadd.f32 %v1147_v37, %v9603_v30  ;;  %10958 = vst [vmem:[#allocation30_spill] sm:$0xff] %v9644_v11  ;;  %v1094_v56 = vsub.f32 %v9375_v34, %v9477_v0 }
 0x5e8   :  { %6305 = vmatprep.mubr.f32.mxu0 %v10944_v35  ;;  %10961 = vst [vmem:[#allocation33_spill] sm:$0xff] %v9651_v23  ;;  %v1095_v35 = vsub.f32 %v9383_v20, %v9477_v0 }
 0x5e9   :  { %v1149_v46 = vadd.f32 %v1148_v27, %v9608_v13  ;;  %v9656_v28 = vmul.f32 %v1094_v56, %v1094_v56 }
 0x5ea   :  { %v9663_v27 = vmul.f32 %v1095_v35, %v1095_v35 }
 0x5eb   :  { %6306 = vmatmul.mubr.f32.gmra.mrb[174].mxu0 %v10947_v59  ;;  %v1150_v1 = vadd.f32 %v1149_v46, %v9615_v16  ;;  %10962 = vst [vmem:[#allocation37_spill] sm:$0xff] %v9656_v28  ;;  %v1096_v59 = vsub.f32 %v9389_v48, %v9477_v0  ;;  %v10968_v46 = vld [vmem:[#allocation70_spill] sm:$0xff]  ;;  %v10971_v48 = vld [vmem:[#allocation76_spill] sm:$0xff] }
 0x5ec   :  { %6308 = vmatprep.mubr.f32.mxu0 %v10948_v38  ;;  %10965 = vst [vmem:[#allocation36_spill] sm:$0xff] %v9663_v27  ;;  %v10972_v0 = vld [vmem:[#allocation78_spill] sm:$0xff] }
 0x5ed   :  { %v1151_v19 = vadd.f32 %v1150_v1, %v9620_v7  ;;  %v9666_v38 = vmul.f32 %v1096_v59, %v1096_v59  ;;  %v10970_v1 = vld [vmem:[#allocation74_spill] sm:$0xff] }
 0x5ef   :  { %6309 = vmatmul.mubr.f32.gmra.mrb[176].mxu0 %v10951_v33  ;;  %v1152_v49 = vadd.f32 %v1151_v19, %v9627_v22  ;;  %10966 = vst [vmem:[#allocation40_spill] sm:$0xff] %v9666_v38  ;;  %v10969_v33 = vld [vmem:[#allocation72_spill] sm:$0xff] }
 0x5f0   :  { %6311 = vmatprep.mubr.f32.mxu0 %v10952_v31  ;;  %v10973_v31 = vld [vmem:[#allocation79_spill] sm:$0xff] }
 0x5f1   :  { %v1153_v43 = vadd.f32 %v1152_v49, %v9632_v12 }
 0x5f3   :  { %6312 = vmatmul.mubr.f32.gmra.mrb[178].mxu0 %v10955_v40  ;;  %v1154_v17 = vadd.f32 %v1153_v43, %v9639_v36 }
 0x5f4   :  { %6314 = vmatprep.mubr.f32.mxu0 %v10956_v2 }
 0x5f5   :  { %v1155_v45 = vadd.f32 %v1154_v17, %v9644_v11 }
 0x5f7   :  { %6315 = vmatmul.mubr.f32.gmra.mrb[180].mxu0 %v10959_v9  ;;  %v1156_v37 = vadd.f32 %v1155_v45, %v9651_v23 }
 0x5f8   :  { %6317 = vmatprep.mubr.f32.mxu0 %v10960_v32 }
 0x5f9   :  { %v1157_v34 = vadd.f32 %v1156_v37, %v9656_v28 }
 0x5fb   :  { %6318 = vmatmul.mubr.f32.gmra.mrb[182].mxu0 %v10963_v29  ;;  %v1158_v20 = vadd.f32 %v1157_v34, %v9663_v27 }
 0x5fc   :  { %6320 = vmatprep.mubr.f32.mxu0 %v10964_v47 }
 0x5fd   :  { %v1159_v50 = vadd.f32 %v1158_v20, %v9666_v38 }
 0x5ff   :  { %6321 = vmatmul.mubr.f32.gmra.mrb[184].mxu0 %v10967_v8  ;;  %1160 = vadd.xlane.f32.xlu0 %v1159_v50 }
 0x600   :  { %6323 = vmatprep.mubr.f32.mxu0 %v10968_v46 }
 0x603   :  { %6324 = vmatmul.mubr.f32.gmra.mrb[186].mxu0 %v10969_v33 }
 0x604   :  { %6326 = vmatprep.mubr.f32.mxu0 %v10970_v1 }
 0x607   :  { %6327 = vmatmul.mubr.f32.gmra.mrb[188].mxu0 %v10971_v48 }
 0x608   :  { %6329 = vmatprep.mubr.f32.mxu0 %v10972_v0 }
 0x60b   :  { %6330 = vmatmul.mubr.f32.gmra.mrb[190].mxu0 %v10973_v31 }
 0x60c   :  { %6420 = vmatprep.mubr.f32.mxu0 %v7704_v39 }
 0x622   :  { %v5476_v19 = vpop.f32.mrb[96].mxu0 }
 0x623   :  { %v5477_v10 = vpop.f32.mrb[97].mxu0 }
 0x624   :  { %v5478_v40 = vadd.f32 %v5477_v10, %v5476_v19 }
 0x626   :  { %v5479_v49 = vpop.f32.mrb[98].mxu0 }
 0x627   :  { %v5480_v2 = vpop.f32.mrb[99].mxu0 }
 0x628   :  { %v5481_v24 = vadd.f32 %v5480_v2, %v5479_v49 }
 0x62a   :  { %v5482_v43 = vpop.f32.mrb[100].mxu0 }
 0x62b   :  { %v5483_v4 = vpop.f32.mrb[101].mxu0 }
 0x62c   :  { %v5484_v9 = vadd.f32 %v5483_v4, %v5482_v43 }
 0x62e   :  { %v5485_v17 = vpop.f32.mrb[102].mxu0 }
 0x62f   :  { %v5486_v32 = vpop.f32.mrb[103].mxu0 }
 0x630   :  { %v5487_v56 = vadd.f32 %v5486_v32, %v5485_v17 }
 0x632   :  { %v5488_v45 = vpop.f32.mrb[104].mxu0 }
 0x633   :  { %v5489_v35 = vpop.f32.mrb[105].mxu0 }
 0x634   :  { %v5490_v29 = vadd.f32 %v5489_v35, %v5488_v45 }
 0x636   :  { %v5491_v37 = vpop.f32.mrb[106].mxu0 }
 0x637   :  { %v5492_v47 = vpop.f32.mrb[107].mxu0 }
 0x638   :  { %v5493_v59 = vadd.f32 %v5492_v47, %v5491_v37  ;;  %v260_v37 = vld [vmem:[#allocation2] sm:$0x1] }
 0x63a   :  { %v5494_v34 = vpop.f32.mrb[108].mxu0 }
 0x63b   :  { %v5495_v8 = vpop.f32.mrb[109].mxu0 }
 0x63c   :  { %v5496_v20 = vadd.f32 %v5495_v8, %v5494_v34 }
 0x63e   :  { %v5497_v46 = vpop.f32.mrb[110].mxu0 }
 0x63f   :  { %v5498_v50 = vpop.f32.mrb[111].mxu0 }
 0x640   :  { %v5499_v33 = vadd.f32 %v5498_v50, %v5497_v46  ;;  %v4995_v46 = vmul.f32 -1.442695, %v260_v37 }
 0x642   :  { %v5500_v1 = vpop.f32.mrb[112].mxu0  ;;  %7104 = vpow2.f32 %v4995_v46 }
 0x643   :  { %v5501_v48 = vpop.f32.mrb[113].mxu0 }
 0x644   :  { %v9677_v0 = vadd.f32 %v5501_v48, %v5500_v1 }
 0x646   :  { %v5503_v31 = vpop.f32.mrb[114].mxu0 }
 0x647   :  { %v5504_v39 = vpop.f32.mrb[115].mxu0 }
 0x648   :  { %v5505_v19 = vadd.f32 %v5504_v39, %v5503_v31 }
 0x64a   :  { %v5506_v10 = vpop.f32.mrb[116].mxu0 }
 0x64b   :  { %v5507_v49 = vpop.f32.mrb[117].mxu0 }
 0x64c   :  { %v9679_v2 = vadd.f32 %v5507_v49, %v5506_v10  ;;  %v7105_v23 = vpop.eup %7104 }
 0x64e   :  { %v5509_v43 = vpop.f32.mrb[118].mxu0 }
 0x64f   :  { %v5510_v4 = vpop.f32.mrb[119].mxu0 }
 0x650   :  { %v9681_v17 = vadd.f32 %v5510_v4, %v5509_v43 }
 0x652   :  { %v5512_v32 = vpop.f32.mrb[120].mxu0 }
 0x653   :  { %v5513_v45 = vpop.f32.mrb[121].mxu0 }
 0x654   :  { %v9683_v35 = vadd.f32 %v5513_v45, %v5512_v32 }
 0x656   :  { %v5515_v47 = vpop.f32.mrb[122].mxu0 }
 0x657   :  { %v5516_v34 = vpop.f32.mrb[123].mxu0 }
 0x658   :  { %v9685_v8 = vadd.f32 %v5516_v34, %v5515_v47 }
 0x65a   :  { %v5518_v50 = vpop.f32.mrb[124].mxu0 }
 0x65b   :  { %v5519_v1 = vpop.f32.mrb[125].mxu0 }
 0x65c   :  { %v9687_v48 = vadd.f32 %v5519_v1, %v5518_v50  ;;  %v4271_v1 = vadd.f32 1.0, %v7105_v23 }
 0x65e   :  { %v5521_v31 = vpop.f32.mrb[126].mxu0 }
 0x65f   :  { %v5522_v39 = vpop.f32.mrb[127].mxu0 }
 0x660   :  { %v9689_v10 = vadd.f32 %v5522_v39, %v5521_v31 }
 0x662   :  { %v6150_v49 = vpop.f32.mrb[128].mxu0 }
 0x663   :  { %v3215_v43 = vadd.f32 %v6150_v49, %v5481_v24  ;;  %v3209_v4 = vpop.f32.mrb[129].mxu0 }
 0x664   :  { %v3210_v32 = vadd.f32 %v5478_v40, %v3209_v4 }
 0x665   :  { %v4964_v45 = vmul.f32 -1.442695, %v3215_v43 }
 0x666   :  { %v4963_v38 = vmul.f32 -1.442695, %v3210_v32  ;;  %v6153_v27 = vpop.f32.mrb[130].mxu0 }
 0x667   :  { %7106 = vpow2.f32 %v4964_v45  ;;  %v3225_v47 = vadd.f32 %v6153_v27, %v5487_v56  ;;  %v3219_v37 = vpop.f32.mrb[131].mxu0 }
 0x668   :  { %7108 = vpow2.f32 %v4963_v38  ;;  %v3220_v34 = vadd.f32 %v5484_v9, %v3219_v37  ;;  %v10974_v37 = vlaneseq }
 0x669   :  { %v4966_v50 = vmul.f32 -1.442695, %v3225_v47 }
 0x66a   :  { %v4965_v46 = vmul.f32 -1.442695, %v3220_v34  ;;  %v6156_v11 = vpop.f32.mrb[132].mxu0 }
 0x66b   :  { %7110 = vpow2.f32 %v4966_v50  ;;  %v3235_v31 = vadd.f32 %v6156_v11, %v5493_v59  ;;  %v3229_v39 = vpop.f32.mrb[133].mxu0  ;;  %v9692_v11 = vshrl.u32 %v10974_v37, 7 }
 0x66c   :  { %7112 = vpow2.f32 %v4965_v46  ;;  %v3230_v24 = vadd.f32 %v5490_v29, %v3229_v39 }
 0x66d   :  { %v4968_v49 = vmul.f32 -1.442695, %v3235_v31  ;;  %7114 = vrcp.f32 %v4271_v1 }
 0x66e   :  { %v4967_v40 = vmul.f32 -1.442695, %v3230_v24  ;;  %v6159_v43 = vpop.f32.mrb[134].mxu0  ;;  %v10662_v24 = vsub.s32 0, %v9692_v11 }
 0x66f   :  { %7116 = vpow2.f32 %v4968_v49  ;;  %v3245_v4 = vadd.f32 %v6159_v43, %v5499_v33  ;;  %v3239_v32 = vpop.f32.mrb[135].mxu0 }
 0x670   :  { %7118 = vpow2.f32 %v4967_v40  ;;  %v3240_v27 = vadd.f32 %v5496_v20, %v3239_v32 }
 0x671   :  { %v7107_v38 = vpop.eup %7106  ;;  %v4970_v9 = vmul.f32 -1.442695, %v3245_v4 }
 0x672   :  { %v7109_v56 = vpop.eup %7108  ;;  %v3337_v23 = vadd.f32 1.0, %v7107_v38  ;;  %v4969_v45 = vmul.f32 -1.442695, %v3240_v27  ;;  %v6162_v47 = vpop.f32.mrb[136].mxu0 }
 0x673   :  { %v3336_v59 = vadd.f32 1.0, %v7109_v56  ;;  %7120 = vpow2.f32 %v4970_v9  ;;  %v3255_v29 = vadd.f32 %v6162_v47, %v5505_v19  ;;  %v3249_v34 = vpop.f32.mrb[137].mxu0 }
 0x674   :  { %7122 = vrcp.f32 %v3337_v23  ;;  %v3250_v50 = vadd.f32 %v9677_v0, %v3249_v34 }
 0x675   :  { %v7111_v33 = vpop.eup %7110  ;;  %7124 = vrcp.f32 %v3336_v59  ;;  %v4972_v1 = vmul.f32 -1.442695, %v3255_v29 }
 0x676   :  { %v7113_v20 = vpop.eup %7112  ;;  %v3339_v46 = vadd.f32 1.0, %v7111_v33  ;;  %7126 = vpow2.f32 %v4969_v45  ;;  %v4971_v31 = vmul.f32 -1.442695, %v3250_v50  ;;  %v6165_v39 = vpop.f32.mrb[138].mxu0 }
 0x677   :  { %v3338_v49 = vadd.f32 1.0, %v7113_v20  ;;  %7128 = vpow2.f32 %v4972_v1  ;;  %v3265_v40 = vadd.f32 %v6165_v39, %v9681_v17  ;;  %v3259_v43 = vpop.f32.mrb[139].mxu0  ;;  %v9697_v19 = vpop.eup %7114 }
 0x678   :  { %7130 = vrcp.f32 %v3339_v46  ;;  %v3260_v0 = vadd.f32 %v9679_v2, %v3259_v43  ;;  %v9703_v23 = vrot.slane %v9697_v19, %v10662_v24 }
 0x679   :  { %v7117_v4 = vpop.eup %7116  ;;  %7132 = vrcp.f32 %v3338_v49  ;;  %v4974_v32 = vmul.f32 -1.442695, %v3265_v40 }
 0x67a   :  { %v7119_v27 = vpop.eup %7118  ;;  %v3341_v38 = vadd.f32 1.0, %v7117_v4  ;;  %7134 = vpow2.f32 %v4971_v31  ;;  %v4973_v9 = vmul.f32 -1.442695, %v3260_v0  ;;  %v6168_v56 = vpop.f32.mrb[140].mxu0 }
 0x67b   :  { %v3340_v17 = vadd.f32 1.0, %v7119_v27  ;;  %7136 = vpow2.f32 %v4974_v32  ;;  %v3275_v45 = vadd.f32 %v6168_v56, %v9685_v8  ;;  %v3269_v47 = vpop.f32.mrb[141].mxu0 }
 0x67c   :  { %7138 = vrcp.f32 %v3341_v38  ;;  %v3270_v2 = vadd.f32 %v9683_v35, %v3269_v47 }
 0x67d   :  { %v7121_v37 = vpop.eup %7120  ;;  %7140 = vrcp.f32 %v3340_v17  ;;  %v4976_v59 = vmul.f32 -1.442695, %v3275_v45 }
 0x67e   :  { %v7123_v29 = vpop.eup %7122  ;;  %v3343_v34 = vadd.f32 1.0, %v7121_v37  ;;  %7142 = vpow2.f32 %v4973_v9  ;;  %v4975_v50 = vmul.f32 -1.442695, %v3270_v2  ;;  %v6171_v33 = vpop.f32.mrb[142].mxu0 }
 0x67f   :  { %v7125_v1 = vpop.eup %7124  ;;  %7144 = vpow2.f32 %v4976_v59  ;;  %v3285_v20 = vadd.f32 %v6171_v33, %v9689_v10  ;;  %v3279_v46 = vpop.f32.mrb[143].mxu0  ;;  %v9709_v31 = vmul.f32 %v7123_v29, %v9703_v23 }
 0x680   :  { %v7127_v8 = vpop.eup %7126  ;;  %7146 = vrcp.f32 %v3343_v34  ;;  %v3280_v35 = vadd.f32 %v9687_v48, %v3279_v46  ;;  %v9713_v39 = vmul.f32 %v7125_v1, %v9703_v23 }
 0x681   :  { %v7129_v49 = vpop.eup %7128  ;;  %v3342_v40 = vadd.f32 1.0, %v7127_v8  ;;  %7148 = vpow2.f32 %v4975_v50  ;;  %v4978_v43 = vmul.f32 -1.442695, %v3285_v20 }
 0x682   :  { %v7131_v0 = vpop.eup %7130  ;;  %v3345_v4 = vadd.f32 1.0, %v7129_v49  ;;  %v4977_v32 = vmul.f32 -1.442695, %v3280_v35  ;;  %v9715_v27 = vpop.f32.mrb[144].mxu0 }
 0x683   :  { %v7133_v10 = vpop.eup %7132  ;;  %7150 = vrcp.f32 %v3342_v40  ;;  %v9717_v38 = vpop.f32.mrb[145].mxu0  ;;  %v9720_v9 = vmul.f32 %v7131_v0, %v9703_v23 }
 0x684   :  { %v7135_v48 = vpop.eup %7134  ;;  %7152 = vrcp.f32 %v3345_v4  ;;  %v9725_v17 = vmul.f32 %v7133_v10, %v9703_v23 }
 0x685   :  { %v7137_v45 = vpop.eup %7136  ;;  %v3344_v47 = vadd.f32 1.0, %v7135_v48  ;;  %7154 = vpow2.f32 %v4978_v43 }
 0x686   :  { %v7139_v2 = vpop.eup %7138  ;;  %v3347_v37 = vadd.f32 1.0, %v7137_v45  ;;  %7156 = vpow2.f32 %v4977_v32  ;;  %v9727_v59 = vpop.f32.mrb[146].mxu0 }
 0x687   :  { %v7141_v29 = vpop.eup %7140  ;;  %7158 = vrcp.f32 %v3344_v47  ;;  %v9729_v34 = vpop.f32.mrb[147].mxu0  ;;  %v9732_v50 = vmul.f32 %v7139_v2, %v9703_v23 }
 0x688   :  { %v7143_v33 = vpop.eup %7142  ;;  %7160 = vrcp.f32 %v3347_v37  ;;  %v9737_v20 = vmul.f32 %v7141_v29, %v9703_v23 }
 0x689   :  { %v7145_v46 = vpop.eup %7144  ;;  %v3346_v8 = vadd.f32 1.0, %v7143_v33 }
 0x68a   :  { %v7147_v35 = vpop.eup %7146  ;;  %v3349_v49 = vadd.f32 1.0, %v7145_v46  ;;  %v9739_v40 = vpop.f32.mrb[148].mxu0 }
 0x68b   :  { %v7149_v43 = vpop.eup %7148  ;;  %7162 = vrcp.f32 %v3346_v8  ;;  %v9741_v0 = vpop.f32.mrb[149].mxu0  ;;  %v9744_v4 = vmul.f32 %v7147_v35, %v9703_v23 }
 0x68c   :  { %7164 = vrcp.f32 %v3349_v49  ;;  %v3348_v32 = vadd.f32 1.0, %v7149_v43  ;;  %v1161_v49 = vpop.xlane.xlu0 %1160 }
 0x68d   :  { %v7151_v48 = vpop.eup %7150 }
 0x68e   :  { %v7153_v45 = vpop.eup %7152  ;;  %7166 = vrcp.f32 %v3348_v32  ;;  %v9748_v47 = vpop.f32.mrb[150].mxu0  ;;  %v9751_v2 = vmul.f32 %v7151_v48, %v9703_v23  ;;  %v1162_v32 = vrot.slane %v1161_v49, 4 }
 0x68f   :  { %v7155_v37 = vpop.eup %7154  ;;  %v9753_v29 = vpop.f32.mrb[151].mxu0  ;;  %v9756_v33 = vmul.f32 %v7153_v45, %v9703_v23 }
 0x690   :  { %v7157_v46 = vpop.eup %7156  ;;  %v3351_v8 = vadd.f32 1.0, %v7155_v37  ;;  %v6794_v35 = vpack.c.bf16 %v9748_v47, %v9753_v29  ;;  %v1163_v36 = vadd.f32 %v1162_v32, %v1161_v49 }
 0x691   :  { %v7159_v43 = vpop.eup %7158  ;;  %v3350_v24 = vadd.f32 1.0, %v7157_v46 }
 0x692   :  { %v7161_v10 = vpop.eup %7160  ;;  %7168 = vrcp.f32 %v3351_v8  ;;  %v6274_v1 = vpop.f32.mrb[152].mxu0  ;;  %v9761_v48 = vmul.f32 %v7159_v43, %v9703_v23  ;;  %v1164_v28 = vrot.slane %v1163_v36, 2 }
 0x693   :  { %7170 = vrcp.f32 %v3350_v24  ;;  %v3683_v56 = vpop.f32.mrb[153].mxu0  ;;  %v9764_v45 = vmul.f32 %v7161_v10, %v9703_v23 }
 0x694   :  { %v6798_v37 = vpack.c.bf16 %v6274_v1, %v3683_v56  ;;  %v1165_v8 = vadd.f32 %v1164_v28, %v1163_v36 }
 0x695   :  { %v7163_v12 = vpop.eup %7162 }
 0x696   :  { %v7165_v47 = vpop.eup %7164  ;;  %v6277_v29 = vpop.f32.mrb[154].mxu0  ;;  %v9767_v46 = vmul.f32 %v7163_v12, %v9703_v23  ;;  %v1166_v16 = vrot.slane %v1165_v8, 1 }
 0x697   :  { %v3693_v22 = vpop.f32.mrb[155].mxu0  ;;  %v9770_v7 = vmul.f32 %v7165_v47, %v9703_v23 }
 0x698   :  { %v7167_v43 = vpop.eup %7166  ;;  %v6802_v24 = vpack.c.bf16 %v6277_v29, %v3693_v22  ;;  %v1167_v1 = vadd.f32 %v1166_v16, %v1165_v8  ;;  %v10975_v16 = vpack.c.bf16 %v9715_v27, %v9717_v38 }
 0x699   :  { %v9773_v49 = vmul.f32 %v7167_v43, %v9703_v23 }
 0x69a   :  { %v6280_v10 = vpop.f32.mrb[156].mxu0  ;;  %6898 = vpush %v1167_v1 }
 0x69b   :  { %v3703_v56 = vpop.f32.mrb[157].mxu0 }
 0x69c   :  { %v7169_v32 = vpop.eup %7168  ;;  %v6806_v13 = vpack.c.bf16 %v6280_v10, %v3703_v56 }
 0x69d   :  { %v7171_v30 = vpop.eup %7170  ;;  %v9776_v12 = vmul.f32 %v7169_v32, %v9703_v23 }
 0x69e   :  { %v6283_v36 = vpop.f32.mrb[158].mxu0  ;;  %v9779_v28 = vmul.f32 %v7171_v30, %v9703_v23  ;;  %v10976_v30 = vpack.c.bf16 %v9727_v59, %v9729_v34 }
 0x69f   :  { %v3713_v47 = vpop.f32.mrb[159].mxu0 }
 0x6a0   :  { %v6810_v22 = vpack.c.bf16 %v6283_v36, %v3713_v47 }
 0x6a2   :  { %v6286_v29 = vpop.f32.mrb[160].mxu0 }
 0x6a3   :  { %v3723_v52 = vpop.f32.mrb[161].mxu0 }
 0x6a4   :  { %v6780_v43 = vpack.c.bf16 %v6286_v29, %v3723_v52  ;;  %v10977_v52 = vpack.c.bf16 %v9739_v40, %v9741_v0 }
 0x6a6   :  { %v6289_v62 = vpop.f32.mrb[162].mxu0  ;;  %6781 = vmatprep.subr.bf16.mxu1 %v6780_v43 }
 0x6a7   :  { %v3733_v6 = vpop.f32.mrb[163].mxu0  ;;  %6783 = vmatpush3.bf16.msra.mxu1 %v10975_v16 }
 0x6a8   :  { %v6784_v8 = vpack.c.bf16 %v6289_v62, %v3733_v6 }
 0x6aa   :  { %v6292_v10 = vpop.f32.mrb[164].mxu0  ;;  %6785 = vmatprep.subr.bf16.mxu1 %v6784_v8 }
 0x6ab   :  { %v3743_v56 = vpop.f32.mrb[165].mxu0  ;;  %6787 = vmatpush3.bf16.msra.mxu1 %v10976_v30  ;;  %v10978_v30 = vunpack.i.h.bf16 %v10848_v44 }
 0x6ac   :  { %v6788_v23 = vpack.c.bf16 %v6292_v10, %v3743_v56 }
 0x6ae   :  { %v6295_v1 = vpop.f32.mrb[166].mxu0  ;;  %6789 = vmatprep.subr.bf16.mxu1 %v6788_v23  ;;  %v10979_v23 = vld [vmem:[#allocation32_spill] sm:$0xff] }
 0x6af   :  { %v3753_v32 = vpop.f32.mrb[167].mxu0  ;;  %6791 = vmatpush3.bf16.msra.mxu1 %v10977_v52 }
 0x6b0   :  { %v6792_v36 = vpack.c.bf16 %v6295_v1, %v3753_v32  ;;  %v10980_v1 = vunpack.i.l.bf16 %v10979_v23 }
 0x6b2   :  { %v6298_v47 = vpop.f32.mrb[168].mxu0  ;;  %6793 = vmatprep.subr.bf16.mxu1 %v6792_v36  ;;  %v10982_v36 = vld [vmem:[#allocation34_spill] sm:$0xff] }
 0x6b3   :  { %v3763_v27 = vpop.f32.mrb[169].mxu0  ;;  %6795 = vmatpush3.bf16.msra.mxu1 %v6794_v35 }
 0x6b4   :  { %v6796_v62 = vpack.c.bf16 %v6298_v47, %v3763_v27  ;;  %v10984_v27 = vunpack.i.h.bf16 %v10982_v36 }
 0x6b6   :  { %v6301_v6 = vpop.f32.mrb[170].mxu0  ;;  %6797 = vmatprep.subr.bf16.mxu1 %v6796_v62 }
 0x6b7   :  { %v3773_v38 = vpop.f32.mrb[171].mxu0  ;;  %6799 = vmatpush3.bf16.msra.mxu1 %v6798_v37 }
 0x6b8   :  { %v6800_v59 = vpack.c.bf16 %v6301_v6, %v3773_v38  ;;  %v10985_v6 = vld [vmem:[#allocation35_spill] sm:$0xff] }
 0x6b9   :  { %v10986_v38 = vunpack.i.l.bf16 %v10985_v6 }
 0x6ba   :  { %v6304_v34 = vpop.f32.mrb[172].mxu0  ;;  %6801 = vmatprep.subr.bf16.mxu1 %v6800_v59 }
 0x6bb   :  { %v3783_v29 = vpop.f32.mrb[173].mxu0  ;;  %6803 = vmatpush3.bf16.msra.mxu1 %v6802_v24 }
 0x6bc   :  { %v6804_v43 = vpack.c.bf16 %v6304_v34, %v3783_v29  ;;  %v10987_v29 = vunpack.i.h.bf16 %v10985_v6 }
 0x6be   :  { %v6307_v16 = vpop.f32.mrb[174].mxu0  ;;  %6805 = vmatprep.subr.bf16.mxu1 %v6804_v43 }
 0x6bf   :  { %v3793_v40 = vpop.f32.mrb[175].mxu0  ;;  %6807 = vmatpush3.bf16.msra.mxu1 %v6806_v13  ;;  %v10981_v13 = vunpack.i.h.bf16 %v10979_v23 }
 0x6c0   :  { %v6808_v0 = vpack.c.bf16 %v6307_v16, %v3793_v40  ;;  %v10988_v16 = vld [vmem:[#allocation39_spill] sm:$0xff] }
 0x6c1   :  { %v10989_v40 = vunpack.i.l.bf16 %v10988_v16 }
 0x6c2   :  { %v6310_v8 = vpop.f32.mrb[176].mxu0  ;;  %6809 = vmatprep.subr.bf16.mxu1 %v6808_v0 }
 0x6c3   :  { %v3803_v10 = vpop.f32.mrb[177].mxu0  ;;  %6811 = vmatpush3.bf16.msra.mxu1 %v6810_v22  ;;  %v10983_v22 = vunpack.i.l.bf16 %v10982_v36 }
 0x6c4   :  { %v6812_v35 = vpack.c.bf16 %v6310_v8, %v3803_v10  ;;  %v10990_v10 = vunpack.i.h.bf16 %v10988_v16 }
 0x6c6   :  { %v6313_v56 = vpop.f32.mrb[178].mxu0  ;;  %3947 = vmatmul.mubr.f32.vlgmr.msra.gmra.mrb[144].mxu1 %v10978_v30  ;;  %6813 = vmatprep.subr.bf16.mxu1 %v6812_v35 }
 0x6c7   :  { %v3813_v37 = vpop.f32.mrb[179].mxu0  ;;  %3951 = vmatprep.mubr.f32.mxu1 %v10980_v1  ;;  %6815 = vmatpush3.bf16.msra.mxu1 %v6812_v35 }
 0x6c8   :  { %v6816_v24 = vpack.c.bf16 %v6313_v56, %v3813_v37  ;;  %v10991_v56 = vld [vmem:[#allocation43_spill] sm:$0xff] }
 0x6c9   :  { %v10992_v30 = vunpack.i.l.bf16 %v10991_v56  ;;  %v10993_v1 = vunpack.i.h.bf16 %v10991_v56 }
 0x6ca   :  { %v6316_v32 = vpop.f32.mrb[180].mxu0  ;;  %3952 = vmatmul.mubr.f32.gmra.mrb[146].mxu1 %v10981_v13  ;;  %6817 = vmatprep.subr.bf16.mxu1 %v6816_v24 }
 0x6cb   :  { %v3823_v52 = vpop.f32.mrb[181].mxu0  ;;  %3956 = vmatprep.mubr.f32.mxu1 %v10983_v22  ;;  %6819 = vmatpush3.bf16.msra.mxu1 %v6816_v24  ;;  %s6899_s8 = spop %6898 }
 0x6cc   :  { %v6820_v47 = vpack.c.bf16 %v6316_v32, %v3823_v52  ;;  %v10994_v32 = vld [vmem:[#allocation47_spill] sm:$0xff] }
 0x6cd   :  { %v10995_v13 = vunpack.i.l.bf16 %v10994_v32  ;;  %v10996_v22 = vunpack.i.h.bf16 %v10994_v32 }
 0x6ce   :  { %v6319_v44 = vpop.f32.mrb[182].mxu0  ;;  %3957 = vmatmul.mubr.f32.gmra.mrb[148].mxu1 %v10984_v27  ;;  %6821 = vmatprep.subr.bf16.mxu1 %v6820_v47 }
 0x6cf   :  { %v3833_v62 = vpop.f32.mrb[183].mxu0  ;;  %3961 = vmatprep.mubr.f32.mxu1 %v10986_v38  ;;  %6823 = vmatpush3.bf16.msra.mxu1 %v6820_v47  ;;  %v11000_v38 = vld [vmem:[#allocation56_spill] sm:$0xff] }
 0x6d0   :  { %v6824_v59 = vpack.c.bf16 %v6319_v44, %v3833_v62  ;;  %v10997_v44 = vld [vmem:[#allocation51_spill] sm:$0xff] }
 0x6d1   :  { %v10998_v27 = vunpack.i.l.bf16 %v10997_v44  ;;  %v10999_v6 = vunpack.i.h.bf16 %v10997_v44 }
 0x6d2   :  { %v6322_v34 = vpop.f32.mrb[184].mxu0  ;;  %3962 = vmatmul.mubr.f32.gmra.mrb[150].mxu1 %v10987_v29  ;;  %6825 = vmatprep.subr.bf16.mxu1 %v6824_v59  ;;  %v11003_v29 = vld [vmem:[#allocation31_spill] sm:$0xff] }
 0x6d3   :  { %v3843_v43 = vpop.f32.mrb[185].mxu0  ;;  %3966 = vmatprep.mubr.f32.mxu1 %v10989_v40  ;;  %6827 = vmatpush3.bf16.msra.mxu1 %v6824_v59  ;;  %v11001_v59 = vunpack.i.l.bf16 %v11000_v38  ;;  %v11005_v16 = vunpack.i.h.bf16 %v11003_v29  ;;  %v11006_v40 = vld [vmem:[#allocation38_spill] sm:$0xff] }
 0x6d4   :  { %v6828_v0 = vpack.c.bf16 %v6322_v34, %v3843_v43  ;;  %v11002_v34 = vunpack.i.h.bf16 %v11000_v38  ;;  %v11004_v43 = vunpack.i.l.bf16 %v11003_v29  ;;  %v11027_v38 = vld [vmem:[#allocation83_spill] sm:$0xff]  ;;  %v11030_v29 = vld [vmem:[#allocation86_spill] sm:$0xff] }
 0x6d6   :  { %v6325_v8 = vpop.f32.mrb[186].mxu0  ;;  %3967 = vmatmul.mubr.f32.gmra.mrb[152].mxu1 %v10990_v10  ;;  %6829 = vmatprep.subr.bf16.mxu1 %v6828_v0  ;;  %v11009_v10 = vld [vmem:[#allocation42_spill] sm:$0xff] }
 0x6d7   :  { %v3853_v35 = vpop.f32.mrb[187].mxu0  ;;  %3971 = vmatprep.mubr.f32.mxu1 %v10992_v30  ;;  %6831 = vmatpush3.bf16.msra.mxu1 %v6828_v0  ;;  %v11007_v0 = vunpack.i.l.bf16 %v11006_v40  ;;  %v11011_v56 = vunpack.i.h.bf16 %v11009_v10  ;;  %v11012_v30 = vld [vmem:[#allocation46_spill] sm:$0xff] }
 0x6d8   :  { %v6832_v37 = vpack.c.bf16 %v6325_v8, %v3853_v35  ;;  %v11008_v8 = vunpack.i.h.bf16 %v11006_v40  ;;  %v11010_v35 = vunpack.i.l.bf16 %v11009_v10  ;;  %v11033_v40 = vld [vmem:[#allocation89_spill] sm:$0xff]  ;;  %v11036_v10 = vld [vmem:[#allocation92_spill] sm:$0xff] }
 0x6da   :  { %v6328_v23 = vpop.f32.mrb[188].mxu0  ;;  %3972 = vmatmul.mubr.f32.gmra.mrb[154].mxu1 %v10993_v1  ;;  %6833 = vmatprep.subr.bf16.mxu1 %v6832_v37  ;;  %v11015_v1 = vld [vmem:[#allocation50_spill] sm:$0xff] }
 0x6db   :  { %v3863_v24 = vpop.f32.mrb[189].mxu0  ;;  %3976 = vmatprep.mubr.f32.mxu1 %v10995_v13  ;;  %6835 = vmatpush3.bf16.msra.mxu1 %v6832_v37  ;;  %v11013_v37 = vunpack.i.l.bf16 %v11012_v30  ;;  %v11017_v32 = vunpack.i.h.bf16 %v11015_v1  ;;  %v11018_v13 = vld [vmem:[#allocation54_spill] sm:$0xff] }
 0x6dc   :  { %v6836_v52 = vpack.c.bf16 %v6328_v23, %v3863_v24  ;;  %v11014_v23 = vunpack.i.h.bf16 %v11012_v30  ;;  %v11016_v24 = vunpack.i.l.bf16 %v11015_v1  ;;  %v11039_v30 = vld [vmem:[#allocation95_spill] sm:$0xff] }
 0x6de   :  { %v6331_v36 = vpop.f32.mrb[190].mxu0  ;;  %3977 = vmatmul.mubr.f32.gmra.mrb[156].mxu1 %v10996_v22  ;;  %6837 = vmatprep.subr.bf16.mxu1 %v6836_v52  ;;  %v11021_v22 = vld [vmem:[#allocation58_spill] sm:$0xff] }
 0x6df   :  { %v3873_v47 = vpop.f32.mrb[191].mxu0  ;;  %3981 = vmatprep.mubr.f32.mxu1 %v10998_v27  ;;  %6839 = vmatpush3.bf16.msra.mxu1 %v6836_v52  ;;  %v11019_v52 = vunpack.i.l.bf16 %v11018_v13  ;;  %v11023_v44 = vunpack.i.h.bf16 %v11021_v22  ;;  %v11024_v27 = vld [vmem:[#allocation80_spill] sm:$0xff] }
 0x6e0   :  { %v6840_v62 = vpack.c.bf16 %v6331_v36, %v3873_v47  ;;  %v11020_v36 = vunpack.i.h.bf16 %v11018_v13  ;;  %v11022_v47 = vunpack.i.l.bf16 %v11021_v22 }
 0x6e2   :  { %3982 = vmatmul.mubr.f32.gmra.mrb[158].mxu1 %v10999_v6  ;;  %6841 = vmatprep.subr.bf16.mxu1 %v6840_v62  ;;  %v11026_v6 = vld [vmem:[#allocation82_spill] sm:$0xff] }
 0x6e3   :  { %3986 = vmatprep.mubr.f32.mxu1 %v11001_v59  ;;  %6843 = vmatpush3.bf16.msra.mxu1 %v6840_v62  ;;  %v11025_v62 = vld [vmem:[#allocation81_spill] sm:$0xff]  ;;  %v11028_v59 = vld [vmem:[#allocation84_spill] sm:$0xff] }
 0x6e6   :  { %3987 = vmatmul.mubr.f32.gmra.mrb[160].mxu1 %v11002_v34  ;;  %v11029_v34 = vld [vmem:[#allocation85_spill] sm:$0xff] }
 0x6e7   :  { %3991 = vmatprep.mubr.f32.mxu1 %v11004_v43  ;;  %v11031_v43 = vld [vmem:[#allocation87_spill] sm:$0xff] }
 0x6ea   :  { %3992 = vmatmul.mubr.f32.gmra.mrb[162].mxu1 %v11005_v16  ;;  %v11032_v16 = vld [vmem:[#allocation88_spill] sm:$0xff] }
 0x6eb   :  { %3996 = vmatprep.mubr.f32.mxu1 %v11007_v0  ;;  %v11034_v0 = vld [vmem:[#allocation90_spill] sm:$0xff] }
 0x6ee   :  { %3997 = vmatmul.mubr.f32.gmra.mrb[164].mxu1 %v11008_v8  ;;  %v11035_v8 = vld [vmem:[#allocation91_spill] sm:$0xff] }
 0x6ef   :  { %4001 = vmatprep.mubr.f32.mxu1 %v11010_v35  ;;  %v11037_v35 = vld [vmem:[#allocation93_spill] sm:$0xff] }
 0x6f2   :  { %4002 = vmatmul.mubr.f32.gmra.mrb[166].mxu1 %v11011_v56  ;;  %v11038_v56 = vld [vmem:[#allocation94_spill] sm:$0xff] }
 0x6f3   :  { %4006 = vmatprep.mubr.f32.mxu1 %v11013_v37  ;;  %v7705_v37 = vld [vmem:[#allocation9 + $0xc8] sm:$0xff] }
 0x6f6   :  { %4007 = vmatmul.mubr.f32.gmra.mrb[168].mxu1 %v11014_v23 }
 0x6f7   :  { %4011 = vmatprep.mubr.f32.mxu1 %v11016_v24 }
 0x6fa   :  { %4012 = vmatmul.mubr.f32.gmra.mrb[170].mxu1 %v11017_v32 }
 0x6fb   :  { %4016 = vmatprep.mubr.f32.mxu1 %v11019_v52 }
 0x6fe   :  { %4017 = vmatmul.mubr.f32.gmra.mrb[172].mxu1 %v11020_v36 }
 0x6ff   :  { %4021 = vmatprep.mubr.f32.mxu1 %v11022_v47 }
 0x702   :  { %4022 = vmatmul.mubr.f32.gmra.mrb[174].mxu1 %v11023_v44 }
 0x703   :  { %6364 = vmatprep.mubr.f32.mxu1 %v11024_v27 }
 0x706   :  { %6365 = vmatmul.mubr.f32.vlgmr.msra.gmra.mrb[176].mxu1 %v11025_v62 }
 0x707   :  { %6367 = vmatprep.mubr.f32.mxu1 %v11026_v6 }
 0x70a   :  { %6368 = vmatmul.mubr.f32.gmra.mrb[178].mxu1 %v11027_v38 }
 0x70b   :  { %6370 = vmatprep.mubr.f32.mxu1 %v11028_v59 }
 0x70e   :  { %6371 = vmatmul.mubr.f32.gmra.mrb[180].mxu1 %v11029_v34 }
 0x70f   :  { %6373 = vmatprep.mubr.f32.mxu1 %v11030_v29 }
 0x712   :  { %6374 = vmatmul.mubr.f32.gmra.mrb[182].mxu1 %v11031_v43 }
 0x713   :  { %6376 = vmatprep.mubr.f32.mxu1 %v11032_v16 }
 0x716   :  { %6377 = vmatmul.mubr.f32.gmra.mrb[184].mxu1 %v11033_v40 }
 0x717   :  { %6379 = vmatprep.mubr.f32.mxu1 %v11034_v0 }
 0x71a   :  { %6380 = vmatmul.mubr.f32.gmra.mrb[186].mxu1 %v11035_v8 }
 0x71b   :  { %6382 = vmatprep.mubr.f32.mxu1 %v11036_v10 }
 0x71e   :  { %6383 = vmatmul.mubr.f32.gmra.mrb[188].mxu1 %v11037_v35 }
 0x71f   :  { %6385 = vmatprep.mubr.f32.mxu1 %v11038_v56 }
 0x722   :  { %6386 = vmatmul.mubr.f32.gmra.mrb[190].mxu1 %v11039_v30 }
 0x723   :  { %6432 = vmatprep.mubr.f32.mxu1 %v7705_v37 }
 0x799   :  { %v5684_v23 = vpop.f32.mrb[144].mxu1 }
 0x79a   :  { %v5685_v1 = vpop.f32.mrb[145].mxu1 }
 0x79b   :  { %v5686_v24 = vadd.f32 %v5685_v1, %v5684_v23 }
 0x79d   :  { %v5687_v32 = vpop.f32.mrb[146].mxu1 }
 0x79e   :  { %v5688_v13 = vpop.f32.mrb[147].mxu1 }
 0x79f   :  { %v5689_v52 = vadd.f32 %v5688_v13, %v5687_v32 }
 0x7a1   :  { %v5690_v36 = vpop.f32.mrb[148].mxu1 }
 0x7a2   :  { %v5691_v22 = vpop.f32.mrb[149].mxu1 }
 0x7a3   :  { %v5692_v47 = vadd.f32 %v5691_v22, %v5690_v36 }
 0x7a5   :  { %v5693_v44 = vpop.f32.mrb[150].mxu1 }
 0x7a6   :  { %v5694_v27 = vpop.f32.mrb[151].mxu1 }
 0x7a7   :  { %v5695_v62 = vadd.f32 %v5694_v27, %v5693_v44 }
 0x7a9   :  { %v5696_v6 = vpop.f32.mrb[152].mxu1 }
 0x7aa   :  { %v5697_v38 = vpop.f32.mrb[153].mxu1 }
 0x7ab   :  { %v5698_v59 = vadd.f32 %v5697_v38, %v5696_v6 }
 0x7ad   :  { %v5699_v34 = vpop.f32.mrb[154].mxu1 }
 0x7ae   :  { %v5700_v29 = vpop.f32.mrb[155].mxu1 }
 0x7af   :  { %v5701_v43 = vadd.f32 %v5700_v29, %v5699_v34 }
 0x7b1   :  { %v5702_v16 = vpop.f32.mrb[156].mxu1 }
 0x7b2   :  { %v5703_v40 = vpop.f32.mrb[157].mxu1 }
 0x7b3   :  { %v5704_v0 = vadd.f32 %v5703_v40, %v5702_v16 }
 0x7b5   :  { %v5705_v8 = vpop.f32.mrb[158].mxu1 }
 0x7b6   :  { %v5706_v10 = vpop.f32.mrb[159].mxu1 }
 0x7b7   :  { %v5707_v35 = vadd.f32 %v5706_v10, %v5705_v8 }
 0x7b9   :  { %v5708_v56 = vpop.f32.mrb[160].mxu1 }
 0x7ba   :  { %v5709_v30 = vpop.f32.mrb[161].mxu1 }
 0x7bb   :  { %v5710_v37 = vadd.f32 %v5709_v30, %v5708_v56 }
 0x7bd   :  { %v5711_v23 = vpop.f32.mrb[162].mxu1 }
 0x7be   :  { %v5712_v1 = vpop.f32.mrb[163].mxu1 }
 0x7bf   :  { %v5713_v32 = vadd.f32 %v5712_v1, %v5711_v23 }
 0x7c1   :  { %v5714_v13 = vpop.f32.mrb[164].mxu1 }
 0x7c2   :  { %v5715_v36 = vpop.f32.mrb[165].mxu1 }
 0x7c3   :  { %v9868_v22 = vadd.f32 %v5715_v36, %v5714_v13 }
 0x7c5   :  { %v5717_v44 = vpop.f32.mrb[166].mxu1 }
 0x7c6   :  { %v5718_v27 = vpop.f32.mrb[167].mxu1 }
 0x7c7   :  { %v9870_v6 = vadd.f32 %v5718_v27, %v5717_v44 }
 0x7c9   :  { %v5720_v38 = vpop.f32.mrb[168].mxu1 }
 0x7ca   :  { %v5721_v34 = vpop.f32.mrb[169].mxu1 }
 0x7cb   :  { %v9872_v29 = vadd.f32 %v5721_v34, %v5720_v38 }
 0x7cd   :  { %v5723_v16 = vpop.f32.mrb[170].mxu1 }
 0x7ce   :  { %v5724_v40 = vpop.f32.mrb[171].mxu1 }
 0x7cf   :  { %v9874_v8 = vadd.f32 %v5724_v40, %v5723_v16 }
 0x7d1   :  { %v5726_v10 = vpop.f32.mrb[172].mxu1 }
 0x7d2   :  { %v5727_v56 = vpop.f32.mrb[173].mxu1 }
 0x7d3   :  { %v9876_v30 = vadd.f32 %v5727_v56, %v5726_v10 }
 0x7d5   :  { %v5729_v23 = vpop.f32.mrb[174].mxu1 }
 0x7d6   :  { %v5730_v1 = vpop.f32.mrb[175].mxu1 }
 0x7d7   :  { %v9878_v13 = vadd.f32 %v5730_v1, %v5729_v23 }
 0x7d9   :  { %v6366_v36 = vpop.f32.mrb[176].mxu1 }
 0x7da   :  { %v4099_v53 = vadd.f32 %v6366_v36, %v5689_v52  ;;  %v4093_v44 = vpop.f32.mrb[177].mxu1 }
 0x7db   :  { %v4094_v27 = vadd.f32 %v5686_v24, %v4093_v44 }
 0x7dc   :  { %v4980_v55 = vmul.f32 -1.442695, %v4099_v53 }
 0x7dd   :  { %v4979_v5 = vmul.f32 -1.442695, %v4094_v27  ;;  %v6369_v38 = vpop.f32.mrb[178].mxu1 }
 0x7de   :  { %7172 = vpow2.f32 %v4980_v55  ;;  %v4109_v34 = vadd.f32 %v6369_v38, %v5695_v62  ;;  %v4103_v54 = vpop.f32.mrb[179].mxu1 }
 0x7df   :  { %7174 = vpow2.f32 %v4979_v5  ;;  %v4104_v16 = vadd.f32 %v5692_v47, %v4103_v54 }
 0x7e0   :  { %v4982_v40 = vmul.f32 -1.442695, %v4109_v34 }
 0x7e1   :  { %v4981_v41 = vmul.f32 -1.442695, %v4104_v16  ;;  %v6372_v10 = vpop.f32.mrb[180].mxu1 }
 0x7e2   :  { %7176 = vpow2.f32 %v4982_v40  ;;  %v4119_v56 = vadd.f32 %v6372_v10, %v5701_v43  ;;  %v4113_v26 = vpop.f32.mrb[181].mxu1  ;;  %v4296_v10 = vsub.f32 1.0, %v9697_v19 }
 0x7e3   :  { %7178 = vpow2.f32 %v4981_v41  ;;  %v4114_v23 = vadd.f32 %v5698_v59, %v4113_v26 }
 0x7e4   :  { %v4984_v1 = vmul.f32 -1.442695, %v4119_v56 }
 0x7e5   :  { %v4983_v52 = vmul.f32 -1.442695, %v4114_v23  ;;  %v6375_v36 = vpop.f32.mrb[182].mxu1 }
 0x7e6   :  { %7180 = vpow2.f32 %v4984_v1  ;;  %v4129_v53 = vadd.f32 %v6375_v36, %v5707_v35  ;;  %v4123_v24 = vpop.f32.mrb[183].mxu1 }
 0x7e7   :  { %7182 = vpow2.f32 %v4983_v52  ;;  %v4124_v55 = vadd.f32 %v5704_v0, %v4123_v24 }
 0x7e8   :  { %v7173_v62 = vpop.eup %7172  ;;  %v4986_v44 = vmul.f32 -1.442695, %v4129_v53 }
 0x7e9   :  { %v7175_v5 = vpop.eup %7174  ;;  %v4221_v54 = vadd.f32 1.0, %v7173_v62  ;;  %v4985_v47 = vmul.f32 -1.442695, %v4124_v55  ;;  %v6378_v27 = vpop.f32.mrb[184].mxu1  ;;  %v11040_v62 = vsub.s32 0, %v9692_v11 }
 0x7ea   :  { %v4220_v38 = vadd.f32 1.0, %v7175_v5  ;;  %7184 = vpow2.f32 %v4986_v44  ;;  %v4139_v43 = vadd.f32 %v6378_v27, %v5713_v32  ;;  %v4133_v34 = vpop.f32.mrb[185].mxu1 }
 0x7eb   :  { %7186 = vrcp.f32 %v4221_v54  ;;  %v4134_v26 = vadd.f32 %v5710_v37, %v4133_v34  ;;  %v9885_v44 = vrot.slane %v4296_v10, %v11040_v62 }
 0x7ec   :  { %v7177_v41 = vpop.eup %7176  ;;  %7188 = vrcp.f32 %v4220_v38  ;;  %v4988_v59 = vmul.f32 -1.442695, %v4139_v43 }
 0x7ed   :  { %v7179_v16 = vpop.eup %7178  ;;  %v4223_v35 = vadd.f32 1.0, %v7177_v41  ;;  %7190 = vpow2.f32 %v4985_v47  ;;  %v4987_v40 = vmul.f32 -1.442695, %v4134_v26  ;;  %v6381_v0 = vpop.f32.mrb[186].mxu1 }
 0x7ee   :  { %v4222_v56 = vadd.f32 1.0, %v7179_v16  ;;  %7192 = vpow2.f32 %v4988_v59  ;;  %v4149_v23 = vadd.f32 %v6381_v0, %v9870_v6  ;;  %v4143_v1 = vpop.f32.mrb[187].mxu1 }
 0x7ef   :  { %7194 = vrcp.f32 %v4223_v35  ;;  %v4144_v32 = vadd.f32 %v9868_v22, %v4143_v1 }
 0x7f0   :  { %v7181_v52 = vpop.eup %7180  ;;  %7196 = vrcp.f32 %v4222_v56  ;;  %v4990_v37 = vmul.f32 -1.442695, %v4149_v23 }
 0x7f1   :  { %v7183_v36 = vpop.eup %7182  ;;  %v4225_v53 = vadd.f32 1.0, %v7181_v52  ;;  %7198 = vpow2.f32 %v4987_v40  ;;  %v4989_v24 = vmul.f32 -1.442695, %v4144_v32  ;;  %v6384_v55 = vpop.f32.mrb[188].mxu1 }
 0x7f2   :  { %v4224_v19 = vadd.f32 1.0, %v7183_v36  ;;  %7200 = vpow2.f32 %v4990_v37  ;;  %v4159_v6 = vadd.f32 %v6384_v55, %v9874_v8  ;;  %v4153_v5 = vpop.f32.mrb[189].mxu1 }
 0x7f3   :  { %7202 = vrcp.f32 %v4225_v53  ;;  %v4154_v22 = vadd.f32 %v9872_v29, %v4153_v5 }
 0x7f4   :  { %v7185_v54 = vpop.eup %7184  ;;  %7204 = vrcp.f32 %v4224_v19  ;;  %v4992_v47 = vmul.f32 -1.442695, %v4159_v6 }
 0x7f5   :  { %v7187_v27 = vpop.eup %7186  ;;  %v4227_v38 = vadd.f32 1.0, %v7185_v54  ;;  %7206 = vpow2.f32 %v4989_v24  ;;  %v4991_v43 = vmul.f32 -1.442695, %v4154_v22  ;;  %v6387_v34 = vpop.f32.mrb[190].mxu1 }
 0x7f6   :  { %v7189_v26 = vpop.eup %7188  ;;  %7208 = vpow2.f32 %v4992_v47  ;;  %v4169_v11 = vadd.f32 %v6387_v34, %v9878_v13  ;;  %v4163_v41 = vpop.f32.mrb[191].mxu1  ;;  %v4304_v59 = vmul.f32 %v7187_v27, %v9885_v44 }
 0x7f7   :  { %v7191_v8 = vpop.eup %7190  ;;  %7210 = vrcp.f32 %v4227_v38  ;;  %v4164_v16 = vadd.f32 %v9876_v30, %v4163_v41  ;;  %v4303_v29 = vmul.f32 %v7189_v26, %v9885_v44 }
 0x7f8   :  { %v7193_v35 = vpop.eup %7192  ;;  %v4226_v40 = vadd.f32 1.0, %v7191_v8  ;;  %7212 = vpow2.f32 %v4991_v43  ;;  %v4994_v0 = vmul.f32 -1.442695, %v4169_v11  ;;  %v4320_v10 = vadd.f32 %v4304_v59, %v9709_v31 }
 0x7f9   :  { %v7195_v56 = vpop.eup %7194  ;;  %v4229_v23 = vadd.f32 1.0, %v7193_v35  ;;  %v4993_v1 = vmul.f32 -1.442695, %v4164_v16  ;;  %v4319_v13 = vadd.f32 %v4303_v29, %v9713_v39 }
 0x7fa   :  { %v7197_v32 = vpop.eup %7196  ;;  %7214 = vrcp.f32 %v4226_v40  ;;  %v4306_v52 = vmul.f32 %v7195_v56, %v9885_v44 }
 0x7fb   :  { %v7199_v37 = vpop.eup %7198  ;;  %7216 = vrcp.f32 %v4229_v23  ;;  %v6844_v30 = vpack.c.bf16 %v4320_v10, %v4319_v13  ;;  %v4305_v36 = vmul.f32 %v7197_v32, %v9885_v44 }
 0x7fc   :  { %v7201_v53 = vpop.eup %7200  ;;  %v4228_v24 = vadd.f32 1.0, %v7199_v37  ;;  %7218 = vpow2.f32 %v4994_v0  ;;  %v4322_v55 = vadd.f32 %v4306_v52, %v9720_v9 }
 0x7fd   :  { %v7203_v31 = vpop.eup %7202  ;;  %v4231_v62 = vadd.f32 1.0, %v7201_v53  ;;  %7220 = vpow2.f32 %v4993_v1  ;;  %6845 = vmatprep.subr.bf16.mxu0 %v6844_v30  ;;  %6876 = vmatprep.subr.bf16.mxu1 %v6844_v30  ;;  %v4321_v39 = vadd.f32 %v4305_v36, %v9725_v17 }
 0x7fe   :  { %v7205_v19 = vpop.eup %7204  ;;  %7222 = vrcp.f32 %v4228_v24  ;;  %6847 = vmatpush3.bf16.msra.mxu0 %v6844_v30  ;;  %6884 = vmatpush3.bf16.msra.mxu1 %v6844_v30  ;;  %v4308_v6 = vmul.f32 %v7203_v31, %v9885_v44 }
 0x7ff   :  { %v7207_v5 = vpop.eup %7206  ;;  %7224 = vrcp.f32 %v4231_v62  ;;  %v6848_v22 = vpack.c.bf16 %v4322_v55, %v4321_v39  ;;  %v4307_v54 = vmul.f32 %v7205_v19, %v9885_v44 }
 0x800   :  { %v7209_v47 = vpop.eup %7208  ;;  %v4230_v9 = vadd.f32 1.0, %v7207_v5  ;;  %v4324_v27 = vadd.f32 %v4308_v6, %v9732_v50 }
 0x801   :  { %v7211_v38 = vpop.eup %7210  ;;  %v4233_v43 = vadd.f32 1.0, %v7209_v47  ;;  %6849 = vmatprep.subr.bf16.mxu0 %v6848_v22  ;;  %6877 = vmatprep.subr.bf16.mxu1 %v6848_v22  ;;  %v4323_v17 = vadd.f32 %v4307_v54, %v9737_v20  ;;  %v7706_v54 = vld [vmem:[#allocation9 + $0x20] sm:$0xff] }
 0x802   :  { %v7213_v34 = vpop.eup %7212  ;;  %7226 = vrcp.f32 %v4230_v9  ;;  %6851 = vmatpush3.bf16.msra.mxu0 %v6848_v22  ;;  %6885 = vmatpush3.bf16.msra.mxu1 %v6848_v22  ;;  %v4310_v26 = vmul.f32 %v7211_v38, %v9885_v44  ;;  %v7707_v47 = vld [vmem:[#allocation9 + $0xe0] sm:$0xff]  ;;  %v7708_v9 = vld [vmem:[#allocation9 + $0xf8] sm:$0xff]  ;;  %v7713_v38 = vld [vmem:[#allocation9 + $0x68] sm:$0xff] }
 0x803   :  { %7228 = vrcp.f32 %v4233_v43  ;;  %v4232_v11 = vadd.f32 1.0, %v7213_v34  ;;  %v6852_v41 = vpack.c.bf16 %v4324_v27, %v4323_v17  ;;  %v7710_v27 = vld [vmem:[#allocation9 + $0x110] sm:$0xff]  ;;  %v7714_v43 = vld [vmem:[#allocation9 + $0x140] sm:$0xff]  ;;  %v7716_v34 = vld [vmem:[#allocation9 + $0x158] sm:$0xff] }
 0x804   :  { %v7215_v59 = vpop.eup %7214  ;;  %v4326_v8 = vadd.f32 %v4310_v26, %v9744_v4  ;;  %v7715_v17 = vld [vmem:[#allocation9 + $0x80] sm:$0xff]  ;;  %v7717_v26 = vld [vmem:[#allocation9 + $0x98] sm:$0xff] }
 0x805   :  { %v7217_v16 = vpop.eup %7216  ;;  %7230 = vrcp.f32 %v4232_v11  ;;  %6853 = vmatprep.subr.bf16.mxu0 %v6852_v41  ;;  %6878 = vmatprep.subr.bf16.mxu1 %v6852_v41  ;;  %v4309_v50 = vmul.f32 %v7215_v59, %v9885_v44  ;;  %v7718_v11 = vld [vmem:[#allocation9 + $0x170] sm:$0xff]  ;;  %v7915_v59 = vmov 0  }
 0x806   :  { %v7219_v29 = vpop.eup %7218  ;;  %6855 = vmatpush3.bf16.msra.mxu0 %v6852_v41  ;;  %6886 = vmatpush3.bf16.msra.mxu1 %v6852_v41  ;;  %v4312_v20 = vmul.f32 %v7217_v16, %v9885_v44  ;;  %v7719_v41 = vld [vmem:[#allocation9 + $0xb0] sm:$0xff] }
 0x807   :  { %v7221_v35 = vpop.eup %7220  ;;  %v4235_v40 = vadd.f32 1.0, %v7219_v29  ;;  %v4325_v0 = vadd.f32 %v4309_v50, %v9751_v2  ;;  %7103 = vset.pattern.permute.xlu1 %v7915_v59  ;;  %7102 = vset.pattern.permute.xlu0 %v7915_v59 }
 0x808   :  { %v7223_v10 = vpop.eup %7222  ;;  %v4234_v56 = vadd.f32 1.0, %v7221_v35  ;;  %v4328_v23 = vadd.f32 %v4312_v20, %v9756_v33 }
 0x809   :  { %v7225_v4 = vpop.eup %7224  ;;  %7232 = vrcp.f32 %v4235_v40  ;;  %v6856_v1 = vpack.c.bf16 %v4326_v8, %v4325_v0  ;;  %v4311_v13 = vmul.f32 %v7223_v10, %v9885_v44  ;;  %v697_v8 = vstv %s9474_s5  ;;  %v11041_v0 = vld [vmem:[#allocation97_spill] sm:$0xff] }
 0x80a   :  { %7234 = vrcp.f32 %v4234_v56  ;;  %v4314_v32 = vmul.f32 %v7225_v4, %v9885_v44  ;;  %v698_v16 = vmul.f32 3.051851e-05, %v697_v8  ;;  %v11042_v56 = vld [vmem:[#allocation96_spill] sm:$0xff] }
 0x80b   :  { %6857 = vmatprep.subr.bf16.mxu0 %v6856_v1  ;;  %6879 = vmatprep.subr.bf16.mxu1 %v6856_v1  ;;  %v4327_v52 = vadd.f32 %v4311_v13, %v9761_v48 }
 0x80c   :  { %v7227_v37 = vpop.eup %7226  ;;  %6859 = vmatpush3.bf16.msra.mxu0 %v6856_v1  ;;  %6887 = vmatpush3.bf16.msra.mxu1 %v6856_v1  ;;  %v4330_v2 = vadd.f32 %v4314_v32, %v9764_v45  ;;  %v699_v50 = vadd.f32 0.0001, %v698_v16  ;;  %v11043_v32 = vld [vmem:[#allocation98_spill] sm:$0xff] }
 0x80d   :  { %v7229_v30 = vpop.eup %7228  ;;  %v6860_v36 = vpack.c.bf16 %v4328_v23, %v4327_v52  ;;  %v4313_v33 = vmul.f32 %v7227_v37, %v9885_v44 }
 0x80e   :  { %v4316_v53 = vmul.f32 %v7229_v30, %v9885_v44  ;;  %v700_v29 = vmul.f32 4.0, %v699_v50 }
 0x80f   :  { %v7231_v24 = vpop.eup %7230  ;;  %6861 = vmatprep.subr.bf16.mxu0 %v6860_v36  ;;  %6880 = vmatprep.subr.bf16.mxu1 %v6860_v36  ;;  %v4329_v55 = vadd.f32 %v4313_v33, %v9767_v46 }
 0x810   :  { %6863 = vmatpush3.bf16.msra.mxu0 %v6860_v36  ;;  %6888 = vmatpush3.bf16.msra.mxu1 %v6860_v36  ;;  %v4315_v48 = vmul.f32 %v7231_v24, %v9885_v44  ;;  %v4332_v31 = vadd.f32 %v4316_v53, %v9770_v7  ;;  %7236 = vrcp.f32 %v700_v29 }
 0x811   :  { %v6864_v62 = vpack.c.bf16 %v4330_v2, %v4329_v55 }
 0x812   :  { %v4331_v45 = vadd.f32 %v4315_v48, %v9773_v49  ;;  %v11045_v48 = vld [vmem:[#allocation100_spill] sm:$0xff] }
 0x813   :  { %v7233_v39 = vpop.eup %7232  ;;  %6865 = vmatprep.subr.bf16.mxu0 %v6864_v62  ;;  %6881 = vmatprep.subr.bf16.mxu1 %v6864_v62 }
 0x814   :  { %v7235_v19 = vpop.eup %7234  ;;  %6867 = vmatpush3.bf16.msra.mxu0 %v6864_v62  ;;  %6889 = vmatpush3.bf16.msra.mxu1 %v6864_v62  ;;  %v6868_v6 = vpack.c.bf16 %v4332_v31, %v4331_v45  ;;  %v4318_v5 = vmul.f32 %v7233_v39, %v9885_v44 }
 0x815   :  { %v4317_v46 = vmul.f32 %v7235_v19, %v9885_v44  ;;  %v7709_v44 = vld [vmem:[#allocation9 + $0x38] sm:$0xff] }
 0x816   :  { %6869 = vmatprep.subr.bf16.mxu0 %v6868_v6  ;;  %6882 = vmatprep.subr.bf16.mxu1 %v6868_v6  ;;  %v4334_v22 = vadd.f32 %v4318_v5, %v9776_v12  ;;  %v7711_v12 = vld [vmem:[#allocation9 + $0x50] sm:$0xff]  ;;  %v11046_v5 = vld [vmem:[#allocation29_spill] sm:$0xff] }
 0x817   :  { %v4333_v7 = vadd.f32 %v4317_v46, %v9779_v28  ;;  %v7712_v28 = vld [vmem:[#allocation9 + $0x128] sm:$0xff] }
 0x818   :  { %6871 = vmatpush3.bf16.msra.mxu0 %v6868_v6  ;;  %6890 = vmatpush3.bf16.msra.mxu1 %v6868_v6 }
 0x819   :  { %v6872_v49 = vpack.c.bf16 %v4334_v22, %v4333_v7 }
 0x81a   :  { %v9924_v20 = vpop.eup %7236 }
 0x81b   :  { %6873 = vmatprep.subr.bf16.mxu0 %v6872_v49  ;;  %6883 = vmatprep.subr.bf16.mxu1 %v6872_v49  ;;  %v703_v35 = vmul.f32 %v9924_v20, %v9174_v51  ;;  %v704_v40 = vmul.f32 %v9924_v20, %v9176_v18  ;;  %v705_v10 = vmul.f32 %v9924_v20, %v11041_v0  ;;  %v11044_v51 = vld [vmem:[#allocation99_spill] sm:$0xff] }
 0x81c   :  { %6875 = vmatpush3.bf16.msra.mxu0 %v6872_v49  ;;  %6891 = vmatpush3.bf16.msra.mxu1 %v6872_v49  ;;  %v706_v23 = vmul.f32 %v9924_v20, %v11042_v56  ;;  %v707_v52 = vmul.f32 %v9924_v20, %v11043_v32  ;;  %v708_v33 = vmul.f32 %v9924_v20, %v11044_v51  ;;  %v11048_v51 = vld [vmem:[#allocation102_spill] sm:$0xff] }
 0x81d   :  { %v735_v4 = vadd.f32 0.5, %v703_v35  ;;  %v736_v1 = vadd.f32 0.5, %v704_v40  ;;  %v737_v13 = vadd.f32 0.5, %v705_v10  ;;  %v709_v31 = vmul.f32 %v9924_v20, %v11045_v48 }
 0x81e   :  { %v738_v37 = vadd.f32 0.5, %v706_v23  ;;  %v739_v18 = vadd.f32 0.5, %v707_v52  ;;  %v710_v46 = vmul.f32 %v9924_v20, %v11046_v5  ;;  %v740_v22 = vadd.f32 0.5, %v708_v33 }
 0x81f   :  { %6421 = vmatmul.mubr.f32.vlgmr.msra.gmra.mrb[192].mxu0 %v7706_v54  ;;  %6433 = vmatmul.mubr.f32.vlgmr.msra.gmra.mrb[192].mxu1 %v7707_v47  ;;  %v4835_v2 = vmul.f32 -1.442695, %v735_v4  ;;  %v4836_v30 = vmul.f32 -1.442695, %v736_v1  ;;  %v4837_v36 = vmul.f32 -1.442695, %v737_v13  ;;  %v712_v33 = vmul.f32 %v9924_v20, %v11048_v51 }
 0x820   :  { %6435 = vmatprep.mubr.f32.mxu1 %v7708_v9  ;;  %6423 = vmatprep.mubr.f32.mxu0 %v7709_v44  ;;  %v4838_v53 = vmul.f32 -1.442695, %v738_v37  ;;  %v741_v47 = vadd.f32 0.5, %v709_v31  ;;  %v4839_v9 = vmul.f32 -1.442695, %v739_v18 }
 0x821   :  { %7238 = vpow2.f32 %v4835_v2 }
 0x822   :  { %7240 = vpow2.f32 %v4836_v30 }
 0x823   :  { %6436 = vmatmul.mubr.f32.gmra.mrb[194].mxu1 %v7710_v27  ;;  %6424 = vmatmul.mubr.f32.gmra.mrb[194].mxu0 %v7711_v12  ;;  %7242 = vpow2.f32 %v4837_v36  ;;  %v11047_v12 = vld [vmem:[#allocation101_spill] sm:$0xff] }
 0x824   :  { %6438 = vmatprep.mubr.f32.mxu1 %v7712_v28  ;;  %6426 = vmatprep.mubr.f32.mxu0 %v7713_v38  ;;  %v711_v28 = vmul.f32 %v9924_v20, %v11047_v12 }
 0x826   :  { %v743_v50 = vadd.f32 0.5, %v711_v28 }
 0x827   :  { %6439 = vmatmul.mubr.f32.gmra.mrb[196].mxu1 %v7714_v43  ;;  %6427 = vmatmul.mubr.f32.gmra.mrb[196].mxu0 %v7715_v17  ;;  %v742_v17 = vadd.f32 0.5, %v710_v46 }
 0x828   :  { %6441 = vmatprep.mubr.f32.mxu1 %v7716_v34  ;;  %6429 = vmatprep.mubr.f32.mxu0 %v7717_v26  ;;  %v4840_v34 = vmul.f32 -1.442695, %v740_v22  ;;  %v4843_v52 = vmul.f32 -1.442695, %v743_v50  ;;  %v744_v22 = vadd.f32 0.5, %v712_v33 }
 0x829   :  { %v4842_v0 = vmul.f32 -1.442695, %v742_v17 }
 0x82b   :  { %6442 = vmatmul.mubr.f32.gmra.mrb[198].mxu1 %v7718_v11  ;;  %6430 = vmatmul.mubr.f32.gmra.mrb[198].mxu0 %v7719_v41  ;;  %v4841_v41 = vmul.f32 -1.442695, %v741_v47  ;;  %v9946_v16 = vpop.eup %7238 }
 0x82c   :  { %v9948_v40 = vpop.eup %7240 }
 0x82d   :  { %v9950_v10 = vpop.eup %7242 }
 0x8f2   :  { %v6422_v24 = vpop.f32.mrb[192].mxu0  ;;  %v6434_v55 = vpop.f32.mrb[192].mxu1 }
 0x8f3   :  { %v4997_v62 = vmul.f32 -1.442695, %v6422_v24  ;;  %v5005_v45 = vmul.f32 -1.442695, %v6434_v55  ;;  %v4441_v39 = vpop.f32.mrb[193].mxu1  ;;  %v4401_v19 = vpop.f32.mrb[193].mxu0 }
 0x8f4   :  { %v4996_v6 = vmul.f32 -1.442695, %v4401_v19  ;;  %v5004_v7 = vmul.f32 -1.442695, %v4441_v39  ;;  %v11049_v24 = vld [vmem:[#allocation103_spill] sm:$0xff] }
 0x8f5   :  { %7244 = vpow2.f32 %v4997_v62  ;;  %v713_v55 = vmul.f32 %v9924_v20, %v11049_v24  ;;  %v11050_v62 = vld [vmem:[#allocation104_spill] sm:$0xff] }
 0x8f6   :  { %7246 = vpow2.f32 %v5005_v45  ;;  %v6437_v49 = vpop.f32.mrb[194].mxu1  ;;  %v6425_v54 = vpop.f32.mrb[194].mxu0  ;;  %v714_v45 = vmul.f32 %v9924_v20, %v11050_v62 }
 0x8f7   :  { %7248 = vpow2.f32 %v4838_v53  ;;  %v4451_v44 = vpop.f32.mrb[195].mxu1  ;;  %v4411_v27 = vpop.f32.mrb[195].mxu0  ;;  %v4999_v43 = vmul.f32 -1.442695, %v6425_v54  ;;  %v5007_v29 = vmul.f32 -1.442695, %v6437_v49 }
 0x8f8   :  { %7250 = vpow2.f32 %v4996_v6  ;;  %v5006_v38 = vmul.f32 -1.442695, %v4451_v44  ;;  %v4998_v18 = vmul.f32 -1.442695, %v4411_v27  ;;  %v11051_v54 = vld [vmem:[#allocation105_spill] sm:$0xff]  ;;  %v746_v27 = vadd.f32 0.5, %v714_v45 }
 0x8f9   :  { %7252 = vpow2.f32 %v5004_v7  ;;  %v715_v47 = vmul.f32 %v9924_v20, %v11051_v54  ;;  %v11054_v45 = vld [vmem:[#allocation108_spill] sm:$0xff]  ;;  %v11056_v54 = vld [vmem:[#allocation110_spill] sm:$0xff] }
 0x8fa   :  { %7254 = vpow2.f32 %v5006_v38  ;;  %v6440_v26 = vpop.f32.mrb[196].mxu1  ;;  %v6428_v11 = vpop.f32.mrb[196].mxu0  ;;  %v11052_v38 = vld [vmem:[#allocation106_spill] sm:$0xff] }
 0x8fb   :  { %7256 = vpow2.f32 %v4839_v9  ;;  %v4461_v59 = vpop.f32.mrb[197].mxu1  ;;  %v9944_v8 = vpop.f32.mrb[197].mxu0  ;;  %v5001_v39 = vmul.f32 -1.442695, %v6428_v11  ;;  %v745_v9 = vadd.f32 0.5, %v713_v55  ;;  %v747_v50 = vadd.f32 0.5, %v715_v47 }
 0x8fc   :  { %v5008_v35 = vmul.f32 -1.442695, %v4461_v59  ;;  %7258 = vpow2.f32 %v4999_v43  ;;  %v5009_v12 = vmul.f32 -1.442695, %v6440_v26  ;;  %v716_v43 = vmul.f32 %v9924_v20, %v11052_v38  ;;  %v11053_v26 = vld [vmem:[#allocation107_spill] sm:$0xff] }
 0x8fd   :  { %7260 = vpow2.f32 %v4840_v34  ;;  %v4847_v33 = vmul.f32 -1.442695, %v747_v50 }
 0x8fe   :  { %7262 = vpow2.f32 %v5008_v35  ;;  %v9952_v56 = vpop.f32.mrb[198].mxu1  ;;  %v9954_v23 = vpop.f32.mrb[198].mxu0 }
 0x8ff   :  { %v7245_v4 = vpop.eup %7244  ;;  %7264 = vpow2.f32 %v4841_v41  ;;  %v4471_v1 = vpop.f32.mrb[199].mxu1  ;;  %v4844_v41 = vmul.f32 -1.442695, %v744_v22  ;;  %v5003_v55 = vmul.f32 -1.442695, %v9954_v23  ;;  %v720_v23 = vmul.f32 %v9924_v20, %v11056_v54  ;;  %v11064_v54 = vld [vmem:[#allocation115_spill] sm:$0xff] }
 0x900   :  { %v9956_v13 = vpop.f32.mrb[199].mxu0  ;;  %v7247_v32 = vpop.eup %7246  ;;  %v4529_v37 = vadd.f32 1.0, %v7245_v4  ;;  %7266 = vpow2.f32 %v5007_v29  ;;  %v5010_v5 = vmul.f32 -1.442695, %v4471_v1  ;;  %v4845_v29 = vmul.f32 -1.442695, %v745_v9 }
 0x901   :  { %v9958_v2 = vpop.eup %7248  ;;  %7268 = vpow2.f32 %v4842_v0  ;;  %v4537_v30 = vadd.f32 1.0, %v7247_v32  ;;  %v717_v0 = vmul.f32 %v9924_v20, %v11053_v26  ;;  %v4846_v4 = vmul.f32 -1.442695, %v746_v27  ;;  %v11057_v27 = vld [vmem:[#allocation122_spill] sm:$0xff] }
 0x902   :  { %v7251_v36 = vpop.eup %7250  ;;  %7270 = vrcp.f32 %v4529_v37  ;;  %v1169_v1 = vstv %s6899_s8 }
 0x903   :  { %v7253_v53 = vpop.eup %7252  ;;  %7272 = vrcp.f32 %v4537_v30  ;;  %v4528_v48 = vadd.f32 1.0, %v7251_v36  ;;  %v5000_v36 = vmul.f32 -1.442695, %v9944_v8  ;;  %v749_v24 = vadd.f32 0.5, %v717_v0  ;;  %v11059_v0 = vld [vmem:[#allocation124_spill] sm:$0xff] }
 0x904   :  { %v7255_v31 = vpop.eup %7254  ;;  %7274 = vpow2.f32 %v4843_v52  ;;  %v4536_v7 = vadd.f32 1.0, %v7253_v53  ;;  %v748_v52 = vadd.f32 0.5, %v716_v43 }
 0x905   :  { %v9966_v19 = vpop.eup %7256  ;;  %7276 = vrcp.f32 %v4528_v48  ;;  %v4538_v6 = vadd.f32 1.0, %v7255_v31  ;;  %v4849_v47 = vmul.f32 -1.442695, %v749_v24 }
 0x906   :  { %v7259_v46 = vpop.eup %7258  ;;  %7278 = vpow2.f32 %v4998_v18  ;;  %v1170_v18 = vmul.f32 3.051851e-05, %v1169_v1  ;;  %v4848_v31 = vmul.f32 -1.442695, %v748_v52  ;;  %v752_v1 = vadd.f32 0.5, %v720_v23 }
 0x907   :  { %v9968_v49 = vpop.eup %7260  ;;  %7280 = vrcp.f32 %v4538_v6  ;;  %v4531_v34 = vadd.f32 1.0, %v7259_v46  ;;  %v11055_v6 = vld [vmem:[#allocation109_spill] sm:$0xff]  ;;  %v725_v23 = vmul.f32 %v9924_v20, %v11064_v54 }
 0x908   :  { %v7263_v44 = vpop.eup %7262  ;;  %7282 = vpow2.f32 %v5001_v39  ;;  %v718_v39 = vmul.f32 %v9924_v20, %v11054_v45  ;;  %v1171_v46 = vadd.f32 0.0001, %v1170_v18 }
 0x909   :  { %v9972_v28 = vpop.eup %7264  ;;  %v4540_v17 = vadd.f32 1.0, %v7263_v44  ;;  %7284 = vpow2.f32 %v5010_v5  ;;  %v719_v5 = vmul.f32 %v9924_v20, %v11055_v6 }
 0x90a   :  { %v7267_v11 = vpop.eup %7266  ;;  %7286 = vrcp.f32 %v4536_v7 }
 0x90b   :  { %v9976_v59 = vpop.eup %7268  ;;  %7288 = vrcp.f32 %v4540_v17  ;;  %v4539_v37 = vadd.f32 1.0, %v7267_v11  ;;  %v11058_v17 = vld [vmem:[#allocation123_spill] sm:$0xff]  ;;  %v750_v11 = vadd.f32 0.5, %v718_v39 }
 0x90c   :  { %v7271_v35 = vpop.eup %7270  ;;  %7290 = vpow2.f32 %v5009_v12  ;;  %v732_v12 = vmul.f32 %v9924_v20, %v11057_v27 }
 0x90d   :  { %v7273_v32 = vpop.eup %7272  ;;  %7292 = vrcp.f32 %v4531_v34  ;;  %4679 = vperm.xlu0 %7102, %v7271_v35   ;;  %v733_v34 = vmul.f32 %v9924_v20, %v11058_v17  ;;  %v1172_v35 = vmul.f32 4.0, %v1171_v46 }
 0x90e   :  { %v9980_v30 = vpop.eup %7274  ;;  %7294 = vpow2.f32 %v4844_v41  ;;  %4719 = vperm.xlu1 %7103, %v7273_v32   ;;  %v5002_v41 = vmul.f32 -1.442695, %v9956_v13  ;;  %v5011_v32 = vmul.f32 -1.442695, %v9952_v56  ;;  %v11060_v13 = vld [vmem:[#allocation111_spill] sm:$0xff] }
 0x90f   :  { %v7277_v51 = vpop.eup %7276  ;;  %7296 = vpow2.f32 %v4845_v29  ;;  %v751_v29 = vadd.f32 0.5, %v719_v5  ;;  %v765_v18 = vadd.f32 0.5, %v733_v34  ;;  %v11063_v5 = vld [vmem:[#allocation114_spill] sm:$0xff] }
 0x910   :  { %v7279_v53 = vpop.eup %7278  ;;  %7298 = vpow2.f32 %v4846_v4  ;;  %v734_v4 = vmul.f32 %v9924_v20, %v11059_v0  ;;  %v724_v46 = vmul.f32 %v9924_v20, %v11063_v5  ;;  %v11066_v0 = vld [vmem:[#allocation117_spill] sm:$0xff] }
 0x911   :  { %v7281_v48 = vpop.eup %7280  ;;  %7300 = vrcp.f32 %v4539_v37  ;;  %v4530_v22 = vadd.f32 1.0, %v7279_v53  ;;  %v764_v37 = vadd.f32 0.5, %v732_v12  ;;  %v4850_v53 = vmul.f32 -1.442695, %v750_v11 }
 0x912   :  { %v7283_v62 = vpop.eup %7282  ;;  %4674 = vperm.xlu1 %7103, %v7277_v51   ;;  %7302 = vpow2.f32 %v5000_v36  ;;  %4724 = vperm.xlu0 %7102, %v7281_v48   ;;  %v766_v39 = vadd.f32 0.5, %v734_v4  ;;  %v727_v4 = vmul.f32 %v9924_v20, %v11066_v0 }
 0x913   :  { %v7285_v8 = vpop.eup %7284  ;;  %7304 = vpow2.f32 %v4847_v33  ;;  %v4533_v38 = vadd.f32 1.0, %v7283_v62  ;;  %v721_v33 = vmul.f32 %v9924_v20, %v11060_v13  ;;  %v11062_v62 = vld [vmem:[#allocation113_spill] sm:$0xff] }
 0x914   :  { %v7287_v7 = vpop.eup %7286  ;;  %v4542_v9 = vadd.f32 1.0, %v7285_v8  ;;  %7306 = vpow2.f32 %v5003_v55  ;;  %v11061_v55 = vld [vmem:[#allocation112_spill] sm:$0xff]  ;;  %v723_v45 = vmul.f32 %v9924_v20, %v11062_v62  ;;  %v4852_v8 = vmul.f32 -1.442695, %v752_v1 }
 0x915   :  { %v7289_v44 = vpop.eup %7288  ;;  %7308 = vpow2.f32 %v4848_v31  ;;  %v722_v48 = vmul.f32 %v9924_v20, %v11061_v55  ;;  %v4851_v31 = vmul.f32 -1.442695, %v751_v29  ;;  %v4866_v11 = vmul.f32 -1.442695, %v766_v39 }
 0x916   :  { %v7291_v43 = vpop.eup %7290  ;;  %7310 = vrcp.f32 %v4542_v9  ;;  %4714 = vperm.xlu1 %7103, %v7287_v7   ;;  %4734 = vperm.xlu0 %7102, %v7289_v44   ;;  %v4865_v9 = vmul.f32 -1.442695, %v765_v18  ;;  %v755_v34 = vadd.f32 0.5, %v723_v45  ;;  %v757_v1 = vadd.f32 0.5, %v725_v23 }
 0x917   :  { %v7293_v50 = vpop.eup %7292  ;;  %7312 = vrcp.f32 %v4530_v22  ;;  %v4541_v36 = vadd.f32 1.0, %v7291_v43  ;;  %v4864_v22 = vmul.f32 -1.442695, %v764_v37  ;;  %v754_v27 = vadd.f32 0.5, %v722_v48  ;;  %v11065_v43 = vld [vmem:[#allocation116_spill] sm:$0xff] }
 0x918   :  { %v9995_v26 = vpop.eup %7294  ;;  %7314 = vpow2.f32 %v4849_v47  ;;  %v753_v47 = vadd.f32 0.5, %v721_v33  ;;  %v726_v17 = vmul.f32 %v9924_v20, %v11065_v43  ;;  %v4855_v48 = vmul.f32 -1.442695, %v755_v34 }
 0x919   :  { %v10000_v52 = vpop.eup %7296  ;;  %7316 = vrcp.f32 %v4533_v38  ;;  %v4854_v33 = vmul.f32 -1.442695, %v754_v27 }
 0x91a   :  { %v10002_v51 = vpop.eup %7298  ;;  %4689 = vperm.xlu1 %7103, %v7293_v50   ;;  %7318 = vpow2.f32 %v5002_v41  ;;  %v756_v50 = vadd.f32 0.5, %v724_v46  ;;  %v758_v55 = vadd.f32 0.5, %v726_v17  ;;  %v759_v46 = vadd.f32 0.5, %v727_v4 }
 0x91b   :  { %v7301_v24 = vpop.eup %7300  ;;  %7320 = vrcp.f32 %v1172_v35 }
 0x91c   :  { %v7303_v56 = vpop.eup %7302  ;;  %7322 = vpow2.f32 %v5011_v32  ;;  %v4853_v32 = vmul.f32 -1.442695, %v753_v47  ;;  %v4856_v45 = vmul.f32 -1.442695, %v756_v50  ;;  %v4858_v27 = vmul.f32 -1.442695, %v758_v55 }
 0x91d   :  { %v10010_v6 = vpop.eup %7304  ;;  %7324 = vrcp.f32 %v4541_v36  ;;  %v4532_v12 = vadd.f32 1.0, %v7303_v56  ;;  %v11067_v36 = vld [vmem:[#allocation118_spill] sm:$0xff]  ;;  %v11069_v56 = vld [vmem:[#allocation120_spill] sm:$0xff]  ;;  %v4859_v34 = vmul.f32 -1.442695, %v759_v46 }
 0x91e   :  { %v7307_v7 = vpop.eup %7306  ;;  %7326 = vpow2.f32 %v4850_v53  ;;  %4729 = vperm.xlu1 %7103, %v7301_v24   ;;  %v728_v13 = vmul.f32 %v9924_v20, %v11067_v36  ;;  %v11068_v53 = vld [vmem:[#allocation119_spill] sm:$0xff]  ;;  %v730_v62 = vmul.f32 %v9924_v20, %v11069_v56 }
 0x91f   :  { %v10016_v44 = vpop.eup %7308  ;;  %7328 = vpow2.f32 %v4851_v31  ;;  %v4535_v29 = vadd.f32 1.0, %v7307_v7  ;;  %v729_v24 = vmul.f32 %v9924_v20, %v11068_v53 }
 0x920   :  { %v7311_v38 = vpop.eup %7310  ;;  %7330 = vpow2.f32 %v4852_v8  ;;  %v11070_v8 = vld [vmem:[#allocation121_spill] sm:$0xff]  ;;  %v760_v54 = vadd.f32 0.5, %v728_v13 }
 0x921   :  { %v7313_v41 = vpop.eup %7312  ;;  %7332 = vpow2.f32 %v4864_v22  ;;  %4744 = vperm.xlu0 %7102, %v7311_v38   ;;  %v731_v5 = vmul.f32 %v9924_v20, %v11070_v8  ;;  %v4857_v22 = vmul.f32 -1.442695, %v757_v1  ;;  %v762_v38 = vadd.f32 0.5, %v730_v62 }
 0x922   :  { %v10020_v35 = vpop.eup %7314  ;;  %7334 = vpow2.f32 %v4865_v9  ;;  %4684 = vperm.xlu1 %7103, %v7313_v41   ;;  %v761_v9 = vadd.f32 0.5, %v729_v24  ;;  %v4860_v50 = vmul.f32 -1.442695, %v760_v54 }
 0x923   :  { %v7317_v37 = vpop.eup %7316  ;;  %7336 = vrcp.f32 %v4532_v12  ;;  %v763_v20 = vadd.f32 0.5, %v731_v5 }
 0x924   :  { %v7319_v18 = vpop.eup %7318  ;;  %7338 = vpow2.f32 %v4866_v11  ;;  %v4861_v4 = vmul.f32 -1.442695, %v761_v9 }
 0x925   :  { %v10028_v31 = vpop.eup %7320  ;;  %7340 = vrcp.f32 %v4535_v29  ;;  %v4534_v23 = vadd.f32 1.0, %v7319_v18  ;;  %v4863_v13 = vmul.f32 -1.442695, %v763_v20 }
 0x926   :  { %v7323_v39 = vpop.eup %7322  ;;  %7342 = vpow2.f32 %v4853_v32  ;;  %4699 = vperm.xlu1 %7103, %v7317_v37   ;;  %v1175_v11 = vmul.f32 %v10028_v31, %v9487_v25  ;;  %v1176_v29 = vmul.f32 %v10028_v31, %v9489_v61  ;;  %v1177_v1 = vmul.f32 %v10028_v31, %v9494_v60 }
 0x927   :  { %v7325_v7 = vpop.eup %7324  ;;  %7344 = vpow2.f32 %v4854_v33  ;;  %v4543_v43 = vadd.f32 1.0, %v7323_v39  ;;  %v4862_v37 = vmul.f32 -1.442695, %v762_v38  ;;  %v1178_v36 = vmul.f32 %v10028_v31, %v9500_v63  ;;  %v11071_v38 = vld [vmem:[#allocation125_spill] sm:$0xff] }
 0x928   :  { %v10034_v47 = vpop.eup %7326  ;;  %7346 = vpow2.f32 %v4855_v48  ;;  %v1179_v33 = vmul.f32 %v10028_v31, %v9507_v58  ;;  %v1207_v61 = vadd.f32 0.5, %v1175_v11  ;;  %v1180_v60 = vmul.f32 %v10028_v31, %v9512_v14 }
 0x929   :  { %v10036_v12 = vpop.eup %7328  ;;  %7348 = vpow2.f32 %v4856_v45  ;;  %v1208_v24 = vadd.f32 0.5, %v1176_v29  ;;  %v1181_v48 = vmul.f32 %v10028_v31, %v9519_v42  ;;  %v1209_v56 = vadd.f32 0.5, %v1177_v1 }
 0x92a   :  { %v10038_v17 = vpop.eup %7330  ;;  %7350 = vpow2.f32 %v4857_v22  ;;  %4739 = vperm.xlu1 %7103, %v7325_v7   ;;  %v1182_v45 = vmul.f32 %v10028_v31, %v9524_v21  ;;  %v1210_v39 = vadd.f32 0.5, %v1178_v36  ;;  %v1183_v14 = vmul.f32 %v10028_v31, %v9531_v3  ;;  %v11074_v36 = vld [vmem:[#allocation16_spill] sm:$0xff] }
 0x92b   :  { %v7333_v41 = vpop.eup %7332  ;;  %7352 = vrcp.f32 %v4534_v23  ;;  %v1211_v5 = vadd.f32 0.5, %v1179_v33  ;;  %v4867_v46 = vmul.f32 -1.442695, %v1207_v61  ;;  %v1184_v42 = vmul.f32 %v10028_v31, %v9536_v57  ;;  %v11072_v57 = vld [vmem:[#allocation126_spill] sm:$0xff] }
 0x92c   :  { %v7335_v0 = vpop.eup %7334  ;;  %7354 = vpow2.f32 %v4858_v27  ;;  %v892_v53 = vadd.f32 1.0, %v7333_v41  ;;  %v1212_v7 = vadd.f32 0.5, %v1180_v60  ;;  %v4868_v54 = vmul.f32 -1.442695, %v1208_v24 }
 0x92d   :  { %v7337_v32 = vpop.eup %7336  ;;  %7356 = vrcp.f32 %v4543_v43  ;;  %v893_v63 = vadd.f32 1.0, %v7335_v0  ;;  %v1185_v21 = vmul.f32 %v10028_v31, %v9543_v15  ;;  %v1213_v9 = vadd.f32 0.5, %v1181_v48  ;;  %v11073_v15 = vld [vmem:[#allocation127_spill] sm:$0xff]  ;;  %v11076_v48 = vld [vmem:[#allocation20_spill] sm:$0xff] }
 0x92e   :  { %v7339_v25 = vpop.eup %7338  ;;  %7358 = vpow2.f32 %v4859_v34  ;;  %4694 = vperm.xlu1 %7103, %v7337_v32   ;;  %v4869_v27 = vmul.f32 -1.442695, %v1209_v56  ;;  %v1186_v43 = vmul.f32 %v10028_v31, %v11071_v38  ;;  %v1214_v20 = vadd.f32 0.5, %v1182_v45  ;;  %v11079_v38 = vld [vmem:[#allocation19_spill] sm:$0xff] }
 0x92f   :  { %v7341_v18 = vpop.eup %7340  ;;  %7360 = vpow2.f32 %v4860_v50  ;;  %v894_v58 = vadd.f32 1.0, %v7339_v25  ;;  %v4870_v34 = vmul.f32 -1.442695, %v1210_v39  ;;  %v1187_v41 = vmul.f32 %v10028_v31, %v11072_v57 }
 0x930   :  { %v10052_v55 = vpop.eup %7342  ;;  %7362 = vpow2.f32 %v4861_v4  ;;  %v1215_v50 = vadd.f32 0.5, %v1183_v14  ;;  %v4871_v29 = vmul.f32 -1.442695, %v1211_v5  ;;  %v1188_v4 = vmul.f32 %v10028_v31, %v11073_v15  ;;  %v11077_v14 = vld [vmem:[#allocation21_spill] sm:$0xff] }
 0x931   :  { %v10056_v62 = vpop.eup %7344  ;;  %7364 = vpow2.f32 %v4862_v37  ;;  %v1216_v1 = vadd.f32 0.5, %v1184_v42  ;;  %v4872_v32 = vmul.f32 -1.442695, %v1212_v7  ;;  %v1189_v25 = vmul.f32 %v10028_v31, %v11074_v36 }
 0x932   :  { %v10060_v8 = vpop.eup %7346  ;;  %7366 = vpow2.f32 %v4863_v13  ;;  %4709 = vperm.xlu1 %7103, %v7341_v18   ;;  %v1217_v13 = vadd.f32 0.5, %v1185_v21  ;;  %v4873_v33 = vmul.f32 -1.442695, %v1213_v9  ;;  %v11075_v18 = vld [vmem:[#allocation17_spill] sm:$0xff]  ;;  %v1218_v60 = vadd.f32 0.5, %v1186_v43 }
 0x933   :  { %v10064_v22 = vpop.eup %7348  ;;  %7368 = vrcp.f32 %v892_v53  ;;  %v1190_v53 = vmul.f32 %v10028_v31, %v11075_v18  ;;  %v4874_v24 = vmul.f32 -1.442695, %v1214_v20  ;;  %v1193_v56 = vmul.f32 %v10028_v31, %v11076_v48 }
 0x934   :  { %v10068_v23 = vpop.eup %7350  ;;  %7370 = vrcp.f32 %v893_v63  ;;  %v4875_v45 = vmul.f32 -1.442695, %v1215_v50  ;;  %v1194_v5 = vmul.f32 %v10028_v31, %v11077_v14  ;;  %v4876_v42 = vmul.f32 -1.442695, %v1216_v1  ;;  %v11086_v14 = vld [vmem:[#allocation26_spill] sm:$0xff] }
 0x935   :  { %v7353_v3 = vpop.eup %7352  ;;  %7372 = vrcp.f32 %v894_v58  ;;  %v1219_v58 = vadd.f32 0.5, %v1187_v41  ;;  %v1221_v9 = vadd.f32 0.5, %v1189_v25  ;;  %v1192_v43 = vmul.f32 %v10028_v31, %v11079_v38  ;;  %v11081_v41 = vld [vmem:[#allocation22_spill] sm:$0xff] }
 0x936   :  { %v10074_v11 = vpop.eup %7354  ;;  %7374 = vpow2.f32 %v4867_v46  ;;  %4704 = vperm.xlu1 %7103, %v7353_v3   ;;  %v1220_v46 = vadd.f32 0.5, %v1188_v4  ;;  %v1222_v20 = vadd.f32 0.5, %v1190_v53  ;;  %v1195_v50 = vmul.f32 %v10028_v31, %v11081_v41  ;;  %v11083_v4 = vld [vmem:[#allocation23_spill] sm:$0xff] }
 0x937   :  { %v7357_v0 = vpop.eup %7356  ;;  %7376 = vpow2.f32 %v4868_v54  ;;  %v11078_v54 = vld [vmem:[#allocation18_spill] sm:$0xff]  ;;  %v1196_v1 = vmul.f32 %v10028_v31, %v11083_v4  ;;  %v4881_v53 = vmul.f32 -1.442695, %v1221_v9 }
 0x938   :  { %v10080_v37 = vpop.eup %7358  ;;  %7378 = vpow2.f32 %v4869_v27  ;;  %v1191_v21 = vmul.f32 %v10028_v31, %v11078_v54  ;;  %v4877_v27 = vmul.f32 -1.442695, %v1217_v13  ;;  %v4880_v36 = vmul.f32 -1.442695, %v1220_v46  ;;  %v11084_v13 = vld [vmem:[#allocation24_spill] sm:$0xff] }
 0x939   :  { %v10084_v61 = vpop.eup %7360  ;;  %7380 = vpow2.f32 %v4870_v34  ;;  %v4878_v34 = vmul.f32 -1.442695, %v1218_v60  ;;  %v1227_v46 = vadd.f32 0.5, %v1195_v50  ;;  %v11089_v50 = vld [vmem:[#allocation28_spill] sm:$0xff] }
 0x93a   :  { %v10088_v63 = vpop.eup %7362  ;;  %7382 = vpow2.f32 %v4871_v29  ;;  %4749 = vperm.xlu1 %7103, %v7357_v0   ;;  %v1225_v29 = vadd.f32 0.5, %v1193_v56  ;;  %v4879_v0 = vmul.f32 -1.442695, %v1219_v58  ;;  %v1223_v18 = vadd.f32 0.5, %v1191_v21  ;;  %v11087_v21 = vld [vmem:[#allocation37_spill] sm:$0xff] }
 0x93b   :  { %v10092_v39 = vpop.eup %7364  ;;  %7384 = vpow2.f32 %v4872_v32  ;;  %v1226_v32 = vadd.f32 0.5, %v1194_v5  ;;  %v1224_v56 = vadd.f32 0.5, %v1192_v43  ;;  %v4882_v58 = vmul.f32 -1.442695, %v1222_v20  ;;  %v11088_v43 = vld [vmem:[#allocation27_spill] sm:$0xff] }
 0x93c   :  { %v10096_v7 = vpop.eup %7366  ;;  %7386 = vpow2.f32 %v4873_v33  ;;  %v1197_v33 = vmul.f32 %v10028_v31, %v11084_v13  ;;  %v1199_v5 = vmul.f32 %v10028_v31, %v11086_v14  ;;  %v1204_v9 = vmul.f32 %v10028_v31, %v11087_v21 }
 0x93d   :  { %v10100_v3 = vpop.eup %7368  ;;  %7388 = vpow2.f32 %v4874_v24  ;;  %v11085_v24 = vld [vmem:[#allocation25_spill] sm:$0xff]  ;;  %v4886_v38 = vmul.f32 -1.442695, %v1226_v32  ;;  %v1200_v20 = vmul.f32 %v10028_v31, %v11088_v43  ;;  %v4883_v4 = vmul.f32 -1.442695, %v1223_v18 }
 0x93e   :  { %v10104_v57 = vpop.eup %7370  ;;  %7390 = vpow2.f32 %v4875_v45  ;;  %v1198_v48 = vmul.f32 %v10028_v31, %v11085_v24  ;;  %v4884_v24 = vmul.f32 -1.442695, %v1224_v56  ;;  %v4887_v21 = vmul.f32 -1.442695, %v1227_v46 }
 0x93f   :  { %11080 = vst [vmem:[#allocation44_spill] sm:$0xff] %v10104_v57  ;;  %v10108_v15 = vpop.eup %7372  ;;  %7392 = vpow2.f32 %v4876_v42  ;;  %v4885_v42 = vmul.f32 -1.442695, %v1225_v29  ;;  %v1201_v29 = vmul.f32 %v10028_v31, %v11089_v50 }
 0x940   :  { %11082 = vst [vmem:[#allocation48_spill] sm:$0xff] %v10108_v15  ;;  %v10112_v25 = vpop.eup %7374  ;;  %7394 = vpow2.f32 %v4877_v27  ;;  %v1228_v27 = vadd.f32 0.5, %v1196_v1  ;;  %v11090_v1 = vld [vmem:[#allocation30_spill] sm:$0xff] }
 0x941   :  { %v10116_v60 = vpop.eup %7376  ;;  %7396 = vpow2.f32 %v4878_v34  ;;  %v1229_v34 = vadd.f32 0.5, %v1197_v33  ;;  %v1202_v32 = vmul.f32 %v10028_v31, %v11090_v1  ;;  %v11092_v33 = vld [vmem:[#allocation33_spill] sm:$0xff] }
 0x942   :  { %v10120_v45 = vpop.eup %7378  ;;  %7398 = vpow2.f32 %v4879_v0  ;;  %v1230_v0 = vadd.f32 0.5, %v1198_v48  ;;  %v1203_v18 = vmul.f32 %v10028_v31, %v11092_v33  ;;  %v4888_v15 = vmul.f32 -1.442695, %v1228_v27  ;;  %v11094_v48 = vld [vmem:[#allocation36_spill] sm:$0xff] }
 0x943   :  { %v10124_v54 = vpop.eup %7380  ;;  %7400 = vpow2.f32 %v4880_v36  ;;  %v1231_v36 = vadd.f32 0.5, %v1199_v5  ;;  %v1205_v56 = vmul.f32 %v10028_v31, %v11094_v48  ;;  %v4889_v57 = vmul.f32 -1.442695, %v1229_v34 }
 0x944   :  { %v10128_v41 = vpop.eup %7382  ;;  %7402 = vpow2.f32 %v4881_v53  ;;  %v1236_v53 = vadd.f32 0.5, %v1204_v9  ;;  %v1233_v5 = vadd.f32 0.5, %v1201_v29  ;;  %v4890_v46 = vmul.f32 -1.442695, %v1230_v0 }
 0x945   :  { %v10132_v13 = vpop.eup %7384  ;;  %7404 = vpow2.f32 %v4882_v58  ;;  %v1232_v58 = vadd.f32 0.5, %v1200_v20  ;;  %v4891_v9 = vmul.f32 -1.442695, %v1231_v36  ;;  %v1235_v27 = vadd.f32 0.5, %v1203_v18  ;;  %v11095_v36 = vld [vmem:[#allocation40_spill] sm:$0xff] }
 0x946   :  { %v10136_v14 = vpop.eup %7386  ;;  %7406 = vpow2.f32 %v4885_v42  ;;  %v4896_v33 = vmul.f32 -1.442695, %v1236_v53  ;;  %v1237_v20 = vadd.f32 0.5, %v1205_v56  ;;  %v4893_v29 = vmul.f32 -1.442695, %v1233_v5 }
 0x947   :  { %v10140_v43 = vpop.eup %7388  ;;  %7408 = vpow2.f32 %v4886_v38  ;;  %v4892_v34 = vmul.f32 -1.442695, %v1232_v58  ;;  %v881_v48 = vadd.f32 1.0, %v10052_v55  ;;  %v882_v58 = vadd.f32 1.0, %v10056_v62 }
 0x948   :  { %11091 = vst [vmem:[#allocation52_spill] sm:$0xff] %v10140_v43  ;;  %v10144_v50 = vpop.eup %7390  ;;  %7410 = vpow2.f32 %v4883_v4  ;;  %v1234_v43 = vadd.f32 0.5, %v1202_v32  ;;  %v4897_v53 = vmul.f32 -1.442695, %v1237_v20  ;;  %v864_v55 = vadd.f32 1.0, %v9948_v40 }
 0x949   :  { %11093 = vst [vmem:[#allocation55_spill] sm:$0xff] %v10144_v50  ;;  %v10148_v1 = vpop.eup %7392  ;;  %7412 = vpow2.f32 %v4884_v24  ;;  %v865_v20 = vadd.f32 1.0, %v9950_v10 }
 0x94a   :  { %v10150_v42 = vpop.eup %7394  ;;  %7414 = vpow2.f32 %v4887_v21  ;;  %v4894_v24 = vmul.f32 -1.442695, %v1234_v43  ;;  %v1206_v21 = vmul.f32 %v10028_v31, %v11095_v36 }
 0x94b   :  { %v10152_v38 = vpop.eup %7396  ;;  %7416 = vpow2.f32 %v4888_v15  ;;  %v4895_v15 = vmul.f32 -1.442695, %v1235_v27 }
 0x94c   :  { %v10154_v50 = vpop.eup %7398  ;;  %7418 = vpow2.f32 %v4889_v57  ;;  %v1238_v5 = vadd.f32 0.5, %v1206_v21  ;;  %v10187_v21 = vadd.f32 1.0, %v9968_v49  ;;  %v10204_v49 = vadd.f32 1.0, %v10000_v52 }
 0x94d   :  { %v10156_v4 = vpop.eup %7400  ;;  %7420 = vpow2.f32 %v4890_v46 }
 0x94e   :  { %v10158_v0 = vpop.eup %7402  ;;  %7422 = vpow2.f32 %v4891_v9  ;;  %v4898_v40 = vmul.f32 -1.442695, %v1238_v5 }
 0x94f   :  { %v10160_v32 = vpop.eup %7404  ;;  %7424 = vpow2.f32 %v4896_v33  ;;  %v863_v33 = vadd.f32 1.0, %v9946_v16  ;;  %v10190_v16 = vadd.f32 1.0, %v9972_v28  ;;  %v10207_v28 = vadd.f32 1.0, %v10002_v51 }
 0x950   :  { %v7407_v18 = vpop.eup %7406  ;;  %7426 = vpow2.f32 %v4892_v34  ;;  %v866_v34 = vadd.f32 1.0, %v9958_v2  ;;  %v10195_v2 = vadd.f32 1.0, %v9976_v59  ;;  %v10213_v59 = vadd.f32 1.0, %v10010_v6 }
 0x951   :  { %v7409_v57 = vpop.eup %7408  ;;  %7428 = vpow2.f32 %v4893_v29  ;;  %v1353_v46 = vadd.f32 1.0, %v7407_v18  ;;  %v10181_v29 = vadd.f32 1.0, %v9966_v19  ;;  %v10198_v19 = vadd.f32 1.0, %v9980_v30 }
 0x952   :  { %v10165_v56 = vpop.eup %7410  ;;  %7430 = vpow2.f32 %v4894_v24  ;;  %v1354_v9 = vadd.f32 1.0, %v7409_v57  ;;  %v1337_v24 = vadd.f32 1.0, %v10120_v45  ;;  %v10201_v45 = vadd.f32 1.0, %v9995_v26  ;;  %11096 = vst [vmem:[#allocation59_spill] sm:$0xff] %v10213_v59  ;;  %v7724_v59 = vld [vmem:[#allocation6 + $0x98] sm:$0xff] }
 0x953   :  { %v10168_v43 = vpop.eup %7412  ;;  %7432 = vpow2.f32 %v4895_v15  ;;  %v1338_v18 = vadd.f32 1.0, %v10124_v54  ;;  %v10216_v30 = vadd.f32 1.0, %v10016_v44  ;;  %v10219_v26 = vadd.f32 1.0, %v10020_v35  ;;  %v7720_v35 = vld [vmem:[#allocation3 + $0xe8] sm:$0xff] }
 0x954   :  { %v10170_v31 = vpop.eup %7414  ;;  %7434 = vpow2.f32 %v4897_v53  ;;  %v10224_v51 = vadd.f32 1.0, %v10034_v47  ;;  %v10227_v54 = vadd.f32 1.0, %v10036_v12  ;;  %v10230_v57 = vadd.f32 1.0, %v10038_v17 }
 0x955   :  { %v10172_v27 = vpop.eup %7416  ;;  %7436 = vrcp.f32 %v881_v48  ;;  %11097 = vst [vmem:[#allocation61_spill] sm:$0xff] %v10216_v30  ;;  %11098 = vst [vmem:[#allocation63_spill] sm:$0xff] %v10219_v26  ;;  %v883_v44 = vadd.f32 1.0, %v10060_v8  ;;  %v884_v47 = vadd.f32 1.0, %v10064_v22  ;;  %v10240_v12 = vadd.f32 1.0, %v10068_v23 }
 0x956   :  { %v10177_v62 = vpop.eup %7418  ;;  %7438 = vrcp.f32 %v882_v58  ;;  %11099 = vst [vmem:[#allocation65_spill] sm:$0xff] %v10224_v51  ;;  %v988_v58 = vmul.f32 %v7720_v35, %v10100_v3  ;;  %v1335_v17 = vadd.f32 1.0, %v10112_v25  ;;  %v10247_v8 = vadd.f32 1.0, %v10080_v37 }
 0x957   :  { %v10184_v36 = vpop.eup %7420  ;;  %7440 = vrcp.f32 %v1353_v46  ;;  %v10254_v22 = vadd.f32 1.0, %v10088_v63  ;;  %v10257_v23 = vadd.f32 1.0, %v10092_v39  ;;  %v10263_v37 = vadd.f32 1.0, %v10128_v41 }
 0x958   :  { %v10192_v10 = vpop.eup %7422  ;;  %7442 = vrcp.f32 %v1354_v9  ;;  %v10244_v9 = vadd.f32 1.0, %v10074_v11  ;;  %v10260_v11 = vadd.f32 1.0, %v10096_v7  ;;  %v10269_v63 = vadd.f32 1.0, %v10136_v14  ;;  %v11101_v7 = vld [vmem:[#allocation55_spill] sm:$0xff] }
 0x959   :  { %v7425_v15 = vpop.eup %7424  ;;  %7444 = vrcp.f32 %v865_v20  ;;  %v1336_v20 = vadd.f32 1.0, %v10116_v60  ;;  %v1020_v60 = vadd.f32 %v7720_v35, %v988_v58  ;;  %v1355_v39 = vadd.f32 1.0, %v10170_v31  ;;  %v7721_v58 = vld [vmem:[#allocation3 + $0x90] sm:$0xff] }
 0x95a   :  { %v10210_v53 = vpop.eup %7426  ;;  %7446 = vrcp.f32 %v1337_v24  ;;  %v1364_v48 = vadd.f32 1.0, %v7425_v15  ;;  %v11100_v24 = vld [vmem:[#allocation52_spill] sm:$0xff]  ;;  %v10276_v15 = vadd.f32 1.0, %v11101_v7  ;;  %v1356_v41 = vadd.f32 1.0, %v10172_v27 }
 0x95b   :  { %v10221_v52 = vpop.eup %7428  ;;  %7448 = vpow2.f32 %v4898_v40  ;;  %v10273_v40 = vadd.f32 1.0, %v11100_v24  ;;  %v10283_v14 = vadd.f32 1.0, %v10150_v42  ;;  %v10286_v31 = vadd.f32 1.0, %v10152_v38 }
 0x95c   :  { %v10232_v6 = vpop.eup %7430  ;;  %7450 = vrcp.f32 %v866_v34  ;;  %v10251_v34 = vadd.f32 1.0, %v10084_v61  ;;  %v10266_v61 = vadd.f32 1.0, %v10132_v13  ;;  %11102 = vst [vmem:[#allocation67_spill] sm:$0xff] %v10276_v15  ;;  %v10280_v13 = vadd.f32 1.0, %v10148_v1  ;;  %v7723_v1 = vld [vmem:[#allocation6 + $0x90] sm:$0xff] }
 0x95d   :  { %v10236_v5 = vpop.eup %7432  ;;  %7452 = vrcp.f32 %v1338_v18  ;;  %v1351_v35 = vadd.f32 1.0, %v10165_v56  ;;  %v10289_v24 = vmul.f32 0.6, %v1020_v60  ;;  %v10292_v38 = vadd.f32 1.0, %v10154_v50  ;;  %v7725_v56 = vld [vmem:[#allocation3 + $0x10] sm:$0xff] }
 0x95e   :  { %v7435_v46 = vpop.eup %7434  ;;  %7454 = vrcp.f32 %v863_v33  ;;  %11103 = vst [vmem:[#allocation69_spill] sm:$0xff] %v10280_v13  ;;  %v7726_v60 = vld [vmem:[#allocation6 + $0x10] sm:$0xff]  ;;  %v10303_v50 = vadd.f32 1.0, %v10160_v32  ;;  %v10307_v32 = vadd.f32 1.0, %v10177_v62 }
 0x95f   :  { %v7437_v3 = vpop.eup %7436  ;;  %7456 = vrcp.f32 %v864_v55  ;;  %11104 = vst [vmem:[#allocation71_spill] sm:$0xff] %v10292_v38 }
 0x960   :  { %v7439_v25 = vpop.eup %7438  ;;  %7458 = vrcp.f32 %v1364_v48 }
 0x961   :  { %v7441_v33 = vpop.eup %7440  ;;  %7460 = vrcp.f32 %v1335_v17  ;;  %v977_v17 = vmul.f32 %v7721_v58, %v7437_v3  ;;  %v10296_v3 = vadd.f32 1.0, %v10156_v4 }
 0x962   :  { %v7443_v55 = vpop.eup %7442  ;;  %7462 = vrcp.f32 %v1336_v20  ;;  %v7722_v20 = vld [vmem:[#allocation3 + $0x98] sm:$0xff]  ;;  %v1449_v30 = vmul.f32 %v7723_v1, %v7441_v33 }
 0x963   :  { %v7445_v18 = vpop.eup %7444  ;;  %7464 = vrcp.f32 %v883_v44  ;;  %v978_v7 = vmul.f32 %v7722_v20, %v7439_v25  ;;  %v1450_v42 = vmul.f32 %v7724_v59, %v7443_v55  ;;  %v1352_v44 = vadd.f32 1.0, %v10168_v43  ;;  %11105 = vst [vmem:[#allocation73_spill] sm:$0xff] %v10296_v3 }
 0x964   :  { %v7447_v48 = vpop.eup %7446  ;;  %7466 = vrcp.f32 %v884_v47  ;;  %v961_v26 = vmul.f32 %v7725_v56, %v7445_v18  ;;  %v10299_v25 = vadd.f32 1.0, %v10158_v0  ;;  %v1365_v55 = vadd.f32 1.0, %v7435_v46  ;;  %v7727_v0 = vld [vmem:[#allocation3 + $0x18] sm:$0xff] }
 0x965   :  { %v7449_v27 = vpop.eup %7448  ;;  %7468 = vrcp.f32 %v1355_v39  ;;  %v1433_v33 = vmul.f32 %v7726_v60, %v7447_v48  ;;  %v1009_v43 = vadd.f32 %v7721_v58, %v977_v17  ;;  %v1010_v18 = vadd.f32 %v7722_v20, %v978_v7  ;;  %v7728_v48 = vld [vmem:[#allocation6 + $0x18] sm:$0xff] }
 0x966   :  { %v7451_v51 = vpop.eup %7450  ;;  %7470 = vrcp.f32 %v1356_v41  ;;  %11106 = vst [vmem:[#allocation75_spill] sm:$0xff] %v10299_v25  ;;  %v1481_v38 = vadd.f32 %v7723_v1, %v1449_v30  ;;  %v1482_v4 = vadd.f32 %v7724_v59, %v1450_v42  ;;  %v993_v13 = vadd.f32 %v7725_v56, %v961_v26 }
 0x967   :  { %v7453_v47 = vpop.eup %7452  ;;  %7472 = vrcp.f32 %v10227_v54  ;;  %v962_v25 = vmul.f32 %v7727_v0, %v7451_v51  ;;  %v1359_v46 = vadd.f32 1.0, %v10192_v10  ;;  %v1465_v58 = vadd.f32 %v7726_v60, %v1433_v33  ;;  %v7730_v60 = vld [vmem:[#allocation3 + $0x8] sm:$0xff] }
 0x968   :  { %v7455_v39 = vpop.eup %7454  ;;  %7474 = vrcp.f32 %v10230_v57  ;;  %v1434_v15 = vmul.f32 %v7728_v48, %v7453_v47  ;;  %v7729_v57 = vld [vmem:[#allocation3] sm:$0xff]  ;;  %v1360_v59 = vadd.f32 1.0, %v10210_v53  ;;  %v1366_v30 = vadd.f32 1.0, %v7449_v27 }
 0x969   :  { %v7457_v41 = vpop.eup %7456  ;;  %7476 = vrcp.f32 %v1351_v35  ;;  %v959_v17 = vmul.f32 %v7729_v57, %v7455_v39  ;;  %v4594_v35 = vmul.f32 0.6, %v1009_v43  ;;  %v4595_v26 = vmul.f32 0.6, %v1010_v18 }
 0x96a   :  { %v7459_v3 = vpop.eup %7458  ;;  %7478 = vrcp.f32 %v1352_v44  ;;  %v4626_v7 = vmul.f32 0.4, %v1481_v38  ;;  %v4627_v1 = vmul.f32 0.4, %v1482_v4  ;;  %v994_v62 = vadd.f32 %v7727_v0, %v962_v25  ;;  %v7732_v0 = vld [vmem:[#allocation6] sm:$0xff] }
 0x96b   :  { %v7461_v54 = vpop.eup %7460  ;;  %7480 = vrcp.f32 %v1365_v55  ;;  %v1466_v44 = vadd.f32 %v7728_v48, %v1434_v15  ;;  %v4578_v56 = vmul.f32 0.6, %v993_v13  ;;  %v4610_v47 = vmul.f32 0.4, %v1465_v58 }
 0x96c   :  { %v7463_v20 = vpop.eup %7462  ;;  %7482 = vrcp.f32 %v10247_v8  ;;  %v960_v33 = vmul.f32 %v7730_v60, %v7457_v41  ;;  %v991_v53 = vadd.f32 %v7729_v57, %v959_v17  ;;  %v10314_v39 = vadd.f32 1.0, %v10184_v36  ;;  %v7731_v8 = vld [vmem:[#allocation6 + $0xe8] sm:$0xff]  ;;  %v7734_v17 = vld [vmem:[#allocation3 + $0xa0] sm:$0xff] }
 0x96d   :  { %v7465_v51 = vpop.eup %7464  ;;  %7484 = vrcp.f32 %v10251_v34  ;;  %v10317_v38 = vadd.f32 1.0, %v10221_v52  ;;  %v1460_v25 = vmul.f32 %v7731_v8, %v7459_v3  ;;  %v10320_v13 = vadd.f32 1.0, %v10232_v6 }
 0x96e   :  { %v7467_v42 = vpop.eup %7466  ;;  %7486 = vrcp.f32 %v1359_v46  ;;  %v1363_v34 = vadd.f32 1.0, %v10236_v5  ;;  %v10323_v55 = vadd.f32 %v4626_v7, %v4594_v35  ;;  %v10325_v41 = vadd.f32 %v4627_v1, %v4595_v26  ;;  %v7733_v46 = vld [vmem:[#allocation6 + $0x8] sm:$0xff]  ;;  %v7736_v35 = vld [vmem:[#allocation6 + $0xa0] sm:$0xff] }
 0x96f   :  { %v7469_v10 = vpop.eup %7468  ;;  %7488 = vrcp.f32 %v1360_v59  ;;  %v10327_v36 = vmul.f32 0.6, %v994_v62  ;;  %v10329_v18 = vmul.f32 0.4, %v1466_v44  ;;  %v10332_v3 = vadd.f32 %v4610_v47, %v4578_v56  ;;  %v7737_v1 = vld [vmem:[#allocation6 + $0xa8] sm:$0xff]  ;;  %v7738_v62 = vld [vmem:[#allocation3 + $0x80] sm:$0xff] }
 0x970   :  { %v7471_v27 = vpop.eup %7470  ;;  %7490 = vrcp.f32 %v1366_v30  ;;  %v992_v4 = vadd.f32 %v7730_v60, %v960_v33  ;;  %v10334_v6 = vmul.f32 0.6, %v991_v53  ;;  %v1431_v48 = vmul.f32 %v7732_v0, %v7461_v54  ;;  %v7735_v30 = vld [vmem:[#allocation3 + $0xa8] sm:$0xff]  ;;  %v7740_v47 = vld [vmem:[#allocation6 + $0x80] sm:$0xff] }
 0x971   :  { %v7473_v15 = vpop.eup %7472  ;;  %7492 = vrcp.f32 %v10190_v16  ;;  %v1432_v58 = vmul.f32 %v7733_v46, %v7463_v20  ;;  %v1492_v57 = vadd.f32 %v7731_v8, %v1460_v25  ;;  %v979_v59 = vmul.f32 %v7734_v17, %v7465_v51  ;;  %v7739_v54 = vld [vmem:[#allocation3 + $0x88] sm:$0xff] }
 0x972   :  { %v7475_v43 = vpop.eup %7474  ;;  %7494 = vrcp.f32 %v10195_v2  ;;  %v980_v16 = vmul.f32 %v7735_v30, %v7467_v42  ;;  %v1451_v26 = vmul.f32 %v7736_v35, %v7469_v10  ;;  %v1452_v2 = vmul.f32 %v7737_v1, %v7471_v27  ;;  %v7741_v60 = vld [vmem:[#allocation6 + $0x88] sm:$0xff] }
 0x973   :  { %v7477_v52 = vpop.eup %7476  ;;  %7496 = vrcp.f32 %v10269_v63  ;;  %v975_v44 = vmul.f32 %v7738_v62, %v7473_v15  ;;  %v976_v56 = vmul.f32 %v7739_v54, %v7475_v43  ;;  %v4577_v20 = vmul.f32 0.6, %v992_v4 }
 0x974   :  { %v7479_v5 = vpop.eup %7478  ;;  %7498 = vrcp.f32 %v10273_v40  ;;  %v1447_v51 = vmul.f32 %v7740_v47, %v7477_v52  ;;  %v1463_v33 = vadd.f32 %v7732_v0, %v1431_v48  ;;  %v1464_v40 = vadd.f32 %v7733_v46, %v1432_v58  ;;  %v7742_v0 = vld [vmem:[#allocation3 + $0xc0] sm:$0xff] }
 0x975   :  { %v10339_v7 = vpop.eup %7480  ;;  %7500 = vrcp.f32 %v10260_v11  ;;  %v1448_v42 = vmul.f32 %v7741_v60, %v7479_v5  ;;  %v4637_v53 = vmul.f32 0.4, %v1492_v57  ;;  %v1011_v8 = vadd.f32 %v7734_v17, %v979_v59  ;;  %v7743_v57 = vld [vmem:[#allocation3 + $0xc8] sm:$0xff] }
 0x976   :  { %11107 = vst [vmem:[#allocation77_spill] sm:$0xff] %v10339_v7  ;;  %v7483_v63 = vpop.eup %7482  ;;  %7502 = vrcp.f32 %v1363_v34  ;;  %v1012_v25 = vadd.f32 %v7735_v30, %v980_v16  ;;  %v1483_v15 = vadd.f32 %v7736_v35, %v1451_v26  ;;  %v1484_v43 = vadd.f32 %v7737_v1, %v1452_v2 }
 0x977   :  { %v7485_v10 = vpop.eup %7484  ;;  %7504 = vrcp.f32 %v10240_v12  ;;  %v1007_v4 = vadd.f32 %v7738_v62, %v975_v44  ;;  %v1008_v7 = vadd.f32 %v7739_v54, %v976_v56  ;;  %v1479_v34 = vadd.f32 %v7740_v47, %v1447_v51 }
 0x978   :  { %v7487_v27 = vpop.eup %7486  ;;  %7506 = vrcp.f32 %v10244_v9  ;;  %v1480_v5 = vadd.f32 %v7741_v60, %v1448_v42  ;;  %v983_v48 = vmul.f32 %v7742_v0, %v7483_v63  ;;  %v4608_v46 = vmul.f32 0.4, %v1463_v33  ;;  %v7744_v9 = vld [vmem:[#allocation6 + $0xc0] sm:$0xff] }
 0x979   :  { %v7489_v11 = vpop.eup %7488  ;;  %7508 = vrcp.f32 %v10307_v32  ;;  %v4609_v58 = vmul.f32 0.4, %v1464_v40  ;;  %v984_v17 = vmul.f32 %v7743_v57, %v7485_v10  ;;  %v1455_v59 = vmul.f32 %v7744_v9, %v7487_v27  ;;  %v7745_v32 = vld [vmem:[#allocation6 + $0xc8] sm:$0xff]  ;;  %v7746_v27 = vld [vmem:[#allocation3 + $0x30] sm:$0xff] }
 0x97a   :  { %v10345_v52 = vpop.eup %7490  ;;  %7510 = vrcp.f32 %v10314_v39  ;;  %v4596_v16 = vmul.f32 0.6, %v1011_v8  ;;  %v4597_v35 = vmul.f32 0.6, %v1012_v25  ;;  %v4628_v26 = vmul.f32 0.4, %v1483_v15 }
 0x97b   :  { %v7493_v12 = vpop.eup %7492  ;;  %v1456_v1 = vmul.f32 %v7745_v32, %v7489_v11  ;;  %v10350_v62 = vadd.f32 %v10329_v18, %v10327_v36  ;;  %v4629_v44 = vmul.f32 0.4, %v1484_v43  ;;  %v4592_v39 = vmul.f32 0.6, %v1007_v4  ;;  %v7747_v11 = vld [vmem:[#allocation3 + $0x38] sm:$0xff] }
 0x97c   :  { %v7495_v30 = vpop.eup %7494  ;;  %v4593_v54 = vmul.f32 0.6, %v1008_v7  ;;  %v4624_v63 = vmul.f32 0.4, %v1479_v34  ;;  %v4625_v47 = vmul.f32 0.4, %v1480_v5  ;;  %v1015_v51 = vadd.f32 %v7742_v0, %v983_v48 }
 0x97d   :  { %v7497_v2 = vpop.eup %7496  ;;  %7512 = vrcp.f32 %v10181_v29  ;;  %v1016_v42 = vadd.f32 %v7743_v57, %v984_v17  ;;  %v1487_v10 = vadd.f32 %v7744_v9, %v1455_v59  ;;  %v10354_v33 = vadd.f32 %v4637_v53, %v10289_v24  ;;  %v7748_v24 = vld [vmem:[#allocation6 + $0x30] sm:$0xff]  ;;  %v7749_v48 = vld [vmem:[#allocation6 + $0x38] sm:$0xff]  ;;  %v7750_v17 = vld [vmem:[#allocation3 + $0xe0] sm:$0xff] }
 0x97e   :  { %v7499_v56 = vpop.eup %7498  ;;  %7514 = vrcp.f32 %v10187_v21  ;;  %v10358_v36 = vadd.f32 %v4608_v46, %v10334_v6  ;;  %v10360_v18 = vadd.f32 %v4609_v58, %v4577_v20  ;;  %v1488_v7 = vadd.f32 %v7745_v32, %v1456_v1  ;;  %v7753_v32 = vld [vmem:[#allocation3 + $0xb8] sm:$0xff] }
 0x97f   :  { %v7501_v60 = vpop.eup %7500  ;;  %v965_v8 = vmul.f32 %v7746_v27, %v7493_v12  ;;  %v10362_v15 = vadd.f32 %v4628_v26, %v4596_v16  ;;  %v10364_v29 = vadd.f32 %v4629_v44, %v4597_v35  ;;  %v966_v43 = vmul.f32 %v7747_v11, %v7495_v30  ;;  %v7751_v16 = vld [vmem:[#allocation6 + $0xe0] sm:$0xff] }
 0x980   :  { %v7503_v40 = vpop.eup %7502  ;;  %v1437_v53 = vmul.f32 %v7748_v24, %v7497_v2  ;;  %v10366_v21 = vadd.f32 %v4624_v63, %v4592_v39  ;;  %v10368_v34 = vadd.f32 %v4625_v47, %v4593_v54  ;;  %v4600_v6 = vmul.f32 0.6, %v1015_v51  ;;  %v7754_v2 = vld [vmem:[#allocation6 + $0xb0] sm:$0xff]  ;;  %v7755_v54 = vld [vmem:[#allocation6 + $0xb8] sm:$0xff] }
 0x981   :  { %v7505_v25 = vpop.eup %7504  ;;  %7516 = vrcp.f32 %v10263_v37  ;;  %v4601_v5 = vmul.f32 0.6, %v1016_v42  ;;  %v4632_v0 = vmul.f32 0.4, %v1487_v10  ;;  %v1438_v12 = vmul.f32 %v7749_v48, %v7499_v56  ;;  %v7752_v37 = vld [vmem:[#allocation3 + $0xb0] sm:$0xff] }
 0x982   :  { %v7507_v4 = vpop.eup %7506  ;;  %7518 = vrcp.f32 %v10266_v61  ;;  %v4633_v58 = vmul.f32 0.4, %v1488_v7  ;;  %v997_v57 = vadd.f32 %v7746_v27, %v965_v8  ;;  %v987_v9 = vmul.f32 %v7750_v17, %v7501_v60 }
 0x983   :  { %v7509_v20 = vpop.eup %7508  ;;  %7520 = vrcp.f32 %v10204_v49  ;;  %v998_v59 = vadd.f32 %v7747_v11, %v966_v43  ;;  %v1469_v30 = vadd.f32 %v7748_v24, %v1437_v53  ;;  %v1459_v35 = vmul.f32 %v7751_v16, %v7503_v40 }
 0x984   :  { %v7511_v46 = vpop.eup %7510  ;;  %7522 = vrcp.f32 %v10207_v28  ;;  %v981_v26 = vmul.f32 %v7752_v37, %v7505_v25  ;;  %v982_v1 = vmul.f32 %v7753_v32, %v7507_v4  ;;  %v1453_v44 = vmul.f32 %v7754_v2, %v7509_v20  ;;  %v7756_v25 = vld [vmem:[#allocation3 + $0x20] sm:$0xff] }
 0x985   :  { %7524 = vrcp.f32 %v10283_v14  ;;  %v10375_v61 = vadd.f32 %v4632_v0, %v4600_v6  ;;  %v1470_v39 = vadd.f32 %v7749_v48, %v1438_v12  ;;  %v1454_v56 = vmul.f32 %v7755_v54, %v7511_v46 }
 0x986   :  { %7526 = vrcp.f32 %v10286_v31  ;;  %v10378_v63 = vadd.f32 %v4633_v58, %v4601_v5  ;;  %v4582_v47 = vmul.f32 0.6, %v997_v57  ;;  %v1019_v28 = vadd.f32 %v7750_v17, %v987_v9  ;;  %v7758_v57 = vld [vmem:[#allocation6 + $0x20] sm:$0xff]  ;;  %v11108_v17 = vld [vmem:[#allocation67_spill] sm:$0xff] }
 0x987   :  { %v7513_v49 = vpop.eup %7512  ;;  %7528 = vrcp.f32 %v10254_v22  ;;  %v4583_v60 = vmul.f32 0.6, %v998_v59  ;;  %v4614_v42 = vmul.f32 0.4, %v1469_v30  ;;  %v1491_v10 = vadd.f32 %v7751_v16, %v1459_v35  ;;  %v7759_v16 = vld [vmem:[#allocation6 + $0x28] sm:$0xff] }
 0x988   :  { %v7515_v51 = vpop.eup %7514  ;;  %7530 = vrcp.f32 %v10257_v23  ;;  %v1013_v14 = vadd.f32 %v7752_v37, %v981_v26  ;;  %v1014_v40 = vadd.f32 %v7753_v32, %v982_v1  ;;  %v1485_v7 = vadd.f32 %v7754_v2, %v1453_v44  ;;  %v7757_v23 = vld [vmem:[#allocation3 + $0x28] sm:$0xff] }
 0x989   :  { %7532 = vrcp.f32 %v10317_v38  ;;  %v4615_v31 = vmul.f32 0.4, %v1470_v39  ;;  %v1486_v8 = vadd.f32 %v7755_v54, %v1454_v56  ;;  %v963_v11 = vmul.f32 %v7756_v25, %v7513_v49  ;;  %v11109_v37 = vld [vmem:[#allocation69_spill] sm:$0xff]  ;;  %v11110_v49 = vld [vmem:[#allocation63_spill] sm:$0xff] }
 0x98a   :  { %7534 = vrcp.f32 %v10320_v13  ;;  %v4604_v4 = vmul.f32 0.6, %v1019_v28  ;;  %v964_v6 = vmul.f32 %v7757_v23, %v7515_v51  ;;  %v4636_v0 = vmul.f32 0.4, %v1491_v10 }
 0x98b   :  { %v7517_v43 = vpop.eup %7516  ;;  %7536 = vrcp.f32 %v10198_v19  ;;  %v4598_v13 = vmul.f32 0.6, %v1013_v14  ;;  %v4599_v12 = vmul.f32 0.6, %v1014_v40  ;;  %v4630_v46 = vmul.f32 0.4, %v1485_v7 }
 0x98c   :  { %v4680_v27 = vpop.permute.xlu0 %4679  ;;  %v7519_v20 = vpop.eup %7518  ;;  %7538 = vrcp.f32 %v10201_v45  ;;  %v995_v58 = vadd.f32 %v7756_v25, %v963_v11  ;;  %v10391_v59 = vadd.f32 %v4614_v42, %v4582_v47  ;;  %v996_v30 = vadd.f32 %v7757_v23, %v964_v6  ;;  %v7760_v14 = vld [vmem:[#allocation3 + $0x50] sm:$0xff]  ;;  %v11112_v7 = vld [vmem:[#allocation75_spill] sm:$0xff] }
 0x98d   :  { %v4720_v22 = vpop.permute.xlu1 %4719  ;;  %v4754_v24 = vmul.f32 %v4680_v27, %v10332_v3  ;;  %v4755_v53 = vmul.f32 %v4680_v27, %v10350_v62  ;;  %v7521_v48 = vpop.eup %7520  ;;  %v4631_v62 = vmul.f32 0.4, %v1486_v8  ;;  %7540 = vrcp.f32 %v11108_v17  ;;  %v11115_v17 = vld [vmem:[#allocation71_spill] sm:$0xff] }
 0x98e   :  { %v4770_v5 = vmul.f32 %v4720_v22, %v10323_v55  ;;  %v4771_v38 = vmul.f32 %v4720_v22, %v10325_v41  ;;  %v7523_v3 = vpop.eup %7522  ;;  %v1435_v55 = vmul.f32 %v7758_v57, %v7517_v43  ;;  %v1436_v35 = vmul.f32 %v7759_v16, %v7519_v20  ;;  %v7761_v43 = vld [vmem:[#allocation3 + $0x58] sm:$0xff] }
 0x98f   :  { %4786 = vst [vmem:[#allocation11 + $0x10] sm:$0xff] %v4754_v24  ;;  %4787 = vst [vmem:[#allocation11 + $0x18] sm:$0xff] %v4755_v53  ;;  %v7525_v41 = vpop.eup %7524  ;;  %7542 = vrcp.f32 %v11109_v37  ;;  %v4647_v39 = vadd.f32 %v4615_v31, %v4583_v60  ;;  %v10398_v54 = vadd.f32 %v4636_v0, %v4604_v4  ;;  %v10400_v56 = vadd.f32 %v4630_v46, %v4598_v13  ;;  %v7762_v24 = vld [vmem:[#allocation6 + $0x50] sm:$0xff]  ;;  %v7763_v4 = vld [vmem:[#allocation6 + $0x58] sm:$0xff] }
 0x990   :  { %4802 = vst [vmem:[#allocation11 + $0x90] sm:$0xff] %v4770_v5  ;;  %4803 = vst [vmem:[#allocation11 + $0x98] sm:$0xff] %v4771_v38  ;;  %v7527_v45 = vpop.eup %7526  ;;  %7544 = vrcp.f32 %v11110_v49  ;;  %v1467_v28 = vadd.f32 %v7758_v57, %v1435_v55  ;;  %v10406_v42 = vmul.f32 0.6, %v996_v30  ;;  %v1468_v10 = vadd.f32 %v7759_v16, %v1436_v35  ;;  %v7767_v46 = vld [vmem:[#allocation6 + $0xd8] sm:$0xff]  ;;  %v11116_v16 = vld [vmem:[#allocation73_spill] sm:$0xff] }
 0x991   :  { %v4675_v9 = vpop.permute.xlu1 %4674  ;;  %v4725_v19 = vpop.permute.xlu0 %4724  ;;  %v969_v40 = vmul.f32 %v7760_v14, %v7521_v48  ;;  %v970_v22 = vmul.f32 %v7761_v43, %v7523_v3  ;;  %v1441_v53 = vmul.f32 %v7762_v24, %v7525_v41  ;;  %v1442_v23 = vmul.f32 %v7763_v4, %v7527_v45  ;;  %v7769_v49 = vld [vmem:[#allocation3 + $0x48] sm:$0xff] }
 0x992   :  { %v4752_v26 = vmul.f32 %v4675_v9, %v10358_v36  ;;  %v4753_v32 = vmul.f32 %v4675_v9, %v10360_v18  ;;  %v4772_v1 = vmul.f32 %v4725_v19, %v10362_v15  ;;  %v4773_v2 = vmul.f32 %v4725_v19, %v10364_v29  ;;  %v7529_v44 = vpop.eup %7528  ;;  %v11111_v15 = vld [vmem:[#allocation65_spill] sm:$0xff] }
 0x993   :  { %v7531_v47 = vpop.eup %7530  ;;  %v10403_v36 = vadd.f32 %v4631_v62, %v4599_v12  ;;  %v4580_v18 = vmul.f32 0.6, %v995_v58  ;;  %7546 = vrcp.f32 %v11111_v15  ;;  %v4612_v13 = vmul.f32 0.4, %v1467_v28 }
 0x994   :  { %4784 = vst [vmem:[#allocation11] sm:$0xff] %v4752_v26  ;;  %4785 = vst [vmem:[#allocation11 + $0x8] sm:$0xff] %v4753_v32  ;;  %v7533_v29 = vpop.eup %7532  ;;  %7548 = vrcp.f32 %v11112_v7  ;;  %v1001_v12 = vadd.f32 %v7760_v14, %v969_v40  ;;  %v4613_v55 = vmul.f32 0.4, %v1468_v10  ;;  %v1002_v9 = vadd.f32 %v7761_v43, %v970_v22  ;;  %v7768_v26 = vld [vmem:[#allocation3 + $0x40] sm:$0xff] }
 0x995   :  { %4804 = vst [vmem:[#allocation11 + $0xa0] sm:$0xff] %v4772_v1  ;;  %4805 = vst [vmem:[#allocation11 + $0xa8] sm:$0xff] %v4773_v2  ;;  %v4715_v51 = vpop.permute.xlu1 %4714  ;;  %v4735_v60 = vpop.permute.xlu0 %4734  ;;  %7550 = vrcp.f32 %v10303_v50  ;;  %v11114_v50 = vld [vmem:[#allocation61_spill] sm:$0xff]  ;;  %v1473_v19 = vadd.f32 %v7762_v24, %v1441_v53  ;;  %v1474_v30 = vadd.f32 %v7763_v4, %v1442_v23 }
 0x996   :  { %v7535_v27 = vpop.eup %7534  ;;  %v4768_v31 = vmul.f32 %v4715_v51, %v10366_v21  ;;  %v4769_v8 = vmul.f32 %v4715_v51, %v10368_v34  ;;  %v4776_v25 = vmul.f32 %v4735_v60, %v10375_v61  ;;  %v4777_v11 = vmul.f32 %v4735_v60, %v10378_v63  ;;  %v7764_v21 = vld [vmem:[#allocation3 + $0xd0] sm:$0xff]  ;;  %v7765_v34 = vld [vmem:[#allocation3 + $0xd8] sm:$0xff]  ;;  %v7770_v60 = vld [vmem:[#allocation6 + $0x40] sm:$0xff] }
 0x997   :  { %v7537_v6 = vpop.eup %7536  ;;  %v985_v20 = vmul.f32 %v7764_v21, %v7529_v44  ;;  %v986_v5 = vmul.f32 %v7765_v34, %v7531_v47  ;;  %v7766_v61 = vld [vmem:[#allocation6 + $0xd0] sm:$0xff]  ;;  %v11113_v63 = vld [vmem:[#allocation59_spill] sm:$0xff]  ;;  %v1458_v3 = vmul.f32 %v7767_v46, %v7535_v27  ;;  %v4586_v44 = vmul.f32 0.6, %v1001_v12 }
 0x998   :  { %4800 = vst [vmem:[#allocation11 + $0x80] sm:$0xff] %v4768_v31  ;;  %4801 = vst [vmem:[#allocation11 + $0x88] sm:$0xff] %v4769_v8  ;;  %v1457_v38 = vmul.f32 %v7766_v61, %v7533_v29  ;;  %7552 = vrcp.f32 %v11113_v63  ;;  %v7539_v0 = vpop.eup %7538  ;;  %v967_v32 = vmul.f32 %v7768_v26, %v7537_v6  ;;  %v4645_v51 = vadd.f32 %v4613_v55, %v10406_v42  ;;  %v7771_v31 = vld [vmem:[#allocation6 + $0x48] sm:$0xff]  ;;  %v7773_v63 = vld [vmem:[#allocation3 + $0x78] sm:$0xff] }
 0x999   :  { %4808 = vst [vmem:[#allocation11 + $0xc0] sm:$0xff] %v4776_v25  ;;  %4809 = vst [vmem:[#allocation11 + $0xc8] sm:$0xff] %v4777_v11  ;;  %v4690_v48 = vpop.permute.xlu1 %4689  ;;  %7554 = vrcp.f32 %v11114_v50  ;;  %v7541_v62 = vpop.eup %7540  ;;  %v1017_v35 = vadd.f32 %v7764_v21, %v985_v20  ;;  %v1018_v37 = vadd.f32 %v7765_v34, %v986_v5  ;;  %v968_v47 = vmul.f32 %v7769_v49, %v7539_v0  ;;  %v7772_v34 = vld [vmem:[#allocation3 + $0x70] sm:$0xff] }
 0x99a   :  { %v4758_v58 = vmul.f32 %v4690_v48, %v10391_v59  ;;  %v4759_v57 = vmul.f32 %v4690_v48, %v4647_v39  ;;  %7556 = vrcp.f32 %v11115_v17  ;;  %v7543_v41 = vpop.eup %7542  ;;  %v1489_v45 = vadd.f32 %v7766_v61, %v1457_v38  ;;  %v7774_v48 = vld [vmem:[#allocation6 + $0x70] sm:$0xff] }
 0x99b   :  { %7558 = vrcp.f32 %v11116_v16  ;;  %v7545_v1 = vpop.eup %7544  ;;  %v4644_v59 = vadd.f32 %v4612_v13, %v4580_v18  ;;  %v1490_v39 = vadd.f32 %v7767_v46, %v1458_v3  ;;  %v1439_v10 = vmul.f32 %v7770_v60, %v7541_v62  ;;  %v7775_v46 = vld [vmem:[#allocation6 + $0x78] sm:$0xff] }
 0x99c   :  { %4790 = vst [vmem:[#allocation11 + $0x30] sm:$0xff] %v4758_v58  ;;  %4791 = vst [vmem:[#allocation11 + $0x38] sm:$0xff] %v4759_v57  ;;  %v4587_v40 = vmul.f32 0.6, %v1002_v9  ;;  %v4618_v7 = vmul.f32 0.4, %v1473_v19  ;;  %v1440_v8 = vmul.f32 %v7771_v31, %v7543_v41  ;;  %v999_v22 = vadd.f32 %v7768_v26, %v967_v32 }
 0x99d   :  { %v4730_v2 = vpop.permute.xlu1 %4729  ;;  %v7547_v28 = vpop.eup %7546  ;;  %v4619_v27 = vmul.f32 0.4, %v1474_v30  ;;  %v4602_v25 = vmul.f32 0.6, %v1017_v35  ;;  %v4603_v11 = vmul.f32 0.6, %v1018_v37  ;;  %v1000_v4 = vadd.f32 %v7769_v49, %v968_v47 }
 0x99e   :  { %v4774_v15 = vmul.f32 %v4730_v2, %v10400_v56  ;;  %v4775_v29 = vmul.f32 %v4730_v2, %v10403_v36  ;;  %v7549_v14 = vpop.eup %7548  ;;  %v4634_v43 = vmul.f32 0.4, %v1489_v45  ;;  %v4635_v53 = vmul.f32 0.4, %v1490_v39  ;;  %v7776_v45 = vld [vmem:[#allocation3 + $0x60] sm:$0xff]  ;;  %v7779_v39 = vld [vmem:[#allocation6 + $0x68] sm:$0xff] }
 0x99f   :  { %v7551_v56 = vpop.eup %7550  ;;  %v1471_v20 = vadd.f32 %v7770_v60, %v1439_v10  ;;  %v973_v5 = vmul.f32 %v7772_v34, %v7545_v1  ;;  %v1472_v38 = vadd.f32 %v7771_v31, %v1440_v8  ;;  %v974_v0 = vmul.f32 %v7773_v63, %v7547_v28  ;;  %v7777_v1 = vld [vmem:[#allocation3 + $0x68] sm:$0xff]  ;;  %v7780_v28 = vld [vmem:[#allocation3 + $0xf0] sm:$0xff]  ;;  %v11118_v60 = vld [vmem:[#allocation48_spill] sm:$0xff] }
 0x9a0   :  { %v4745_v18 = vpop.permute.xlu0 %4744  ;;  %4806 = vst [vmem:[#allocation11 + $0xb0] sm:$0xff] %v4774_v15  ;;  %4807 = vst [vmem:[#allocation11 + $0xb8] sm:$0xff] %v4775_v29  ;;  %v1445_v13 = vmul.f32 %v7774_v48, %v7549_v14  ;;  %v4651_v12 = vadd.f32 %v4619_v27, %v4587_v40  ;;  %v1446_v3 = vmul.f32 %v7775_v46, %v7551_v56  ;;  %v4584_v55 = vmul.f32 0.6, %v999_v22  ;;  %v11117_v15 = vld [vmem:[#allocation44_spill] sm:$0xff]  ;;  %v7782_v14 = vld [vmem:[#allocation6 + $0xf0] sm:$0xff] }
 0x9a1   :  { %v4780_v36 = vmul.f32 %v4745_v18, %v10398_v54  ;;  %v4781_v42 = vmul.f32 %v4745_v18, %v10354_v33  ;;  %v4685_v24 = vpop.permute.xlu1 %4684  ;;  %v4650_v33 = vadd.f32 %v4618_v7, %v4586_v44  ;;  %v4666_v58 = vadd.f32 %v4634_v43, %v4602_v25  ;;  %v11119_v40 = vld [vmem:[#allocation77_spill] sm:$0xff]  ;;  %v7783_v27 = vld [vmem:[#allocation6 + $0xf8] sm:$0xff] }
 0x9a2   :  { %v7553_v23 = vpop.eup %7552  ;;  %v4756_v6 = vmul.f32 %v4685_v24, %v4644_v59  ;;  %v4757_v21 = vmul.f32 %v4685_v24, %v4645_v51  ;;  %v4667_v57 = vadd.f32 %v4635_v53, %v4603_v11  ;;  %v4585_v17 = vmul.f32 0.6, %v1000_v4  ;;  %v7778_v59 = vld [vmem:[#allocation6 + $0x60] sm:$0xff]  ;;  %v7781_v51 = vld [vmem:[#allocation3 + $0xf8] sm:$0xff] }
 0x9a3   :  { %v7555_v61 = vpop.eup %7554  ;;  %4812 = vst [vmem:[#allocation11 + $0xe0] sm:$0xff] %v4780_v36  ;;  %4813 = vst [vmem:[#allocation11 + $0xe8] sm:$0xff] %v4781_v42  ;;  %v4616_v19 = vmul.f32 0.4, %v1471_v20  ;;  %v1005_v30 = vadd.f32 %v7772_v34, %v973_v5  ;;  %v4617_v16 = vmul.f32 0.4, %v1472_v38  ;;  %v1006_v35 = vadd.f32 %v7773_v63, %v974_v0 }
 0x9a4   :  { %v7557_v54 = vpop.eup %7556  ;;  %4788 = vst [vmem:[#allocation11 + $0x20] sm:$0xff] %v4756_v6  ;;  %4789 = vst [vmem:[#allocation11 + $0x28] sm:$0xff] %v4757_v21  ;;  %v1477_v37 = vadd.f32 %v7774_v48, %v1445_v13  ;;  %v971_v26 = vmul.f32 %v7776_v45, %v7553_v23  ;;  %v1478_v32 = vadd.f32 %v7775_v46, %v1446_v3 }
 0x9a5   :  { %v7559_v50 = vpop.eup %7558  ;;  %v4700_v62 = vpop.permute.xlu1 %4699  ;;  %v972_v2 = vmul.f32 %v7777_v1, %v7555_v61  ;;  %v1443_v44 = vmul.f32 %v7778_v59, %v7557_v54  ;;  %v989_v29 = vmul.f32 %v7780_v28, %v11117_v15  ;;  %v990_v10 = vmul.f32 %v7781_v51, %v11118_v60 }
 0x9a6   :  { %v4762_v41 = vmul.f32 %v4700_v62, %v4650_v33  ;;  %v4763_v9 = vmul.f32 %v4700_v62, %v4651_v12  ;;  %v1444_v49 = vmul.f32 %v7779_v39, %v7559_v50  ;;  %v1461_v7 = vmul.f32 %v7782_v14, %v11119_v40 }
 0x9a7   :  { %v1462_v31 = vmul.f32 %v7783_v27, %v10345_v52  ;;  %v4648_v25 = vadd.f32 %v4616_v19, %v4584_v55  ;;  %v4590_v11 = vmul.f32 0.6, %v1005_v30  ;;  %v4649_v43 = vadd.f32 %v4617_v16, %v4585_v17 }
 0x9a8   :  { %4794 = vst [vmem:[#allocation11 + $0x50] sm:$0xff] %v4762_v41  ;;  %4795 = vst [vmem:[#allocation11 + $0x58] sm:$0xff] %v4763_v9  ;;  %v4591_v22 = vmul.f32 0.6, %v1006_v35  ;;  %v4622_v56 = vmul.f32 0.4, %v1477_v37  ;;  %v1003_v36 = vadd.f32 %v7776_v45, %v971_v26  ;;  %v1004_v24 = vadd.f32 %v7777_v1, %v972_v2 }
 0x9a9   :  { %v4740_v47 = vpop.permute.xlu1 %4739  ;;  %v4623_v42 = vmul.f32 0.4, %v1478_v32  ;;  %v1475_v53 = vadd.f32 %v7778_v59, %v1443_v44  ;;  %v1476_v4 = vadd.f32 %v7779_v39, %v1444_v49  ;;  %v1021_v20 = vadd.f32 %v7780_v28, %v989_v29 }
 0x9aa   :  { %v4778_v8 = vmul.f32 %v4740_v47, %v4666_v58  ;;  %v4779_v18 = vmul.f32 %v4740_v47, %v4667_v57  ;;  %v1022_v34 = vadd.f32 %v7781_v51, %v990_v10  ;;  %v4654_v52 = vadd.f32 %v4622_v56, %v4590_v11 }
 0x9ab   :  { %v4588_v5 = vmul.f32 0.6, %v1003_v36  ;;  %v1493_v61 = vadd.f32 %v7782_v14, %v1461_v7  ;;  %v1494_v38 = vadd.f32 %v7783_v27, %v1462_v31  ;;  %v4655_v63 = vadd.f32 %v4623_v42, %v4591_v22 }
 0x9ac   :  { %4810 = vst [vmem:[#allocation11 + $0xd0] sm:$0xff] %v4778_v8  ;;  %4811 = vst [vmem:[#allocation11 + $0xd8] sm:$0xff] %v4779_v18  ;;  %v4589_v0 = vmul.f32 0.6, %v1004_v24  ;;  %v4620_v48 = vmul.f32 0.4, %v1475_v53 }
 0x9ad   :  { %v4695_v23 = vpop.permute.xlu1 %4694  ;;  %v4621_v13 = vmul.f32 0.4, %v1476_v4  ;;  %v4606_v46 = vmul.f32 0.6, %v1021_v20  ;;  %v4607_v3 = vmul.f32 0.6, %v1022_v34 }
 0x9ae   :  { %v4760_v6 = vmul.f32 %v4695_v23, %v4648_v25  ;;  %v4761_v21 = vmul.f32 %v4695_v23, %v4649_v43  ;;  %v4652_v50 = vadd.f32 %v4620_v48, %v4588_v5  ;;  %v4638_v58 = vmul.f32 0.4, %v1493_v61 }
 0x9af   :  { %v4653_v62 = vadd.f32 %v4621_v13, %v4589_v0  ;;  %v4639_v57 = vmul.f32 0.4, %v1494_v38 }
 0x9b0   :  { %4792 = vst [vmem:[#allocation11 + $0x40] sm:$0xff] %v4760_v6  ;;  %4793 = vst [vmem:[#allocation11 + $0x48] sm:$0xff] %v4761_v21  ;;  %v4670_v9 = vadd.f32 %v4638_v58, %v4606_v46 }
 0x9b1   :  { %v4710_v54 = vpop.permute.xlu1 %4709  ;;  %v4671_v19 = vadd.f32 %v4639_v57, %v4607_v3 }
 0x9b2   :  { %v4766_v33 = vmul.f32 %v4710_v54, %v4654_v52  ;;  %v4767_v12 = vmul.f32 %v4710_v54, %v4655_v63 }
 0x9b4   :  { %4798 = vst [vmem:[#allocation11 + $0x70] sm:$0xff] %v4766_v33  ;;  %4799 = vst [vmem:[#allocation11 + $0x78] sm:$0xff] %v4767_v12 }
 0x9b5   :  { %v4705_v55 = vpop.permute.xlu1 %4704 }
 0x9b6   :  { %v4764_v17 = vmul.f32 %v4705_v55, %v4652_v50  ;;  %v4765_v41 = vmul.f32 %v4705_v55, %v4653_v62 }
 0x9b8   :  { %4796 = vst [vmem:[#allocation11 + $0x60] sm:$0xff] %v4764_v17  ;;  %4797 = vst [vmem:[#allocation11 + $0x68] sm:$0xff] %v4765_v41 }
 0x9b9   :  { %v4750_v30 = vpop.permute.xlu1 %4749 }
 0x9ba   :  { %v4782_v16 = vmul.f32 %v4750_v30, %v4670_v9  ;;  %v4783_v35 = vmul.f32 %v4750_v30, %v4671_v19 }
 0x9bc   :  { %4814 = vst [vmem:[#allocation11 + $0xf0] sm:$0xff] %v4782_v16  ;;  %4815 = vst [vmem:[#allocation11 + $0xf8] sm:$0xff] %v4783_v35 }
 0x9bd   :  { %7883 = shalt.err (!%p7880_p8)
}
 0x9be   :  { %s7884_s12 = scalar_lea.hbm %s10450_s7, 4096 }
 0x9bf   :  { %p7885_p9 = scmp.ne.s32.totalorder %s10450_s7, %s7884_s12  ;;  %p7888_p10 = scmp.lt.u32.totalorder %s7884_s12, %s10450_s7 }
 0x9c1   :  { %p7890_p11 = pnand %p7888_p10, %p7885_p9 }
 0x9c3   :  { %7893 = shalt.err (!%p7890_p11)
}
 0x9c4   :  { %4827 = dma.vmem_to_hbm [thread:$0]  %s4822_s10, 4096, %s10450_s7, [#allocation5], %s7904_s14, %s7904_s14, %s7905_s15  }
 0x9c5   :  { %7900 = dma.done.wait [#allocation5], 4096  }
 0x9c6   :  { %7901 = vsyncadd [#allocation5], 4294963200 }
 0x9c7   :  { %4831 = vsyncpa [#allocation4], 1 }
 0x9c8   :  { %4832 = vsyncpa [#allocation7], 1 }
 0x9c9   :  { %4833 = vsyncpa [#allocation10], 1 }
 0x9ca   :  { %4834 = vsyncpa [#allocation5], 1 }

</bundles_post_ra>
